<compile_context>
chip_gen: v5e
topology: v5e:2x2
jax: 0.10.0
libtpu: 0.0.40
codegen_flags: <defaults>
</compile_context>

<pallas_src>
import jax
import jax.numpy as jnp
from jax.experimental import pallas as pl
from jax.experimental.pallas import tpu as pltpu


def _resblock_kernel(x_ref, w1_ref, b1_ref, w2_ref, b2_ref, out_ref, pad_ref):
    # x_ref:   (1, H, W, Cp)       bf16 input block (channel-padded, no halo)
    # w1_ref:  (9*Cp, Cp)          conv1 weights (BN1 folded), bf16, im2col K
    # b1_ref:  (1, Cp)             conv1 + BN1 folded bias, f32
    # w2_ref:  (9*Cp, Cp_out)      conv2 weights (BN2 folded), bf16
    # b2_ref:  (1, Cp_out)         conv2 + BN2 folded bias, f32
    # out_ref: (1, H, W, Cp_out)   f32, lane-dense (Cp_out multiple of 128)
    # pad_ref: (H+2, W+2, Cp)      bf16 VMEM scratch shared by conv1 / conv2
    _, H, W, Cp = x_ref.shape
    Hp2, Wp2 = H + 2, W + 2
    Cp_out = out_ref.shape[3]

    # Re-zero only the 1-pixel halo border; the interior is fully overwritten
    # below.  Done every grid step (NOT behind a program_id==0 guard) so the
    # scratch is always valid when the batch axis is split across TensorCores.
    zrow = jnp.zeros((1, Wp2, Cp), pad_ref.dtype)
    pad_ref[0:1, :, :] = zrow
    pad_ref[Hp2 - 1:Hp2, :, :] = zrow
    zcol = jnp.zeros((Hp2, 1, Cp), pad_ref.dtype)
    pad_ref[:, 0:1, :] = zcol
    pad_ref[:, Wp2 - 1:Wp2, :] = zcol

    x = x_ref[0]                            # (H, W, Cp) bf16
    pad_ref[1:H + 1, 1:W + 1, :] = x        # stage input interior (bf16)

    taps = [(dy, dx) for dy in range(3) for dx in range(3)]

    def conv3x3(w_ref):
        # 3x3 conv as accumulating im2col dots over tap PAIRS:
        # K = 2*Cp = 256 per pass -> full MXU depth on v6e/v7x, two full
        # 128-deep passes on v5e; the 9-tap patches buffer is never built.
        acc = None
        for c in range(0, 8, 2):
            (dy0, dx0), (dy1, dx1) = taps[c], taps[c + 1]
            p = jnp.concatenate(
                [pad_ref[dy0:dy0 + H, dx0:dx0 + W, :],
                 pad_ref[dy1:dy1 + H, dx1:dx1 + W, :]],
                axis=-1).reshape(H * W, 2 * Cp)
            d = jnp.dot(p, w_ref[c * Cp:(c + 2) * Cp, :],
                        preferred_element_type=jnp.float32)
            acc = d if acc is None else acc + d
        dy, dx = taps[8]                    # last (odd) tap on its own
        p = pad_ref[dy:dy + H, dx:dx + W, :].reshape(H * W, Cp)
        return acc + jnp.dot(p, w_ref[8 * Cp:9 * Cp, :],
                             preferred_element_type=jnp.float32)

    # ---- conv1 + (folded) BN1 + ReLU, residual add in f32 ------------------
    resid = x.astype(jnp.float32).reshape(H * W, Cp)
    h = jnp.maximum(conv3x3(w1_ref) + b1_ref[...], 0.0) + resid

    # Reuse the same padded scratch to stage conv2's input (halo stays zero).
    pad_ref[1:H + 1, 1:W + 1, :] = h.astype(pad_ref.dtype).reshape(H, W, Cp)

    # ---- conv2 + (folded) BN2 + ReLU ---------------------------------------
    y = jnp.maximum(conv3x3(w2_ref) + b2_ref[...], 0.0)
    out_ref[0] = y.reshape(H, W, Cp_out).astype(out_ref.dtype)


def _round_up(x, m):
    return ((x + m - 1) // m) * m


def resblock_pallas(x_nchw, w1_eff, b1_eff, w2_eff, b2_eff):
    """x_nchw: (N, Cin, H, W) float32; returns (N, Cout, H, W) float32."""
    N, Cin, H, W = x_nchw.shape
    Cout = w2_eff.shape[-1]
    LANE = 128
    Cp = _round_up(Cin, LANE)        # lane-dense input / intermediate channels
    Cp_out = _round_up(Cout, LANE)   # lane-dense output channels

    # NHWC + channel pad to lane width, bf16 activations in HBM.  No spatial
    # halo here: the 1-px zero halo is built inside the kernel's VMEM scratch,
    # so no padded input copy is round-tripped through HBM.
    x = jnp.transpose(x_nchw, (0, 2, 3, 1))
    x = jnp.pad(x, ((0, 0), (0, 0), (0, 0), (0, Cp - Cin))).astype(jnp.bfloat16)

    # Pad channels, flatten the 3x3 taps into the contraction (K) dim in the
    # same dy-major / dx-minor / channel order used by the kernel; bf16.
    def prep_w(w_hwio, cout_p):
        cin, cout = w_hwio.shape[2], w_hwio.shape[3]
        wp = jnp.pad(w_hwio, ((0, 0), (0, 0), (0, Cp - cin), (0, cout_p - cout)))
        return wp.reshape(9 * Cp, cout_p).astype(jnp.bfloat16)

    def prep_b(b, cout_p):
        return jnp.pad(b, ((0, 0), (0, cout_p - b.shape[1]))).astype(jnp.float32)

    w1r, b1r = prep_w(w1_eff, Cp), prep_b(b1_eff, Cp)
    w2r, b2r = prep_w(w2_eff, Cp_out), prep_b(b2_eff, Cp_out)

    flops = 2 * N * H * W * (9 * Cp) * (Cp + Cp_out)
    bytes_accessed = (x.size * 2 + w1r.size * 2 + w2r.size * 2 +
                      b1r.size * 4 + b2r.size * 4 + N * H * W * Cp_out * 4)

    out_nhwc = pl.pallas_call(
        _resblock_kernel,
        out_shape=jax.ShapeDtypeStruct((N, H, W, Cp_out), jnp.float32),
        grid_spec=pltpu.PrefetchScalarGridSpec(
            num_scalar_prefetch=0,
            grid=(N,),
            in_specs=[
                pl.BlockSpec((1, H, W, Cp), lambda n: (n, 0, 0, 0)),
                pl.BlockSpec((9 * Cp, Cp), lambda n: (0, 0)),
                pl.BlockSpec((1, Cp), lambda n: (0, 0)),
                pl.BlockSpec((9 * Cp, Cp_out), lambda n: (0, 0)),
                pl.BlockSpec((1, Cp_out), lambda n: (0, 0)),
            ],
            out_specs=pl.BlockSpec((1, H, W, Cp_out), lambda n: (n, 0, 0, 0)),
            scratch_shapes=[pltpu.VMEM((H + 2, W + 2, Cp), jnp.bfloat16)],
        ),
        compiler_params=pltpu.CompilerParams(
            dimension_semantics=("parallel",)),
        cost_estimate=pl.CostEstimate(
            flops=flops, transcendentals=0, bytes_accessed=bytes_accessed),
    )(x, w1r, b1r, w2r, b2r)

    # Drop the channel padding and go back to NCHW.
    return jnp.transpose(out_nhwc[..., :Cout], (0, 3, 1, 2))


# ----------------------- parameter setup (plain JAX glue) -----------------------

def init_params(key, in_channels, out_channels):
    k = jax.random.split(key, 12)

    def conv_init(kw, kb, cin, cout):
        fan_in = cin * 9
        bound = 1.0 / (fan_in ** 0.5)
        w = jax.random.uniform(kw, (cout, cin, 3, 3), jnp.float32, -bound, bound)
        b = jax.random.uniform(kb, (cout,), jnp.float32, -bound, bound)
        return w, b

    def bn_init(kg, kb, km, kv, c):
        gamma = jax.random.uniform(kg, (c,), jnp.float32, 0.5, 1.5)
        beta = jax.random.uniform(kb, (c,), jnp.float32, -0.3, 0.3)
        mean = 0.1 * jax.random.normal(km, (c,), jnp.float32)
        var = jax.random.uniform(kv, (c,), jnp.float32, 0.5, 1.5)
        return gamma, beta, mean, var

    w1, b1 = conv_init(k[0], k[1], in_channels, in_channels)
    w2, b2 = conv_init(k[2], k[3], in_channels, out_channels)
    bn1 = bn_init(k[4], k[5], k[6], k[7], in_channels)
    bn2 = bn_init(k[8], k[9], k[10], k[11], out_channels)
    return (w1, b1, bn1), (w2, b2, bn2)


def fold_conv_bn(w_oihw, b, gamma, beta, mean, var, eps=1e-5):
    """Fold eval-mode BN into conv:  y = s*(conv(x)+b-mean)+beta."""
    s = gamma / jnp.sqrt(var + eps)                      # (Cout,)
    w_hwio = jnp.transpose(w_oihw, (2, 3, 1, 0))         # (3,3,Cin,Cout)
    w_eff = w_hwio * s[None, None, None, :]
    b_eff = s * (b - mean) + beta
    return w_eff, b_eff[None, :]                         # (1, Cout)


def ref_resblock(x_nchw, layer1, layer2, eps=1e-5):
    """Pure-JAX reference (NCHW, eval-mode BN), mirrors the PyTorch forward."""
    def conv_bn_relu(x, w, b, gamma, beta, mean, var):
        y = jax.lax.conv_general_dilated(
            x, w, window_strides=(1, 1), padding='SAME',
            dimension_numbers=('NCHW', 'OIHW', 'NCHW'),
            precision=jax.lax.Precision.HIGHEST)
        y = y + b[None, :, None, None]
        y = (y - mean[None, :, None, None]) / jnp.sqrt(var[None, :, None, None] + eps)
        y = gamma[None, :, None, None] * y + beta[None, :, None, None]
        return jnp.maximum(y, 0.0)

    w1, b1, (g1, be1, m1, v1) = layer1
    w2, b2, (g2, be2, m2, v2) = layer2
    h = conv_bn_relu(x_nchw, w1, b1, g1, be1, m1, v1) + x_nchw
    return conv_bn_relu(h, w2, b2, g2, be2, m2, v2)


if __name__ == "__main__":
    key = jax.random.PRNGKey(0)
    kx, kp = jax.random.split(key)

    N, Cin, Cout, H, W = 2, 4, 8, 16, 16
    x = jax.random.normal(kx, (N, Cin, H, W), jnp.float32)

    layer1, layer2 = init_params(kp, Cin, Cout)
    w1_eff, b1_eff = fold_conv_bn(layer1[0], layer1[1], *layer1[2])
    w2_eff, b2_eff = fold_conv_bn(layer2[0], layer2[1], *layer2[2])

    out = resblock_pallas(x, w1_eff, b1_eff, w2_eff, b2_eff)
    out = jax.block_until_ready(out)

    ref = ref_resblock(x, layer1, layer2)
    assert out.shape == (N, Cout, H, W), out.shape
    max_err = float(jnp.max(jnp.abs(out - ref)))
    # bf16 activations / weights on the MXU (single pass) vs f32 HIGHEST
    # reference: expect small numeric drift, so loosened tolerances.
    assert jnp.allclose(out, ref, rtol=5e-2, atol=5e-2), max_err

    print("KERNEL_OK")
</pallas_src>

<mosaic_0001>
module attributes {stable_mosaic.version = 11 : i64} {
  func.func @_resblock_kernel(%arg0: i32, %arg1: memref<1x16x16x128xbf16, #tpu.memory_space<vmem>>, %arg2: memref<1152x128xbf16, #tpu.memory_space<vmem>>, %arg3: memref<1x128xf32, #tpu.memory_space<vmem>>, %arg4: memref<1152x128xbf16, #tpu.memory_space<vmem>>, %arg5: memref<1x128xf32, #tpu.memory_space<vmem>>, %arg6: memref<1x16x16x128xf32, #tpu.memory_space<vmem>>, %arg7: memref<18x18x128xbf16, #tpu.memory_space<vmem>>) attributes {dimension_semantics = [#tpu.dimension_semantics<parallel>], iteration_bounds = array<i64: 2>, scalar_prefetch = 0 : i64, scratch_operands = 1 : i64, tpu.core_type = #tpu.core_type<tc>, window_params = [{transform_indices = @transform_0, window_bounds = array<i64: 1, 16, 16, 128>}, {pipeline_mode = #tpu.pipeline_mode<synchronous>, transform_indices = @transform_1, window_bounds = array<i64: 1152, 128>}, {pipeline_mode = #tpu.pipeline_mode<synchronous>, transform_indices = @transform_2, window_bounds = array<i64: 1, 128>}, {pipeline_mode = #tpu.pipeline_mode<synchronous>, transform_indices = @transform_3, window_bounds = array<i64: 1152, 128>}, {pipeline_mode = #tpu.pipeline_mode<synchronous>, transform_indices = @transform_4, window_bounds = array<i64: 1, 128>}, {transform_indices = @transform_5, window_bounds = array<i64: 1, 16, 16, 128>}]} {
    %cst = arith.constant 0.000000e+00 : bf16
    %0 = vector.broadcast %cst : bf16 to vector<1x18x128xbf16>
    %c0 = arith.constant 0 : index
    %c0_0 = arith.constant 0 : index
    %c0_1 = arith.constant 0 : index
    %1 = vector.load %arg7[%c0, %c0_0, %c0_1] : memref<18x18x128xbf16, #tpu.memory_space<vmem>>, vector<1x18x128xbf16>
    tpu.vector_store %arg7[%c0, %c0_0, %c0_1], %0 {strides = array<i32>} : memref<18x18x128xbf16, #tpu.memory_space<vmem>>, vector<1x18x128xbf16>,
    %c17 = arith.constant 17 : index
    %c0_2 = arith.constant 0 : index
    %c0_3 = arith.constant 0 : index
    %2 = vector.load %arg7[%c17, %c0_2, %c0_3] : memref<18x18x128xbf16, #tpu.memory_space<vmem>>, vector<1x18x128xbf16>
    tpu.vector_store %arg7[%c17, %c0_2, %c0_3], %0 {strides = array<i32>} : memref<18x18x128xbf16, #tpu.memory_space<vmem>>, vector<1x18x128xbf16>,
    %cst_4 = arith.constant 0.000000e+00 : bf16
    %3 = vector.broadcast %cst_4 : bf16 to vector<18x1x128xbf16>
    %c0_5 = arith.constant 0 : index
    %c0_6 = arith.constant 0 : index
    %c0_7 = arith.constant 0 : index
    %4 = vector.load %arg7[%c0_5, %c0_6, %c0_7] : memref<18x18x128xbf16, #tpu.memory_space<vmem>>, vector<18x1x128xbf16>
    tpu.vector_store %arg7[%c0_5, %c0_6, %c0_7], %3 {strides = array<i32>} : memref<18x18x128xbf16, #tpu.memory_space<vmem>>, vector<18x1x128xbf16>,
    %c0_8 = arith.constant 0 : index
    %c17_9 = arith.constant 17 : index
    %c0_10 = arith.constant 0 : index
    %5 = vector.load %arg7[%c0_8, %c17_9, %c0_10] : memref<18x18x128xbf16, #tpu.memory_space<vmem>>, vector<18x1x128xbf16>
    tpu.vector_store %arg7[%c0_8, %c17_9, %c0_10], %3 {strides = array<i32>} : memref<18x18x128xbf16, #tpu.memory_space<vmem>>, vector<18x1x128xbf16>,
    %c0_11 = arith.constant 0 : index
    %c0_12 = arith.constant 0 : index
    %c0_13 = arith.constant 0 : index
    %c0_14 = arith.constant 0 : index
    %6 = vector.load %arg1[%c0_11, %c0_12, %c0_13, %c0_14] : memref<1x16x16x128xbf16, #tpu.memory_space<vmem>>, vector<1x16x16x128xbf16>
    %7 = vector.shape_cast %6 : vector<1x16x16x128xbf16> to vector<16x16x128xbf16>
    %c1 = arith.constant 1 : index
    %c1_15 = arith.constant 1 : index
    %c0_16 = arith.constant 0 : index
    %8 = vector.load %arg7[%c1, %c1_15, %c0_16] : memref<18x18x128xbf16, #tpu.memory_space<vmem>>, vector<16x16x128xbf16>
    tpu.vector_store %arg7[%c1, %c1_15, %c0_16], %7 {strides = array<i32>} : memref<18x18x128xbf16, #tpu.memory_space<vmem>>, vector<16x16x128xbf16>,
    %9 = arith.extf %7 : vector<16x16x128xbf16> to vector<16x16x128xf32>
    %10 = vector.shape_cast %9 : vector<16x16x128xf32> to vector<256x128xf32>
    %c0_17 = arith.constant 0 : index
    %c0_18 = arith.constant 0 : index
    %c0_19 = arith.constant 0 : index
    %11 = vector.load %arg7[%c0_17, %c0_18, %c0_19] : memref<18x18x128xbf16, #tpu.memory_space<vmem>>, vector<16x16x128xbf16>
    %c0_20 = arith.constant 0 : index
    %c1_21 = arith.constant 1 : index
    %c0_22 = arith.constant 0 : index
    %12 = vector.load %arg7[%c0_20, %c1_21, %c0_22] : memref<18x18x128xbf16, #tpu.memory_space<vmem>>, vector<16x16x128xbf16>
    %13 = tpu.concatenate %11, %12 in 2 : vector<16x16x128xbf16>, vector<16x16x128xbf16> -> vector<16x16x256xbf16>
    %14 = vector.shape_cast %13 : vector<16x16x256xbf16> to vector<256x256xbf16>
    %c0_23 = arith.constant 0 : index
    %c0_24 = arith.constant 0 : index
    %15 = vector.load %arg2[%c0_23, %c0_24] : memref<1152x128xbf16, #tpu.memory_space<vmem>>, vector<256x128xbf16>
    %cst_25 = arith.constant dense<0.000000e+00> : vector<256x128xf32>
    %16 = tpu.matmul %14, %15, %cst_25 {dimension_numbers = #tpu.dot_dimension_numbers<[1], [0], [0], [1], [0, 0, 1, 1], [], []>} : vector<256x256xbf16>, vector<256x128xbf16>, vector<256x128xf32> -> vector<256x128xf32>
    %c0_26 = arith.constant 0 : index
    %c2 = arith.constant 2 : index
    %c0_27 = arith.constant 0 : index
    %17 = vector.load %arg7[%c0_26, %c2, %c0_27] : memref<18x18x128xbf16, #tpu.memory_space<vmem>>, vector<16x16x128xbf16>
    %c1_28 = arith.constant 1 : index
    %c0_29 = arith.constant 0 : index
    %c0_30 = arith.constant 0 : index
    %18 = vector.load %arg7[%c1_28, %c0_29, %c0_30] : memref<18x18x128xbf16, #tpu.memory_space<vmem>>, vector<16x16x128xbf16>
    %19 = tpu.concatenate %17, %18 in 2 : vector<16x16x128xbf16>, vector<16x16x128xbf16> -> vector<16x16x256xbf16>
    %20 = vector.shape_cast %19 : vector<16x16x256xbf16> to vector<256x256xbf16>
    %c256 = arith.constant 256 : index
    %c0_31 = arith.constant 0 : index
    %21 = vector.load %arg2[%c256, %c0_31] : memref<1152x128xbf16, #tpu.memory_space<vmem>>, vector<256x128xbf16>
    %cst_32 = arith.constant dense<0.000000e+00> : vector<256x128xf32>
    %22 = tpu.matmul %20, %21, %cst_32 {dimension_numbers = #tpu.dot_dimension_numbers<[1], [0], [0], [1], [0, 0, 1, 1], [], []>} : vector<256x256xbf16>, vector<256x128xbf16>, vector<256x128xf32> -> vector<256x128xf32>
    %23 = arith.addf %16, %22 : vector<256x128xf32>
    %c1_33 = arith.constant 1 : index
    %c1_34 = arith.constant 1 : index
    %c0_35 = arith.constant 0 : index
    %24 = vector.load %arg7[%c1_33, %c1_34, %c0_35] : memref<18x18x128xbf16, #tpu.memory_space<vmem>>, vector<16x16x128xbf16>
    %c1_36 = arith.constant 1 : index
    %c2_37 = arith.constant 2 : index
    %c0_38 = arith.constant 0 : index
    %25 = vector.load %arg7[%c1_36, %c2_37, %c0_38] : memref<18x18x128xbf16, #tpu.memory_space<vmem>>, vector<16x16x128xbf16>
    %26 = tpu.concatenate %24, %25 in 2 : vector<16x16x128xbf16>, vector<16x16x128xbf16> -> vector<16x16x256xbf16>
    %27 = vector.shape_cast %26 : vector<16x16x256xbf16> to vector<256x256xbf16>
    %c512 = arith.constant 512 : index
    %c0_39 = arith.constant 0 : index
    %28 = vector.load %arg2[%c512, %c0_39] : memref<1152x128xbf16, #tpu.memory_space<vmem>>, vector<256x128xbf16>
    %cst_40 = arith.constant dense<0.000000e+00> : vector<256x128xf32>
    %29 = tpu.matmul %27, %28, %cst_40 {dimension_numbers = #tpu.dot_dimension_numbers<[1], [0], [0], [1], [0, 0, 1, 1], [], []>} : vector<256x256xbf16>, vector<256x128xbf16>, vector<256x128xf32> -> vector<256x128xf32>
    %30 = arith.addf %23, %29 : vector<256x128xf32>
    %c2_41 = arith.constant 2 : index
    %c0_42 = arith.constant 0 : index
    %c0_43 = arith.constant 0 : index
    %31 = vector.load %arg7[%c2_41, %c0_42, %c0_43] : memref<18x18x128xbf16, #tpu.memory_space<vmem>>, vector<16x16x128xbf16>
    %c2_44 = arith.constant 2 : index
    %c1_45 = arith.constant 1 : index
    %c0_46 = arith.constant 0 : index
    %32 = vector.load %arg7[%c2_44, %c1_45, %c0_46] : memref<18x18x128xbf16, #tpu.memory_space<vmem>>, vector<16x16x128xbf16>
    %33 = tpu.concatenate %31, %32 in 2 : vector<16x16x128xbf16>, vector<16x16x128xbf16> -> vector<16x16x256xbf16>
    %34 = vector.shape_cast %33 : vector<16x16x256xbf16> to vector<256x256xbf16>
    %c768 = arith.constant 768 : index
    %c0_47 = arith.constant 0 : index
    %35 = vector.load %arg2[%c768, %c0_47] : memref<1152x128xbf16, #tpu.memory_space<vmem>>, vector<256x128xbf16>
    %cst_48 = arith.constant dense<0.000000e+00> : vector<256x128xf32>
    %36 = tpu.matmul %34, %35, %cst_48 {dimension_numbers = #tpu.dot_dimension_numbers<[1], [0], [0], [1], [0, 0, 1, 1], [], []>} : vector<256x256xbf16>, vector<256x128xbf16>, vector<256x128xf32> -> vector<256x128xf32>
    %37 = arith.addf %30, %36 : vector<256x128xf32>
    %c2_49 = arith.constant 2 : index
    %c2_50 = arith.constant 2 : index
    %c0_51 = arith.constant 0 : index
    %38 = vector.load %arg7[%c2_49, %c2_50, %c0_51] : memref<18x18x128xbf16, #tpu.memory_space<vmem>>, vector<16x16x128xbf16>
    %39 = vector.shape_cast %38 : vector<16x16x128xbf16> to vector<256x128xbf16>
    %c1024 = arith.constant 1024 : index
    %c0_52 = arith.constant 0 : index
    %40 = vector.load %arg2[%c1024, %c0_52] : memref<1152x128xbf16, #tpu.memory_space<vmem>>, vector<128x128xbf16>
    %cst_53 = arith.constant dense<0.000000e+00> : vector<256x128xf32>
    %41 = tpu.matmul %39, %40, %cst_53 {dimension_numbers = #tpu.dot_dimension_numbers<[1], [0], [0], [1], [0, 0, 1, 1], [], []>} : vector<256x128xbf16>, vector<128x128xbf16>, vector<256x128xf32> -> vector<256x128xf32>
    %42 = arith.addf %37, %41 : vector<256x128xf32>
    %c0_54 = arith.constant 0 : index
    %c0_55 = arith.constant 0 : index
    %43 = vector.load %arg3[%c0_54, %c0_55] : memref<1x128xf32, #tpu.memory_space<vmem>>, vector<1x128xf32>
    %44 = vector.broadcast %43 : vector<1x128xf32> to vector<256x128xf32>
    %45 = arith.addf %42, %44 : vector<256x128xf32>
    %cst_56 = arith.constant 0.000000e+00 : f32
    %46 = vector.broadcast %cst_56 : f32 to vector<256x128xf32>
    %47 = arith.maximumf %45, %46 : vector<256x128xf32>
    %48 = arith.addf %47, %10 : vector<256x128xf32>
    %49 = arith.truncf %48 : vector<256x128xf32> to vector<256x128xbf16>
    %50 = vector.shape_cast %49 : vector<256x128xbf16> to vector<16x16x128xbf16>
    %c1_57 = arith.constant 1 : index
    %c1_58 = arith.constant 1 : index
    %c0_59 = arith.constant 0 : index
    %51 = vector.load %arg7[%c1_57, %c1_58, %c0_59] : memref<18x18x128xbf16, #tpu.memory_space<vmem>>, vector<16x16x128xbf16>
    tpu.vector_store %arg7[%c1_57, %c1_58, %c0_59], %50 {strides = array<i32>} : memref<18x18x128xbf16, #tpu.memory_space<vmem>>, vector<16x16x128xbf16>,
    %c0_60 = arith.constant 0 : index
    %c0_61 = arith.constant 0 : index
    %c0_62 = arith.constant 0 : index
    %52 = vector.load %arg7[%c0_60, %c0_61, %c0_62] : memref<18x18x128xbf16, #tpu.memory_space<vmem>>, vector<16x16x128xbf16>
    %c0_63 = arith.constant 0 : index
    %c1_64 = arith.constant 1 : index
    %c0_65 = arith.constant 0 : index
    %53 = vector.load %arg7[%c0_63, %c1_64, %c0_65] : memref<18x18x128xbf16, #tpu.memory_space<vmem>>, vector<16x16x128xbf16>
    %54 = tpu.concatenate %52, %53 in 2 : vector<16x16x128xbf16>, vector<16x16x128xbf16> -> vector<16x16x256xbf16>
    %55 = vector.shape_cast %54 : vector<16x16x256xbf16> to vector<256x256xbf16>
    %c0_66 = arith.constant 0 : index
    %c0_67 = arith.constant 0 : index
    %56 = vector.load %arg4[%c0_66, %c0_67] : memref<1152x128xbf16, #tpu.memory_space<vmem>>, vector<256x128xbf16>
    %cst_68 = arith.constant dense<0.000000e+00> : vector<256x128xf32>
    %57 = tpu.matmul %55, %56, %cst_68 {dimension_numbers = #tpu.dot_dimension_numbers<[1], [0], [0], [1], [0, 0, 1, 1], [], []>} : vector<256x256xbf16>, vector<256x128xbf16>, vector<256x128xf32> -> vector<256x128xf32>
    %c0_69 = arith.constant 0 : index
    %c2_70 = arith.constant 2 : index
    %c0_71 = arith.constant 0 : index
    %58 = vector.load %arg7[%c0_69, %c2_70, %c0_71] : memref<18x18x128xbf16, #tpu.memory_space<vmem>>, vector<16x16x128xbf16>
    %c1_72 = arith.constant 1 : index
    %c0_73 = arith.constant 0 : index
    %c0_74 = arith.constant 0 : index
    %59 = vector.load %arg7[%c1_72, %c0_73, %c0_74] : memref<18x18x128xbf16, #tpu.memory_space<vmem>>, vector<16x16x128xbf16>
    %60 = tpu.concatenate %58, %59 in 2 : vector<16x16x128xbf16>, vector<16x16x128xbf16> -> vector<16x16x256xbf16>
    %61 = vector.shape_cast %60 : vector<16x16x256xbf16> to vector<256x256xbf16>
    %c256_75 = arith.constant 256 : index
    %c0_76 = arith.constant 0 : index
    %62 = vector.load %arg4[%c256_75, %c0_76] : memref<1152x128xbf16, #tpu.memory_space<vmem>>, vector<256x128xbf16>
    %cst_77 = arith.constant dense<0.000000e+00> : vector<256x128xf32>
    %63 = tpu.matmul %61, %62, %cst_77 {dimension_numbers = #tpu.dot_dimension_numbers<[1], [0], [0], [1], [0, 0, 1, 1], [], []>} : vector<256x256xbf16>, vector<256x128xbf16>, vector<256x128xf32> -> vector<256x128xf32>
    %64 = arith.addf %57, %63 : vector<256x128xf32>
    %c1_78 = arith.constant 1 : index
    %c1_79 = arith.constant 1 : index
    %c0_80 = arith.constant 0 : index
    %65 = vector.load %arg7[%c1_78, %c1_79, %c0_80] : memref<18x18x128xbf16, #tpu.memory_space<vmem>>, vector<16x16x128xbf16>
    %c1_81 = arith.constant 1 : index
    %c2_82 = arith.constant 2 : index
    %c0_83 = arith.constant 0 : index
    %66 = vector.load %arg7[%c1_81, %c2_82, %c0_83] : memref<18x18x128xbf16, #tpu.memory_space<vmem>>, vector<16x16x128xbf16>
    %67 = tpu.concatenate %65, %66 in 2 : vector<16x16x128xbf16>, vector<16x16x128xbf16> -> vector<16x16x256xbf16>
    %68 = vector.shape_cast %67 : vector<16x16x256xbf16> to vector<256x256xbf16>
    %c512_84 = arith.constant 512 : index
    %c0_85 = arith.constant 0 : index
    %69 = vector.load %arg4[%c512_84, %c0_85] : memref<1152x128xbf16, #tpu.memory_space<vmem>>, vector<256x128xbf16>
    %cst_86 = arith.constant dense<0.000000e+00> : vector<256x128xf32>
    %70 = tpu.matmul %68, %69, %cst_86 {dimension_numbers = #tpu.dot_dimension_numbers<[1], [0], [0], [1], [0, 0, 1, 1], [], []>} : vector<256x256xbf16>, vector<256x128xbf16>, vector<256x128xf32> -> vector<256x128xf32>
    %71 = arith.addf %64, %70 : vector<256x128xf32>
    %c2_87 = arith.constant 2 : index
    %c0_88 = arith.constant 0 : index
    %c0_89 = arith.constant 0 : index
    %72 = vector.load %arg7[%c2_87, %c0_88, %c0_89] : memref<18x18x128xbf16, #tpu.memory_space<vmem>>, vector<16x16x128xbf16>
    %c2_90 = arith.constant 2 : index
    %c1_91 = arith.constant 1 : index
    %c0_92 = arith.constant 0 : index
    %73 = vector.load %arg7[%c2_90, %c1_91, %c0_92] : memref<18x18x128xbf16, #tpu.memory_space<vmem>>, vector<16x16x128xbf16>
    %74 = tpu.concatenate %72, %73 in 2 : vector<16x16x128xbf16>, vector<16x16x128xbf16> -> vector<16x16x256xbf16>
    %75 = vector.shape_cast %74 : vector<16x16x256xbf16> to vector<256x256xbf16>
    %c768_93 = arith.constant 768 : index
    %c0_94 = arith.constant 0 : index
    %76 = vector.load %arg4[%c768_93, %c0_94] : memref<1152x128xbf16, #tpu.memory_space<vmem>>, vector<256x128xbf16>
    %cst_95 = arith.constant dense<0.000000e+00> : vector<256x128xf32>
    %77 = tpu.matmul %75, %76, %cst_95 {dimension_numbers = #tpu.dot_dimension_numbers<[1], [0], [0], [1], [0, 0, 1, 1], [], []>} : vector<256x256xbf16>, vector<256x128xbf16>, vector<256x128xf32> -> vector<256x128xf32>
    %78 = arith.addf %71, %77 : vector<256x128xf32>
    %c2_96 = arith.constant 2 : index
    %c2_97 = arith.constant 2 : index
    %c0_98 = arith.constant 0 : index
    %79 = vector.load %arg7[%c2_96, %c2_97, %c0_98] : memref<18x18x128xbf16, #tpu.memory_space<vmem>>, vector<16x16x128xbf16>
    %80 = vector.shape_cast %79 : vector<16x16x128xbf16> to vector<256x128xbf16>
    %c1024_99 = arith.constant 1024 : index
    %c0_100 = arith.constant 0 : index
    %81 = vector.load %arg4[%c1024_99, %c0_100] : memref<1152x128xbf16, #tpu.memory_space<vmem>>, vector<128x128xbf16>
    %cst_101 = arith.constant dense<0.000000e+00> : vector<256x128xf32>
    %82 = tpu.matmul %80, %81, %cst_101 {dimension_numbers = #tpu.dot_dimension_numbers<[1], [0], [0], [1], [0, 0, 1, 1], [], []>} : vector<256x128xbf16>, vector<128x128xbf16>, vector<256x128xf32> -> vector<256x128xf32>
    %83 = arith.addf %78, %82 : vector<256x128xf32>
    %c0_102 = arith.constant 0 : index
    %c0_103 = arith.constant 0 : index
    %84 = vector.load %arg5[%c0_102, %c0_103] : memref<1x128xf32, #tpu.memory_space<vmem>>, vector<1x128xf32>
    %85 = vector.broadcast %84 : vector<1x128xf32> to vector<256x128xf32>
    %86 = arith.addf %83, %85 : vector<256x128xf32>
    %cst_104 = arith.constant 0.000000e+00 : f32
    %87 = vector.broadcast %cst_104 : f32 to vector<256x128xf32>
    %88 = arith.maximumf %86, %87 : vector<256x128xf32>
    %89 = vector.shape_cast %88 : vector<256x128xf32> to vector<16x16x128xf32>
    %c0_105 = arith.constant 0 : index
    %c0_106 = arith.constant 0 : index
    %c0_107 = arith.constant 0 : index
    %c0_108 = arith.constant 0 : index
    %90 = vector.load %arg6[%c0_105, %c0_106, %c0_107, %c0_108] : memref<1x16x16x128xf32, #tpu.memory_space<vmem>>, vector<1x16x16x128xf32>
    %91 = vector.shape_cast %90 : vector<1x16x16x128xf32> to vector<16x16x128xf32>
    %92 = vector.shape_cast %89 : vector<16x16x128xf32> to vector<1x16x16x128xf32>
    tpu.vector_store %arg6[%c0_105, %c0_106, %c0_107, %c0_108], %92 {strides = array<i32>} : memref<1x16x16x128xf32, #tpu.memory_space<vmem>>, vector<1x16x16x128xf32>,
    return
  }
  func.func @transform_0(%arg0: i32) -> (i32, i32, i32, i32) {
    %c0_i32 = arith.constant 0 : i32
    %c0_i32_0 = arith.constant 0 : i32
    %c0_i32_1 = arith.constant 0 : i32
    %c0_i32_2 = arith.constant 0 : i32
    return %arg0, %c0_i32, %c0_i32_0, %c0_i32_1 : i32, i32, i32, i32
  }
  func.func @transform_1(%arg0: i32) -> (i32, i32) {
    %c0_i32 = arith.constant 0 : i32
    %c0_i32_0 = arith.constant 0 : i32
    %c0_i32_1 = arith.constant 0 : i32
    return %c0_i32, %c0_i32_0 : i32, i32
  }
  func.func @transform_2(%arg0: i32) -> (i32, i32) {
    %c0_i32 = arith.constant 0 : i32
    %c0_i32_0 = arith.constant 0 : i32
    %c0_i32_1 = arith.constant 0 : i32
    return %c0_i32, %c0_i32_0 : i32, i32
  }
  func.func @transform_3(%arg0: i32) -> (i32, i32) {
    %c0_i32 = arith.constant 0 : i32
    %c0_i32_0 = arith.constant 0 : i32
    %c0_i32_1 = arith.constant 0 : i32
    return %c0_i32, %c0_i32_0 : i32, i32
  }
  func.func @transform_4(%arg0: i32) -> (i32, i32) {
    %c0_i32 = arith.constant 0 : i32
    %c0_i32_0 = arith.constant 0 : i32
    %c0_i32_1 = arith.constant 0 : i32
    return %c0_i32, %c0_i32_0 : i32, i32
  }
  func.func @transform_5(%arg0: i32) -> (i32, i32, i32, i32) {
    %c0_i32 = arith.constant 0 : i32
    %c0_i32_0 = arith.constant 0 : i32
    %c0_i32_1 = arith.constant 0 : i32
    %c0_i32_2 = arith.constant 0 : i32
    return %arg0, %c0_i32, %c0_i32_0, %c0_i32_1 : i32, i32, i32, i32
  }
}

</mosaic_0001>

<bundles_post_ra>
// kernel: tpu_custom_call.1
= control target key start
LH: loop header
LB: loop body
LE: loop exit
PB: predicated region body
PF: predicated region fallthrough
CT: control target
= control target key end

     0   :  { %10 = vsyncpa [#allocation4], 0  ;;  %s13058_s0 = inlined_call_operand.hbm [shape: bf16[2,16,16,128], index: 0, kind: input, shape index: {}]   ;;  %s13059_s1 = inlined_call_operand.hbm [shape: bf16[1152,128], index: 1, kind: input, shape index: {}]   ;;  %s13060_s2 = inlined_call_operand.vmem [shape: f32[1,128], index: 2, kind: input, shape index: {}]   ;;  %s13061_s3 = inlined_call_operand.hbm [shape: bf16[1152,128], index: 3, kind: input, shape index: {}]   ;;  %s13062_s4 = inlined_call_operand.vmem [shape: f32[1,128], index: 4, kind: input, shape index: {}]   ;;  %s13063_s5 = inlined_call_operand.hbm [shape: f32[2,16,16,128], index: 5, kind: output, shape index: {}]  }
   0x1   :  { %12 = vsyncpa [#allocation4 + $0x1], 0 }
   0x2   :  { %13 = vsyncpa [#allocation7], 0 }
   0x3   :  { %14 = vsyncpa [#allocation5], 0 }
   0x4   :  { %16 = vsyncpa [#allocation5 + $0x1], 0  ;;  %s10632_s18 = smov 0   ;;  %s10634_s19 = smov 0  }
   0x5   :  { %s10636_s20 = smov 0   ;;  %s10638_s21 = smov 0  }
   0x6 LB: > { %s10653_s22 = sadd.s32 4294967295, %s10593_s21   ;;  %s8879_s23 = sadd.s32 4294967294, %s10593_s21   ;;  %s10593_s21 = sphi %s10638_s21, %s13238_s21   ;;  %s10589_s20 = sphi %s10636_s20, %s13237_s20   ;;  %s10585_s19 = sphi %s10634_s19, %s13236_s19   ;;  %s10581_s18 = sphi %s10632_s18, %s13235_s18  }
   0x7   : > { %p42_p0 = scmp.ne.s32.totalorder %s10585_s19, %s10581_s18  ;;  %p43_p1 = scmp.eq.s32.totalorder %s10653_s22, 0 }
   0x8   : > { %p150_p2 = scmp.eq.s32.totalorder %s10653_s22, 1  ;;  %p156_p3 = scmp.eq.s32.totalorder %s8879_s23, 1 }
   0x9   : > { %p10662_p4 = por %p43_p1, %p42_p0  ;;  %p8880_p5 = scmp.ge.s32.totalorder %s10593_s21, 1 }
   0xa   : > { %p10667_p6 = por %p156_p3, %p42_p0  ;;  %p163_p7 = scmp.lt.s32.totalorder %s10593_s21, 3 }
   0xb   : > { %s174_s28 = sshll.u32 %s13059_s1, 4  ;;  %s10595_s30 = smov [#allocation6]   ;;  %s175_s28 = int_to_ptr.hbm [resolvable:$true] %s174_s28 }
   0xc   : > { %p10675_p8 = pnand %p8880_p5, %p163_p7  ;;  %s176_s6 = sshll.u32 %s10595_s30, 4  ;;  %s177_s6 = int_to_ptr.vmem [resolvable:$true] %s176_s6 }
   0xd   : > { %s191_s9 = sshll.u32 %s13061_s3, 4  ;;  %s13064_s10 = smov 64   ;;  %s192_s9 = int_to_ptr.hbm [resolvable:$true] %s191_s9 }
   0xe   : > { %p10285_p9 = pneg %p10675_p8  ;;  %s10597_s11 = smov 4  }
   0xf   : > { %s10598_s12 = smov [#allocation8]   ;;  %s10694_s14 = sadd.s32 1, %s10593_s21  }
  0x10   : > { %p10286_p10 = pnand %p10285_p9, %p43_p1  ;;  %s193_s13 = sshll.u32 %s10598_s12, 4  ;;  %s194_s13 = int_to_ptr.vmem [resolvable:$true] %s193_s13 }
  0x11   : > { %s29_s15 = sadd.s32 1, %s10589_s20  ;;  %s26_s16 = ssub.s32 %s10593_s21, %s10694_s14 }
  0x12   : > { %10288 = dma.hbm_to_vmem [thread:$0]  (!%p10286_p10), %s175_s28, 9216, %s177_s6, [#allocation7], %s13064_s10, %s13064_s10, %s10597_s11  }
  0x13   : > { %10291 = dma.hbm_to_vmem [thread:$0]  (!%p10286_p10), %s192_s9, 9216, %s194_s13, [#allocation7], %s13064_s10, %s13064_s10, %s10597_s11  }
  0x14   : > { %p36_p12 = scmp.ne.s32.totalorder %s10589_s20, %s10585_s19  ;;  %p27_p13 = scmp.eq.s32.totalorder %s26_s16, 0 }
  0x15   : > { %p37_p0 = scmp.eq.s32.totalorder %s10593_s21, 0  ;;  %p10302_p5 = scmp.lt.s32.totalorder %s10593_s21, 2 }
  0x16   : > { %p10704_p3 = por %p150_p2, %p36_p12  ;;  %s210_s26 = sand.u32 1, %s10589_s20  }
  0x17   : > { %s10710_s23 = scalar_select %p27_p13, %s10589_s20, %s29_s15  }
  0x18   : > { %p38_p7 = por %p37_p0, %p36_p12  ;;  %s8884_s27 = sshll.u32 %s210_s26, 7 }
  0x19   : > { %s9793_s28 = sshll.u32 %s10593_s21, 7  ;;  %s214_s8 = scalar_lea.vmem [#allocation3], %s8884_s27 }
  0x1a   : > { %s219_s7 = scalar_lea.hbm %s13058_s0, %s9793_s28  ;;  %s222_s9 = sshll.u32 %s214_s8, 4  ;;  %s223_s9 = int_to_ptr.vmem [resolvable:$true] %s222_s9 }
  0x1b   : > { %s220_s12 = sshll.u32 %s219_s7, 4  ;;  %p10717_p2 = pnand %p10302_p5, %p38_p7  ;;  %s221_s12 = int_to_ptr.hbm [resolvable:$true] %s220_s12 }
  0x1c   : > { %s211_s15 = scalar_lea.sflag [#allocation4], %s210_s26  ;;  %s10466_s16 = sshra.s32 %s221_s12, 4  ;;  %s10467_s16 = int_to_ptr.hbm [resolvable:$true] %s10466_s16 }
  0x1d   : > { %s10468_s10 = scalar_lea.hbm %s10467_s16, 128  ;;  %p10470_p10 = pneg %p10717_p2 }
  0x1e   : > { %p10469_p9 = scmp.ne.s32.totalorder %s10467_s16, %s10468_s10  ;;  %s10473_s30 = scalar_lea.hbm %s13058_s0, 256 }
  0x1f   : > { %p10474_p0 = scmp.lt.s32.totalorder %s10467_s16, %s13058_s0  ;;  %p10475_p5 = scmp.lt.s32.totalorder %s10473_s30, %s10468_s10 }
  0x20   : > { %p10471_p12 = pnand %p10470_p10, %p10469_p9 }
  0x21   : > { %p10476_p7 = por %p10475_p5, %p10474_p0 }
  0x22   : > { %p10472_p13 = pneg %p10471_p12 }
  0x24   : > { %p10477_p11 = pnand %p10476_p7, %p10472_p13 }
  0x26   : > { %10480 = shalt.err (!%p10477_p11)
}
  0x27   : > { %s13083_s26 = smov 64   ;;  %234 = sbr.rel (%p10675_p8) target bundleno = 1527 (0x5f7), region = 40 }
  0x28   : > { %10295 = dma.hbm_to_vmem [thread:$0]  (!%p10717_p2), %s221_s12, 2048, %s223_s9, %s211_s15, %s13083_s26, %s13083_s26, %s10597_s11  }
  0x2c   : > { %s10737_s8 = sand.u32 1, %s10585_s19  }
  0x2d   : > { %s8888_s16 = sshll.u32 %s10737_s8, 7  ;;  %s237_s10 = scalar_lea.sflag [#allocation4], %s10737_s8 }
  0x2e   : > { %s10741_s28 = scalar_lea.vmem [#allocation3], %s8888_s16 }
  0x2f   : > { %10541 = dma.done.wait (%p10662_p4), %s237_s10, 2048  }
  0x30   : > { %10543 = vsyncadd (%p10662_p4), %s237_s10, 4294965248 }
  0x31   : > { %10545 = dma.done.wait (%p43_p1), [#allocation7], 18432  }
  0x32   : > { %10547 = vsyncadd (%p43_p1), [#allocation7], 4294948864  ;;  %v10599_v0 = vmov 0   ;;  %v9833_v1 = vld [vmem:[#allocation6 + $0xb8] sm:$0xff]  ;;  %vm287_vm0 = vsmask.f32 256 }
  0x33   : > { %279 = vst [vmem:[#allocation2] sm:$0xf] %v10599_v0  ;;  %v9841_v2 = vld [vmem:[#allocation6 + $0xf8] sm:$0xff]  ;;  %1766 = vmatpush.bf16.msra.mxu0 %v9833_v1  ;;  %10257 = vmatpush.bf16.msra.mxu2 %v9833_v1  ;;  %v9832_v3 = vld [vmem:[#allocation6 + $0xb0] sm:$0xff]  ;;  %vm286_vm1 = vcmask 1040384   ;;  %v9831_v8 = vld [vmem:[#allocation6 + $0xa8] sm:$0xff] }
  0x34   : > { %280 = vst [vmem:[#allocation2 + $0x4] sm:$0xf] %v10599_v0  ;;  %vm343_vm2 = vsmask.f32 7938  ;;  %10265 = vmatpush.bf16.msra.mxu3 %v9841_v2  ;;  %1855 = vmatpush.bf16.msra.mxu1 %v9841_v2  ;;  %v9840_v4 = vld [vmem:[#allocation6 + $0xf0] sm:$0xff]  ;;  %vm10752_vm3 = vmand %vm286_vm1, %vm287_vm0  ;;  %v9839_v11 = vld [vmem:[#allocation6 + $0xe8] sm:$0xff] }
  0x35   : > { %281 = vst [vmem:[#allocation2 + $0x8] sm:$0x1] %v10599_v0  ;;  %vm10757_vm4 = vmand %vm286_vm1, %vm343_vm2  ;;  %v313_v10 = vld [vmem:[#allocation2 + $0x60] sm:$0x1]  ;;  %vm431_vm5 = vsmask.f32 4368 }
  0x36   : > { %283 = vst [vmem:[#allocation2 + $0xcc] sm:$0xf] %v10599_v0  ;;  %v314_v12 = vsel %vm10752_vm3, 0, %v313_v10  ;;  %v369_v13 = vld [vmem:[#allocation2 + $0x68] sm:$0x1]  ;;  %vm754_vm6 = vcmask 1043456   ;;  %vm10783_vm8 = vmor %vm287_vm0, %vm431_vm5 }
  0x37   : > { %284 = vst [vmem:[#allocation2 + $0xd0] sm:$0xf] %v10599_v0  ;;  %1767 = vmatpush.bf16.msra.mxu0 %v9832_v3  ;;  %10258 = vmatpush.bf16.msra.mxu2 %v9832_v3  ;;  %v370_v14 = vsel %vm10757_vm4, 0, %v369_v13  ;;  %v413_v15 = vld [vmem:[%s10741_s28 + $0x38] sm:$0xf]  ;;  %v9830_v16 = vld [vmem:[#allocation6 + $0xa0] sm:$0xff]  ;;  %vm10775_vm7 = vmand %vm754_vm6, %vm343_vm2 }
  0x38   : > { %285 = vst [vmem:[#allocation2 + $0xd4] sm:$0x1] %v10599_v0  ;;  %10266 = vmatpush.bf16.msra.mxu3 %v9840_v4  ;;  %1856 = vmatpush.bf16.msra.mxu1 %v9840_v4  ;;  %v414_v17 = vld [vmem:[%s10741_s28 + $0x3c] sm:$0xf]  ;;  %v553_v18 = vshrl.u32 %v413_v15, 16  ;;  %v9838_v19 = vld [vmem:[#allocation6 + $0xe0] sm:$0xff] }
  0x39   : > { %315 = vst [vmem:[#allocation2 + $0x60] sm:$0x1] %v314_v12  ;;  %v556_v20 = vshll.u32 %v413_v15, 16  ;;  %v561_v21 = vshrl.u32 %v414_v17, 16  ;;  %v564_v22 = vshll.u32 %v414_v17, 16  ;;  %v9829_v28 = vld [vmem:[#allocation6 + $0x98] sm:$0xff] }
  0x3a   : > { %371 = vst [vmem:[#allocation2 + $0x68] sm:$0x1] %v370_v14  ;;  %v316_v23 = vld [vmem:[#allocation2 + $0x6c] sm:$0x1]  ;;  %v555_v24 = vrot.slane %v553_v18, 7  ;;  %v13088_v29 = vmov 0 }
  0x3b   : > { %1768 = vmatpush.bf16.msra.mxu0 %v9831_v8  ;;  %10259 = vmatpush.bf16.msra.mxu2 %v9831_v8  ;;  %v317_v25 = vsel %vm10752_vm3, 0, %v316_v23  ;;  %v415_v26 = vld [vmem:[%s10741_s28 + $0x40] sm:$0xf]  ;;  %v416_v27 = vld [vmem:[%s10741_s28 + $0x44] sm:$0xf]  ;;  %v13089_v29 = vsel %vm10775_vm7, 4294967295, %v13088_v29 }
  0x3c   : > { %v345_v7 = vld [vmem:[#allocation2 + $0x8] sm:$0x1]  ;;  %10267 = vmatpush.bf16.msra.mxu3 %v9839_v11  ;;  %1857 = vmatpush.bf16.msra.mxu1 %v9839_v11  ;;  %13090 = vst [vmem:[#allocation13_spill] sm:$0xff] %v13089_v29  ;;  %v10779_v30 = vld [vmem:[#allocation2] sm:$0xf0]  ;;  %v563_v32 = vrot.slane %v561_v21, 7  ;;  %v558_v37 = vor.u32 %v556_v20, %v555_v24 }
  0x3d   : > { %v346_v9 = vsel %vm10757_vm4, 0, %v345_v7  ;;  %v10139_v31 = vld [vmem:[#allocation2] sm:$0xe]  ;;  %318 = vst [vmem:[#allocation2 + $0x6c] sm:$0x1] %v317_v25  ;;  %v570_v33 = vshrl.u32 %v415_v26, 16 }
  0x3e   : > { %347 = vst [vmem:[#allocation2 + $0x8] sm:$0x1] %v346_v9  ;;  %v573_v34 = vshll.u32 %v415_v26, 16  ;;  %v578_v35 = vshrl.u32 %v416_v27, 16  ;;  %v13091_v36 = vmov 0  ;;  %v559_v38 = vrot.slane %v555_v24, 4 }
  0x3f   : > { %v13092_v36 = vsel %vm10783_vm8, 4294967295, %v13091_v36  ;;  %v581_v39 = vshll.u32 %v416_v27, 16  ;;  %v292_v40 = vld [vmem:[#allocation2 + $0xc] sm:$0x1]  ;;  %v399_v41 = vld [vmem:[%s10741_s28] sm:$0xf]  ;;  %1769 = vmatpush.bf16.msra.mxu0 %v9830_v16  ;;  %10260 = vmatpush.bf16.msra.mxu2 %v9830_v16  ;;  %v566_v44 = vor.u32 %v564_v22, %v563_v32  ;;  %v10140_v60 = vor.u32 %v10139_v31, %v10779_v30 }
  0x40   : > { %13093 = vst [vmem:[#allocation14_spill] sm:$0xff] %v13092_v36  ;;  %v9837_v42 = vld [vmem:[#allocation6 + $0xd8] sm:$0xff]  ;;  %v568_v45 = vrot.slane %v563_v32, 4  ;;  %v572_v46 = vrot.slane %v570_v33, 7  ;;  %v10788_v47 = vrot.slane %v578_v35, 7  ;;  %10268 = vmatpush.bf16.msra.mxu3 %v9838_v19  ;;  %1858 = vmatpush.bf16.msra.mxu1 %v9838_v19  ;;  %v293_v50 = vsel %vm10752_vm3, 0, %v292_v40 }
  0x41   : > { %v805_v49 = vld [vmem:[#allocation2 + $0x60] sm:$0xf]  ;;  %v400_v51 = vld [vmem:[%s10741_s28 + $0x4] sm:$0xf]  ;;  %v434_v52 = vshrl.u32 %v399_v41, 16  ;;  %v567_v53 = vsel %vm10783_vm8, %v559_v38, %v566_v44  ;;  %v9828_v58 = vld [vmem:[#allocation6 + $0x90] sm:$0xff] }
  0x42   : > { %v806_v54 = vsel %vm10775_vm7, %v558_v37, %v805_v49  ;;  %v809_v55 = vld [vmem:[#allocation2 + $0x68] sm:$0x1]  ;;  %v575_v56 = vor.u32 %v573_v34, %v572_v46  ;;  %v576_v57 = vrot.slane %v572_v46, 4  ;;  %294 = vst [vmem:[#allocation2 + $0xc] sm:$0x1] %v293_v50  ;;  %v583_v62 = vor.u32 %v581_v39, %v10788_v47  ;;  %v9827_v10 = vld [vmem:[#allocation6 + $0x88] sm:$0xff] }
  0x43   : > { %807 = vst [vmem:[#allocation2 + $0x60] sm:$0xf] %v806_v54  ;;  %v810_v61 = vsel %vm10752_vm3, %v568_v45, %v809_v55  ;;  %v348_v63 = vld [vmem:[#allocation2 + $0x14] sm:$0x1]  ;;  %1770 = vmatpush.bf16.msra.mxu0 %v9829_v28  ;;  %10261 = vmatpush.bf16.msra.mxu2 %v9829_v28  ;;  %v436_v0 = vrot.slane %v434_v52, 7  ;;  %v437_v1 = vshll.u32 %v399_v41, 16 }
  0x44   : > { %808 = vst [vmem:[#allocation2 + $0x64] sm:$0xf] %v567_v53  ;;  %v442_v2 = vshrl.u32 %v400_v51, 16  ;;  %v445_v3 = vshll.u32 %v400_v51, 16  ;;  %10269 = vmatpush.bf16.msra.mxu3 %v9837_v42  ;;  %1859 = vmatpush.bf16.msra.mxu1 %v9837_v42  ;;  %v9836_v4 = vld [vmem:[#allocation6 + $0xd0] sm:$0xff]  ;;  %v584_v7 = vsel %vm10783_vm8, %v576_v57, %v583_v62  ;;  %v349_v9 = vsel %vm10757_vm4, 0, %v348_v63 }
  0x45   : > { %v932_v43 = vld [vmem:[#allocation2 + $0x8] sm:$0x1]  ;;  %811 = vst [vmem:[#allocation2 + $0x68] sm:$0x1] %v810_v61  ;;  %v812_v8 = vld [vmem:[#allocation2 + $0x6c] sm:$0xf]  ;;  %v439_v12 = vor.u32 %v437_v1, %v436_v0 }
  0x46   : > { %v1060_v48 = vunpack.c.l.b16 %v932_v43  ;;  %v813_v11 = vsel %vm10775_vm7, %v575_v56, %v812_v8  ;;  %815 = vst [vmem:[#allocation2 + $0x70] sm:$0xf] %v584_v7  ;;  %v440_v13 = vrot.slane %v436_v0, 4  ;;  %v10809_v14 = vrot.slane %v442_v2, 7  ;;  %v372_v15 = vld [vmem:[#allocation2 + $0x74] sm:$0x1] }
  0x47   : > { %v9835_v16 = vld [vmem:[#allocation6 + $0xc8] sm:$0xff]  ;;  %v1526_v17 = vrot.slane %v10140_v60, 1  ;;  %814 = vst [vmem:[#allocation2 + $0x6c] sm:$0xf] %v813_v11  ;;  %v373_v18 = vsel %vm10757_vm4, 0, %v372_v15  ;;  %1771 = vmatpush.bf16.msra.mxu0 %v9828_v58  ;;  %10262 = vmatpush.bf16.msra.mxu2 %v9828_v58  ;;  %v9826_v26 = vld [vmem:[#allocation6 + $0x80] sm:$0xff] }
  0x48   : > { %v10797_v59 = vpack.c.b16 %v1060_v48, %v1060_v48  ;;  %v319_v19 = vld [vmem:[#allocation2 + $0x78] sm:$0x1]  ;;  %v447_v21 = vor.u32 %v445_v3, %v10809_v14  ;;  %350 = vst [vmem:[#allocation2 + $0x14] sm:$0x1] %v349_v9  ;;  %v417_v23 = vld [vmem:[%s10741_s28 + $0x48] sm:$0xf]  ;;  %10270 = vmatpush.bf16.msra.mxu3 %v9836_v4  ;;  %1860 = vmatpush.bf16.msra.mxu1 %v9836_v4 }
  0x49   : > { %v320_v22 = vsel %vm10752_vm3, 0, %v319_v19  ;;  %v756_v24 = vld [vmem:[#allocation2 + $0xc] sm:$0xf]  ;;  %374 = vst [vmem:[#allocation2 + $0x74] sm:$0x1] %v373_v18  ;;  %v587_v31 = vshrl.u32 %v417_v23, 16 }
  0x4a   : > { %v1527_v20 = vrot.slane %v10797_v59, 1  ;;  %v418_v25 = vld [vmem:[%s10741_s28 + $0x4c] sm:$0xf]  ;;  %v10151_v27 = vld [vmem:[#allocation2 + $0x60] sm:$0xe]  ;;  %v448_v28 = vsel %vm10783_vm8, %v440_v13, %v447_v21  ;;  %v757_v30 = vsel %vm10775_vm7, %v439_v12, %v756_v24  ;;  %v590_v32 = vshll.u32 %v417_v23, 16 }
  0x4b   : > { %321 = vst [vmem:[#allocation2 + $0x78] sm:$0x1] %v320_v22  ;;  %v10150_v33 = vld [vmem:[#allocation2 + $0x60] sm:$0xf0]  ;;  %v595_v34 = vshrl.u32 %v418_v25, 16  ;;  %v598_v35 = vshll.u32 %v418_v25, 16  ;;  %1772 = vmatpush.bf16.msra.mxu0 %v9827_v10  ;;  %10263 = vmatpush.bf16.msra.mxu2 %v9827_v10 }
  0x4c   : > { %758 = vst [vmem:[#allocation2 + $0xc] sm:$0xf] %v757_v30  ;;  %v940_v37 = vld [vmem:[#allocation2 + $0x68] sm:$0x1]  ;;  %v10152_v38 = vor.u32 %v10151_v27, %v10150_v33  ;;  %v449_v39 = vrot.slane %v10809_v14, 4  ;;  %v589_v40 = vrot.slane %v587_v31, 7  ;;  %10271 = vmatpush.bf16.msra.mxu3 %v9835_v16  ;;  %1861 = vmatpush.bf16.msra.mxu1 %v9835_v16 }
  0x4d   : > { %759 = vst [vmem:[#allocation2 + $0x10] sm:$0xf] %v448_v28  ;;  %v9834_v41 = vld [vmem:[#allocation6 + $0xc0] sm:$0xff]  ;;  %vm1525_vm9 = vcmask 1046528   ;;  %v1068_v42 = vunpack.c.l.b16 %v940_v37  ;;  %v585_v43 = vrot.slane %v10788_v47, 4  ;;  %v9801_v44 = vld [vmem:[#allocation6 + $0x38] sm:$0xff] }
  0x4e   : > { %v9809_v45 = vld [vmem:[#allocation6 + $0x78] sm:$0xff]  ;;  %v10825_v46 = vrot.slane %v595_v34, 7  ;;  %v1566_v48 = vrot.slane %v10152_v38, 1  ;;  %v592_v50 = vor.u32 %v590_v32, %v589_v40  ;;  %v593_v51 = vrot.slane %v589_v40, 4  ;;  %v295_v52 = vld [vmem:[#allocation2 + $0x18] sm:$0x1] }
  0x4f   : > { %v10827_v49 = vld [vmem:[#allocation2 + $0x70] sm:$0xf]  ;;  %v10829_v53 = vpack.c.b16 %v1068_v42, %v1068_v42  ;;  %v760_v55 = vld [vmem:[#allocation2 + $0x14] sm:$0x1]  ;;  %v1342_v56 = vld [vmem:[#allocation2 + $0x6c] sm:$0xe]  ;;  %1773 = vmatpush.bf16.msra.mxu0 %v9826_v26  ;;  %10264 = vmatpush.bf16.msra.mxu2 %v9826_v26  ;;  %v1528_v47 = vsel %vm1525_vm9, %v1526_v17, %v1527_v20 }
  0x50   : > { %v9849_v54 = vld [vmem:[#allocation6 + $0x138] sm:$0xff]  ;;  %v600_v57 = vor.u32 %v598_v35, %v10825_v46  ;;  %v10833_v58 = vld [vmem:[%s10741_s28 + $0x8] sm:$0xf]  ;;  %v761_v61 = vsel %vm10752_vm3, %v449_v39, %v760_v55  ;;  %v9800_v63 = vld [vmem:[#allocation6 + $0x30] sm:$0xff]  ;;  %10272 = vmatpush.bf16.msra.mxu3 %v9834_v41  ;;  %1862 = vmatpush.bf16.msra.mxu1 %v9834_v41  ;;  %v13068_v7 = vunpack.c.l.b16 %v10827_v49  ;;  %v296_v9 = vsel %vm10752_vm3, 0, %v295_v52  ;;  %s8891_s30 = sshll.u32 %s10737_s8, 8 }
  0x51   : > { %v9818_v60 = vld [vmem:[#allocation2 + $0x6c] sm:$0xff]  ;;  %v816_v62 = vld [vmem:[#allocation2 + $0x74] sm:$0x1]  ;;  %v402_v1 = vld [vmem:[%s10741_s28 + $0xc] sm:$0xf]  ;;  %v451_v2 = vshrl.u32 %v10833_v58, 16  ;;  %v1406_v19 = vunpack.c.l.b16 %v1342_v56 }
  0x52   : > { %v9808_v0 = vld [vmem:[#allocation6 + $0x70] sm:$0xff]  ;;  %v1567_v3 = vrot.slane %v10829_v53, 1  ;;  %762 = vst [vmem:[#allocation2 + $0x14] sm:$0x1] %v761_v61  ;;  %v817_v4 = vsel %vm10752_vm3, %v585_v43, %v816_v62  ;;  %v819_v8 = vld [vmem:[#allocation2 + $0x78] sm:$0xf]  ;;  %v601_v11 = vsel %vm10783_vm8, %v593_v51, %v600_v57  ;;  %1774 = vmatmul.bf16.vlgmr.msra.gmra.mxu0 %v1528_v47 }
  0x53   : > { %2040 = vmatpush.bf16.msrb.mxu2 %v9801_v44  ;;  %v1334_v10 = vld [vmem:[#allocation2 + $0xc] sm:$0xe]  ;;  %818 = vst [vmem:[#allocation2 + $0x74] sm:$0x1] %v817_v4  ;;  %v820_v12 = vsel %vm10775_vm7, %v592_v50, %v819_v8  ;;  %v453_v13 = vrot.slane %v451_v2, 7  ;;  %v459_v14 = vshrl.u32 %v402_v1, 16  ;;  %1903 = vmatmul.bf16.vlgmr.msra.gmra.mxu3 %v9818_v60  ;;  %v1422_v33 = vpack.c.b16 %v13068_v7, %v1406_v19 }
  0x54   : > { %2129 = vmatpush.bf16.msrb.mxu3 %v9809_v45  ;;  %v1568_v15 = vsel %vm1525_vm9, %v1566_v48, %v1567_v3  ;;  %v9810_v16 = vld [vmem:[#allocation2 + $0xc] sm:$0xff]  ;;  %v1398_v18 = vunpack.c.l.b16 %v1334_v10  ;;  %821 = vst [vmem:[#allocation2 + $0x78] sm:$0xf] %v820_v12  ;;  %v454_v20 = vshll.u32 %v10833_v58, 16  ;;  %v351_v25 = vld [vmem:[#allocation2 + $0x20] sm:$0x1]  ;;  %3162 = vmatpush.bf16.msrb.mxu0 %v9849_v54 }
  0x55   : > { %v10851_v17 = vld [vmem:[#allocation2 + $0x10] sm:$0xf]  ;;  %v9848_v21 = vld [vmem:[#allocation6 + $0x130] sm:$0xff]  ;;  %1814 = vmatmul.bf16.vlgmr.msra.gmra.mxu2 %v1568_v15  ;;  %822 = vst [vmem:[#allocation2 + $0x7c] sm:$0xf] %v601_v11  ;;  %v457_v23 = vrot.slane %v453_v13, 4  ;;  %1863 = vmatmul.bf16.vlgmr.msra.gmra.mxu1 %v9810_v16 }
  0x56   : > { %v983_v22 = vunpack.c.l.b16 %v10851_v17  ;;  %v461_v24 = vrot.slane %v459_v14, 7  ;;  %297 = vst [vmem:[#allocation2 + $0x18] sm:$0x1] %v296_v9  ;;  %v462_v26 = vshll.u32 %v402_v1, 16  ;;  %v352_v27 = vsel %vm10757_vm4, 0, %v351_v25  ;;  %v9799_v38 = vld [vmem:[#allocation6 + $0x28] sm:$0xff] }
  0x57   : > { %v375_v28 = vld [vmem:[#allocation2 + $0x80] sm:$0x1]  ;;  %2041 = vmatpush.bf16.msrb.mxu2 %v9800_v63  ;;  %353 = vst [vmem:[#allocation2 + $0x20] sm:$0x1] %v352_v27  ;;  %v322_v31 = vld [vmem:[#allocation2 + $0x84] sm:$0x1]  ;;  %v456_v44 = vor.u32 %v454_v20, %v453_v13 }
  0x58   : > { %2130 = vmatpush.bf16.msrb.mxu3 %v9808_v0  ;;  %v376_v30 = vsel %vm10757_vm4, 0, %v375_v28  ;;  %v1414_v32 = vpack.c.b16 %v983_v22, %v1398_v18  ;;  %v464_v34 = vor.u32 %v462_v26, %v461_v24  ;;  %v323_v35 = vsel %vm10752_vm3, 0, %v322_v31  ;;  %v419_v37 = vld [vmem:[%s10741_s28 + $0x50] sm:$0xf]  ;;  %3163 = vmatpush.bf16.msrb.mxu0 %v9848_v21  ;;  %v420_v48 = vld [vmem:[%s10741_s28 + $0x54] sm:$0xf] }
  0x59   : > { %377 = vst [vmem:[#allocation2 + $0x80] sm:$0x1] %v376_v30  ;;  %v933_v39 = vld [vmem:[#allocation2 + $0x14] sm:$0x1]  ;;  %v602_v40 = vrot.slane %v10825_v46, 4  ;;  %v604_v41 = vshrl.u32 %v419_v37, 16 }
  0x5a   : > { %324 = vst [vmem:[#allocation2 + $0x84] sm:$0x1] %v323_v35  ;;  %v1061_v42 = vunpack.c.l.b16 %v933_v39  ;;  %v941_v43 = vld [vmem:[#allocation2 + $0x74] sm:$0x1]  ;;  %v465_v45 = vsel %vm10783_vm8, %v457_v23, %v464_v34  ;;  %v607_v50 = vshll.u32 %v419_v37, 16  ;;  %v9807_v51 = vld [vmem:[#allocation6 + $0x68] sm:$0xff] }
  0x5b   : > { %v1069_v52 = vunpack.c.l.b16 %v941_v43  ;;  %v466_v54 = vrot.slane %v461_v24, 4  ;;  %766 = vst [vmem:[#allocation2 + $0x1c] sm:$0xf] %v465_v45  ;;  %v606_v55 = vrot.slane %v604_v41, 7  ;;  %v612_v56 = vshrl.u32 %v420_v48, 16  ;;  %2042 = vmatpush.bf16.msrb.mxu2 %v9799_v38  ;;  %v9847_v1 = vld [vmem:[#allocation6 + $0x128] sm:$0xff] }
  0x5c   : > { %v10870_v46 = vpack.c.b16 %v1061_v42, %v1061_v42  ;;  %v1531_v57 = vrot.slane %v1414_v32, 1  ;;  %v1571_v58 = vrot.slane %v1422_v33, 1  ;;  %v615_v47 = vshll.u32 %v420_v48, 16  ;;  %2131 = vmatpush.bf16.msrb.mxu3 %v9807_v51  ;;  %v298_v0 = vld [vmem:[#allocation2 + $0x24] sm:$0x1]  ;;  %3164 = vmatpush.bf16.msrb.mxu0 %v9847_v1  ;;  %v9819_v13 = vld [vmem:[#allocation2 + $0x78] sm:$0xff] }
  0x5d   : > { %v10872_v60 = vpack.c.b16 %v1069_v52, %v1069_v52  ;;  %v763_v61 = vld [vmem:[#allocation2 + $0x18] sm:$0xf]  ;;  %v609_v62 = vor.u32 %v607_v50, %v606_v55  ;;  %v610_v63 = vrot.slane %v606_v55, 4  ;;  %v10877_v8 = vrot.slane %v612_v56, 7  ;;  %v403_v9 = vld [vmem:[%s10741_s28 + $0x10] sm:$0xf] }
  0x5e   : > { %v1532_v2 = vrot.slane %v10870_v46, 1  ;;  %v764_v3 = vsel %vm10775_vm7, %v456_v44, %v763_v61  ;;  %v767_v4 = vld [vmem:[#allocation2 + $0x20] sm:$0x1]  ;;  %v299_v20 = vsel %vm10752_vm3, 0, %v298_v0  ;;  %v404_v21 = vld [vmem:[%s10741_s28 + $0x14] sm:$0xf] }
  0x5f   : > { %v1572_v10 = vrot.slane %v10872_v60, 1  ;;  %765 = vst [vmem:[#allocation2 + $0x18] sm:$0xf] %v764_v3  ;;  %v768_v11 = vsel %vm10752_vm3, %v466_v54, %v767_v4  ;;  %v617_v15 = vor.u32 %v615_v47, %v10877_v8  ;;  %v468_v23 = vshrl.u32 %v403_v9, 16  ;;  %v10153_v25 = vld [vmem:[#allocation2 + $0x78] sm:$0xf0] }
  0x60   : > { %v823_v12 = vld [vmem:[#allocation2 + $0x80] sm:$0x1]  ;;  %769 = vst [vmem:[#allocation2 + $0x20] sm:$0x1] %v768_v11  ;;  %v1533_v18 = vsel %vm1525_vm9, %v1531_v57, %v1532_v2  ;;  %v10154_v26 = vld [vmem:[#allocation2 + $0x78] sm:$0xe] }
  0x61   : > { %v824_v14 = vsel %vm10752_vm3, %v602_v40, %v823_v12  ;;  %v826_v16 = vld [vmem:[#allocation2 + $0x84] sm:$0xf]  ;;  %v1573_v24 = vsel %vm1525_vm9, %v1571_v58, %v1572_v10  ;;  %v618_v27 = vsel %vm10783_vm8, %v610_v63, %v617_v15  ;;  %v476_v28 = vshrl.u32 %v404_v21, 16  ;;  %v354_v34 = vld [vmem:[#allocation2 + $0x2c] sm:$0x1]  ;;  %v9798_v52 = vld [vmem:[#allocation6 + $0x20] sm:$0xff] }
  0x62   : > { %825 = vst [vmem:[#allocation2 + $0x80] sm:$0x1] %v824_v14  ;;  %v827_v19 = vsel %vm10775_vm7, %v609_v62, %v826_v16  ;;  %v479_v30 = vshll.u32 %v404_v21, 16  ;;  %v10141_v31 = vld [vmem:[#allocation2 + $0x18] sm:$0xf0]  ;;  %v470_v32 = vrot.slane %v468_v23, 7  ;;  %1779 = vmatmul.bf16.gmra.mxu0 %v1533_v18  ;;  %v10155_v48 = vor.u32 %v10154_v26, %v10153_v25  ;;  %2043 = vmatpush.bf16.msrb.mxu2 %v9798_v52 }
  0x63   : > { %828 = vst [vmem:[#allocation2 + $0x84] sm:$0xf] %v827_v19  ;;  %v471_v33 = vshll.u32 %v403_v9, 16  ;;  %v478_v35 = vrot.slane %v476_v28, 7  ;;  %v355_v37 = vsel %vm10757_vm4, 0, %v354_v34  ;;  %1908 = vmatmul.bf16.gmra.mxu3 %v9819_v13  ;;  %v619_v1 = vrot.slane %v10877_v8, 4 }
  0x64   : > { %829 = vst [vmem:[#allocation2 + $0x88] sm:$0xf] %v618_v27  ;;  %v378_v38 = vld [vmem:[#allocation2 + $0x8c] sm:$0x1]  ;;  %v474_v39 = vrot.slane %v470_v32, 4  ;;  %v9806_v4 = vld [vmem:[#allocation6 + $0x60] sm:$0xff] }
  0x65   : > { %300 = vst [vmem:[#allocation2 + $0x24] sm:$0x1] %v299_v20  ;;  %1819 = vmatmul.bf16.gmra.mxu2 %v1573_v24  ;;  %v379_v40 = vsel %vm10757_vm4, 0, %v378_v38  ;;  %v325_v41 = vld [vmem:[#allocation2 + $0x90] sm:$0x1]  ;;  %v481_v44 = vor.u32 %v479_v30, %v478_v35  ;;  %v473_v57 = vor.u32 %v471_v33, %v470_v32  ;;  %v483_v62 = vrot.slane %v478_v35, 4  ;;  %2132 = vmatpush.bf16.msrb.mxu3 %v9806_v4 }
  0x66   : > { %356 = vst [vmem:[#allocation2 + $0x2c] sm:$0x1] %v355_v37  ;;  %v9811_v42 = vld [vmem:[#allocation2 + $0x18] sm:$0xff]  ;;  %v326_v50 = vsel %vm10752_vm3, 0, %v325_v41  ;;  %v421_v51 = vld [vmem:[%s10741_s28 + $0x58] sm:$0xf] }
  0x67   : > { %v10142_v43 = vld [vmem:[#allocation2 + $0x18] sm:$0xe]  ;;  %380 = vst [vmem:[#allocation2 + $0x8c] sm:$0x1] %v379_v40  ;;  %v934_v45 = vld [vmem:[#allocation2 + $0x20] sm:$0x1]  ;;  %1868 = vmatmul.bf16.gmra.mxu1 %v9811_v42  ;;  %v482_v58 = vsel %vm10783_vm8, %v474_v39, %v481_v44 }
  0x68   : > { %v1062_v54 = vunpack.c.l.b16 %v934_v45  ;;  %v10143_v55 = vor.u32 %v10142_v43, %v10141_v31  ;;  %327 = vst [vmem:[#allocation2 + $0x90] sm:$0x1] %v326_v50  ;;  %v422_v47 = vld [vmem:[%s10741_s28 + $0x5c] sm:$0xf]  ;;  %v621_v63 = vshrl.u32 %v421_v51, 16  ;;  %v624_v2 = vshll.u32 %v421_v51, 16 }
  0x69   : > { %v942_v56 = vld [vmem:[#allocation2 + $0x80] sm:$0x1]  ;;  %773 = vst [vmem:[#allocation2 + $0x28] sm:$0xf] %v482_v58  ;;  %v629_v3 = vshrl.u32 %v422_v47, 16  ;;  %v632_v12 = vshll.u32 %v422_v47, 16 }
  0x6a   : > { %v1070_v61 = vunpack.c.l.b16 %v942_v56  ;;  %v10905_v0 = vpack.c.b16 %v1062_v54, %v1062_v54  ;;  %v623_v11 = vrot.slane %v621_v63, 7  ;;  %v301_v13 = vld [vmem:[#allocation2 + $0x30] sm:$0x1]  ;;  %v1536_v14 = vrot.slane %v10143_v55, 1  ;;  %v9846_v8 = vld [vmem:[#allocation6 + $0x120] sm:$0xff]  ;;  %v9880_v17 = vld [vmem:[#allocation6 + $0x1b0] sm:$0xff] }
  0x6b   : > { %v1576_v15 = vrot.slane %v10155_v48, 1  ;;  %v10912_v19 = vrot.slane %v629_v3, 7  ;;  %v1344_v24 = vld [vmem:[#allocation2 + $0x84] sm:$0xe]  ;;  %v302_v26 = vsel %vm10752_vm3, 0, %v301_v13  ;;  %3165 = vmatpush.bf16.msrb.mxu0 %v9846_v8  ;;  %vm4143_vm11 = vcmask 1042432  }
  0x6c   : > { %v10908_v9 = vpack.c.b16 %v1070_v61, %v1070_v61  ;;  %v770_v10 = vld [vmem:[#allocation2 + $0x24] sm:$0xf]  ;;  %v1537_v20 = vrot.slane %v10905_v0, 1  ;;  %v626_v25 = vor.u32 %v624_v2, %v623_v11  ;;  %v627_v30 = vrot.slane %v623_v11, 4  ;;  %v405_v32 = vld [vmem:[%s10741_s28 + $0x18] sm:$0xf] }
  0x6d   : > { %v771_v16 = vsel %vm10775_vm7, %v473_v57, %v770_v10  ;;  %v774_v18 = vld [vmem:[#allocation2 + $0x2c] sm:$0x1]  ;;  %v634_v31 = vor.u32 %v632_v12, %v10912_v19  ;;  %v10924_v33 = vld [vmem:[#allocation2 + $0x88] sm:$0xf]  ;;  %303 = vst [vmem:[#allocation2 + $0x30] sm:$0x1] %v302_v26  ;;  %v1408_v50 = vunpack.c.l.b16 %v1344_v24 }
  0x6e   : > { %772 = vst [vmem:[#allocation2 + $0x24] sm:$0xf] %v771_v16  ;;  %v775_v21 = vsel %vm10752_vm3, %v483_v62, %v774_v18  ;;  %v830_v23 = vld [vmem:[#allocation2 + $0x8c] sm:$0x1]  ;;  %v1577_v27 = vrot.slane %v10908_v9, 1  ;;  %v1538_v40 = vsel %vm1525_vm9, %v1536_v14, %v1537_v20  ;;  %v9820_v41 = vld [vmem:[#allocation2 + $0x84] sm:$0xff]  ;;  %v13067_v48 = vunpack.c.l.b16 %v10924_v33 }
  0x6f   : > { %776 = vst [vmem:[#allocation2 + $0x2c] sm:$0x1] %v775_v21  ;;  %v831_v28 = vsel %vm10752_vm3, %v619_v1, %v830_v23  ;;  %v833_v34 = vld [vmem:[#allocation2 + $0x90] sm:$0xf]  ;;  %v635_v37 = vsel %vm10783_vm8, %v627_v30, %v634_v31  ;;  %v406_v39 = vld [vmem:[%s10741_s28 + $0x1c] sm:$0xf] }
  0x70   : > { %832 = vst [vmem:[#allocation2 + $0x8c] sm:$0x1] %v831_v28  ;;  %v10926_v35 = vld [vmem:[#allocation2 + $0x28] sm:$0xf]  ;;  %v834_v38 = vsel %vm10775_vm7, %v626_v25, %v833_v34  ;;  %v485_v42 = vshrl.u32 %v405_v32, 16  ;;  %v488_v43 = vshll.u32 %v405_v32, 16  ;;  %v1578_v45 = vsel %vm1525_vm9, %v1576_v15, %v1577_v27 }
  0x71   : > { %835 = vst [vmem:[#allocation2 + $0x90] sm:$0xf] %v834_v38  ;;  %v493_v44 = vshrl.u32 %v406_v39, 16  ;;  %v496_v51 = vshll.u32 %v406_v39, 16  ;;  %v357_v52 = vld [vmem:[#allocation2 + $0x38] sm:$0x1]  ;;  %v987_v54 = vunpack.c.l.b16 %v10926_v35  ;;  %v1424_v13 = vpack.c.b16 %v13067_v48, %v1408_v50 }
  0x72   : > { %836 = vst [vmem:[#allocation2 + $0x94] sm:$0xf] %v635_v37  ;;  %v487_v55 = vrot.slane %v485_v42, 7  ;;  %v358_v57 = vsel %vm10757_vm4, 0, %v357_v52  ;;  %v381_v58 = vld [vmem:[#allocation2 + $0x98] sm:$0x1]  ;;  %1784 = vmatmul.bf16.gmra.mxu0 %v1538_v40 }
  0x73   : > { %v495_v56 = vrot.slane %v493_v44, 7  ;;  %359 = vst [vmem:[#allocation2 + $0x38] sm:$0x1] %v358_v57  ;;  %v382_v62 = vsel %vm10757_vm4, 0, %v381_v58  ;;  %1913 = vmatmul.bf16.gmra.mxu3 %v9820_v41  ;;  %v9797_v10 = vld [vmem:[#allocation6 + $0x18] sm:$0xff]  ;;  %v636_v30 = vrot.slane %v10912_v19, 4 }
  0x74   : > { %v490_v2 = vor.u32 %v488_v43, %v487_v55  ;;  %v491_v3 = vrot.slane %v487_v55, 4  ;;  %383 = vst [vmem:[#allocation2 + $0x98] sm:$0x1] %v382_v62  ;;  %v328_v14 = vld [vmem:[#allocation2 + $0x9c] sm:$0x1]  ;;  %v9805_v15 = vld [vmem:[#allocation6 + $0x58] sm:$0xff]  ;;  %2044 = vmatpush.bf16.msrb.mxu2 %v9797_v10 }
  0x75   : > { %v9812_v47 = vld [vmem:[#allocation2 + $0x24] sm:$0xff]  ;;  %1824 = vmatmul.bf16.gmra.mxu2 %v1578_v45  ;;  %v498_v4 = vor.u32 %v496_v51, %v495_v56  ;;  %v777_v20 = vld [vmem:[#allocation2 + $0x30] sm:$0xf]  ;;  %v329_v21 = vsel %vm10752_vm3, 0, %v328_v14  ;;  %v423_v23 = vld [vmem:[%s10741_s28 + $0x60] sm:$0xf]  ;;  %2133 = vmatpush.bf16.msrb.mxu3 %v9805_v15 }
  0x76   : > { %v1336_v61 = vld [vmem:[#allocation2 + $0x24] sm:$0xe]  ;;  %v935_v63 = vld [vmem:[#allocation2 + $0x2c] sm:$0x1]  ;;  %v500_v25 = vrot.slane %v495_v56, 4  ;;  %v778_v26 = vsel %vm10775_vm7, %v490_v2, %v777_v20  ;;  %v1581_v31 = vrot.slane %v1424_v13, 1 }
  0x77   : > { %v1400_v1 = vunpack.c.l.b16 %v1336_v61  ;;  %v1063_v11 = vunpack.c.l.b16 %v935_v63  ;;  %v943_v12 = vld [vmem:[#allocation2 + $0x8c] sm:$0x1]  ;;  %v499_v8 = vsel %vm10783_vm8, %v491_v3, %v498_v4  ;;  %1873 = vmatmul.bf16.gmra.mxu1 %v9812_v47  ;;  %v424_v27 = vld [vmem:[%s10741_s28 + $0x64] sm:$0xf]  ;;  %779 = vst [vmem:[#allocation2 + $0x30] sm:$0xf] %v778_v26 }
  0x78   : > { %v1071_v18 = vunpack.c.l.b16 %v943_v12  ;;  %780 = vst [vmem:[#allocation2 + $0x34] sm:$0xf] %v499_v8  ;;  %v638_v32 = vshrl.u32 %v423_v23, 16  ;;  %v641_v34 = vshll.u32 %v423_v23, 16  ;;  %v9845_v37 = vld [vmem:[#allocation6 + $0x118] sm:$0xff]  ;;  %v646_v41 = vshrl.u32 %v424_v27, 16 }
  0x79   : > { %v1416_v16 = vpack.c.b16 %v987_v54, %v1400_v1  ;;  %v10950_v24 = vpack.c.b16 %v1063_v11, %v1063_v11  ;;  %330 = vst [vmem:[#allocation2 + $0x9c] sm:$0x1] %v329_v21  ;;  %v649_v42 = vshll.u32 %v424_v27, 16  ;;  %v304_v50 = vld [vmem:[#allocation2 + $0x3c] sm:$0x1]  ;;  %3166 = vmatpush.bf16.msrb.mxu0 %v9845_v37  ;;  %v9821_v1 = vld [vmem:[#allocation2 + $0x90] sm:$0xff] }
  0x7a   : > { %v10955_v28 = vpack.c.b16 %v1071_v18, %v1071_v18  ;;  %v781_v40 = vld [vmem:[#allocation2 + $0x38] sm:$0x1]  ;;  %v640_v45 = vrot.slane %v638_v32, 7  ;;  %v10964_v52 = vrot.slane %v646_v41, 7  ;;  %v305_v55 = vsel %vm10752_vm3, 0, %v304_v50  ;;  %v9887_v35 = vld [vmem:[#allocation6 + $0x1e8] sm:$0xff] }
  0x7b   : > { %v1541_v38 = vrot.slane %v1416_v16, 1  ;;  %v1542_v39 = vrot.slane %v10950_v24, 1  ;;  %v782_v44 = vsel %vm10752_vm3, %v500_v25, %v781_v40  ;;  %v837_v19 = vld [vmem:[#allocation2 + $0x98] sm:$0x1]  ;;  %v408_v47 = vld [vmem:[%s10741_s28 + $0x24] sm:$0xf] }
  0x7c   : > { %v1582_v43 = vrot.slane %v10955_v28, 1  ;;  %783 = vst [vmem:[#allocation2 + $0x38] sm:$0x1] %v782_v44  ;;  %v838_v51 = vsel %vm10752_vm3, %v636_v30, %v837_v19  ;;  %v407_v56 = vld [vmem:[%s10741_s28 + $0x20] sm:$0xf]  ;;  %v643_v57 = vor.u32 %v641_v34, %v640_v45  ;;  %v644_v58 = vrot.slane %v640_v45, 4 }
  0x7d   : > { %839 = vst [vmem:[#allocation2 + $0x98] sm:$0x1] %v838_v51  ;;  %v502_v61 = vshrl.u32 %v407_v56, 16  ;;  %v651_v62 = vor.u32 %v649_v42, %v10964_v52  ;;  %v505_v63 = vshll.u32 %v407_v56, 16  ;;  %v510_v3 = vshrl.u32 %v408_v47, 16  ;;  %s12791_s6 = scalar_lea.vmem [#allocation9], %s8891_s30 }
  0x7e   : > { %306 = vst [vmem:[#allocation2 + $0x3c] sm:$0x1] %v305_v55  ;;  %v513_v4 = vshll.u32 %v408_v47, 16  ;;  %v1543_v10 = vsel %vm1525_vm9, %v1541_v38, %v1542_v39  ;;  %v10156_v11 = vld [vmem:[#allocation2 + $0x90] sm:$0xf0]  ;;  %v1583_v18 = vsel %vm1525_vm9, %v1581_v31, %v1582_v43  ;;  %v9804_v47 = vld [vmem:[#allocation6 + $0x50] sm:$0xff] }
  0x7f   : > { %v504_v2 = vrot.slane %v502_v61, 7  ;;  %v10157_v12 = vld [vmem:[#allocation2 + $0x90] sm:$0xe]  ;;  %v652_v13 = vsel %vm10783_vm8, %v644_v58, %v651_v62  ;;  %v360_v15 = vld [vmem:[#allocation2 + $0x44] sm:$0x1]  ;;  %v512_v25 = vrot.slane %v510_v3, 7  ;;  %2134 = vmatpush.bf16.msrb.mxu3 %v9804_v47 }
  0x80   : > { %v840_v14 = vld [vmem:[#allocation2 + $0x9c] sm:$0xf]  ;;  %v384_v16 = vld [vmem:[#allocation2 + $0xa4] sm:$0x1]  ;;  %v10144_v8 = vld [vmem:[#allocation2 + $0x30] sm:$0xf0]  ;;  %v10158_v44 = vor.u32 %v10157_v12, %v10156_v11 }
  0x81   : > { %v10145_v20 = vld [vmem:[#allocation2 + $0x30] sm:$0xe]  ;;  %v841_v21 = vsel %vm10775_vm7, %v643_v57, %v840_v14  ;;  %843 = vst [vmem:[#allocation2 + $0xa0] sm:$0xf] %v652_v13  ;;  %v508_v23 = vrot.slane %v504_v2, 4  ;;  %v507_v27 = vor.u32 %v505_v63, %v504_v2  ;;  %v361_v30 = vsel %vm10757_vm4, 0, %v360_v15 }
  0x82   : > { %v331_v26 = vld [vmem:[#allocation2 + $0xa8] sm:$0x1]  ;;  %842 = vst [vmem:[#allocation2 + $0x9c] sm:$0xf] %v841_v21  ;;  %v385_v32 = vsel %vm10757_vm4, 0, %v384_v16  ;;  %1789 = vmatmul.bf16.gmra.mxu0 %v1543_v10  ;;  %v9813_v34 = vld [vmem:[#allocation2 + $0x30] sm:$0xff]  ;;  %v515_v38 = vor.u32 %v513_v4, %v512_v25  ;;  %v10146_v51 = vor.u32 %v10145_v20, %v10144_v8 }
  0x83   : > { %v332_v31 = vsel %vm10752_vm3, 0, %v331_v26  ;;  %v936_v37 = vld [vmem:[#allocation2 + $0x38] sm:$0x1]  ;;  %v517_v39 = vrot.slane %v512_v25, 4  ;;  %362 = vst [vmem:[#allocation2 + $0x44] sm:$0x1] %v361_v30  ;;  %1918 = vmatmul.bf16.gmra.mxu3 %v9821_v1 }
  0x84   : > { %v1064_v40 = vunpack.c.l.b16 %v936_v37  ;;  %v944_v41 = vld [vmem:[#allocation2 + $0x98] sm:$0x1]  ;;  %386 = vst [vmem:[#allocation2 + $0xa4] sm:$0x1] %v385_v32  ;;  %v425_v42 = vld [vmem:[%s10741_s28 + $0x68] sm:$0xf]  ;;  %v516_v19 = vsel %vm10783_vm8, %v508_v23, %v515_v38 }
  0x85   : > { %1829 = vmatmul.bf16.gmra.mxu2 %v1583_v18  ;;  %v1072_v43 = vunpack.c.l.b16 %v944_v41  ;;  %v784_v45 = vld [vmem:[#allocation2 + $0x3c] sm:$0xf]  ;;  %333 = vst [vmem:[#allocation2 + $0xa8] sm:$0x1] %v332_v31  ;;  %v426_v50 = vld [vmem:[%s10741_s28 + $0x6c] sm:$0xf] }
  0x86   : > { %v785_v55 = vsel %vm10775_vm7, %v507_v27, %v784_v45  ;;  %787 = vst [vmem:[#allocation2 + $0x40] sm:$0xf] %v516_v19  ;;  %v655_v56 = vshrl.u32 %v425_v42, 16  ;;  %v658_v57 = vshll.u32 %v425_v42, 16  ;;  %v9796_v58 = vld [vmem:[#allocation6 + $0x10] sm:$0xff]  ;;  %v10989_v61 = vpack.c.b16 %v1064_v40, %v1064_v40  ;;  %s10002_s7 = sshll.u32 %s10653_s22, 8 }
  0x87   : > { %1878 = vmatmul.bf16.gmra.mxu1 %v9813_v34  ;;  %v10991_v62 = vpack.c.b16 %v1072_v43, %v1072_v43  ;;  %786 = vst [vmem:[#allocation2 + $0x3c] sm:$0xf] %v785_v55  ;;  %v663_v63 = vshrl.u32 %v426_v50, 16  ;;  %v666_v1 = vshll.u32 %v426_v50, 16  ;;  %v307_v2 = vld [vmem:[#allocation2 + $0x48] sm:$0x1]  ;;  %2045 = vmatpush.bf16.msrb.mxu2 %v9796_v58  ;;  %s8783_s10 = scalar_lea.hbm %s13063_s5, %s10002_s7 }
  0x88   : > { %v653_v3 = vrot.slane %v10964_v52, 4  ;;  %v657_v4 = vrot.slane %v655_v56, 7  ;;  %v308_v10 = vsel %vm10752_vm3, 0, %v307_v2  ;;  %v9844_v11 = vld [vmem:[#allocation6 + $0x110] sm:$0xff]  ;;  %v1586_v12 = vrot.slane %v10158_v44, 1  ;;  %s8786_s24 = sshll.u32 %s8783_s10, 4  ;;  %s8787_s24 = int_to_ptr.hbm [resolvable:$true] %s8786_s24 }
  0x89   : > { %v10996_v13 = vrot.slane %v663_v63, 7  ;;  %v1546_v14 = vrot.slane %v10146_v51, 1  ;;  %309 = vst [vmem:[#allocation2 + $0x48] sm:$0x1] %v308_v10  ;;  %3167 = vmatpush.bf16.msrb.mxu0 %v9844_v11  ;;  %v1547_v52 = vrot.slane %v10989_v61, 1  ;;  %v1587_v8 = vrot.slane %v10991_v62, 1 }
  0x8a   : > { %v788_v15 = vld [vmem:[#allocation2 + $0x44] sm:$0x1]  ;;  %v660_v16 = vor.u32 %v658_v57, %v657_v4  ;;  %v661_v18 = vrot.slane %v657_v4, 4  ;;  %v409_v25 = vld [vmem:[%s10741_s28 + $0x28] sm:$0xf]  ;;  %vm4144_vm12 = vcmask 1046532  }
  0x8b   : > { %v789_v20 = vsel %vm10752_vm3, %v517_v39, %v788_v15  ;;  %v844_v21 = vld [vmem:[#allocation2 + $0xa4] sm:$0x1]  ;;  %v668_v23 = vor.u32 %v666_v1, %v10996_v13  ;;  %v519_v37 = vshrl.u32 %v409_v25, 16  ;;  %v522_v38 = vshll.u32 %v409_v25, 16  ;;  %v11013_v40 = vld [vmem:[#allocation2 + $0xa0] sm:$0xf]  ;;  %vm11479_vm13 = vmor %vm4143_vm11, %vm4144_vm12 }
  0x8c   : > { %790 = vst [vmem:[#allocation2 + $0x44] sm:$0x1] %v789_v20  ;;  %v845_v26 = vsel %vm10752_vm3, %v653_v3, %v844_v21  ;;  %v847_v27 = vld [vmem:[#allocation2 + $0xa8] sm:$0xf]  ;;  %v410_v30 = vld [vmem:[%s10741_s28 + $0x2c] sm:$0xf]  ;;  %v1548_v45 = vsel %vm1525_vm9, %v1546_v14, %v1547_v52  ;;  %v1588_v58 = vsel %vm1525_vm9, %v1586_v12, %v1587_v8 }
  0x8d   : > { %v11007_v32 = vld [vmem:[#allocation2 + $0x40] sm:$0xf]  ;;  %846 = vst [vmem:[#allocation2 + $0xa4] sm:$0x1] %v845_v26  ;;  %v669_v31 = vsel %vm10783_vm8, %v661_v18, %v668_v23  ;;  %v848_v34 = vsel %vm10775_vm7, %v660_v16, %v847_v27  ;;  %v1346_v41 = vld [vmem:[#allocation2 + $0x9c] sm:$0xe]  ;;  %v13066_v18 = vunpack.c.l.b16 %v11013_v40 }
  0x8e   : > { %v1338_v39 = vld [vmem:[#allocation2 + $0x3c] sm:$0xe]  ;;  %849 = vst [vmem:[#allocation2 + $0xa8] sm:$0xf] %v848_v34  ;;  %v521_v43 = vrot.slane %v519_v37, 7  ;;  %v527_v44 = vshrl.u32 %v410_v30, 16  ;;  %v13070_v50 = vunpack.c.l.b16 %v11007_v32  ;;  %v1410_v52 = vunpack.c.l.b16 %v1346_v41 }
  0x8f   : > { %v9822_v42 = vld [vmem:[#allocation2 + $0x9c] sm:$0xff]  ;;  %850 = vst [vmem:[#allocation2 + $0xac] sm:$0xf] %v669_v31  ;;  %v530_v19 = vshll.u32 %v410_v30, 16  ;;  %v1402_v51 = vunpack.c.l.b16 %v1338_v39  ;;  %v363_v55 = vld [vmem:[#allocation2 + $0x50] sm:$0x1] }
  0x90   : > { %v387_v56 = vld [vmem:[#allocation2 + $0xb0] sm:$0x1]  ;;  %v334_v57 = vld [vmem:[#allocation2 + $0xb4] sm:$0x1]  ;;  %v524_v47 = vor.u32 %v522_v38, %v521_v43  ;;  %v525_v63 = vrot.slane %v521_v43, 4  ;;  %v529_v1 = vrot.slane %v527_v44, 7 }
  0x91   : > { %v791_v2 = vld [vmem:[#allocation2 + $0x48] sm:$0xf]  ;;  %v364_v4 = vsel %vm10757_vm4, 0, %v363_v55  ;;  %v388_v10 = vsel %vm10757_vm4, 0, %v387_v56  ;;  %v428_v11 = vld [vmem:[%s10741_s28 + $0x74] sm:$0xf]  ;;  %v11029_v21 = vpack.c.b16 %v13070_v50, %v1402_v51 }
  0x92   : > { %v427_v3 = vld [vmem:[%s10741_s28 + $0x70] sm:$0xf]  ;;  %1794 = vmatmul.bf16.gmra.mxu0 %v1548_v45  ;;  %v9814_v15 = vld [vmem:[#allocation2 + $0x3c] sm:$0xff]  ;;  %v532_v12 = vor.u32 %v530_v19, %v529_v1  ;;  %v792_v8 = vsel %vm10775_vm7, %v524_v47, %v791_v2  ;;  %365 = vst [vmem:[#allocation2 + $0x50] sm:$0x1] %v364_v4  ;;  %v335_v25 = vsel %vm10752_vm3, 0, %v334_v57 }
  0x93   : > { %v672_v14 = vshrl.u32 %v427_v3, 16  ;;  %v937_v16 = vld [vmem:[#allocation2 + $0x44] sm:$0x1]  ;;  %1923 = vmatmul.bf16.gmra.mxu3 %v9822_v42  ;;  %793 = vst [vmem:[#allocation2 + $0x48] sm:$0xf] %v792_v8  ;;  %v680_v31 = vshrl.u32 %v428_v11, 16 }
  0x94   : > { %v1065_v20 = vunpack.c.l.b16 %v937_v16  ;;  %v945_v23 = vld [vmem:[#allocation2 + $0xa4] sm:$0x1]  ;;  %v533_v30 = vsel %vm10783_vm8, %v525_v63, %v532_v12  ;;  %389 = vst [vmem:[#allocation2 + $0xb0] sm:$0x1] %v388_v10  ;;  %v683_v34 = vshll.u32 %v428_v11, 16  ;;  %v534_v38 = vrot.slane %v529_v1, 4 }
  0x95   : > { %1834 = vmatmul.bf16.gmra.mxu2 %v1588_v58  ;;  %v674_v26 = vrot.slane %v672_v14, 7  ;;  %v1073_v27 = vunpack.c.l.b16 %v945_v23  ;;  %794 = vst [vmem:[#allocation2 + $0x4c] sm:$0xf] %v533_v30  ;;  %v675_v39 = vshll.u32 %v427_v3, 16  ;;  %v11037_v42 = vrot.slane %v680_v31, 7  ;;  %v9795_v43 = vld [vmem:[#allocation6 + $0x8] sm:$0xff] }
  0x96   : > { %v11035_v37 = vpack.c.b16 %v1065_v20, %v1065_v20  ;;  %336 = vst [vmem:[#allocation2 + $0xb4] sm:$0x1] %v335_v25  ;;  %v9803_v44 = vld [vmem:[#allocation6 + $0x48] sm:$0xff]  ;;  %v9857_v19 = vld [vmem:[#allocation6 + $0x178] sm:$0xff]  ;;  %v670_v45 = vrot.slane %v10996_v13, 4  ;;  %v1551_v56 = vrot.slane %v11029_v21, 1  ;;  %v1426_v58 = vpack.c.b16 %v13066_v18, %v1410_v52  ;;  %2046 = vmatpush.bf16.msrb.mxu2 %v9795_v43 }
  0x97   : > { %v678_v41 = vrot.slane %v674_v26, 4  ;;  %1883 = vmatmul.bf16.gmra.mxu1 %v9814_v15  ;;  %v310_v51 = vld [vmem:[#allocation2 + $0x54] sm:$0x1]  ;;  %v411_v55 = vld [vmem:[%s10741_s28 + $0x30] sm:$0xf]  ;;  %v11042_v57 = vpack.c.b16 %v1073_v27, %v1073_v27  ;;  %v685_v47 = vor.u32 %v683_v34, %v11037_v42  ;;  %2135 = vmatpush.bf16.msrb.mxu3 %v9803_v44  ;;  %v9843_v1 = vld [vmem:[#allocation6 + $0x108] sm:$0xff]  ;;  %v677_v4 = vor.u32 %v675_v39, %v674_v26 }
  0x98   : > { %v412_v63 = vld [vmem:[%s10741_s28 + $0x34] sm:$0xf]  ;;  %v1552_v2 = vrot.slane %v11035_v37, 1  ;;  %v311_v13 = vsel %vm10752_vm3, 0, %v310_v51  ;;  %v536_v10 = vshrl.u32 %v411_v55, 16  ;;  %3251 = vmatpush.bf16.msrb.mxu1 %v9857_v19  ;;  %v539_v16 = vshll.u32 %v411_v55, 16  ;;  %3168 = vmatpush.bf16.msrb.mxu0 %v9843_v1 }
  0x99   : > { %v795_v3 = vld [vmem:[#allocation2 + $0x50] sm:$0x1]  ;;  %v9856_v11 = vld [vmem:[#allocation6 + $0x170] sm:$0xff]  ;;  %v686_v15 = vsel %vm10783_vm8, %v678_v41, %v685_v47  ;;  %312 = vst [vmem:[#allocation2 + $0x54] sm:$0x1] %v311_v13  ;;  %v544_v52 = vshrl.u32 %v412_v63, 16 }
  0x9a   : > { %v796_v14 = vsel %vm10752_vm3, %v534_v38, %v795_v3  ;;  %v538_v8 = vrot.slane %v536_v10, 7  ;;  %v547_v20 = vshll.u32 %v412_v63, 16  ;;  %v1591_v21 = vrot.slane %v1426_v58, 1  ;;  %857 = vst [vmem:[#allocation2 + $0xb8] sm:$0xf] %v686_v15  ;;  %v9855_v31 = vld [vmem:[#allocation6 + $0x168] sm:$0xff] }
  0x9b   : > { %797 = vst [vmem:[#allocation2 + $0x50] sm:$0x1] %v796_v14  ;;  %v851_v12 = vld [vmem:[#allocation2 + $0xb0] sm:$0x1]  ;;  %v1592_v23 = vrot.slane %v11042_v57, 1  ;;  %v11058_v26 = vrot.slane %v544_v52, 7  ;;  %v1553_v44 = vsel %vm1525_vm9, %v1551_v56, %v1552_v2 }
  0x9c   : > { %v852_v25 = vsel %vm10752_vm3, %v670_v45, %v851_v12  ;;  %v542_v30 = vrot.slane %v538_v8, 4  ;;  %3252 = vmatpush.bf16.msrb.mxu1 %v9856_v11  ;;  %v541_v38 = vor.u32 %v539_v16, %v538_v8  ;;  %v366_v41 = vld [vmem:[#allocation2 + $0x5c] sm:$0x1]  ;;  %v9823_v19 = vld [vmem:[#allocation2 + $0xa8] sm:$0xff]  ;;  %v337_v1 = vld [vmem:[#allocation2 + $0xc0] sm:$0x1] }
  0x9d   : > { %853 = vst [vmem:[#allocation2 + $0xb0] sm:$0x1] %v852_v25  ;;  %v854_v27 = vld [vmem:[#allocation2 + $0xb4] sm:$0xf]  ;;  %v549_v39 = vor.u32 %v547_v20, %v11058_v26  ;;  %v390_v43 = vld [vmem:[#allocation2 + $0xbc] sm:$0x1]  ;;  %v1593_v58 = vsel %vm1525_vm9, %v1591_v21, %v1592_v23 }
  0x9e   : > { %v855_v34 = vsel %vm10775_vm7, %v677_v4, %v854_v27  ;;  %v9854_v45 = vld [vmem:[#allocation6 + $0x160] sm:$0xff]  ;;  %v367_v51 = vsel %vm10757_vm4, 0, %v366_v41  ;;  %v391_v55 = vsel %vm10757_vm4, 0, %v390_v43  ;;  %v9815_v47 = vld [vmem:[#allocation2 + $0x48] sm:$0xff]  ;;  %v429_v3 = vld [vmem:[%s10741_s28 + $0x78] sm:$0xf] }
  0x9f   : > { %856 = vst [vmem:[#allocation2 + $0xb4] sm:$0xf] %v855_v34  ;;  %v550_v63 = vsel %vm10783_vm8, %v542_v30, %v549_v39  ;;  %v10147_v56 = vld [vmem:[#allocation2 + $0x48] sm:$0xf0]  ;;  %v10148_v2 = vld [vmem:[#allocation2 + $0x48] sm:$0xe] }
  0xa0   : > { %368 = vst [vmem:[#allocation2 + $0x5c] sm:$0x1] %v367_v51  ;;  %v798_v4 = vld [vmem:[#allocation2 + $0x54] sm:$0xf]  ;;  %3253 = vmatpush.bf16.msrb.mxu1 %v9855_v31  ;;  %v338_v13 = vsel %vm10752_vm3, 0, %v337_v1  ;;  %v689_v10 = vshrl.u32 %v429_v3, 16 }
  0xa1   : > { %801 = vst [vmem:[#allocation2 + $0x58] sm:$0xf] %v550_v63  ;;  %v10159_v14 = vld [vmem:[#allocation2 + $0xa8] sm:$0xf0]  ;;  %v10160_v15 = vld [vmem:[#allocation2 + $0xa8] sm:$0xe]  ;;  %v799_v16 = vsel %vm10775_vm7, %v541_v38, %v798_v4  ;;  %v10149_v38 = vor.u32 %v10148_v2, %v10147_v56 }
  0xa2   : > { %1799 = vmatmul.bf16.gmra.mxu0 %v1553_v44  ;;  %v938_v11 = vld [vmem:[#allocation2 + $0x50] sm:$0x1]  ;;  %392 = vst [vmem:[#allocation2 + $0xbc] sm:$0x1] %v391_v55  ;;  %v430_v52 = vld [vmem:[%s10741_s28 + $0x7c] sm:$0xf] }
  0xa3   : > { %1928 = vmatmul.bf16.gmra.mxu3 %v9823_v19  ;;  %v1066_v12 = vunpack.c.l.b16 %v938_v11  ;;  %v551_v8 = vrot.slane %v11058_v26, 4  ;;  %800 = vst [vmem:[#allocation2 + $0x54] sm:$0xf] %v799_v16  ;;  %v691_v20 = vrot.slane %v689_v10, 7  ;;  %v692_v21 = vshll.u32 %v429_v3, 16  ;;  %v9794_v31 = vld [vmem:[#allocation6] sm:$0xff] }
  0xa4   : > { %v946_v23 = vld [vmem:[#allocation2 + $0xb0] sm:$0x1]  ;;  %339 = vst [vmem:[#allocation2 + $0xc0] sm:$0x1] %v338_v13  ;;  %v697_v25 = vshrl.u32 %v430_v52, 16  ;;  %v700_v27 = vshll.u32 %v430_v52, 16  ;;  %3254 = vmatpush.bf16.msrb.mxu1 %v9854_v45  ;;  %v10161_v19 = vor.u32 %v10160_v15, %v10159_v14  ;;  %2047 = vmatpush.bf16.msrb.mxu2 %v9794_v31 }
  0xa5   : > { %1839 = vmatmul.bf16.gmra.mxu2 %v1593_v58  ;;  %v1074_v30 = vunpack.c.l.b16 %v946_v23  ;;  %v9802_v34 = vld [vmem:[#allocation6 + $0x40] sm:$0xff]  ;;  %v687_v39 = vrot.slane %v11037_v42, 4  ;;  %v695_v41 = vrot.slane %v691_v20, 4  ;;  %v9853_v44 = vld [vmem:[#allocation6 + $0x158] sm:$0xff]  ;;  %v11081_v26 = vpack.c.b16 %v1066_v12, %v1066_v12  ;;  %v289_v42 = vld [vmem:[#allocation2] sm:$0x1] }
  0xa6   : > { %v11079_v43 = vrot.slane %v697_v25, 7  ;;  %2136 = vmatpush.bf16.msrb.mxu3 %v9802_v34  ;;  %v9842_v55 = vld [vmem:[#allocation6 + $0x100] sm:$0xff]  ;;  %v9852_v3 = vld [vmem:[#allocation6 + $0x150] sm:$0xff]  ;;  %v1556_v56 = vrot.slane %v10149_v38, 1  ;;  %v290_v11 = vsel %vm10752_vm3, 0, %v289_v42  ;;  %v1596_v14 = vrot.slane %v10161_v19, 1 }
  0xa7   : > { %1888 = vmatmul.bf16.gmra.mxu1 %v9815_v47  ;;  %v802_v51 = vld [vmem:[#allocation2 + $0x5c] sm:$0x1]  ;;  %v11083_v58 = vpack.c.b16 %v1074_v30, %v1074_v30  ;;  %v694_v47 = vor.u32 %v692_v21, %v691_v20  ;;  %3169 = vmatpush.bf16.msrb.mxu0 %v9842_v55  ;;  %v1557_v13 = vrot.slane %v11081_v26, 1  ;;  %v9851_v52 = vld [vmem:[#allocation6 + $0x148] sm:$0xff]  ;;  %v11098_v12 = vld [vmem:[#allocation2 + $0xc] sm:$0xff]   ;;  %s8772_s29 = scalar_lea.sflag [#allocation5], %s10737_s8 }
  0xa8   : > { %v803_v45 = vsel %vm10752_vm3, %v551_v8, %v802_v51  ;;  %v702_v63 = vor.u32 %v700_v27, %v11079_v43  ;;  %3255 = vmatpush.bf16.msrb.mxu1 %v9853_v44  ;;  %v2266_v8 = vld [vmem:[#allocation2 + $0xc] sm:$0xe]  ;;  %291 = vst [vmem:[#allocation2] sm:$0x1] %v290_v11  ;;  %v9824_v21 = vld [vmem:[#allocation2 + $0xb4] sm:$0xff]  ;;  %v2331_v38 = vunpack.c.h.b16 %v11098_v12  ;;  %s10510_s22 = sshra.s32 %s8787_s24, 4  ;;  %s10511_s22 = int_to_ptr.hbm [resolvable:$true] %s10510_s22 }
  0xa9   : > { %804 = vst [vmem:[#allocation2 + $0x5c] sm:$0x1] %v803_v45  ;;  %v858_v1 = vld [vmem:[#allocation2 + $0xbc] sm:$0x1]  ;;  %v1597_v15 = vrot.slane %v11083_v58, 1  ;;  %v1558_v20 = vsel %vm1525_vm9, %v1556_v56, %v1557_v13  ;;  %s10512_s11 = scalar_lea.hbm %s10511_s22, 256  ;;  %p10517_p11 = scmp.lt.s32.totalorder %s10511_s22, %s13063_s5 }
  0xaa   : > { %v859_v2 = vsel %vm10752_vm3, %v687_v39, %v858_v1  ;;  %v703_v4 = vsel %vm10783_vm8, %v695_v41, %v702_v63  ;;  %v11101_v23 = vld [vmem:[#allocation2 + $0xb8] sm:$0xf]  ;;  %v1348_v25 = vld [vmem:[#allocation2 + $0xb4] sm:$0xe]  ;;  %v2426_v39 = vunpack.c.l.b16 %v2266_v8  ;;  %v2220_v44 = vld [vmem:[#allocation2 + $0x14] sm:$0x1]  ;;  %p10513_p1 = scmp.ne.s32.totalorder %s10511_s22, %s10512_s11 }
  0xab   : > { %860 = vst [vmem:[#allocation2 + $0xbc] sm:$0x1] %v859_v2  ;;  %v861_v10 = vld [vmem:[#allocation2 + $0xc0] sm:$0xf]  ;;  %v1598_v27 = vsel %vm1525_vm9, %v1596_v14, %v1597_v15  ;;  %v11104_v30 = vld [vmem:[#allocation2 + $0x58] sm:$0xf]  ;;  %v13065_v55 = vunpack.c.l.b16 %v11101_v23  ;;  %v1412_v42 = vunpack.c.l.b16 %v1348_v25  ;;  %v2332_v2 = vunpack.c.l.b16 %v2220_v44 }
  0xac   : > { %v862_v16 = vsel %vm10775_vm7, %v694_v47, %v861_v10  ;;  %864 = vst [vmem:[#allocation2 + $0xc4] sm:$0xf] %v703_v4  ;;  %3256 = vmatpush.bf16.msrb.mxu1 %v9852_v3  ;;  %v1340_v34 = vld [vmem:[#allocation2 + $0x54] sm:$0xe]  ;;  %v9850_v41 = vld [vmem:[#allocation6 + $0x140] sm:$0xff]  ;;  %v13069_v45 = vunpack.c.l.b16 %v11104_v30  ;;  %v2442_v4 = vpack.c.b16 %v2331_v38, %v2426_v39  ;;  %p10514_p4 = pnand %p10513_p1, %p10704_p3  ;;  %s10516_s13 = scalar_lea.hbm %s13063_s5, 512 }
  0xad   : > { %863 = vst [vmem:[#allocation2 + $0xc0] sm:$0xf] %v862_v16  ;;  %v9816_v19 = vld [vmem:[#allocation2 + $0x54] sm:$0xff]  ;;  %v1404_v63 = vunpack.c.l.b16 %v1340_v34  ;;  %v1428_v11 = vpack.c.b16 %v13065_v55, %v1412_v42  ;;  %v2218_v15 = vld [vmem:[#allocation2 + $0xc] sm:$0xf]  ;;  %v2379_v16 = vpack.c.b16 %v2332_v2, %v2332_v2  ;;  %p10518_p2 = scmp.lt.s32.totalorder %s10516_s13, %s10512_s11 }
  0xae   : > { %v9881_v1 = vld [vmem:[#allocation6 + $0x1b8] sm:$0xff]  ;;  %v2459_v39 = vshrl.u32 %v2442_v4, 16  ;;  %vm1092_vm10 = vsmask.f32 7424  ;;  %v10171_v2 = vld [vmem:[#allocation2 + $0x18] sm:$0xe]  ;;  %p10515_p8 = pneg %p10514_p4 }
  0xaf   : > { %v9889_v3 = vld [vmem:[#allocation6 + $0x1f8] sm:$0xff]  ;;  %3901 = vmatpush.bf16.msra.mxu2 %v9881_v1  ;;  %v1420_v10 = vpack.c.b16 %v13069_v45, %v1404_v63  ;;  %v1601_v25 = vrot.slane %v1428_v11, 1  ;;  %v2466_v34 = vshll.u32 %v2379_v16, 16  ;;  %v10004_v63 = vld [vmem:[#allocation2] sm:$0xff]   ;;  %p10519_p9 = por %p10518_p2, %p10517_p11 }
  0xb0   : > { %v939_v31 = vld [vmem:[#allocation2 + $0x5c] sm:$0x1]  ;;  %3257 = vmatpush.bf16.msrb.mxu1 %v9851_v52  ;;  %3990 = vmatpush.bf16.msra.mxu3 %v9889_v3  ;;  %v2461_v52 = vshll.u32 %v2442_v4, 16  ;;  %v9897_v8 = vld [vmem:[#allocation6 + $0x238] sm:$0xff]  ;;  %v2223_v3 = vld [vmem:[#allocation2 + $0x20] sm:$0x1] }
  0xb1   : > { %v1067_v47 = vunpack.c.l.b16 %v939_v31  ;;  %4386 = vmatpush.bf16.msra.mxu0 %v9897_v8  ;;  %v2468_v42 = vrot.slane %v2466_v34, 1  ;;  %v1096_v11 = vshll.u32 %v10004_v63, 16  ;;  %p10520_p10 = pnand %p10519_p9, %p10515_p8 }
  0xb2   : > { %1804 = vmatmul.bf16.gmra.mxu0 %v1558_v20  ;;  %v947_v51 = vld [vmem:[#allocation2 + $0xbc] sm:$0x1]  ;;  %v1561_v20 = vrot.slane %v1420_v10, 1  ;;  %v9817_v10 = vld [vmem:[#allocation2 + $0x60] sm:$0xff] }
  0xb3   : > { %1933 = vmatmul.bf16.gmra.mxu3 %v9824_v21  ;;  %v1075_v56 = vunpack.c.l.b16 %v947_v51  ;;  %v11109_v13 = vpack.c.b16 %v1067_v47, %v1067_v47  ;;  %v1098_v34 = vrot.slane %v1096_v11, 1  ;;  %3902 = vmatpush.bf16.msra.mxu2 %v9880_v17 }
  0xb4   : > { %3258 = vmatpush.bf16.msrb.mxu1 %v9850_v41  ;;  %v2463_v41 = vrot.slane %v2461_v52, 1  ;;  %v2335_v52 = vunpack.c.l.b16 %v2223_v3 }
  0xb5   : > { %1844 = vmatmul.bf16.gmra.mxu2 %v1598_v27  ;;  %v11115_v14 = vpack.c.b16 %v1075_v56, %v1075_v56  ;;  %v1562_v21 = vrot.slane %v11109_v13, 1  ;;  %v2330_v27 = vunpack.c.l.b16 %v2218_v15  ;;  %v10170_v56 = vld [vmem:[#allocation2 + $0x18] sm:$0xf0] }
  0xb6   : > { %v2464_v1 = vor.u32 %v2463_v41, %v2459_v39  ;;  %v10172_v8 = vor.u32 %v10171_v2, %v10170_v56  ;;  %v2381_v39 = vpack.c.b16 %v2335_v52, %v2335_v52 }
  0xb7   : > { %1893 = vmatmul.bf16.gmra.mxu1 %v9816_v19  ;;  %v1602_v31 = vrot.slane %v11115_v14, 1  ;;  %v1563_v44 = vsel %vm1525_vm9, %v1561_v20, %v1562_v21  ;;  %v9825_v19 = vld [vmem:[#allocation2 + $0xc0] sm:$0xff]  ;;  %v2378_v51 = vpack.c.b16 %v2331_v38, %v2330_v27  ;;  %v1101_v38 = vshll.u32 %v10797_v59, 16 }
  0xb8   : > { %v2469_v15 = vsel %vm1092_vm10, %v2464_v1, %v2468_v42  ;;  %v2470_v20 = vshrl.u32 %v2379_v16, 16  ;;  %v2475_v41 = vshll.u32 %v10172_v8, 16  ;;  %v982_v1 = vunpack.c.l.b16 %v11098_v12  ;;  %v11124_v59 = vld [vmem:[#allocation2 + $0x24] sm:$0xff]  }
  0xb9   : > { %v1603_v47 = vsel %vm1525_vm9, %v1601_v25, %v1602_v31  ;;  %v2685_v4 = vshll.u32 %v2378_v51, 16  ;;  %v2683_v21 = vshrl.u32 %v2378_v51, 16  ;;  %v2693_v27 = vshll.u32 %v2469_v15, 16  ;;  %v10552_v16 = vld [vmem:[#allocation2 + $0x24] sm:$0xf0] }
  0xba   : > { %v1094_v31 = vshrl.u32 %v10004_v63, 16  ;;  %v2691_v55 = vshrl.u32 %v2469_v15, 16  ;;  %v2480_v56 = vshll.u32 %v2381_v39, 16  ;;  %v2473_v2 = vshrl.u32 %v10172_v8, 16  ;;  %v10553_v51 = vld [vmem:[#allocation2 + $0x24] sm:$0xe] }
  0xbb   : > { %v2687_v25 = vrot.slane %v2685_v4, 1  ;;  %v2695_v18 = vrot.slane %v2693_v27, 1  ;;  %v1013_v12 = vpack.c.b16 %v983_v22, %v982_v1  ;;  %v2226_v8 = vld [vmem:[#allocation2 + $0x2c] sm:$0x1]  ;;  %v2484_v1 = vshrl.u32 %v2381_v39, 16 }
  0xbc   : > { %v1099_v3 = vor.u32 %v1098_v34, %v1094_v31  ;;  %v9888_v22 = vld [vmem:[#allocation6 + $0x1f0] sm:$0xff] }
  0xbd   : > { %v2696_v52 = vor.u32 %v2695_v18, %v2691_v55  ;;  %v2338_v55 = vunpack.c.l.b16 %v2226_v8  ;;  %v1108_v34 = vshll.u32 %v1013_v12, 16  ;;  %3991 = vmatpush.bf16.msra.mxu3 %v9888_v22  ;;  %v2718_v8 = vshll.u32 %v2484_v1, 16 }
  0xc1   : > { %3992 = vmatpush.bf16.msra.mxu3 %v9887_v35 }
  0xc2   : > { %1809 = vmatmul.bf16.gmra.mxu0 %v1563_v44  ;;  %v1103_v44 = vrot.slane %v1101_v38, 1  ;;  %v11127_v38 = vld [vmem:[#allocation2 + $0x18] sm:$0xff]  }
  0xc3   : > { %1938 = vmatmul.bf16.gmra.mxu3 %v9825_v19  ;;  %v2688_v19 = vor.u32 %v2687_v25, %v2683_v21  ;;  %v2705_v31 = vshll.u32 %v11127_v38, 16 }
  0xc4   : > { %v1104_v15 = vsel %vm1092_vm10, %v1099_v3, %v1103_v44 }
  0xc5   : > { %1849 = vmatmul.bf16.gmra.mxu2 %v1603_v47  ;;  %v2698_v47 = vshll.u32 %v2470_v20, 16  ;;  %v2689_v11 = vsel %vm1092_vm10, %v2688_v19, %v2468_v42  ;;  %v2482_v20 = vrot.slane %v2480_v56, 1  ;;  %v10554_v42 = vor.u32 %v10553_v51, %v10552_v16 }
  0xc6   : > { %v2707_v19 = vrot.slane %v2705_v31, 1  ;;  %v1106_v16 = vshrl.u32 %v1013_v12, 16  ;;  %v1110_v51 = vrot.slane %v1108_v34, 1 }
  0xc7   : > { %1898 = vmatmul.bf16.gmra.mxu1 %v9817_v10  ;;  %v2477_v10 = vrot.slane %v2475_v41, 1  ;;  %v2700_v4 = vrot.slane %v2698_v47, 1  ;;  %v2487_v31 = vshrl.u32 %v10554_v42, 16 }
  0xc8   : > { %v1111_v17 = vor.u32 %v1110_v51, %v1106_v16  ;;  %v10174_v16 = vld [vmem:[#allocation2 + $0x30] sm:$0xe]  ;;  %v2725_v51 = vshll.u32 %v11124_v59, 16 }
  0xc9   : > { %v2478_v21 = vor.u32 %v2477_v10, %v2473_v2  ;;  %v2701_v18 = vsel %vm1092_vm10, %v2696_v52, %v2700_v4  ;;  %v2383_v2 = vpack.c.b16 %v2338_v55, %v2338_v55  ;;  %v2489_v10 = vshll.u32 %v10554_v42, 16  ;;  %v9896_v55 = vld [vmem:[#allocation6 + $0x230] sm:$0xff] }
  0xca   : > { %v1113_v4 = vshll.u32 %v10870_v46, 16  ;;  %v2720_v46 = vrot.slane %v2718_v8, 1  ;;  %4387 = vmatpush.bf16.msra.mxu0 %v9896_v55 }
  0xcb   : > { %v2483_v41 = vsel %vm1092_vm10, %v2478_v21, %v2482_v20 }
  0xcc   : > { %v2713_v56 = vshll.u32 %v2483_v41, 16  ;;  %v2711_v21 = vshrl.u32 %v2483_v41, 16 }
  0xce   : > { %v2715_v39 = vrot.slane %v2713_v56, 1  ;;  %v2229_v56 = vld [vmem:[#allocation2 + $0x38] sm:$0x1] }
  0xcf   : > { %v1775_v48 = vpop.f32.mrf.mxu0 }
  0xd2   : > { %v1864_v25 = vpop.f32.mrf.mxu1  ;;  %3170 = vmatmul.bf16.vlgmr.msrb.gmra.mxu0 %v2689_v11 }
  0xd3   : > { %v11132_v27 = vadd.f32 %v1864_v25, %v1775_v48  ;;  %2137 = vmatmul.bf16.vlgmr.msrb.gmra.mxu3 %v1104_v15  ;;  %v2703_v48 = vshrl.u32 %v11127_v38, 16  ;;  %v2494_v25 = vshll.u32 %v2383_v2, 16 }
  0xd5   : > { %2048 = vmatmul.bf16.vlgmr.msrb.gmra.mxu2 %v10004_v63  ;;  %v11143_v15 = vor.u32 %v2707_v19, %v2703_v48  ;;  %v2716_v19 = vor.u32 %v2715_v39, %v2711_v21  ;;  %v2496_v41 = vrot.slane %v2494_v25, 1  ;;  %v2723_v39 = vshrl.u32 %v11124_v59, 16 }
  0xd6   : > { %v1904_v47 = vpop.f32.mrf.mxu3  ;;  %v2727_v25 = vrot.slane %v2725_v51, 1 }
  0xd7   : > { %3259 = vmatmul.bf16.vlgmr.msrb.gmra.mxu1 %v2701_v18  ;;  %v1777_v63 = vpop.f32.mrf.mxu0  ;;  %v2491_v18 = vrot.slane %v2489_v10, 1  ;;  %v2709_v34 = vsel %vm1092_vm10, %v11143_v15, %v2482_v20  ;;  %v10173_v10 = vld [vmem:[#allocation2 + $0x30] sm:$0xf0]  ;;  %v2721_v20 = vsel %vm1092_vm10, %v2716_v19, %v2720_v46  ;;  %v1125_v46 = vshll.u32 %v10905_v0, 16 }
  0xd8   : > { %v1815_v44 = vpop.f32.mrf.mxu2  ;;  %v10175_v55 = vor.u32 %v10174_v16, %v10173_v10  ;;  %v2728_v19 = vor.u32 %v2727_v25, %v2723_v39 }
  0xd9   : > { %v11138_v3 = vadd.f32 %v1904_v47, %v1815_v44  ;;  %v1115_v44 = vrot.slane %v1113_v4, 1  ;;  %v2492_v1 = vor.u32 %v2491_v18, %v2487_v31  ;;  %v2341_v4 = vunpack.c.l.b16 %v2229_v56 }
  0xda   : > { %v1866_v11 = vpop.f32.mrf.mxu1  ;;  %v2501_v16 = vshrl.u32 %v10175_v55, 16  ;;  %v2729_v39 = vsel %vm1092_vm10, %v2728_v19, %v2496_v41 }
  0xdb   : > { %v11141_v52 = vadd.f32 %v1866_v11, %v1777_v63  ;;  %v1116_v42 = vsel %vm1092_vm10, %v1111_v17, %v1115_v44  ;;  %v2497_v8 = vsel %vm1092_vm10, %v2492_v1, %v2496_v41  ;;  %v2498_v17 = vshrl.u32 %v2383_v2, 16  ;;  %v906_v1 = vld [vmem:[#allocation2 + $0x24] sm:$0xf] }
  0xdc   : > { %v2733_v44 = vshll.u32 %v2497_v8, 16 }
  0xde   : > { %v1906_v47 = vpop.f32.mrf.mxu3  ;;  %v2735_v56 = vrot.slane %v2733_v44, 1 }
  0xdf   : > { %v1780_v48 = vpop.f32.mrf.mxu0 }
  0xe0   : > { %v1817_v22 = vpop.f32.mrf.mxu2 }
  0xe1   : > { %v11147_v63 = vadd.f32 %v1906_v47, %v1817_v22  ;;  %v11156_v22 = vpack.c.b16 %v2341_v4, %v2341_v4  ;;  %v1127_v4 = vrot.slane %v1125_v46, 1 }
  0xe2   : > { %3175 = vmatmul.bf16.gmra.mxu0 %v2709_v34  ;;  %v2503_v34 = vshll.u32 %v10175_v55, 16  ;;  %v11169_v55 = vld [vmem:[#allocation2 + $0x30] sm:$0xff]  }
  0xe3   : > { %13094 = vst [vmem:[#allocation15_spill] sm:$0xff] %v11147_v63  ;;  %2142 = vmatmul.bf16.gmra.mxu3 %v1116_v42  ;;  %v2738_v42 = vshll.u32 %v2498_v17, 16  ;;  %v2508_v59 = vshll.u32 %v11156_v22, 16 }
  0xe4   : > { %v1869_v11 = vpop.f32.mrf.mxu1  ;;  %v2505_v51 = vrot.slane %v2503_v34, 1  ;;  %v1128_v34 = vsel %vm1092_vm10, %v11143_v15, %v1127_v4 }
  0xe5   : > { %2053 = vmatmul.bf16.gmra.mxu2 %v1013_v12  ;;  %v11153_v21 = vadd.f32 %v1869_v11, %v1780_v48  ;;  %v2731_v48 = vshrl.u32 %v2497_v8, 16  ;;  %v986_v11 = vunpack.c.l.b16 %v906_v1  ;;  %v2740_v25 = vrot.slane %v2738_v42, 1  ;;  %v2232_v1 = vld [vmem:[#allocation2 + $0x44] sm:$0x1] }
  0xe6   : > { %v1909_v18 = vpop.f32.mrf.mxu3  ;;  %v2510_v17 = vrot.slane %v2508_v59, 1  ;;  %v9879_v59 = vld [vmem:[#allocation6 + $0x1a8] sm:$0xff] }
  0xe7   : > { %3264 = vmatmul.bf16.gmra.mxu1 %v2721_v20  ;;  %v1782_v12 = vpop.f32.mrf.mxu0  ;;  %v11164_v20 = vld [vmem:[#allocation2 + $0x3c] sm:$0xff]   ;;  %v2736_v8 = vor.u32 %v2735_v56, %v2731_v48  ;;  %v1015_v46 = vpack.c.b16 %v987_v54, %v986_v11  ;;  %v2344_v48 = vunpack.c.l.b16 %v2232_v1  ;;  %3903 = vmatpush.bf16.msra.mxu2 %v9879_v59 }
  0xe8   : > { %v1820_v31 = vpop.f32.mrf.mxu2 }
  0xe9   : > { %v11158_v47 = vadd.f32 %v1909_v18, %v1820_v31  ;;  %v10555_v31 = vld [vmem:[#allocation2 + $0x3c] sm:$0xf0]  ;;  %v10556_v18 = vld [vmem:[#allocation2 + $0x3c] sm:$0xe]  ;;  %v1132_v15 = vshll.u32 %v1015_v46, 16 }
  0xea   : > { %v10557_v56 = vor.u32 %v10556_v18, %v10555_v31  ;;  %v1130_v31 = vshrl.u32 %v1015_v46, 16 }
  0xeb   : > { %13095 = vst [vmem:[#allocation16_spill] sm:$0xff] %v11158_v47  ;;  %v1134_v18 = vrot.slane %v1132_v15, 1  ;;  %v9892_v47 = vld [vmem:[#allocation6 + $0x210] sm:$0xff] }
  0xec   : > { %v1871_v10 = vpop.f32.mrf.mxu1  ;;  %v2515_v59 = vshrl.u32 %v10557_v56, 16 }
  0xed   : > { %v11162_v2 = vadd.f32 %v1871_v10, %v1782_v12  ;;  %v2506_v12 = vor.u32 %v2505_v51, %v2501_v16  ;;  %v2745_v10 = vshll.u32 %v11169_v55, 16  ;;  %v2743_v51 = vshrl.u32 %v11169_v55, 16 }
  0xee   : > { %v1911_v0 = vpop.f32.mrf.mxu3  ;;  %v1135_v50 = vor.u32 %v1134_v18, %v1130_v31  ;;  %v10177_v31 = vld [vmem:[#allocation2 + $0x48] sm:$0xe]  ;;  %v2765_v18 = vshll.u32 %v11164_v20, 16 }
  0xef   : > { %v1785_v45 = vpop.f32.mrf.mxu0  ;;  %v2511_v19 = vsel %vm1092_vm10, %v2506_v12, %v2510_v17  ;;  %v2747_v4 = vrot.slane %v2745_v10, 1 }
  0xf0   : > { %v1822_v7 = vpop.f32.mrf.mxu2  ;;  %v2753_v11 = vshll.u32 %v2511_v19, 16 }
  0xf1   : > { %v11167_v44 = vadd.f32 %v1911_v0, %v1822_v7  ;;  %v2741_v7 = vsel %vm1092_vm10, %v2736_v8, %v2740_v25  ;;  %v2387_v8 = vpack.c.b16 %v2344_v48, %v2344_v48  ;;  %v1137_v25 = vshll.u32 %v10950_v24, 16  ;;  %v9895_v48 = vld [vmem:[#allocation6 + $0x228] sm:$0xff] }
  0xf2   : > { %3180 = vmatmul.bf16.gmra.mxu0 %v2729_v39  ;;  %v2512_v39 = vshrl.u32 %v11156_v22, 16  ;;  %v11186_v12 = vor.u32 %v2747_v4, %v2743_v51  ;;  %v2755_v1 = vrot.slane %v2753_v11, 1 }
  0xf3   : > { %13096 = vst [vmem:[#allocation17_spill] sm:$0xff] %v11167_v44  ;;  %2147 = vmatmul.bf16.gmra.mxu3 %v1128_v34  ;;  %v2751_v34 = vshrl.u32 %v2511_v19, 16  ;;  %v1139_v22 = vrot.slane %v1137_v25, 1  ;;  %4388 = vmatpush.bf16.msra.mxu0 %v9895_v48 }
  0xf4   : > { %v1874_v41 = vpop.f32.mrf.mxu1  ;;  %v2758_v10 = vshll.u32 %v2512_v39, 16  ;;  %v2749_v15 = vsel %vm1092_vm10, %v11186_v12, %v2510_v17 }
  0xf5   : > { %2058 = vmatmul.bf16.gmra.mxu2 %v11127_v38  ;;  %v11179_v42 = vadd.f32 %v1874_v41, %v1785_v45  ;;  %v2517_v45 = vshll.u32 %v10557_v56, 16  ;;  %v2756_v24 = vor.u32 %v2755_v1, %v2751_v34  ;;  %v2235_v56 = vld [vmem:[#allocation2 + $0x50] sm:$0x1] }
  0xf6   : > { %v1914_v16 = vpop.f32.mrf.mxu3  ;;  %v2760_v4 = vrot.slane %v2758_v10, 1  ;;  %v2347_v25 = vunpack.c.l.b16 %v2235_v56  ;;  %v2763_v10 = vshrl.u32 %v11164_v20, 16 }
  0xf7   : > { %3269 = vmatmul.bf16.gmra.mxu1 %v2741_v7  ;;  %v1787_v0 = vpop.f32.mrf.mxu0  ;;  %v2522_v7 = vshll.u32 %v2387_v8, 16 }
  0xf8   : > { %v1825_v54 = vpop.f32.mrf.mxu2  ;;  %v2761_v17 = vsel %vm1092_vm10, %v2756_v24, %v2760_v4  ;;  %v11201_v48 = vpack.c.b16 %v2347_v25, %v2347_v25  ;;  %v1149_v24 = vshll.u32 %v10989_v61, 16 }
  0xf9   : > { %v11182_v38 = vadd.f32 %v1914_v16, %v1825_v54  ;;  %v2519_v54 = vrot.slane %v2517_v45, 1  ;;  %v2524_v11 = vrot.slane %v2522_v7, 1  ;;  %v10176_v45 = vld [vmem:[#allocation2 + $0x48] sm:$0xf0]  ;;  %v2767_v7 = vrot.slane %v2765_v18, 1 }
  0xfa   : > { %v10178_v34 = vor.u32 %v10177_v31, %v10176_v45  ;;  %v2536_v20 = vshll.u32 %v11201_v48, 16  ;;  %v1151_v25 = vrot.slane %v1149_v24, 1  ;;  %v13101_v24 = vunpack.c.l.b16 %v11007_v32  ;;  %v9886_v32 = vld [vmem:[#allocation6 + $0x1e0] sm:$0xff] }
  0xfb   : > { %13097 = vst [vmem:[#allocation18_spill] sm:$0xff] %v11182_v38  ;;  %v2520_v39 = vor.u32 %v2519_v54, %v2515_v59  ;;  %v2526_v54 = vshrl.u32 %v2387_v8, 16  ;;  %v2768_v4 = vor.u32 %v2767_v7, %v2763_v10  ;;  %3993 = vmatpush.bf16.msra.mxu3 %v9886_v32 }
  0xfc   : > { %v1876_v41 = vpop.f32.mrf.mxu1  ;;  %v2529_v31 = vshrl.u32 %v10178_v34, 16 }
  0xfd   : > { %v11188_v16 = vadd.f32 %v1876_v41, %v1787_v0  ;;  %v1140_v0 = vsel %vm1092_vm10, %v1135_v50, %v1139_v22  ;;  %v2769_v10 = vsel %vm1092_vm10, %v2768_v4, %v2524_v11 }
  0xfe   : > { %v1916_v36 = vpop.f32.mrf.mxu3 }
  0xff   : > { %v1790_v19 = vpop.f32.mrf.mxu0 }
 0x100   : > { %v1827_v35 = vpop.f32.mrf.mxu2 }
 0x101   : > { %v11192_v51 = vadd.f32 %v1916_v36, %v1827_v35  ;;  %v2525_v36 = vsel %vm1092_vm10, %v2520_v39, %v2524_v11  ;;  %v910_v39 = vld [vmem:[#allocation2 + $0x3c] sm:$0xf] }
 0x102   : > { %3185 = vmatmul.bf16.gmra.mxu0 %v2749_v15  ;;  %v2773_v22 = vshll.u32 %v2525_v36, 16  ;;  %v2531_v15 = vshll.u32 %v10178_v34, 16  ;;  %v11214_v34 = vld [vmem:[#allocation2 + $0x48] sm:$0xff]  }
 0x103   : > { %13098 = vst [vmem:[#allocation19_spill] sm:$0xff] %v11192_v51  ;;  %2152 = vmatmul.bf16.gmra.mxu3 %v1140_v0  ;;  %v2778_v0 = vshll.u32 %v2526_v54, 16  ;;  %v2538_v54 = vrot.slane %v2536_v20, 1  ;;  %v2785_v51 = vshll.u32 %v11214_v34, 16  ;;  %v9878_v20 = vld [vmem:[#allocation6 + $0x1a0] sm:$0xff] }
 0x104   : > { %v1879_v41 = vpop.f32.mrf.mxu1  ;;  %v2775_v56 = vrot.slane %v2773_v22, 1  ;;  %v2533_v18 = vrot.slane %v2531_v15, 1  ;;  %v1152_v15 = vsel %vm1092_vm10, %v11186_v12, %v1151_v25  ;;  %v2783_v25 = vshrl.u32 %v11214_v34, 16  ;;  %3904 = vmatpush.bf16.msra.mxu2 %v9878_v20 }
 0x105   : > { %2063 = vmatmul.bf16.gmra.mxu2 %v1015_v46  ;;  %v11198_v1 = vadd.f32 %v1879_v41, %v1790_v19  ;;  %v2771_v19 = vshrl.u32 %v2525_v36, 16  ;;  %v990_v41 = vunpack.c.l.b16 %v910_v39  ;;  %v2780_v7 = vrot.slane %v2778_v0, 1 }
 0x106   : > { %v1919_v59 = vpop.f32.mrf.mxu3 }
 0x107   : > { %3274 = vmatmul.bf16.gmra.mxu1 %v2761_v17  ;;  %v1792_v46 = vpop.f32.mrf.mxu0  ;;  %v11209_v17 = vld [vmem:[#allocation2 + $0x54] sm:$0xff]   ;;  %v2776_v36 = vor.u32 %v2775_v56, %v2771_v19  ;;  %v1017_v39 = vpack.c.b16 %v13101_v24, %v990_v41  ;;  %v2787_v41 = vrot.slane %v2785_v51, 1 }
 0x108   : > { %v1830_v50 = vpop.f32.mrf.mxu2 }
 0x109   : > { %v11203_v35 = vadd.f32 %v1919_v59, %v1830_v50  ;;  %v10558_v50 = vld [vmem:[#allocation2 + $0x54] sm:$0xf0]  ;;  %v10559_v59 = vld [vmem:[#allocation2 + $0x54] sm:$0xe]  ;;  %v1156_v12 = vshll.u32 %v1017_v39, 16 }
 0x10a   : > { %v10560_v56 = vor.u32 %v10559_v59, %v10558_v50  ;;  %v1154_v50 = vshrl.u32 %v1017_v39, 16 }
 0x10b   : > { %13099 = vst [vmem:[#allocation20_spill] sm:$0xff] %v11203_v35  ;;  %v1158_v59 = vrot.slane %v1156_v12, 1 }
 0x10c   : > { %v1881_v45 = vpop.f32.mrf.mxu1  ;;  %v2543_v20 = vshrl.u32 %v10560_v56, 16 }
 0x10d   : > { %v11207_v8 = vadd.f32 %v1881_v45, %v1792_v46  ;;  %v2534_v46 = vor.u32 %v2533_v18, %v2529_v31  ;;  %v2238_v45 = vld [vmem:[#allocation2 + $0x5c] sm:$0x1] }
 0x10e   : > { %v1921_v61 = vpop.f32.mrf.mxu3  ;;  %v2350_v19 = vunpack.c.l.b16 %v2238_v45 }
 0x10f   : > { %v1795_v35 = vpop.f32.mrf.mxu0  ;;  %v2539_v4 = vsel %vm1092_vm10, %v2534_v46, %v2538_v54  ;;  %v1161_v46 = vshll.u32 %v11035_v37, 16 }
 0x110   : > { %v1832_v29 = vpop.f32.mrf.mxu2  ;;  %v2791_v24 = vshrl.u32 %v2539_v4, 16 }
 0x111   : > { %v11212_v22 = vadd.f32 %v1921_v61, %v1832_v29  ;;  %v2781_v29 = vsel %vm1092_vm10, %v2776_v36, %v2780_v7  ;;  %v2793_v61 = vshll.u32 %v2539_v4, 16  ;;  %v2540_v36 = vshrl.u32 %v11201_v48, 16 }
 0x112   : > { %3190 = vmatmul.bf16.gmra.mxu0 %v2769_v10  ;;  %v2391_v7 = vpack.c.b16 %v2350_v19, %v2350_v19  ;;  %v1163_v48 = vrot.slane %v1161_v46, 1  ;;  %v9894_v19 = vld [vmem:[#allocation6 + $0x220] sm:$0xff] }
 0x113   : > { %13100 = vst [vmem:[#allocation21_spill] sm:$0xff] %v11212_v22  ;;  %2157 = vmatmul.bf16.gmra.mxu3 %v1152_v15  ;;  %v11231_v15 = vor.u32 %v2787_v41, %v2783_v25  ;;  %v2795_v45 = vrot.slane %v2793_v61, 1  ;;  %v2798_v51 = vshll.u32 %v2540_v36, 16  ;;  %4389 = vmatpush.bf16.msra.mxu0 %v9894_v19 }
 0x114   : > { %v1884_v11 = vpop.f32.mrf.mxu1 }
 0x115   : > { %2068 = vmatmul.bf16.gmra.mxu2 %v11169_v55  ;;  %v11224_v0 = vadd.f32 %v1884_v11, %v1795_v35  ;;  %v2545_v35 = vshll.u32 %v10560_v56, 16  ;;  %v2789_v12 = vsel %vm1092_vm10, %v11231_v15, %v2538_v54  ;;  %v2796_v37 = vor.u32 %v2795_v45, %v2791_v24  ;;  %v2241_v56 = vld [vmem:[#allocation2 + $0x68] sm:$0x1] }
 0x116   : > { %v1924_v18 = vpop.f32.mrf.mxu3  ;;  %v2800_v41 = vrot.slane %v2798_v51, 1  ;;  %v2353_v46 = vunpack.c.l.b16 %v2241_v56  ;;  %v2803_v51 = vshrl.u32 %v11209_v17, 16 }
 0x117   : > { %3279 = vmatmul.bf16.gmra.mxu1 %v2781_v29  ;;  %v1797_v10 = vpop.f32.mrf.mxu0  ;;  %v2550_v29 = vshll.u32 %v2391_v7, 16 }
 0x118   : > { %v1835_v31 = vpop.f32.mrf.mxu2  ;;  %v2801_v54 = vsel %vm1092_vm10, %v2796_v37, %v2800_v41  ;;  %v11246_v19 = vpack.c.b16 %v2353_v46, %v2353_v46  ;;  %v1173_v37 = vshll.u32 %v11081_v26, 16 }
 0x119   : > { %v11227_v55 = vadd.f32 %v1924_v18, %v1835_v31  ;;  %v2547_v31 = vrot.slane %v2545_v35, 1  ;;  %v2552_v61 = vrot.slane %v2550_v29, 1  ;;  %v10179_v35 = vld [vmem:[#allocation2 + $0x60] sm:$0xf0] }
 0x11a   : > { %v1175_v46 = vrot.slane %v1173_v37, 1  ;;  %v13106_v37 = vunpack.c.l.b16 %v11104_v30  ;;  %v9885_v30 = vld [vmem:[#allocation6 + $0x1d8] sm:$0xff] }
 0x11b   : > { %13102 = vst [vmem:[#allocation22_spill] sm:$0xff] %v11227_v55  ;;  %v1159_v55 = vor.u32 %v1158_v59, %v1154_v50  ;;  %v2548_v36 = vor.u32 %v2547_v31, %v2543_v20  ;;  %v10180_v50 = vld [vmem:[#allocation2 + $0x60] sm:$0xe]  ;;  %v2805_v59 = vshll.u32 %v11209_v17, 16  ;;  %v2554_v31 = vshrl.u32 %v2391_v7, 16  ;;  %3994 = vmatpush.bf16.msra.mxu3 %v9885_v30 }
 0x11c   : > { %v1886_v11 = vpop.f32.mrf.mxu1  ;;  %v10181_v24 = vor.u32 %v10180_v50, %v10179_v35  ;;  %v2564_v17 = vshll.u32 %v11246_v19, 16 }
 0x11d   : > { %v11233_v18 = vadd.f32 %v1886_v11, %v1797_v10  ;;  %v1164_v10 = vsel %vm1092_vm10, %v1159_v55, %v1163_v48  ;;  %v2807_v29 = vrot.slane %v2805_v59, 1 }
 0x11e   : > { %v1926_v22 = vpop.f32.mrf.mxu3  ;;  %v2557_v50 = vshrl.u32 %v10181_v24, 16 }
 0x11f   : > { %v1800_v4 = vpop.f32.mrf.mxu0  ;;  %v2808_v41 = vor.u32 %v2807_v29, %v2803_v51 }
 0x120   : > { %v1837_v32 = vpop.f32.mrf.mxu2 }
 0x121   : > { %v11237_v25 = vadd.f32 %v1926_v22, %v1837_v32  ;;  %v2553_v22 = vsel %vm1092_vm10, %v2548_v36, %v2552_v61  ;;  %v914_v36 = vld [vmem:[#allocation2 + $0x54] sm:$0xf]  ;;  %v2809_v51 = vsel %vm1092_vm10, %v2808_v41, %v2552_v61 }
 0x122   : > { %3195 = vmatmul.bf16.gmra.mxu0 %v2789_v12  ;;  %v2813_v48 = vshll.u32 %v2553_v22, 16  ;;  %v2559_v12 = vshll.u32 %v10181_v24, 16  ;;  %v11259_v24 = vld [vmem:[#allocation2 + $0x60] sm:$0xff]  }
 0x123   : > { %13103 = vst [vmem:[#allocation23_spill] sm:$0xff] %v11237_v25  ;;  %2162 = vmatmul.bf16.gmra.mxu3 %v1164_v10  ;;  %v2818_v10 = vshll.u32 %v2554_v31, 16  ;;  %v2566_v31 = vrot.slane %v2564_v17, 1  ;;  %v2825_v38 = vshll.u32 %v11259_v24, 16  ;;  %v9877_v17 = vld [vmem:[#allocation6 + $0x198] sm:$0xff] }
 0x124   : > { %v1889_v11 = vpop.f32.mrf.mxu1  ;;  %v2815_v56 = vrot.slane %v2813_v48, 1  ;;  %v2561_v59 = vrot.slane %v2559_v12, 1  ;;  %v1176_v12 = vsel %vm1092_vm10, %v11231_v15, %v1175_v46  ;;  %v2823_v46 = vshrl.u32 %v11259_v24, 16  ;;  %3905 = vmatpush.bf16.msra.mxu2 %v9877_v17 }
 0x125   : > { %2073 = vmatmul.bf16.gmra.mxu2 %v1017_v39  ;;  %v11243_v45 = vadd.f32 %v1889_v11, %v1800_v4  ;;  %v2811_v4 = vshrl.u32 %v2553_v22, 16  ;;  %v994_v11 = vunpack.c.l.b16 %v914_v36  ;;  %v2820_v29 = vrot.slane %v2818_v10, 1 }
 0x126   : > { %v1929_v20 = vpop.f32.mrf.mxu3 }
 0x127   : > { %3284 = vmatmul.bf16.gmra.mxu1 %v2801_v54  ;;  %v1802_v39 = vpop.f32.mrf.mxu0  ;;  %v11254_v54 = vld [vmem:[#allocation2 + $0x6c] sm:$0xff]   ;;  %v2816_v22 = vor.u32 %v2815_v56, %v2811_v4  ;;  %v1019_v36 = vpack.c.b16 %v13106_v37, %v994_v11  ;;  %v2827_v11 = vrot.slane %v2825_v38, 1 }
 0x128   : > { %v1840_v55 = vpop.f32.mrf.mxu2 }
 0x129   : > { %v11248_v32 = vadd.f32 %v1929_v20, %v1840_v55  ;;  %v10561_v55 = vld [vmem:[#allocation2 + $0x6c] sm:$0xf0]  ;;  %v10562_v20 = vld [vmem:[#allocation2 + $0x6c] sm:$0xe]  ;;  %v1180_v15 = vshll.u32 %v1019_v36, 16 }
 0x12a   : > { %v10563_v56 = vor.u32 %v10562_v20, %v10561_v55  ;;  %v1178_v55 = vshrl.u32 %v1019_v36, 16 }
 0x12b   : > { %13104 = vst [vmem:[#allocation24_spill] sm:$0xff] %v11248_v32  ;;  %v1182_v20 = vrot.slane %v1180_v15, 1 }
 0x12c   : > { %v1891_v35 = vpop.f32.mrf.mxu1  ;;  %v2571_v17 = vshrl.u32 %v10563_v56, 16 }
 0x12d   : > { %v11252_v7 = vadd.f32 %v1891_v35, %v1802_v39  ;;  %v2562_v39 = vor.u32 %v2561_v59, %v2557_v50  ;;  %v2244_v35 = vld [vmem:[#allocation2 + $0x74] sm:$0x1] }
 0x12e   : > { %v1931_v26 = vpop.f32.mrf.mxu3  ;;  %v2356_v4 = vunpack.c.l.b16 %v2244_v35 }
 0x12f   : > { %v1805_v25 = vpop.f32.mrf.mxu0  ;;  %v2567_v41 = vsel %vm1092_vm10, %v2562_v39, %v2566_v31  ;;  %v1185_v39 = vshll.u32 %v11109_v13, 16 }
 0x130   : > { %v1842_v32 = vpop.f32.mrf.mxu2  ;;  %v2831_v37 = vshrl.u32 %v2567_v41, 16 }
 0x131   : > { %v11257_v48 = vadd.f32 %v1931_v26, %v1842_v32  ;;  %v2821_v32 = vsel %vm1092_vm10, %v2816_v22, %v2820_v29  ;;  %v2833_v26 = vshll.u32 %v2567_v41, 16  ;;  %v2568_v22 = vshrl.u32 %v11246_v19, 16 }
 0x132   : > { %3200 = vmatmul.bf16.gmra.mxu0 %v2809_v51  ;;  %v2395_v29 = vpack.c.b16 %v2356_v4, %v2356_v4  ;;  %v1187_v19 = vrot.slane %v1185_v39, 1  ;;  %v9893_v4 = vld [vmem:[#allocation6 + $0x218] sm:$0xff] }
 0x133   : > { %13105 = vst [vmem:[#allocation25_spill] sm:$0xff] %v11257_v48  ;;  %2167 = vmatmul.bf16.gmra.mxu3 %v1176_v12  ;;  %v11276_v12 = vor.u32 %v2827_v11, %v2823_v46  ;;  %v2835_v35 = vrot.slane %v2833_v26, 1  ;;  %v2838_v38 = vshll.u32 %v2568_v22, 16  ;;  %4390 = vmatpush.bf16.msra.mxu0 %v9893_v4 }
 0x134   : > { %v1894_v61 = vpop.f32.mrf.mxu1 }
 0x135   : > { %2078 = vmatmul.bf16.gmra.mxu2 %v11214_v34  ;;  %v11269_v10 = vadd.f32 %v1894_v61, %v1805_v25  ;;  %v2573_v25 = vshll.u32 %v10563_v56, 16  ;;  %v2829_v15 = vsel %vm1092_vm10, %v11276_v12, %v2566_v31  ;;  %v2836_v13 = vor.u32 %v2835_v35, %v2831_v37  ;;  %v2247_v56 = vld [vmem:[#allocation2 + $0x80] sm:$0x1] }
 0x136   : > { %v1934_v59 = vpop.f32.mrf.mxu3  ;;  %v2840_v11 = vrot.slane %v2838_v38, 1  ;;  %v2359_v39 = vunpack.c.l.b16 %v2247_v56  ;;  %v2843_v38 = vshrl.u32 %v11254_v54, 16 }
 0x137   : > { %3289 = vmatmul.bf16.gmra.mxu1 %v2821_v32  ;;  %v1807_v51 = vpop.f32.mrf.mxu0  ;;  %v2578_v32 = vshll.u32 %v2395_v29, 16  ;;  %4391 = vmatpush.bf16.msra.mxu0 %v9892_v47 }
 0x138   : > { %v1845_v50 = vpop.f32.mrf.mxu2  ;;  %v2841_v31 = vsel %vm1092_vm10, %v2836_v13, %v2840_v11  ;;  %v11291_v4 = vpack.c.b16 %v2359_v39, %v2359_v39  ;;  %v1197_v13 = vshll.u32 %v10829_v53, 16 }
 0x139   : > { %v11272_v34 = vadd.f32 %v1934_v59, %v1845_v50  ;;  %v2575_v50 = vrot.slane %v2573_v25, 1  ;;  %v2580_v26 = vrot.slane %v2578_v32, 1  ;;  %v10182_v25 = vld [vmem:[#allocation2 + $0x78] sm:$0xf0] }
 0x13a   : > { %v1199_v39 = vrot.slane %v1197_v13, 1  ;;  %v13111_v13 = vunpack.c.l.b16 %v10827_v49  ;;  %v9876_v49 = vld [vmem:[#allocation6 + $0x190] sm:$0xff] }
 0x13b   : > { %13107 = vst [vmem:[#allocation26_spill] sm:$0xff] %v11272_v34  ;;  %v1183_v34 = vor.u32 %v1182_v20, %v1178_v55  ;;  %v2576_v22 = vor.u32 %v2575_v50, %v2571_v17  ;;  %v10183_v55 = vld [vmem:[#allocation2 + $0x78] sm:$0xe]  ;;  %v2845_v20 = vshll.u32 %v11254_v54, 16  ;;  %v2582_v50 = vshrl.u32 %v2395_v29, 16  ;;  %3906 = vmatpush.bf16.msra.mxu2 %v9876_v49 }
 0x13c   : > { %v1896_v61 = vpop.f32.mrf.mxu1  ;;  %v10184_v37 = vor.u32 %v10183_v55, %v10182_v25  ;;  %v2592_v54 = vshll.u32 %v11291_v4, 16 }
 0x13d   : > { %v11278_v59 = vadd.f32 %v1896_v61, %v1807_v51  ;;  %v1188_v51 = vsel %vm1092_vm10, %v1183_v34, %v1187_v19  ;;  %v2847_v32 = vrot.slane %v2845_v20, 1 }
 0x13e   : > { %v1936_v48 = vpop.f32.mrf.mxu3  ;;  %v2585_v55 = vshrl.u32 %v10184_v37, 16 }
 0x13f   : > { %v1810_v41 = vpop.f32.mrf.mxu0  ;;  %v2848_v11 = vor.u32 %v2847_v32, %v2843_v38 }
 0x140   : > { %v1847_v30 = vpop.f32.mrf.mxu2 }
 0x141   : > { %v11282_v46 = vadd.f32 %v1936_v48, %v1847_v30  ;;  %v2581_v48 = vsel %vm1092_vm10, %v2576_v22, %v2580_v26  ;;  %v918_v22 = vld [vmem:[#allocation2 + $0x6c] sm:$0xf]  ;;  %v2849_v38 = vsel %vm1092_vm10, %v2848_v11, %v2580_v26 }
 0x142   : > { %3205 = vmatmul.bf16.gmra.mxu0 %v2829_v15  ;;  %v2853_v19 = vshll.u32 %v2581_v48, 16  ;;  %v2587_v15 = vshll.u32 %v10184_v37, 16  ;;  %v11304_v37 = vld [vmem:[#allocation2 + $0x78] sm:$0xff]  }
 0x143   : > { %13108 = vst [vmem:[#allocation27_spill] sm:$0xff] %v11282_v46  ;;  %2172 = vmatmul.bf16.gmra.mxu3 %v1188_v51  ;;  %v2858_v51 = vshll.u32 %v2582_v50, 16  ;;  %v2594_v50 = vrot.slane %v2592_v54, 1  ;;  %v2865_v26 = vshll.u32 %v11304_v37, 16 }
 0x144   : > { %v1899_v61 = vpop.f32.mrf.mxu1  ;;  %v2855_v56 = vrot.slane %v2853_v19, 1  ;;  %v2589_v20 = vrot.slane %v2587_v15, 1  ;;  %v1200_v15 = vsel %vm1092_vm10, %v11276_v12, %v1199_v39 }
 0x145   : > { %2083 = vmatmul.bf16.gmra.mxu2 %v1019_v36  ;;  %v11288_v35 = vadd.f32 %v1899_v61, %v1810_v41  ;;  %v2851_v41 = vshrl.u32 %v2581_v48, 16  ;;  %v998_v61 = vunpack.c.l.b16 %v918_v22  ;;  %v2860_v32 = vrot.slane %v2858_v51, 1 }
 0x146   : > { %v1939_v17 = vpop.f32.mrf.mxu3 }
 0x147   : > { %3294 = vmatmul.bf16.gmra.mxu1 %v2841_v31  ;;  %v1812_v36 = vpop.f32.mrf.mxu0  ;;  %v11299_v31 = vld [vmem:[#allocation2 + $0x84] sm:$0xff]   ;;  %v2856_v48 = vor.u32 %v2855_v56, %v2851_v41  ;;  %v11310_v22 = vpack.c.b16 %v13111_v13, %v998_v61  ;;  %v1209_v13 = vshll.u32 %v10872_v60, 16 }
 0x148   : > { %v1850_v34 = vpop.f32.mrf.mxu2 }
 0x149   : > { %v11293_v30 = vadd.f32 %v1939_v17, %v1850_v34  ;;  %v10564_v34 = vld [vmem:[#allocation2 + $0x84] sm:$0xf0]  ;;  %v10565_v17 = vld [vmem:[#allocation2 + $0x84] sm:$0xe]  ;;  %v1204_v12 = vshll.u32 %v11310_v22, 16  ;;  %v1211_v44 = vrot.slane %v1209_v13, 1 }
 0x14a   : > { %v10566_v51 = vor.u32 %v10565_v17, %v10564_v34  ;;  %v1202_v17 = vshrl.u32 %v11310_v22, 16 }
 0x14b   : > { %13109 = vst [vmem:[#allocation28_spill] sm:$0xff] %v11293_v30 }
 0x14c   : > { %v1901_v25 = vpop.f32.mrf.mxu1 }
 0x14d   : > { %v11297_v29 = vadd.f32 %v1901_v25, %v1812_v36  ;;  %v2590_v36 = vor.u32 %v2589_v20, %v2585_v55  ;;  %v2250_v25 = vld [vmem:[#allocation2 + $0x8c] sm:$0x1]  ;;  %v9937_v20 = vld [vmem:[#allocation8 + $0xb8] sm:$0xff] }
 0x14e   : > { %v1941_v53 = vpop.f32.mrf.mxu3  ;;  %v2362_v56 = vunpack.c.l.b16 %v2250_v25  ;;  %v9884_v55 = vld [vmem:[#allocation6 + $0x1d0] sm:$0xff]  ;;  %5934 = vmatpush.bf16.msra.mxu1 %v9937_v20 }
 0x14f   : > { %v3171_v46 = vpop.f32.mrf.mxu0  ;;  %v2595_v41 = vsel %vm1092_vm10, %v2590_v36, %v2594_v50  ;;  %3995 = vmatpush.bf16.msra.mxu3 %v9884_v55  ;;  %v1206_v36 = vrot.slane %v1204_v12, 1 }
 0x150   : > { %v1852_v30 = vpop.f32.mrf.mxu2  ;;  %v11320_v34 = vpack.c.b16 %v2362_v56, %v2362_v56 }
 0x151   : > { %v11302_v19 = vadd.f32 %v1941_v53, %v1852_v30  ;;  %v2861_v30 = vsel %vm1092_vm10, %v2856_v48, %v2860_v32  ;;  %v2863_v53 = vshrl.u32 %v11304_v37, 16 }
 0x152   : > { %3210 = vmatmul.bf16.gmra.mxu0 %v2849_v38  ;;  %v2867_v38 = vrot.slane %v2865_v26, 1  ;;  %v2871_v26 = vshrl.u32 %v2595_v41, 16  ;;  %v2606_v56 = vshll.u32 %v11320_v34, 16 }
 0x153   : > { %13110 = vst [vmem:[#allocation29_spill] sm:$0xff] %v11302_v19  ;;  %2177 = vmatmul.bf16.gmra.mxu3 %v1200_v15  ;;  %v2873_v15 = vshll.u32 %v2595_v41, 16  ;;  %v1207_v19 = vor.u32 %v1206_v36, %v1202_v17  ;;  %v2885_v17 = vshll.u32 %v11299_v31, 16 }
 0x154   : > { %v3260_v11 = vpop.f32.mrf.mxu1 }
 0x155   : > { %2088 = vmatmul.bf16.gmra.mxu2 %v11259_v24  ;;  %v3261_v54 = vadd.f32 %v3260_v11, %v3171_v46  ;;  %v2596_v24 = vshrl.u32 %v11291_v4, 16  ;;  %v2601_v46 = vshll.u32 %v10566_v51, 16  ;;  %v11324_v11 = vor.u32 %v2867_v38, %v2863_v53 }
 0x156   : > { %v2138_v61 = vpop.f32.mrf.mxu3  ;;  %v2875_v4 = vrot.slane %v2873_v15, 1  ;;  %v2608_v38 = vrot.slane %v2606_v56, 1  ;;  %v2253_v15 = vld [vmem:[#allocation2 + $0x98] sm:$0x1] }
 0x157   : > { %3299 = vmatmul.bf16.gmra.mxu1 %v2861_v30  ;;  %v3173_v32 = vpop.f32.mrf.mxu0  ;;  %v2878_v30 = vshll.u32 %v2596_v24, 16  ;;  %v2603_v55 = vrot.slane %v2601_v46, 1  ;;  %v2365_v47 = vunpack.c.l.b16 %v2253_v15 }
 0x158   : > { %v2049_v39 = vpop.f32.mrf.mxu2  ;;  %v2876_v60 = vor.u32 %v2875_v4, %v2871_v26 }
 0x159   : > { %v2050_v48 = vadd.f32 %v2049_v39, %v11132_v27  ;;  %v2599_v39 = vshrl.u32 %v10566_v51, 16  ;;  %v1212_v51 = vsel %vm1092_vm10, %v1207_v19, %v1211_v44  ;;  %v2883_v44 = vshrl.u32 %v11299_v31, 16 }
 0x15a   : > { %v2887_v19 = vrot.slane %v2885_v17, 1  ;;  %v11341_v56 = vpack.c.b16 %v2365_v47, %v2365_v47  ;;  %v10567_v17 = vld [vmem:[#allocation2 + $0x9c] sm:$0xf0] }
 0x15b   : > { %v2139_v25 = vadd.f32 %v2138_v61, %v2050_v48  ;;  %v2880_v61 = vrot.slane %v2878_v30, 1  ;;  %v2604_v24 = vor.u32 %v2603_v55, %v2599_v39  ;;  %v10185_v48 = vld [vmem:[#allocation2 + $0x90] sm:$0xf0]  ;;  %v2610_v30 = vshrl.u32 %v11320_v34, 16 }
 0x15c   : > { %v3262_v27 = vpop.f32.mrf.mxu1 }
 0x15d   : > { %v11326_v49 = vadd.f32 %v3261_v54, %v2139_v25  ;;  %v3263_v20 = vadd.f32 %v3262_v27, %v3173_v32  ;;  %v2869_v54 = vsel %vm1092_vm10, %v11324_v11, %v2594_v50  ;;  %v10186_v32 = vld [vmem:[#allocation2 + $0x90] sm:$0xe]  ;;  %v2881_v36 = vsel %vm1092_vm10, %v2876_v60, %v2880_v61  ;;  %v922_v61 = vld [vmem:[#allocation2 + $0x84] sm:$0xf] }
 0x15e   : > { %v2140_v63 = vpop.f32.mrf.mxu3  ;;  %v2609_v50 = vsel %vm1092_vm10, %v2604_v24, %v2608_v38  ;;  %v10187_v25 = vor.u32 %v10186_v32, %v10185_v48  ;;  %v2888_v60 = vor.u32 %v2887_v19, %v2883_v44 }
 0x15f   : > { %v3176_v53 = vpop.f32.mrf.mxu0  ;;  %v2893_v27 = vshll.u32 %v2609_v50, 16 }
 0x160   : > { %v2051_v12 = vpop.f32.mrf.mxu2  ;;  %v2613_v15 = vshrl.u32 %v10187_v25, 16 }
 0x161   : > { %v2052_v41 = vadd.f32 %v2051_v12, %v11141_v52  ;;  %v2895_v31 = vrot.slane %v2893_v27, 1  ;;  %v13112_v27 = vunpack.c.l.b16 %v10924_v33 }
 0x162   : > { %3215 = vmatmul.bf16.gmra.mxu0 %v2869_v54  ;;  %v2620_v54 = vshll.u32 %v11341_v56, 16 }
 0x163   : > { %v2141_v46 = vadd.f32 %v2140_v63, %v2052_v41  ;;  %2182 = vmatmul.bf16.gmra.mxu3 %v1212_v51  ;;  %v2891_v41 = vshrl.u32 %v2609_v50, 16 }
 0x164   : > { %v3265_v52 = vpop.f32.mrf.mxu1  ;;  %v11351_v19 = vrot.slane %v2620_v54, 1  ;;  %v9936_v54 = vld [vmem:[#allocation8 + $0xb0] sm:$0xff] }
 0x165   : > { %v11335_v13 = vadd.f32 %v3263_v20, %v2141_v46  ;;  %2093 = vmatmul.bf16.gmra.mxu2 %v11310_v22  ;;  %v3266_v26 = vadd.f32 %v3265_v52, %v3176_v53  ;;  %v2615_v22 = vshll.u32 %v10187_v25, 16  ;;  %v1221_v20 = vshll.u32 %v10908_v9, 16  ;;  %v11348_v46 = vld [vmem:[#allocation2 + $0x9c] sm:$0xff]   ;;  %v11354_v25 = vld [vmem:[#allocation2 + $0x90] sm:$0xff]   ;;  %5935 = vmatpush.bf16.msra.mxu1 %v9936_v54 }
 0x166   : > { %v2143_v4 = vpop.f32.mrf.mxu3  ;;  %v2898_v53 = vshll.u32 %v2610_v30, 16  ;;  %v10568_v9 = vld [vmem:[#allocation2 + $0x9c] sm:$0xe]  ;;  %v2889_v52 = vsel %vm1092_vm10, %v2888_v60, %v2608_v38  ;;  %v2896_v50 = vor.u32 %v2895_v31, %v2891_v41  ;;  %v9875_v31 = vld [vmem:[#allocation6 + $0x188] sm:$0xff] }
 0x167   : > { %3304 = vmatmul.bf16.gmra.mxu1 %v2881_v36  ;;  %v3178_v55 = vpop.f32.mrf.mxu0  ;;  %v2617_v51 = vrot.slane %v2615_v22, 1  ;;  %v1223_v32 = vrot.slane %v1221_v20, 1  ;;  %v2905_v20 = vshll.u32 %v11354_v25, 16  ;;  %v10569_v33 = vor.u32 %v10568_v9, %v10567_v17  ;;  %3907 = vmatpush.bf16.msra.mxu2 %v9875_v31 }
 0x168   : > { %v2054_v63 = vpop.f32.mrf.mxu2  ;;  %v2900_v44 = vrot.slane %v2898_v53, 1  ;;  %v9883_v53 = vld [vmem:[#allocation6 + $0x1c8] sm:$0xff] }
 0x169   : > { %v2055_v39 = vadd.f32 %v2054_v63, %v11153_v21  ;;  %v1002_v21 = vunpack.c.l.b16 %v922_v61  ;;  %v1224_v30 = vsel %vm1092_vm10, %v11324_v11, %v1223_v32  ;;  %3996 = vmatpush.bf16.msra.mxu3 %v9883_v53  ;;  %v2629_v9 = vshll.u32 %v10569_v33, 16 }
 0x16a   : > { %v2901_v38 = vsel %vm1092_vm10, %v2896_v50, %v2900_v44  ;;  %v1233_v50 = vshll.u32 %v10955_v28, 16 }
 0x16b   : > { %v2144_v12 = vadd.f32 %v2143_v4, %v2055_v39  ;;  %v2618_v4 = vor.u32 %v2617_v51, %v2613_v15  ;;  %v11360_v39 = vpack.c.b16 %v13112_v27, %v1002_v21  ;;  %v2903_v51 = vshrl.u32 %v11354_v25, 16 }
 0x16c   : > { %v3267_v34 = vpop.f32.mrf.mxu1 }
 0x16d   : > { %v11346_v24 = vadd.f32 %v3266_v26, %v2144_v12  ;;  %v3268_v48 = vadd.f32 %v3267_v34, %v3178_v55  ;;  %v2256_v55 = vld [vmem:[#allocation2 + $0xa4] sm:$0x1]  ;;  %v2623_v11 = vsel %vm1092_vm10, %v2618_v4, %v11351_v19  ;;  %v1228_v41 = vshll.u32 %v11360_v39, 16 }
 0x16e   : > { %v2145_v47 = vpop.f32.mrf.mxu3  ;;  %v2368_v60 = vunpack.c.l.b16 %v2256_v55  ;;  %v2913_v32 = vshll.u32 %v2623_v11, 16  ;;  %v2627_v55 = vshrl.u32 %v10569_v33, 16  ;;  %v2259_v33 = vld [vmem:[#allocation2 + $0xb0] sm:$0x1] }
 0x16f   : > { %v3181_v63 = vpop.f32.mrf.mxu0 }
 0x170   : > { %v2056_v36 = vpop.f32.mrf.mxu2  ;;  %v11373_v17 = vpack.c.b16 %v2368_v60, %v2368_v60  ;;  %v9891_v60 = vld [vmem:[#allocation6 + $0x208] sm:$0xff] }
 0x171   : > { %v2057_v26 = vadd.f32 %v2056_v36, %v11162_v2  ;;  %4392 = vmatpush.bf16.msra.mxu0 %v9891_v60  ;;  %v1245_v60 = vshll.u32 %v10991_v62, 16  ;;  %v10570_v62 = vld [vmem:[#allocation2 + $0xb4] sm:$0xf0] }
 0x172   : > { %3220 = vmatmul.bf16.gmra.mxu0 %v2889_v52  ;;  %v1230_v52 = vrot.slane %v1228_v41, 1  ;;  %v2634_v27 = vshll.u32 %v11373_v17, 16 }
 0x173   : > { %v2146_v22 = vadd.f32 %v2145_v47, %v2057_v26  ;;  %2187 = vmatmul.bf16.gmra.mxu3 %v1224_v30  ;;  %v1226_v47 = vshrl.u32 %v11360_v39, 16 }
 0x174   : > { %v3270_v2 = vpop.f32.mrf.mxu1 }
 0x175   : > { %v11364_v12 = vadd.f32 %v3268_v48, %v2146_v22  ;;  %2098 = vmatmul.bf16.gmra.mxu2 %v11304_v37  ;;  %v3271_v61 = vadd.f32 %v3270_v2, %v3181_v63  ;;  %v2907_v48 = vrot.slane %v2905_v20, 1  ;;  %v2624_v37 = vshrl.u32 %v11341_v56, 16 }
 0x176   : > { %v2148_v15 = vpop.f32.mrf.mxu3  ;;  %v2911_v63 = vshrl.u32 %v2623_v11, 16  ;;  %v2915_v56 = vrot.slane %v2913_v32, 1  ;;  %v2631_v22 = vrot.slane %v2629_v9, 1  ;;  %v1231_v20 = vor.u32 %v1230_v52, %v1226_v47 }
 0x177   : > { %3309 = vmatmul.bf16.gmra.mxu1 %v2901_v38  ;;  %v3183_v36 = vpop.f32.mrf.mxu0  ;;  %v11377_v26 = vor.u32 %v2907_v48, %v2903_v51  ;;  %v2918_v4 = vshll.u32 %v2624_v37, 16  ;;  %v1235_v2 = vrot.slane %v1233_v50, 1  ;;  %v10188_v48 = vld [vmem:[#allocation2 + $0xa8] sm:$0xf0]  ;;  %v10189_v37 = vld [vmem:[#allocation2 + $0xa8] sm:$0xe]  ;;  %v2371_v9 = vunpack.c.l.b16 %v2259_v33 }
 0x178   : > { %v2059_v34 = vpop.f32.mrf.mxu2  ;;  %v2916_v28 = vor.u32 %v2915_v56, %v2911_v63  ;;  %v10190_v52 = vor.u32 %v10189_v37, %v10188_v48  ;;  %v393_v50 = vld [vmem:[#allocation2 + $0xc8] sm:$0x1]  ;;  %v2923_v63 = vshrl.u32 %v11348_v46, 16  ;;  %v1247_v48 = vrot.slane %v1245_v60, 1 }
 0x179   : > { %v2060_v21 = vadd.f32 %v2059_v34, %v11179_v42  ;;  %v2920_v53 = vrot.slane %v2918_v4, 1  ;;  %v2636_v34 = vrot.slane %v2634_v27, 1  ;;  %v1236_v51 = vsel %vm1092_vm10, %v1231_v20, %v1235_v2 }
 0x17a   : > { %v394_v4 = vsel %vm10757_vm4, 0, %v393_v50  ;;  %v2643_v2 = vshll.u32 %v10190_v52, 16  ;;  %v2641_v33 = vshrl.u32 %v10190_v52, 16 }
 0x17b   : > { %v2149_v44 = vadd.f32 %v2148_v15, %v2060_v21  ;;  %v2632_v15 = vor.u32 %v2631_v22, %v2627_v55  ;;  %v2925_v21 = vshll.u32 %v11348_v46, 16  ;;  %v2638_v55 = vshrl.u32 %v11373_v17, 16  ;;  %395 = vst [vmem:[#allocation2 + $0xc8] sm:$0x1] %v394_v4  ;;  %v11413_v4 = vld [vmem:[#allocation2 + $0xa8] sm:$0xff]  }
 0x17c   : > { %v3272_v42 = vpop.f32.mrf.mxu1  ;;  %v704_v46 = vrot.slane %v11079_v43, 4  ;;  %v10571_v43 = vld [vmem:[#allocation2 + $0xb4] sm:$0xe] }
 0x17d   : > { %v11379_v30 = vadd.f32 %v3271_v61, %v2149_v44  ;;  %v3273_v38 = vadd.f32 %v3272_v42, %v3183_v36  ;;  %v2909_v61 = vsel %vm1092_vm10, %v11377_v26, %v11351_v19  ;;  %v2921_v36 = vsel %vm1092_vm10, %v2916_v28, %v2920_v53  ;;  %v926_v28 = vld [vmem:[#allocation2 + $0x9c] sm:$0xf] }
 0x17e   : > { %v2150_v31 = vpop.f32.mrf.mxu3  ;;  %v2637_v19 = vsel %vm1092_vm10, %v2632_v15, %v2636_v34  ;;  %v2927_v56 = vrot.slane %v2925_v21, 1  ;;  %v1006_v37 = vunpack.c.l.b16 %v926_v28  ;;  %v9874_v28 = vld [vmem:[#allocation6 + $0x180] sm:$0xff] }
 0x17f   : > { %v3186_v54 = vpop.f32.mrf.mxu0  ;;  %v2933_v22 = vshll.u32 %v2637_v19, 16  ;;  %v2931_v53 = vshrl.u32 %v2637_v19, 16  ;;  %3908 = vmatpush.bf16.msra.mxu2 %v9874_v28 }
 0x180   : > { %v2061_v41 = vpop.f32.mrf.mxu2 }
 0x181   : > { %v2062_v11 = vadd.f32 %v2061_v41, %v11188_v16 }
 0x182   : > { %3225 = vmatmul.bf16.gmra.mxu0 %v2909_v61 }
 0x183   : > { %v2151_v32 = vadd.f32 %v2150_v31, %v2062_v11  ;;  %2192 = vmatmul.bf16.gmra.mxu3 %v1236_v51  ;;  %v2928_v31 = vor.u32 %v2927_v56, %v2923_v63  ;;  %v2935_v11 = vrot.slane %v2933_v22, 1  ;;  %v2645_v51 = vrot.slane %v2643_v2, 1  ;;  %v2262_v22 = vld [vmem:[#allocation2 + $0xbc] sm:$0x1] }
 0x184   : > { %v3275_v47 = vpop.f32.mrf.mxu1  ;;  %v2945_v2 = vshll.u32 %v11413_v4, 16 }
 0x185   : > { %v11389_v16 = vadd.f32 %v3273_v38, %v2151_v32  ;;  %2103 = vmatmul.bf16.gmra.mxu2 %v11360_v39  ;;  %v3276_v44 = vadd.f32 %v3275_v47, %v3186_v54  ;;  %v11397_v38 = vpack.c.b16 %v2371_v9, %v2371_v9  ;;  %v2938_v54 = vshll.u32 %v2638_v55, 16  ;;  %v11405_v32 = vld [vmem:[#allocation2 + $0xb4] sm:$0xff]  }
 0x186   : > { %v2153_v27 = vpop.f32.mrf.mxu3  ;;  %v2929_v21 = vsel %vm1092_vm10, %v2928_v31, %v2636_v34  ;;  %v2936_v19 = vor.u32 %v2935_v11, %v2931_v53  ;;  %v1248_v34 = vsel %vm1092_vm10, %v11377_v26, %v1247_v48  ;;  %v9882_v53 = vld [vmem:[#allocation6 + $0x1c0] sm:$0xff]  ;;  %v9935_v11 = vld [vmem:[#allocation8 + $0xa8] sm:$0xff] }
 0x187   : > { %3314 = vmatmul.bf16.gmra.mxu1 %v2921_v36  ;;  %v3188_v20 = vpop.f32.mrf.mxu0  ;;  %v2648_v17 = vshll.u32 %v11397_v38, 16  ;;  %v865_v36 = vld [vmem:[#allocation2 + $0xc8] sm:$0x1]  ;;  %v2940_v50 = vrot.slane %v2938_v54, 1  ;;  %3997 = vmatpush.bf16.msra.mxu3 %v9882_v53  ;;  %v10191_v53 = vld [vmem:[#allocation2 + $0xc0] sm:$0xf0] }
 0x188   : > { %v2064_v42 = vpop.f32.mrf.mxu2  ;;  %v866_v52 = vsel %vm10752_vm3, %v704_v46, %v865_v36  ;;  %v2374_v46 = vunpack.c.l.b16 %v2262_v22  ;;  %5936 = vmatpush.bf16.msra.mxu1 %v9935_v11  ;;  %v1257_v36 = vshll.u32 %v11042_v57, 16  ;;  %v9890_v22 = vld [vmem:[#allocation6 + $0x200] sm:$0xff]  ;;  %v10192_v11 = vld [vmem:[#allocation2 + $0xc0] sm:$0xe] }
 0x189   : > { %v2065_v39 = vadd.f32 %v2064_v42, %v11198_v1  ;;  %v11408_v63 = vrot.slane %v2648_v17, 1  ;;  %v2646_v42 = vor.u32 %v2645_v51, %v2641_v33  ;;  %867 = vst [vmem:[#allocation2 + $0xc8] sm:$0x1] %v866_v52  ;;  %v2947_v33 = vrot.slane %v2945_v2, 1  ;;  %4393 = vmatpush.bf16.msra.mxu0 %v9890_v22 }
 0x18b   : > { %v2154_v41 = vadd.f32 %v2153_v27, %v2065_v39  ;;  %v13113_v27 = vunpack.c.l.b16 %v11013_v40  ;;  %v2651_v26 = vsel %vm1092_vm10, %v2646_v42, %v11408_v63  ;;  %v10572_v40 = vor.u32 %v10571_v43, %v10570_v62 }
 0x18c   : > { %v3277_v15 = vpop.f32.mrf.mxu1  ;;  %v2953_v51 = vshll.u32 %v2651_v26, 16 }
 0x18d   : > { %v11403_v61 = vadd.f32 %v3276_v44, %v2154_v41  ;;  %v3278_v1 = vadd.f32 %v3277_v15, %v3188_v20  ;;  %v11419_v55 = vpack.c.b16 %v13113_v27, %v1006_v37  ;;  %v2941_v20 = vsel %vm1092_vm10, %v2936_v19, %v2940_v50 }
 0x18e   : > { %v2155_v47 = vpop.f32.mrf.mxu3  ;;  %v2943_v15 = vshrl.u32 %v11413_v4, 16  ;;  %v11432_v37 = vpack.c.b16 %v2374_v46, %v2374_v46  ;;  %v2657_v62 = vshll.u32 %v10572_v40, 16  ;;  %v1259_v27 = vrot.slane %v1257_v36, 1 }
 0x18f   : > { %v3191_v56 = vpop.f32.mrf.mxu0  ;;  %v1252_v31 = vshll.u32 %v11419_v55, 16  ;;  %v1250_v43 = vshrl.u32 %v11419_v55, 16 }
 0x190   : > { %v2066_v9 = vpop.f32.mrf.mxu2  ;;  %v11436_v19 = vor.u32 %v2947_v33, %v2943_v15  ;;  %v2659_v42 = vrot.slane %v2657_v62, 1  ;;  %v2265_v28 = vld [vmem:[#allocation2 + $0xc8] sm:$0x1]  ;;  %v2965_v33 = vshll.u32 %v11405_v32, 16 }
 0x191   : > { %v2067_v44 = vadd.f32 %v2066_v9, %v11207_v8 }
 0x192   : > { %3230 = vmatmul.bf16.gmra.mxu0 %v2929_v21  ;;  %v1254_v21 = vrot.slane %v1252_v31, 1  ;;  %v2949_v46 = vsel %vm1092_vm10, %v11436_v19, %v11408_v63  ;;  %v2967_v36 = vrot.slane %v2965_v33, 1 }
 0x193   : > { %v2156_v39 = vadd.f32 %v2155_v47, %v2067_v44  ;;  %2197 = vmatmul.bf16.gmra.mxu3 %v1248_v34  ;;  %v2951_v47 = vshrl.u32 %v2651_v26, 16  ;;  %v2662_v44 = vshll.u32 %v11432_v37, 16 }
 0x194   : > { %v3280_v60 = vpop.f32.mrf.mxu1  ;;  %v1255_v34 = vor.u32 %v1254_v21, %v1250_v43  ;;  %v2963_v21 = vshrl.u32 %v11405_v32, 16 }
 0x195   : > { %v11423_v8 = vadd.f32 %v3278_v1, %v2156_v39  ;;  %2108 = vmatmul.bf16.gmra.mxu2 %v11354_v25  ;;  %v3281_v41 = vadd.f32 %v3280_v60, %v3191_v56  ;;  %v2652_v25 = vshrl.u32 %v11397_v38, 16  ;;  %v2955_v38 = vrot.slane %v2953_v51, 1 }
 0x196   : > { %v2158_v17 = vpop.f32.mrf.mxu3  ;;  %v2655_v56 = vshrl.u32 %v10572_v40, 16  ;;  %v1260_v40 = vsel %vm1092_vm10, %v1255_v34, %v1259_v27  ;;  %v2377_v51 = vunpack.c.l.b16 %v2265_v28  ;;  %v2968_v34 = vor.u32 %v2967_v36, %v2963_v21  ;;  %v9934_v21 = vld [vmem:[#allocation8 + $0xa0] sm:$0xff] }
 0x197   : > { %3319 = vmatmul.bf16.gmra.mxu1 %v2941_v20  ;;  %v3193_v48 = vpop.f32.mrf.mxu0  ;;  %v2958_v50 = vshll.u32 %v2652_v25, 16  ;;  %v2956_v2 = vor.u32 %v2955_v38, %v2951_v47 }
 0x198   : > { %v2069_v54 = vpop.f32.mrf.mxu2  ;;  %v2660_v31 = vor.u32 %v2659_v42, %v2655_v56  ;;  %v930_v42 = vld [vmem:[#allocation2 + $0xb4] sm:$0xf]  ;;  %5937 = vmatpush.bf16.msra.mxu1 %v9934_v21  ;;  %v13115_v21 = vmov 0 }
 0x199   : > { %v2070_v1 = vadd.f32 %v2069_v54, %v11224_v0  ;;  %v2960_v57 = vrot.slane %v2958_v50, 1  ;;  %v13116_v21 = vsel %vm11479_vm13, 4294967295, %v13115_v21 }
 0x19a   : > { %13117 = vst [vmem:[#allocation30_spill] sm:$0xff] %v13116_v21 }
 0x19b   : > { %v2159_v9 = vadd.f32 %v2158_v17, %v2070_v1  ;;  %v2961_v15 = vsel %vm1092_vm10, %v2956_v2, %v2960_v57  ;;  %v10193_v1 = vor.u32 %v10192_v11, %v10191_v53 }
 0x19c   : > { %v3282_v0 = vpop.f32.mrf.mxu1 }
 0x19d   : > { %v11438_v52 = vadd.f32 %v3281_v41, %v2159_v9  ;;  %v2664_v41 = vrot.slane %v2662_v44, 1  ;;  %v3283_v54 = vadd.f32 %v3282_v0, %v3193_v48  ;;  %v2666_v9 = vshrl.u32 %v11432_v37, 16 }
 0x19e   : > { %v2160_v20 = vpop.f32.mrf.mxu3  ;;  %v2409_v0 = vpack.c.b16 %v2377_v51, %v2377_v51  ;;  %v1269_v44 = vshll.u32 %v11083_v58, 16  ;;  %v2669_v57 = vshrl.u32 %v10193_v1, 16 }
 0x19f   : > { %v3196_v26 = vpop.f32.mrf.mxu0  ;;  %v2665_v63 = vsel %vm1092_vm10, %v2660_v31, %v2664_v41  ;;  %v2969_v31 = vsel %vm1092_vm10, %v2968_v34, %v2664_v41 }
 0x1a0   : > { %v2071_v39 = vpop.f32.mrf.mxu2  ;;  %v2973_v47 = vshll.u32 %v2665_v63, 16  ;;  %v2971_v27 = vshrl.u32 %v2665_v63, 16  ;;  %v2676_v2 = vshll.u32 %v2409_v0, 16 }
 0x1a1   : > { %v2072_v60 = vadd.f32 %v2071_v39, %v11233_v18  ;;  %v2978_v39 = vshll.u32 %v2666_v9, 16  ;;  %v2680_v9 = vshrl.u32 %v2409_v0, 16 }
 0x1a2   : > { %3235 = vmatmul.bf16.gmra.mxu0 %v2949_v46  ;;  %v2975_v22 = vrot.slane %v2973_v47, 1  ;;  %v2678_v11 = vrot.slane %v2676_v2, 1 }
 0x1a3   : > { %v2161_v17 = vadd.f32 %v2160_v20, %v2072_v60  ;;  %2202 = vmatmul.bf16.gmra.mxu3 %v1260_v40  ;;  %v1271_v60 = vrot.slane %v1269_v44, 1  ;;  %v2980_v40 = vrot.slane %v2978_v39, 1  ;;  %v2998_v39 = vshll.u32 %v2680_v9, 16 }
 0x1a4   : > { %v3285_v25 = vpop.f32.mrf.mxu1  ;;  %v2976_v53 = vor.u32 %v2975_v22, %v2971_v27 }
 0x1a5   : > { %v11448_v18 = vadd.f32 %v3283_v54, %v2161_v17  ;;  %2113 = vmatmul.bf16.gmra.mxu2 %v11419_v55  ;;  %v3286_v62 = vadd.f32 %v3285_v25, %v3196_v26  ;;  %v2671_v55 = vshll.u32 %v10193_v1, 16  ;;  %v1010_v26 = vunpack.c.l.b16 %v930_v42  ;;  %v10169_v25 = vld [vmem:[#allocation2 + $0xc0] sm:$0xff]  }
 0x1a6   : > { %v2163_v48 = vpop.f32.mrf.mxu3  ;;  %v1272_v17 = vsel %vm1092_vm10, %v11436_v19, %v1271_v60  ;;  %v1281_v42 = vshll.u32 %v11115_v14, 16  ;;  %v3374_v60 = vld [vmem:[#allocation2 + $0x1c] sm:$0xf] }
 0x1a7   : > { %3324 = vmatmul.bf16.gmra.mxu1 %v2961_v15  ;;  %v3198_v50 = vpop.f32.mrf.mxu0  ;;  %v2673_v37 = vrot.slane %v2671_v55, 1  ;;  %v13114_v15 = vunpack.c.l.b16 %v11101_v23  ;;  %v2983_v55 = vshrl.u32 %v10169_v25, 16 }
 0x1a8   : > { %v2074_v43 = vpop.f32.mrf.mxu2 }
 0x1a9   : > { %v2075_v38 = vadd.f32 %v2074_v43, %v11243_v45  ;;  %v2674_v54 = vor.u32 %v2673_v37, %v2669_v57  ;;  %v1027_v33 = vpack.c.b16 %v13114_v15, %v1010_v26  ;;  %v1283_v37 = vrot.slane %v1281_v42, 1  ;;  %v4111_v15 = vld [vmem:[#allocation2 + $0x18] sm:$0xe] }
 0x1ab   : > { %v2164_v56 = vadd.f32 %v2163_v48, %v2075_v38  ;;  %v2679_v43 = vsel %vm1092_vm10, %v2674_v54, %v2678_v11  ;;  %v1276_v19 = vshll.u32 %v1027_v33, 16  ;;  %v9858_v54 = vld [vmem:[#allocation2 + $0x18] sm:$0xff] }
 0x1ac   : > { %v3287_v32 = vpop.f32.mrf.mxu1  ;;  %v2993_v47 = vshll.u32 %v2679_v43, 16  ;;  %v2991_v27 = vshrl.u32 %v2679_v43, 16 }
 0x1ad   : > { %v11456_v20 = vadd.f32 %v3286_v62, %v2164_v56  ;;  %v3288_v63 = vadd.f32 %v3287_v32, %v3198_v50  ;;  %v2985_v62 = vshll.u32 %v10169_v25, 16  ;;  %v1278_v56 = vrot.slane %v1276_v19, 1 }
 0x1ae   : > { %v2165_v46 = vpop.f32.mrf.mxu3  ;;  %v2995_v22 = vrot.slane %v2993_v47, 1  ;;  %v3568_v19 = vshll.u32 %v9858_v54, 16 }
 0x1af   : > { %v3201_v28 = vpop.f32.mrf.mxu0  ;;  %v2987_v44 = vrot.slane %v2985_v62, 1 }
 0x1b0   : > { %v2076_v45 = vpop.f32.mrf.mxu2 }
 0x1b1   : > { %v2077_v58 = vadd.f32 %v2076_v45, %v11252_v7  ;;  %v2981_v7 = vsel %vm1092_vm10, %v2976_v53, %v2980_v40  ;;  %v2988_v57 = vor.u32 %v2987_v44, %v2983_v55  ;;  %v3570_v55 = vrot.slane %v3568_v19, 1 }
 0x1b2   : > { %3240 = vmatmul.bf16.gmra.mxu0 %v2969_v31  ;;  %v3000_v31 = vrot.slane %v2998_v39, 1 }
 0x1b3   : > { %v2166_v51 = vadd.f32 %v2165_v46, %v2077_v58  ;;  %2207 = vmatmul.bf16.gmra.mxu3 %v1272_v17  ;;  %v2996_v46 = vor.u32 %v2995_v22, %v2991_v27  ;;  %v2989_v14 = vsel %vm1092_vm10, %v2988_v57, %v2678_v11  ;;  %v9292_v11 = vrot.slane %v4111_v15, 9 }
 0x1b4   : > { %v3290_v41 = vpop.f32.mrf.mxu1 }
 0x1b5   : > { %v11464_v1 = vadd.f32 %v3288_v63, %v2166_v51  ;;  %2118 = vmatmul.bf16.gmra.mxu2 %v11413_v4  ;;  %v3291_v48 = vadd.f32 %v3290_v41, %v3201_v28  ;;  %v1274_v4 = vshrl.u32 %v1027_v33, 16  ;;  %v4148_v28 = vrot.slane %v3374_v60, 5 }
 0x1b6   : > { %v2168_v36 = vpop.f32.mrf.mxu3  ;;  %v3001_v51 = vsel %vm1092_vm10, %v2996_v46, %v3000_v31  ;;  %v9859_v46 = vld [vmem:[#allocation2 + $0x24] sm:$0xff] }
 0x1b7   : > { %3329 = vmatmul.bf16.gmra.mxu1 %v2981_v7  ;;  %v3203_v50 = vpop.f32.mrf.mxu0  ;;  %v1279_v0 = vor.u32 %v1278_v56, %v1274_v4  ;;  %v4150_v62 = vrot.slane %v4148_v28, 4  ;;  %v3578_v19 = vshrl.u32 %v9859_v46, 16 }
 0x1b8   : > { %v2079_v23 = vpop.f32.mrf.mxu2 }
 0x1b9   : > { %v2080_v38 = vadd.f32 %v2079_v23, %v11269_v10  ;;  %v3405_v10 = vld [vmem:[#allocation2 + $0x20] sm:$0x1]  ;;  %v1284_v53 = vsel %vm1092_vm10, %v1279_v0, %v1283_v37 }
 0x1ba   : > { %v3533_v17 = vunpack.c.l.b16 %v3405_v10 }
 0x1bb   : > { %v2169_v34 = vadd.f32 %v2168_v36, %v2080_v38 }
 0x1bc   : > { %v3292_v2 = vpop.f32.mrf.mxu1 }
 0x1bd   : > { %v11471_v32 = vadd.f32 %v3291_v48, %v2169_v34  ;;  %v3293_v25 = vadd.f32 %v3292_v2, %v3203_v50  ;;  %v3549_v48 = vpack.c.b16 %v3533_v17, %v3533_v17  ;;  %v3566_v50 = vshrl.u32 %v9858_v54, 16  ;;  %v3376_v2 = vld [vmem:[#allocation2 + $0x28] sm:$0xf] }
 0x1be   : > { %v2170_v45 = vpop.f32.mrf.mxu3 }
 0x1bf   : > { %v3206_v58 = vpop.f32.mrf.mxu0  ;;  %v3573_v44 = vshll.u32 %v3549_v48, 16  ;;  %v3571_v22 = vor.u32 %v3570_v55, %v3566_v50 }
 0x1c0   : > { %v2081_v26 = vpop.f32.mrf.mxu2 }
 0x1c1   : > { %v2082_v40 = vadd.f32 %v2081_v26, %v11278_v59  ;;  %v4151_v59 = vrot.slane %v3405_v10, 5  ;;  %v3575_v39 = vrot.slane %v3573_v44, 1  ;;  %v4155_v26 = vrot.slane %v3376_v2, 5 }
 0x1c2   : > { %3245 = vmatmul.bf16.gmra.mxu0 %v2989_v14 }
 0x1c3   : > { %v2171_v63 = vadd.f32 %v2170_v45, %v2082_v40  ;;  %2212 = vmatmul.bf16.gmra.mxu3 %v1284_v53  ;;  %v4152_v38 = vsel %vm11479_vm13, %v4150_v62, %v4151_v59  ;;  %v3576_v45 = vsel %vm1092_vm10, %v3571_v22, %v3575_v39  ;;  %v4112_v40 = vld [vmem:[#allocation2 + $0x24] sm:$0xe]  ;;  %v4157_v15 = vrot.slane %v4155_v26, 4  ;;  %v13118_v22 = vld [vmem:[#allocation15_spill] sm:$0xff] }
 0x1c4   : > { %v3295_v7 = vpop.f32.mrf.mxu1  ;;  %v4275_v42 = vunpack.c.l.b16 %v4152_v38  ;;  %v9293_v17 = vrot.slane %v4112_v40, 9 }
 0x1c5   : > { %v11477_v41 = vadd.f32 %v3293_v25, %v2171_v63  ;;  %2123 = vmatmul.bf16.gmra.mxu2 %v1027_v33  ;;  %v3296_v43 = vadd.f32 %v3295_v7, %v3206_v58  ;;  %v4149_v33 = vsel %vm11479_vm13, %v9292_v11, %v4148_v28  ;;  %v9933_v7 = vld [vmem:[#allocation8 + $0x98] sm:$0xff] }
 0x1c6   : > { %v2173_v36 = vpop.f32.mrf.mxu3  ;;  %v4274_v56 = vunpack.c.l.b16 %v4149_v33  ;;  %5938 = vmatpush.bf16.msra.mxu1 %v9933_v7  ;;  %v4156_v48 = vsel %vm11479_vm13, %v9293_v17, %v4155_v26 }
 0x1c7   : > { %3334 = vmatmul.bf16.gmra.mxu1 %v3001_v51  ;;  %v3208_v47 = vpop.f32.mrf.mxu0 }
 0x1c8   : > { %v2084_v23 = vpop.f32.mrf.mxu2  ;;  %v4306_v37 = vpack.c.b16 %v4275_v42, %v4274_v56 }
 0x1c9   : > { %v2085_v9 = vadd.f32 %v2084_v23, %v11288_v35  ;;  %v3406_v35 = vld [vmem:[#allocation2 + $0x2c] sm:$0x1] }
 0x1ca   : > { %v3534_v31 = vunpack.c.l.b16 %v3406_v35  ;;  %v4158_v25 = vrot.slane %v3406_v35, 5 }
 0x1cb   : > { %v2174_v4 = vadd.f32 %v2173_v36, %v2085_v9 }
 0x1cc   : > { %v3297_v27 = vpop.f32.mrf.mxu1  ;;  %v3550_v51 = vpack.c.b16 %v3534_v31, %v3534_v31 }
 0x1cd   : > { %v11488_v34 = vadd.f32 %v3296_v43, %v2174_v4  ;;  %v3298_v58 = vadd.f32 %v3297_v27, %v3208_v47  ;;  %v4276_v47 = vunpack.c.l.b16 %v4156_v48  ;;  %v3378_v4 = vld [vmem:[#allocation2 + $0x34] sm:$0xf] }
 0x1ce   : > { %v2175_v0 = vpop.f32.mrf.mxu3  ;;  %v3585_v36 = vshll.u32 %v3550_v51, 16  ;;  %v4162_v35 = vrot.slane %v3378_v4, 5 }
 0x1cf   : > { %v3211_v10 = vpop.f32.mrf.mxu0 }
 0x1d0   : > { %v2086_v57 = vpop.f32.mrf.mxu2  ;;  %v3587_v44 = vrot.slane %v3585_v36, 1 }
 0x1d1   : > { %v2087_v60 = vadd.f32 %v2086_v57, %v11297_v29  ;;  %v3580_v29 = vshll.u32 %v9859_v46, 16 }
 0x1d2   : > { %4394 = vmatmul.bf16.vlgmr.msra.gmra.mxu0 %v4306_v37 }
 0x1d3   : > { %v2176_v14 = vadd.f32 %v2175_v0, %v2087_v60  ;;  %3998 = vmatmul.bf16.vlgmr.msra.gmra.mxu3 %v3576_v45  ;;  %v3582_v23 = vrot.slane %v3580_v29, 1  ;;  %v9860_v0 = vld [vmem:[#allocation2 + $0x30] sm:$0xff] }
 0x1d4   : > { %v3300_v53 = vpop.f32.mrf.mxu1  ;;  %v4113_v60 = vld [vmem:[#allocation2 + $0x30] sm:$0xe]  ;;  %v3592_v17 = vshll.u32 %v9860_v0, 16 }
 0x1d5   : > { %v11492_v28 = vadd.f32 %v3298_v58, %v2176_v14  ;;  %3909 = vmatmul.bf16.vlgmr.msra.gmra.mxu2 %v9858_v54  ;;  %v3301_v63 = vadd.f32 %v3300_v53, %v3211_v10  ;;  %v4159_v54 = vsel %vm11479_vm13, %v4157_v15, %v4158_v25  ;;  %v3583_v55 = vor.u32 %v3582_v23, %v3578_v19  ;;  %v13119_v29 = vld [vmem:[#allocation16_spill] sm:$0xff] }
 0x1d6   : > { %v2178_v11 = vpop.f32.mrf.mxu3  ;;  %v4277_v33 = vunpack.c.l.b16 %v4159_v54  ;;  %v9294_v40 = vrot.slane %v4113_v60, 9  ;;  %v4164_v58 = vrot.slane %v4162_v35, 4 }
 0x1d7   : > { %v3213_v43 = vpop.f32.mrf.mxu0  ;;  %v3588_v57 = vsel %vm1092_vm10, %v3583_v55, %v3587_v44 }
 0x1d8   : > { %v2089_v59 = vpop.f32.mrf.mxu2  ;;  %v4307_v27 = vpack.c.b16 %v4277_v33, %v4276_v47  ;;  %v3380_v33 = vld [vmem:[#allocation2 + $0x40] sm:$0xf] }
 0x1d9   : > { %v2090_v62 = vadd.f32 %v2089_v59, %v11138_v3  ;;  %v3407_v3 = vld [vmem:[#allocation2 + $0x38] sm:$0x1]  ;;  %v4163_v59 = vsel %vm11479_vm13, %v9294_v40, %v4162_v35  ;;  %v4114_v35 = vld [vmem:[#allocation2 + $0x3c] sm:$0xe] }
 0x1da   : > { %v3535_v37 = vunpack.c.l.b16 %v3407_v3  ;;  %v4165_v14 = vrot.slane %v3407_v3, 5  ;;  %v4278_v54 = vunpack.c.l.b16 %v4163_v59  ;;  %v13120_v3 = vld [vmem:[#allocation17_spill] sm:$0xff] }
 0x1db   : > { %v2179_v9 = vadd.f32 %v2178_v11, %v2090_v62  ;;  %v3590_v62 = vshrl.u32 %v9860_v0, 16 }
 0x1dc   : > { %v3302_v50 = vpop.f32.mrf.mxu1  ;;  %v3551_v15 = vpack.c.b16 %v3535_v37, %v3535_v37  ;;  %v4166_v11 = vsel %vm11479_vm13, %v4164_v58, %v4165_v14 }
 0x1dd   : > { %v11499_v38 = vadd.f32 %v3301_v63, %v2179_v9  ;;  %v3303_v10 = vadd.f32 %v3302_v50, %v3213_v43  ;;  %v4279_v19 = vunpack.c.l.b16 %v4166_v11  ;;  %v3408_v50 = vld [vmem:[#allocation2 + $0x44] sm:$0x1] }
 0x1de   : > { %v2180_v42 = vpop.f32.mrf.mxu3  ;;  %v3597_v43 = vshll.u32 %v3551_v15, 16  ;;  %v4172_v40 = vrot.slane %v3408_v50, 5 }
 0x1df   : > { %v3216_v2 = vpop.f32.mrf.mxu0  ;;  %v4308_v4 = vpack.c.b16 %v4279_v19, %v4278_v54 }
 0x1e0   : > { %v2091_v56 = vpop.f32.mrf.mxu2  ;;  %v3599_v47 = vrot.slane %v3597_v43, 1 }
 0x1e1   : > { %v2092_v39 = vadd.f32 %v2091_v56, %v13118_v22 }
 0x1e2   : > { %4399 = vmatmul.bf16.gmra.mxu0 %v4307_v27  ;;  %v4169_v27 = vrot.slane %v3380_v33, 5  ;;  %v3409_v33 = vld [vmem:[#allocation2 + $0x50] sm:$0x1] }
 0x1e3   : > { %v2181_v26 = vadd.f32 %v2180_v42, %v2092_v39  ;;  %4003 = vmatmul.bf16.gmra.mxu3 %v3588_v57  ;;  %v9861_v39 = vld [vmem:[#allocation2 + $0x3c] sm:$0xff] }
 0x1e4   : > { %v3305_v31 = vpop.f32.mrf.mxu1  ;;  %v3604_v14 = vshll.u32 %v9861_v39, 16  ;;  %v3602_v59 = vshrl.u32 %v9861_v39, 16 }
 0x1e5   : > { %v11503_v45 = vadd.f32 %v3303_v10, %v2181_v26  ;;  %3914 = vmatmul.bf16.gmra.mxu2 %v9859_v46  ;;  %v3306_v53 = vadd.f32 %v3305_v31, %v3216_v2  ;;  %v3594_v46 = vrot.slane %v3592_v17, 1  ;;  %v3536_v2 = vunpack.c.l.b16 %v3408_v50  ;;  %v9932_v17 = vld [vmem:[#allocation8 + $0x90] sm:$0xff] }
 0x1e6   : > { %v2183_v63 = vpop.f32.mrf.mxu3  ;;  %v9295_v26 = vrot.slane %v4114_v35, 9  ;;  %v4171_v31 = vrot.slane %v4169_v27, 4  ;;  %5939 = vmatpush.bf16.msra.mxu1 %v9932_v17  ;;  %v3606_v11 = vrot.slane %v3604_v14, 1  ;;  %v4115_v35 = vld [vmem:[#allocation2 + $0x48] sm:$0xe] }
 0x1e7   : > { %v3218_v7 = vpop.f32.mrf.mxu0  ;;  %v3595_v9 = vor.u32 %v3594_v46, %v3590_v62 }
 0x1e8   : > { %v2094_v25 = vpop.f32.mrf.mxu2 }
 0x1e9   : > { %v2095_v51 = vadd.f32 %v2094_v25, %v13119_v29  ;;  %v3600_v22 = vsel %vm1092_vm10, %v3595_v9, %v3599_v47  ;;  %v3382_v47 = vld [vmem:[#allocation2 + $0x4c] sm:$0xf] }
 0x1eb   : > { %v2184_v48 = vadd.f32 %v2183_v63, %v2095_v51  ;;  %v13121_v63 = vld [vmem:[#allocation18_spill] sm:$0xff] }
 0x1ec   : > { %v3307_v36 = vpop.f32.mrf.mxu1 }
 0x1ed   : > { %v11510_v23 = vadd.f32 %v3306_v53, %v2184_v48  ;;  %v3308_v57 = vadd.f32 %v3307_v36, %v3218_v7  ;;  %v3552_v53 = vpack.c.b16 %v3536_v2, %v3536_v2  ;;  %v4170_v7 = vsel %vm11479_vm13, %v9295_v26, %v4169_v27 }
 0x1ee   : > { %v2185_v44 = vpop.f32.mrf.mxu3  ;;  %v4280_v43 = vunpack.c.l.b16 %v4170_v7  ;;  %v3607_v36 = vor.u32 %v3606_v11, %v3602_v59  ;;  %v3537_v2 = vunpack.c.l.b16 %v3409_v33 }
 0x1ef   : > { %v3221_v42 = vpop.f32.mrf.mxu0  ;;  %v3609_v62 = vshll.u32 %v3552_v53, 16 }
 0x1f0   : > { %v2096_v55 = vpop.f32.mrf.mxu2  ;;  %v3553_v17 = vpack.c.b16 %v3537_v2, %v3537_v2  ;;  %v9863_v2 = vld [vmem:[#allocation2 + $0x54] sm:$0xff] }
 0x1f1   : > { %v2097_v56 = vadd.f32 %v2096_v55, %v13120_v3  ;;  %v3611_v9 = vrot.slane %v3609_v62, 1 }
 0x1f2   : > { %4404 = vmatmul.bf16.gmra.mxu0 %v4308_v4  ;;  %v13122_v4 = vld [vmem:[#allocation19_spill] sm:$0xff]  ;;  %v3621_v11 = vshll.u32 %v3553_v17, 16 }
 0x1f3   : > { %v2186_v37 = vadd.f32 %v2185_v44, %v2097_v56  ;;  %4008 = vmatmul.bf16.gmra.mxu3 %v3600_v22  ;;  %v3612_v27 = vsel %vm1092_vm10, %v3607_v36, %v3611_v9  ;;  %v9862_v22 = vld [vmem:[#allocation2 + $0x48] sm:$0xff] }
 0x1f4   : > { %v3310_v10 = vpop.f32.mrf.mxu1  ;;  %v3616_v53 = vshll.u32 %v9862_v22, 16  ;;  %v3614_v59 = vshrl.u32 %v9862_v22, 16  ;;  %v3623_v9 = vrot.slane %v3621_v11, 1  ;;  %v3626_v11 = vshrl.u32 %v9863_v2, 16 }
 0x1f5   : > { %v11514_v60 = vadd.f32 %v3308_v57, %v2186_v37  ;;  %3919 = vmatmul.bf16.gmra.mxu2 %v9860_v0  ;;  %v3311_v58 = vadd.f32 %v3310_v10, %v3221_v42  ;;  %v4173_v0 = vsel %vm11479_vm13, %v4171_v31, %v4172_v40  ;;  %v4176_v42 = vrot.slane %v3382_v47, 5  ;;  %v3384_v47 = vld [vmem:[#allocation2 + $0x58] sm:$0xf] }
 0x1f6   : > { %v2188_v25 = vpop.f32.mrf.mxu3  ;;  %v4281_v48 = vunpack.c.l.b16 %v4173_v0  ;;  %v9296_v31 = vrot.slane %v4115_v35, 9 }
 0x1f7   : > { %v3223_v51 = vpop.f32.mrf.mxu0  ;;  %v4178_v40 = vrot.slane %v4176_v42, 4 }
 0x1f8   : > { %v2099_v15 = vpop.f32.mrf.mxu2  ;;  %v4309_v44 = vpack.c.b16 %v4281_v48, %v4280_v43 }
 0x1f9   : > { %v2100_v29 = vadd.f32 %v2099_v15, %v13121_v63  ;;  %v13123_v63 = vld [vmem:[#allocation20_spill] sm:$0xff] }
 0x1fb   : > { %v2189_v46 = vadd.f32 %v2188_v25, %v2100_v29 }
 0x1fc   : > { %v3312_v19 = vpop.f32.mrf.mxu1 }
 0x1fd   : > { %v11521_v54 = vadd.f32 %v3311_v58, %v2189_v46  ;;  %v3313_v57 = vadd.f32 %v3312_v19, %v3223_v51  ;;  %v4179_v58 = vrot.slane %v3409_v33, 5  ;;  %v4177_v51 = vsel %vm11479_vm13, %v9296_v31, %v4176_v42  ;;  %v3410_v33 = vld [vmem:[#allocation2 + $0x5c] sm:$0x1] }
 0x1fe   : > { %v2190_v55 = vpop.f32.mrf.mxu3  ;;  %v4282_v46 = vunpack.c.l.b16 %v4177_v51  ;;  %v4183_v42 = vrot.slane %v3384_v47, 5  ;;  %v3538_v35 = vunpack.c.l.b16 %v3410_v33 }
 0x1ff   : > { %v3226_v56 = vpop.f32.mrf.mxu0  ;;  %v4180_v0 = vsel %vm11479_vm13, %v4178_v40, %v4179_v58 }
 0x200   : > { %v2101_v50 = vpop.f32.mrf.mxu2  ;;  %v4283_v43 = vunpack.c.l.b16 %v4180_v0  ;;  %v13125_v0 = vld [vmem:[#allocation22_spill] sm:$0xff] }
 0x201   : > { %v2102_v3 = vadd.f32 %v2101_v50, %v13122_v4  ;;  %v13124_v4 = vld [vmem:[#allocation21_spill] sm:$0xff] }
 0x202   : > { %4409 = vmatmul.bf16.gmra.mxu0 %v4309_v44  ;;  %v4310_v44 = vpack.c.b16 %v4283_v43, %v4282_v46 }
 0x203   : > { %v2191_v37 = vadd.f32 %v2190_v55, %v2102_v3  ;;  %4013 = vmatmul.bf16.gmra.mxu3 %v3612_v27 }
 0x204   : > { %v3315_v26 = vpop.f32.mrf.mxu1 }
 0x205   : > { %v11525_v10 = vadd.f32 %v3313_v57, %v2191_v37  ;;  %3924 = vmatmul.bf16.gmra.mxu2 %v9861_v39  ;;  %v3316_v14 = vadd.f32 %v3315_v26, %v3226_v56  ;;  %v3618_v39 = vrot.slane %v3616_v53, 1  ;;  %v4116_v57 = vld [vmem:[#allocation2 + $0x54] sm:$0xe]  ;;  %v4186_v53 = vrot.slane %v3410_v33, 5 }
 0x206   : > { %v2193_v25 = vpop.f32.mrf.mxu3  ;;  %v9297_v58 = vrot.slane %v4116_v57, 9 }
 0x207   : > { %v3228_v7 = vpop.f32.mrf.mxu0  ;;  %v3619_v36 = vor.u32 %v3618_v39, %v3614_v59 }
 0x208   : > { %v2104_v15 = vpop.f32.mrf.mxu2  ;;  %v4184_v39 = vsel %vm11479_vm13, %v9297_v58, %v4183_v42  ;;  %v4117_v58 = vld [vmem:[#allocation2 + $0x60] sm:$0xe] }
 0x209   : > { %v2105_v29 = vadd.f32 %v2104_v15, %v13123_v63  ;;  %v3624_v27 = vsel %vm1092_vm10, %v3619_v36, %v3623_v9  ;;  %v3628_v15 = vshll.u32 %v9863_v2, 16  ;;  %v9931_v63 = vld [vmem:[#allocation8 + $0x88] sm:$0xff] }
 0x20a   : > { %5940 = vmatpush.bf16.msra.mxu1 %v9931_v63 }
 0x20b   : > { %v2194_v62 = vadd.f32 %v2193_v25, %v2105_v29  ;;  %v3554_v25 = vpack.c.b16 %v3538_v35, %v3538_v35 }
 0x20c   : > { %v3317_v19 = vpop.f32.mrf.mxu1 }
 0x20d   : > { %v11532_v48 = vadd.f32 %v3316_v14, %v2194_v62  ;;  %v3318_v37 = vadd.f32 %v3317_v19, %v3228_v7  ;;  %v4185_v14 = vrot.slane %v4183_v42, 4  ;;  %v3630_v62 = vrot.slane %v3628_v15, 1  ;;  %v13126_v42 = vld [vmem:[#allocation23_spill] sm:$0xff] }
 0x20e   : > { %v2195_v55 = vpop.f32.mrf.mxu3  ;;  %v3633_v46 = vshll.u32 %v3554_v25, 16  ;;  %v4284_v19 = vunpack.c.l.b16 %v4184_v39  ;;  %v9298_v25 = vrot.slane %v4117_v58, 9 }
 0x20f   : > { %v3231_v56 = vpop.f32.mrf.mxu0  ;;  %v3631_v33 = vor.u32 %v3630_v62, %v3626_v11  ;;  %v13128_v11 = vld [vmem:[#allocation24_spill] sm:$0xff] }
 0x210   : > { %v2106_v50 = vpop.f32.mrf.mxu2 }
 0x211   : > { %v2107_v3 = vadd.f32 %v2106_v50, %v13124_v4  ;;  %v3635_v50 = vrot.slane %v3633_v46, 1 }
 0x212   : > { %4414 = vmatmul.bf16.gmra.mxu0 %v4310_v44  ;;  %v3411_v44 = vld [vmem:[#allocation2 + $0x68] sm:$0x1] }
 0x213   : > { %v2196_v26 = vadd.f32 %v2195_v55, %v2107_v3  ;;  %4018 = vmatmul.bf16.gmra.mxu3 %v3624_v27  ;;  %v3386_v55 = vld [vmem:[#allocation2 + $0x64] sm:$0xf] }
 0x214   : > { %v3320_v40 = vpop.f32.mrf.mxu1  ;;  %v4190_v57 = vrot.slane %v3386_v55, 5 }
 0x215   : > { %v11536_v31 = vadd.f32 %v3318_v37, %v2196_v26  ;;  %3929 = vmatmul.bf16.gmra.mxu2 %v9862_v22  ;;  %v3321_v17 = vadd.f32 %v3320_v40, %v3231_v56  ;;  %v4187_v22 = vsel %vm11479_vm13, %v4185_v14, %v4186_v53  ;;  %v3636_v37 = vsel %vm1092_vm10, %v3631_v33, %v3635_v50  ;;  %v9864_v26 = vld [vmem:[#allocation2 + $0x60] sm:$0xff] }
 0x216   : > { %v2198_v51 = vpop.f32.mrf.mxu3  ;;  %v4285_v36 = vunpack.c.l.b16 %v4187_v22  ;;  %v3539_v40 = vunpack.c.l.b16 %v3411_v44  ;;  %v4192_v63 = vrot.slane %v4190_v57, 4 }
 0x217   : > { %v3233_v7 = vpop.f32.mrf.mxu0 }
 0x218   : > { %v2109_v29 = vpop.f32.mrf.mxu2  ;;  %v4311_v56 = vpack.c.b16 %v4285_v36, %v4284_v19  ;;  %v3638_v19 = vshrl.u32 %v9864_v26, 16 }
 0x219   : > { %v2110_v59 = vadd.f32 %v2109_v29, %v13125_v0  ;;  %v4193_v29 = vrot.slane %v3411_v44, 5  ;;  %v3640_v0 = vshll.u32 %v9864_v26, 16 }
 0x21b   : > { %v2199_v43 = vadd.f32 %v2198_v51, %v2110_v59  ;;  %v3555_v59 = vpack.c.b16 %v3539_v40, %v3539_v40 }
 0x21c   : > { %v3322_v47 = vpop.f32.mrf.mxu1 }
 0x21d   : > { %v11543_v9 = vadd.f32 %v3321_v17, %v2199_v43  ;;  %v3323_v14 = vadd.f32 %v3322_v47, %v3233_v7  ;;  %v4191_v7 = vsel %vm11479_vm13, %v9298_v25, %v4190_v57  ;;  %v4194_v43 = vsel %vm11479_vm13, %v4192_v63, %v4193_v29  ;;  %v13130_v57 = vld [vmem:[#allocation25_spill] sm:$0xff]  ;;  %v4118_v63 = vld [vmem:[#allocation2 + $0x6c] sm:$0xe] }
 0x21e   : > { %v2200_v3 = vpop.f32.mrf.mxu3  ;;  %v3645_v36 = vshll.u32 %v3555_v59, 16  ;;  %v4286_v33 = vunpack.c.l.b16 %v4191_v7  ;;  %v4287_v50 = vunpack.c.l.b16 %v4194_v43 }
 0x21f   : > { %v3236_v35 = vpop.f32.mrf.mxu0 }
 0x220   : > { %v2111_v4 = vpop.f32.mrf.mxu2 }
 0x221   : > { %v2112_v27 = vadd.f32 %v2111_v4, %v13126_v42  ;;  %v3412_v42 = vld [vmem:[#allocation2 + $0x74] sm:$0x1] }
 0x222   : > { %4419 = vmatmul.bf16.gmra.mxu0 %v4311_v56  ;;  %v3388_v56 = vld [vmem:[#allocation2 + $0x70] sm:$0xf]  ;;  %v3540_v25 = vunpack.c.l.b16 %v3412_v42 }
 0x223   : > { %v2201_v53 = vadd.f32 %v2200_v3, %v2112_v27  ;;  %4023 = vmatmul.bf16.gmra.mxu3 %v3636_v37  ;;  %v3647_v3 = vrot.slane %v3645_v36, 1  ;;  %v4312_v37 = vpack.c.b16 %v4287_v50, %v4286_v33 }
 0x224   : > { %v3325_v15 = vpop.f32.mrf.mxu1 }
 0x225   : > { %v11547_v17 = vadd.f32 %v3323_v14, %v2201_v53  ;;  %3934 = vmatmul.bf16.gmra.mxu2 %v9863_v2  ;;  %v3326_v51 = vadd.f32 %v3325_v15, %v3236_v35  ;;  %v3642_v2 = vrot.slane %v3640_v0, 1  ;;  %v4197_v14 = vrot.slane %v3388_v56, 5  ;;  %v9865_v15 = vld [vmem:[#allocation2 + $0x6c] sm:$0xff] }
 0x226   : > { %v2203_v22 = vpop.f32.mrf.mxu3  ;;  %v3652_v43 = vshll.u32 %v9865_v15, 16 }
 0x227   : > { %13127 = vst [vmem:[#allocation15_spill] sm:$0xff] %v11547_v17  ;;  %v3238_v46 = vpop.f32.mrf.mxu0  ;;  %v3643_v4 = vor.u32 %v3642_v2, %v3638_v19  ;;  %v3556_v19 = vpack.c.b16 %v3540_v25, %v3540_v25 }
 0x228   : > { %v2114_v39 = vpop.f32.mrf.mxu2 }
 0x229   : > { %v2115_v62 = vadd.f32 %v2114_v39, %v13128_v11  ;;  %v3648_v53 = vsel %vm1092_vm10, %v3643_v4, %v3647_v3  ;;  %v9299_v39 = vrot.slane %v4118_v63, 9  ;;  %v4200_v11 = vrot.slane %v3412_v42, 5 }
 0x22a   : > { %v3654_v4 = vrot.slane %v3652_v43, 1  ;;  %v3657_v3 = vshll.u32 %v3556_v19, 16 }
 0x22b   : > { %v2204_v47 = vadd.f32 %v2203_v22, %v2115_v62  ;;  %v4199_v22 = vrot.slane %v4197_v14, 4  ;;  %v9930_v62 = vld [vmem:[#allocation8 + $0x80] sm:$0xff]  ;;  %v4198_v50 = vsel %vm11479_vm13, %v9299_v39, %v4197_v14  ;;  %v13134_v14 = vld [vmem:[#allocation27_spill] sm:$0xff] }
 0x22c   : > { %v3327_v44 = vpop.f32.mrf.mxu1  ;;  %5941 = vmatpush.bf16.msra.mxu1 %v9930_v62  ;;  %v4288_v42 = vunpack.c.l.b16 %v4198_v50  ;;  %v4119_v39 = vld [vmem:[#allocation2 + $0x78] sm:$0xe] }
 0x22d   : > { %v11554_v55 = vadd.f32 %v3326_v51, %v2204_v47  ;;  %v3328_v29 = vadd.f32 %v3327_v44, %v3238_v46  ;;  %v13132_v47 = vld [vmem:[#allocation26_spill] sm:$0xff]  ;;  %v3650_v44 = vshrl.u32 %v9865_v15, 16  ;;  %v9866_v62 = vld [vmem:[#allocation2 + $0x78] sm:$0xff] }
 0x22e   : > { %v2205_v35 = vpop.f32.mrf.mxu3 }
 0x22f   : > { %13129 = vst [vmem:[#allocation16_spill] sm:$0xff] %v11554_v55  ;;  %v3241_v58 = vpop.f32.mrf.mxu0 }
 0x230   : > { %v2116_v27 = vpop.f32.mrf.mxu2 }
 0x231   : > { %v2117_v40 = vadd.f32 %v2116_v27, %v13130_v57  ;;  %v3655_v57 = vor.u32 %v3654_v4, %v3650_v44  ;;  %v3664_v44 = vshll.u32 %v9866_v62, 16 }
 0x232   : > { %4424 = vmatmul.bf16.gmra.mxu0 %v4312_v37 }
 0x233   : > { %v2206_v51 = vadd.f32 %v2205_v35, %v2117_v40  ;;  %4028 = vmatmul.bf16.gmra.mxu3 %v3648_v53  ;;  %v3659_v40 = vrot.slane %v3657_v3, 1  ;;  %v3413_v53 = vld [vmem:[#allocation2 + $0x80] sm:$0x1]  ;;  %v5102_v3 = vld [vmem:[#allocation2 + $0x8] sm:$0x1] }
 0x234   : > { %v3330_v59 = vpop.f32.mrf.mxu1  ;;  %v3541_v43 = vunpack.c.l.b16 %v3413_v53  ;;  %v4207_v50 = vrot.slane %v3413_v53, 5 }
 0x235   : > { %v11558_v0 = vadd.f32 %v3328_v29, %v2206_v51  ;;  %3939 = vmatmul.bf16.gmra.mxu2 %v9864_v26  ;;  %v3331_v7 = vadd.f32 %v3330_v59, %v3241_v58  ;;  %v4201_v26 = vsel %vm11479_vm13, %v4199_v22, %v4200_v11  ;;  %v3390_v58 = vld [vmem:[#allocation2 + $0x7c] sm:$0xf]  ;;  %v3660_v11 = vsel %vm1092_vm10, %v3655_v57, %v3659_v40  ;;  %v10202_v57 = vld [vmem:[#allocation2] sm:$0xe]  ;;  %v13136_v40 = vld [vmem:[#allocation28_spill] sm:$0xff] }
 0x236   : > { %v2208_v36 = vpop.f32.mrf.mxu3  ;;  %v4289_v27 = vunpack.c.l.b16 %v4201_v26  ;;  %v4204_v22 = vrot.slane %v3390_v58, 5  ;;  %v3557_v4 = vpack.c.b16 %v3541_v43, %v3541_v43 }
 0x237   : > { %13131 = vst [vmem:[#allocation17_spill] sm:$0xff] %v11558_v0  ;;  %v3243_v46 = vpop.f32.mrf.mxu0 }
 0x238   : > { %v2119_v2 = vpop.f32.mrf.mxu2  ;;  %v4313_v29 = vpack.c.b16 %v4289_v27, %v4288_v42 }
 0x239   : > { %v2120_v33 = vadd.f32 %v2119_v2, %v13132_v47  ;;  %v9300_v2 = vrot.slane %v4119_v39, 9 }
 0x23b   : > { %v2209_v56 = vadd.f32 %v2208_v36, %v2120_v33  ;;  %v4206_v33 = vrot.slane %v4204_v22, 4 }
 0x23c   : > { %v3332_v37 = vpop.f32.mrf.mxu1 }
 0x23d   : > { %v11565_v35 = vadd.f32 %v3331_v7, %v2209_v56  ;;  %v3333_v19 = vadd.f32 %v3332_v37, %v3243_v46  ;;  %v5230_v56 = vunpack.c.l.b16 %v5102_v3  ;;  %v4205_v46 = vsel %vm11479_vm13, %v9300_v2, %v4204_v22  ;;  %v10201_v37 = vld [vmem:[#allocation2] sm:$0xf0]  ;;  %v3392_v3 = vld [vmem:[#allocation2 + $0x88] sm:$0xf] }
 0x23e   : > { %v2210_v63 = vpop.f32.mrf.mxu3  ;;  %v10203_v53 = vor.u32 %v10202_v57, %v10201_v37  ;;  %v4290_v43 = vunpack.c.l.b16 %v4205_v46  ;;  %v4211_v57 = vrot.slane %v3392_v3, 5 }
 0x23f   : > { %13133 = vst [vmem:[#allocation18_spill] sm:$0xff] %v11565_v35  ;;  %v3246_v59 = vpop.f32.mrf.mxu0 }
 0x240   : > { %v2121_v25 = vpop.f32.mrf.mxu2  ;;  %v5694_v39 = vrot.slane %v10203_v53, 1 }
 0x241   : > { %v2122_v51 = vadd.f32 %v2121_v25, %v13134_v14  ;;  %v3666_v14 = vrot.slane %v3664_v44, 1 }
 0x242   : > { %4429 = vmatmul.bf16.gmra.mxu0 %v4313_v29  ;;  %v3662_v29 = vshrl.u32 %v9866_v62, 16 }
 0x243   : > { %v2211_v7 = vadd.f32 %v2210_v63, %v2122_v51  ;;  %4033 = vmatmul.bf16.gmra.mxu3 %v3660_v11  ;;  %v11576_v63 = vpack.c.b16 %v5230_v56, %v5230_v56  ;;  %v3669_v51 = vshll.u32 %v3557_v4, 16  ;;  %v13138_v4 = vld [vmem:[#allocation29_spill] sm:$0xff] }
 0x244   : > { %v3335_v47 = vpop.f32.mrf.mxu1  ;;  %v3667_v2 = vor.u32 %v3666_v14, %v3662_v29 }
 0x245   : > { %v11569_v36 = vadd.f32 %v3333_v19, %v2211_v7  ;;  %3944 = vmatmul.bf16.gmra.mxu2 %v9865_v15  ;;  %v3336_v26 = vadd.f32 %v3335_v47, %v3246_v59  ;;  %v4208_v15 = vsel %vm11479_vm13, %v4206_v33, %v4207_v50  ;;  %v5695_v11 = vrot.slane %v11576_v63, 1  ;;  %v3414_v50 = vld [vmem:[#allocation2 + $0x8c] sm:$0x1] }
 0x246   : > { %v2213_v27 = vpop.f32.mrf.mxu3  ;;  %v4291_v22 = vunpack.c.l.b16 %v4208_v15  ;;  %v3671_v47 = vrot.slane %v3669_v51, 1  ;;  %v4213_v51 = vrot.slane %v4211_v57, 4 }
 0x247   : > { %13135 = vst [vmem:[#allocation19_spill] sm:$0xff] %v11569_v36  ;;  %v3248_v25 = vpop.f32.mrf.mxu0  ;;  %v5696_v7 = vsel %vm1525_vm9, %v5694_v39, %v5695_v11  ;;  %v11611_v36 = vld [vmem:[#allocation2 + $0x9c] sm:$0xff] }
 0x248   : > { %v2124_v42 = vpop.f32.mrf.mxu2  ;;  %5942 = vmatmul.bf16.vlgmr.msra.gmra.mxu1 %v5696_v7  ;;  %v4314_v44 = vpack.c.b16 %v4291_v22, %v4290_v43  ;;  %v3672_v46 = vsel %vm1092_vm10, %v3667_v2, %v3671_v47 }
 0x249   : > { %v2125_v58 = vadd.f32 %v2124_v42, %v13136_v40  ;;  %v9867_v40 = vld [vmem:[#allocation2 + $0x84] sm:$0xff] }
 0x24a   : > { %v3676_v39 = vshll.u32 %v9867_v40, 16  ;;  %v3674_v47 = vshrl.u32 %v9867_v40, 16 }
 0x24b   : > { %v2214_v59 = vadd.f32 %v2213_v27, %v2125_v58  ;;  %v4120_v58 = vld [vmem:[#allocation2 + $0x84] sm:$0xe] }
 0x24c   : > { %v3337_v33 = vpop.f32.mrf.mxu1  ;;  %v9301_v14 = vrot.slane %v4120_v58, 9  ;;  %v9945_v58 = vld [vmem:[#allocation8 + $0xf8] sm:$0xff] }
 0x24d   : > { %v11579_v19 = vadd.f32 %v3336_v26, %v2214_v59  ;;  %v3542_v26 = vunpack.c.l.b16 %v3414_v50  ;;  %v3338_v15 = vadd.f32 %v3337_v33, %v3248_v25  ;;  %v4214_v59 = vrot.slane %v3414_v50, 5  ;;  %v11594_v50 = vld [vmem:[%s13060_s2] ss:$0 sm:$0xff]  ;;  %6023 = vmatpush.bf16.msrb.mxu2 %v9945_v58 }
 0x24e   : > { %v2215_v42 = vpop.f32.mrf.mxu3  ;;  %v4212_v2 = vsel %vm11479_vm13, %v9301_v14, %v4211_v57  ;;  %v3678_v33 = vrot.slane %v3676_v39, 1 }
 0x24f   : > { %13137 = vst [vmem:[#allocation20_spill] sm:$0xff] %v11579_v19  ;;  %v4395_v37 = vpop.f32.mrf.mxu0  ;;  %v3558_v11 = vpack.c.b16 %v3542_v26, %v3542_v26  ;;  %v4215_v25 = vsel %vm11479_vm13, %v4213_v51, %v4214_v59  ;;  %v11598_v59 = vld [vmem:[#allocation2 + $0x90] sm:$0xff] }
 0x250   : > { %v2126_v56 = vpop.f32.mrf.mxu2  ;;  %v3679_v57 = vor.u32 %v3678_v33, %v3674_v47 }
 0x251   : > { %v2127_v27 = vadd.f32 %v2126_v56, %v13138_v4 }
 0x252   : > { %4434 = vmatmul.bf16.gmra.mxu0 %v4314_v44  ;;  %v4293_v44 = vunpack.c.l.b16 %v4215_v25  ;;  %v4121_v25 = vld [vmem:[#allocation2 + $0x90] sm:$0xe] }
 0x253   : > { %v2216_v53 = vadd.f32 %v2215_v42, %v2127_v27  ;;  %4038 = vmatmul.bf16.gmra.mxu3 %v3672_v46  ;;  %v4292_v42 = vunpack.c.l.b16 %v4212_v2  ;;  %v3415_v27 = vld [vmem:[#allocation2 + $0x98] sm:$0x1]  ;;  %v3394_v46 = vld [vmem:[#allocation2 + $0x94] sm:$0xf] }
 0x255   : > { %v11584_v29 = vadd.f32 %v3338_v15, %v2216_v53  ;;  %3949 = vmatmul.bf16.gmra.mxu2 %v9866_v62  ;;  %v3681_v62 = vshll.u32 %v3558_v11, 16  ;;  %v9905_v15 = vld [vmem:[#allocation8 + $0x38] sm:$0xff]  ;;  %v10347_v53 = vld [vmem:[%s10741_s28] sm:$0xf]  ;;  %v4315_v11 = vpack.c.b16 %v4293_v44, %v4292_v42  ;;  %v4221_v44 = vrot.slane %v3415_v27, 5 }
 0x256   : > { %v3999_v22 = vpop.f32.mrf.mxu3  ;;  %v868_v14 = vunpack.c.l.bf16 %v10347_v53  ;;  %6208 = vmatpush.bf16.msrb.mxu3 %v9905_v15  ;;  %v9302_v53 = vrot.slane %v4121_v25, 9 }
 0x257   : > { %13139 = vst [vmem:[#allocation21_spill] sm:$0xff] %v11584_v29  ;;  %v4397_v3 = vpop.f32.mrf.mxu0  ;;  %v3683_v26 = vrot.slane %v3681_v62, 1  ;;  %v3396_v29 = vld [vmem:[#allocation2 + $0xa0] sm:$0xf] }
 0x258   : > { %v3910_v43 = vpop.f32.mrf.mxu2 }
 0x259   : > { %v4000_v7 = vadd.f32 %v3999_v22, %v3910_v43  ;;  %v3543_v43 = vunpack.c.l.b16 %v3415_v27  ;;  %v4218_v22 = vrot.slane %v3394_v46, 5  ;;  %v3684_v47 = vsel %vm1092_vm10, %v3679_v57, %v3683_v26  ;;  %v10348_v46 = vld [vmem:[%s10741_s28 + $0x4] sm:$0xf]  ;;  %v9913_v57 = vld [vmem:[#allocation8 + $0x78] sm:$0xff] }
 0x25a   : > { %v3686_v26 = vshrl.u32 %v11598_v59, 16  ;;  %6297 = vmatpush.bf16.msrb.mxu0 %v9913_v57 }
 0x25b   : > { %v4079_v56 = vadd.f32 %v4000_v7, %v11326_v49  ;;  %v4220_v42 = vrot.slane %v4218_v22, 4  ;;  %v4219_v27 = vsel %vm11479_vm13, %v9302_v53, %v4218_v22 }
 0x25c   : > { %v4294_v22 = vunpack.c.l.b16 %v4219_v27 }
 0x25d   : > { %v4475_v4 = vadd.f32 %v4395_v37, %v4079_v56  ;;  %v3688_v56 = vshll.u32 %v11598_v59, 16 }
 0x25e   : > { %v4001_v39 = vpop.f32.mrf.mxu3 }
 0x25f   : > { %v4511_v51 = vadd.f32 %v11594_v50, %v4475_v4  ;;  %v4400_v2 = vpop.f32.mrf.mxu0  ;;  %v3559_v4 = vpack.c.b16 %v3543_v43, %v3543_v43 }
 0x260   : > { %v3912_v49 = vpop.f32.mrf.mxu2 }
 0x261   : > { %v4543_v37 = vmax.f32 %v4511_v51, 0.0  ;;  %v4002_v7 = vadd.f32 %v4001_v39, %v3912_v49  ;;  %v869_v51 = vunpack.c.l.bf16 %v10348_v46  ;;  %v3693_v43 = vshll.u32 %v3559_v4, 16 }
 0x262   : > { %4439 = vmatmul.bf16.gmra.mxu0 %v4315_v11 }
 0x263   : > { %v4575_v33 = vadd.f32 %v4543_v37, %v868_v14  ;;  %v4080_v62 = vadd.f32 %v4002_v7, %v11335_v13  ;;  %4043 = vmatmul.bf16.gmra.mxu3 %v3684_v47  ;;  %v3690_v13 = vrot.slane %v3688_v56, 1  ;;  %v9953_v14 = vld [vmem:[#allocation8 + $0x138] sm:$0xff]  ;;  %v3695_v19 = vrot.slane %v3693_v43, 1 }
 0x264   : > { %7330 = vmatpush.bf16.msrb.mxu1 %v9953_v14  ;;  %v4225_v14 = vrot.slane %v3396_v29, 5 }
 0x265   : > { %v4607_v58 = vpack.c.bf16 %v4575_v33, %v4575_v33  ;;  %v4476_v15 = vadd.f32 %v4397_v3, %v4080_v62  ;;  %3954 = vmatmul.bf16.gmra.mxu2 %v9867_v40  ;;  %v4222_v40 = vsel %vm11479_vm13, %v4220_v42, %v4221_v44  ;;  %v3416_v62 = vld [vmem:[#allocation2 + $0xa4] sm:$0x1]  ;;  %v3691_v4 = vor.u32 %v3690_v13, %v3686_v26  ;;  %v10349_v44 = vld [vmem:[#allocation2 + $0xc] sm:$0xf]  ;;  %v4122_v26 = vld [vmem:[#allocation2 + $0x9c] sm:$0xe] }
 0x266   : > { %v4004_v11 = vpop.f32.mrf.mxu3  ;;  %v4295_v53 = vunpack.c.l.b16 %v4222_v40  ;;  %v3544_v42 = vunpack.c.l.b16 %v3416_v62 }
 0x267   : > { %v4640_v49 = vshrl.u32 %v4607_v58, 16  ;;  %v4512_v39 = vadd.f32 %v11594_v50, %v4476_v15  ;;  %v4643_v7 = vshll.u32 %v4607_v58, 16  ;;  %v4402_v33 = vpop.f32.mrf.mxu0  ;;  %v3696_v27 = vsel %vm1092_vm10, %v3691_v4, %v3695_v19 }
 0x268   : > { %v3915_v37 = vpop.f32.mrf.mxu2  ;;  %v4316_v40 = vpack.c.b16 %v4295_v53, %v4294_v22 }
 0x269   : > { %v4642_v3 = vrot.slane %v4640_v49, 7  ;;  %v4544_v25 = vmax.f32 %v4512_v39, 0.0  ;;  %v4005_v47 = vadd.f32 %v4004_v11, %v3915_v37  ;;  %v10350_v37 = vld [vmem:[%s10741_s28 + $0x8] sm:$0xf] }
 0x26a   : > { %v870_v11 = vunpack.c.l.bf16 %v10350_v37  ;;  %v4227_v37 = vrot.slane %v4225_v14, 4 }
 0x26b   : > { %v4645_v15 = vor.u32 %v4643_v7, %v4642_v3  ;;  %v4576_v56 = vadd.f32 %v4544_v25, %v869_v51  ;;  %v4081_v46 = vadd.f32 %v4005_v47, %v11346_v24  ;;  %v3700_v7 = vshll.u32 %v11611_v36, 16 }
 0x26c   : > { %v3560_v25 = vpack.c.b16 %v3544_v42, %v3544_v42  ;;  %v4646_v29 = vrot.slane %v4642_v3, 4  ;;  %v10351_v3 = vld [vmem:[%s10741_s28 + $0xc] sm:$0xf] }
 0x26d   : > { %v4959_v49 = vsel %vm10775_vm7, %v4645_v15, %v10349_v44  ;;  %v4608_v39 = vpack.c.bf16 %v4576_v56, %v4576_v56  ;;  %v4477_v57 = vadd.f32 %v4400_v2, %v4081_v46  ;;  %v4962_v44 = vld [vmem:[#allocation2 + $0x14] sm:$0x1] }
 0x26e   : > { %4960 = vst [vmem:[#allocation2 + $0xc] sm:$0xf] %v4959_v49  ;;  %v4006_v43 = vpop.f32.mrf.mxu3  ;;  %v9303_v49 = vrot.slane %v4122_v26, 9 }
 0x26f   : > { %v4648_v51 = vshrl.u32 %v4608_v39, 16  ;;  %v4513_v24 = vadd.f32 %v11594_v50, %v4477_v57  ;;  %v4651_v15 = vshll.u32 %v4608_v39, 16  ;;  %v4405_v46 = vpop.f32.mrf.mxu0  ;;  %v4228_v57 = vrot.slane %v3416_v62, 5 }
 0x270   : > { %v3917_v13 = vpop.f32.mrf.mxu2  ;;  %v3698_v62 = vshrl.u32 %v11611_v36, 16 }
 0x271   : > { %v4650_v47 = vrot.slane %v4648_v51, 7  ;;  %v4545_v56 = vmax.f32 %v4513_v24, 0.0  ;;  %v4007_v2 = vadd.f32 %v4006_v43, %v3917_v13  ;;  %v871_v51 = vunpack.c.l.bf16 %v10351_v3 }
 0x272   : > { %4444 = vmatmul.bf16.gmra.mxu0 %v4316_v40  ;;  %v3705_v24 = vshll.u32 %v3560_v25, 16  ;;  %v4965_v25 = vld [vmem:[#allocation2 + $0x18] sm:$0xf] }
 0x273   : > { %v4653_v35 = vor.u32 %v4651_v15, %v4650_v47  ;;  %v4655_v0 = vrot.slane %v4650_v47, 4  ;;  %v4577_v55 = vadd.f32 %v4545_v56, %v870_v11  ;;  %v4082_v19 = vadd.f32 %v4007_v2, %v11364_v12  ;;  %4048 = vmatmul.bf16.gmra.mxu3 %v3696_v27  ;;  %v11638_v2 = vld [vmem:[#allocation2 + $0xac] sm:$0xf] }
 0x274   : > { %v3702_v11 = vrot.slane %v3700_v7, 1  ;;  %v11636_v7 = vld [vmem:[#allocation2 + $0xb0] sm:$0x1]  ;;  %v3707_v15 = vrot.slane %v3705_v24, 1  ;;  %v4232_v24 = vrot.slane %v11638_v2, 5 }
 0x275   : > { %v4654_v22 = vsel %vm10783_vm8, %v4646_v29, %v4653_v35  ;;  %v4963_v53 = vsel %vm10752_vm3, %v4655_v0, %v4962_v44  ;;  %v4609_v42 = vpack.c.bf16 %v4577_v55, %v4577_v55  ;;  %v4478_v39 = vadd.f32 %v4402_v33, %v4082_v19  ;;  %3959 = vmatmul.bf16.gmra.mxu2 %v11598_v59  ;;  %v10352_v19 = vld [vmem:[%s10741_s28 + $0x10] sm:$0xf] }
 0x276   : > { %4961 = vst [vmem:[#allocation2 + $0x10] sm:$0xf] %v4654_v22  ;;  %v4226_v35 = vsel %vm11479_vm13, %v9303_v49, %v4225_v14  ;;  %v4229_v55 = vsel %vm11479_vm13, %v4227_v37, %v4228_v57  ;;  %v4009_v59 = vpop.f32.mrf.mxu3  ;;  %v3703_v47 = vor.u32 %v3702_v11, %v3698_v62  ;;  %v5503_v37 = vld [vmem:[#allocation2 + $0xc] sm:$0xe]  ;;  %v872_v22 = vunpack.c.l.bf16 %v10352_v19  ;;  %v4123_v11 = vld [vmem:[#allocation2 + $0xa8] sm:$0xe] }
 0x277   : > { %4964 = vst [vmem:[#allocation2 + $0x14] sm:$0x1] %v4963_v53  ;;  %v4657_v12 = vshrl.u32 %v4609_v42, 16  ;;  %v4514_v26 = vadd.f32 %v11594_v50, %v4478_v39  ;;  %v4660_v13 = vshll.u32 %v4609_v42, 16  ;;  %v11634_v40 = vpop.f32.mrf.mxu0  ;;  %v4296_v56 = vunpack.c.l.b16 %v4226_v35  ;;  %v11642_v57 = vld [vmem:[#allocation2 + $0xa8] sm:$0xff] }
 0x278   : > { %v3920_v0 = vpop.f32.mrf.mxu2  ;;  %v4297_v14 = vunpack.c.l.b16 %v4229_v55  ;;  %v3545_v53 = vunpack.c.l.b16 %v11636_v7  ;;  %v5567_v35 = vunpack.c.l.b16 %v5503_v37  ;;  %v9944_v55 = vld [vmem:[#allocation8 + $0xf0] sm:$0xff] }
 0x279   : > { %v11632_v33 = vrot.slane %v4657_v12, 7  ;;  %v4546_v43 = vmax.f32 %v4514_v26, 0.0  ;;  %v4010_v27 = vadd.f32 %v4009_v59, %v3920_v0  ;;  %v9904_v0 = vld [vmem:[#allocation8 + $0x30] sm:$0xff]  ;;  %6024 = vmatpush.bf16.msrb.mxu2 %v9944_v55 }
 0x27a   : > { %6209 = vmatpush.bf16.msrb.mxu3 %v9904_v0 }
 0x27b   : > { %v4662_v29 = vor.u32 %v4660_v13, %v11632_v33  ;;  %v4578_v44 = vadd.f32 %v4546_v43, %v871_v51  ;;  %v4083_v49 = vadd.f32 %v4010_v27, %v11379_v30  ;;  %v3708_v30 = vsel %vm1092_vm10, %v3703_v47, %v3707_v15 }
 0x27c   : > { %v4317_v51 = vpack.c.b16 %v4297_v14, %v4296_v56  ;;  %v3561_v47 = vpack.c.b16 %v3545_v53, %v3545_v53  ;;  %v9304_v15 = vrot.slane %v4123_v11, 9  ;;  %v4663_v19 = vrot.slane %v11632_v33, 4 }
 0x27d   : > { %v4966_v42 = vsel %vm10775_vm7, %v4662_v29, %v4965_v25  ;;  %v4610_v39 = vpack.c.bf16 %v4578_v44, %v4578_v44  ;;  %v4479_v3 = vadd.f32 %v4405_v46, %v4083_v49  ;;  %v11648_v62 = vld [vmem:[#allocation2 + $0x10] sm:$0xf]  ;;  %v3712_v46 = vshll.u32 %v11642_v57, 16 }
 0x27e   : > { %4967 = vst [vmem:[#allocation2 + $0x18] sm:$0xf] %v4966_v42  ;;  %v5103_v12 = vld [vmem:[#allocation2 + $0x14] sm:$0x1]  ;;  %v5153_v26 = vunpack.c.l.b16 %v11648_v62  ;;  %v4011_v29 = vpop.f32.mrf.mxu3  ;;  %v4969_v42 = vld [vmem:[#allocation2 + $0x20] sm:$0x1] }
 0x27f   : > { %v4665_v59 = vshrl.u32 %v4610_v39, 16  ;;  %v4515_v13 = vadd.f32 %v11594_v50, %v4479_v3  ;;  %v5231_v43 = vunpack.c.l.b16 %v5103_v12  ;;  %v4668_v27 = vshll.u32 %v4610_v39, 16  ;;  %v11657_v49 = vpop.f32.mrf.mxu0 }
 0x280   : > { %v3922_v25 = vpop.f32.mrf.mxu2  ;;  %v5583_v2 = vpack.c.b16 %v5153_v26, %v5567_v35  ;;  %v4234_v3 = vrot.slane %v4232_v24, 4  ;;  %v4235_v12 = vrot.slane %v11636_v7, 5 }
 0x281   : > { %v4667_v56 = vrot.slane %v4665_v59, 7  ;;  %v4547_v14 = vmax.f32 %v4515_v13, 0.0  ;;  %v4012_v44 = vadd.f32 %v4011_v29, %v3922_v25  ;;  %v11659_v37 = vpack.c.b16 %v5231_v43, %v5231_v43  ;;  %v5072_v29 = vld [vmem:[#allocation2 + $0xc] sm:$0xf] }
 0x282   : > { %v5699_v39 = vrot.slane %v5583_v2, 1  ;;  %4449 = vmatmul.bf16.gmra.mxu0 %v4317_v51  ;;  %v3710_v59 = vshrl.u32 %v11642_v57, 16  ;;  %v3714_v13 = vrot.slane %v3712_v46, 1  ;;  %v3717_v46 = vshll.u32 %v3561_v47, 16 }
 0x283   : > { %v4670_v35 = vor.u32 %v4668_v27, %v4667_v56  ;;  %v4672_v55 = vrot.slane %v4667_v56, 4  ;;  %v4579_v0 = vadd.f32 %v4547_v14, %v872_v22  ;;  %v4084_v53 = vadd.f32 %v4012_v44, %v11389_v16  ;;  %v11672_v22 = vld [vmem:[#allocation2 + $0xbc] sm:$0x1]  ;;  %v10353_v16 = vld [vmem:[%s10741_s28 + $0x14] sm:$0xf]  ;;  %4053 = vmatmul.bf16.gmra.mxu3 %v3708_v30 }
 0x284   : > { %v5700_v11 = vrot.slane %v11659_v37, 1  ;;  %v873_v51 = vunpack.c.l.bf16 %v10353_v16  ;;  %v9912_v14 = vld [vmem:[#allocation8 + $0x70] sm:$0xff]  ;;  %v3715_v30 = vor.u32 %v3714_v13, %v3710_v59  ;;  %v5152_v59 = vunpack.c.l.b16 %v5072_v29 }
 0x285   : > { %v4671_v33 = vsel %vm10783_vm8, %v4663_v19, %v4670_v35  ;;  %v4970_v43 = vsel %vm10752_vm3, %v4672_v55, %v4969_v42  ;;  %v4611_v25 = vpack.c.bf16 %v4579_v0, %v4579_v0  ;;  %v4480_v7 = vadd.f32 %v11634_v40, %v4084_v53  ;;  %3964 = vmatmul.bf16.gmra.mxu2 %v11611_v36  ;;  %v9952_v44 = vld [vmem:[#allocation8 + $0x130] sm:$0xff]  ;;  %v10205_v62 = vld [vmem:[#allocation2 + $0x18] sm:$0xe] }
 0x286   : > { %4971 = vst [vmem:[#allocation2 + $0x20] sm:$0x1] %v4970_v43  ;;  %v5701_v27 = vsel %vm1525_vm9, %v5699_v39, %v5700_v11  ;;  %v4233_v40 = vsel %vm11479_vm13, %v9304_v15, %v4232_v24  ;;  %v4236_v36 = vsel %vm11479_vm13, %v4234_v3, %v4235_v12  ;;  %v4014_v42 = vpop.f32.mrf.mxu3  ;;  %v3546_v39 = vunpack.c.l.b16 %v11672_v22  ;;  %6298 = vmatpush.bf16.msrb.mxu0 %v9912_v14  ;;  %v11686_v11 = vld [vmem:[#allocation2 + $0xb8] sm:$0xf]  ;;  %v4972_v24 = vld [vmem:[#allocation2 + $0x24] sm:$0xf] }
 0x287   : > { %4968 = vst [vmem:[#allocation2 + $0x1c] sm:$0xf] %v4671_v33  ;;  %v4674_v2 = vshrl.u32 %v4611_v25, 16  ;;  %v4516_v56 = vadd.f32 %v11594_v50, %v4480_v7  ;;  %5947 = vmatmul.bf16.gmra.mxu1 %v5701_v27  ;;  %v4677_v35 = vshll.u32 %v4611_v25, 16  ;;  %v11684_v53 = vpop.f32.mrf.mxu0  ;;  %v3719_v15 = vrot.slane %v3717_v46, 1  ;;  %v11692_v7 = vld [vmem:[#allocation2 + $0xb4] sm:$0xff] }
 0x288   : > { %v3925_v19 = vpop.f32.mrf.mxu2  ;;  %7331 = vmatpush.bf16.msrb.mxu1 %v9952_v44  ;;  %v4298_v3 = vunpack.c.l.b16 %v4233_v40  ;;  %v4299_v12 = vunpack.c.l.b16 %v4236_v36  ;;  %v11688_v33 = vld [vmem:[#allocation2 + $0xb4] sm:$0xe]  ;;  %v3562_v16 = vpack.c.b16 %v3546_v39, %v3546_v39  ;;  %v13075_v27 = vrot.slane %v11686_v11, 5 }
 0x289   : > { %v11682_v47 = vrot.slane %v4674_v2, 7  ;;  %v4548_v55 = vmax.f32 %v4516_v56, 0.0  ;;  %v4015_v0 = vadd.f32 %v4014_v42, %v3925_v19  ;;  %v11697_v2 = vpack.c.b16 %v5153_v26, %v5152_v59 }
 0x28a   : > { %v3720_v36 = vsel %vm1092_vm10, %v3715_v30, %v3719_v15  ;;  %v4318_v44 = vpack.c.b16 %v4299_v12, %v4298_v3  ;;  %v4241_v59 = vrot.slane %v13075_v27, 4  ;;  %v10355_v27 = vld [vmem:[%s10741_s28 + $0x1c] sm:$0xf] }
 0x28b   : > { %v4679_v13 = vor.u32 %v4677_v35, %v11682_v47  ;;  %v4580_v43 = vadd.f32 %v4548_v55, %v873_v51  ;;  %v4085_v25 = vadd.f32 %v4015_v0, %v11403_v61  ;;  %v9305_v51 = vrot.slane %v11688_v33, 9  ;;  %v10354_v61 = vld [vmem:[%s10741_s28 + $0x18] sm:$0xf] }
 0x28c   : > { %v874_v40 = vunpack.c.l.bf16 %v10354_v61  ;;  %v3724_v55 = vshll.u32 %v11692_v7, 16  ;;  %v3729_v33 = vshll.u32 %v3562_v16, 16  ;;  %v5277_v30 = vshll.u32 %v11697_v2, 16 }
 0x28d   : > { %v4973_v46 = vsel %vm10775_vm7, %v4679_v13, %v4972_v24  ;;  %v4612_v56 = vpack.c.bf16 %v4580_v43, %v4580_v43  ;;  %v4481_v29 = vadd.f32 %v11657_v49, %v4085_v25  ;;  %v5104_v14 = vld [vmem:[#allocation2 + $0x20] sm:$0x1]  ;;  %v4680_v25 = vrot.slane %v11682_v47, 4 }
 0x28e   : > { %4974 = vst [vmem:[#allocation2 + $0x24] sm:$0xf] %v4973_v46  ;;  %v10204_v19 = vld [vmem:[#allocation2 + $0x18] sm:$0xf0]  ;;  %v5232_v42 = vunpack.c.l.b16 %v5104_v14  ;;  %v4016_v49 = vpop.f32.mrf.mxu3  ;;  %v4976_v46 = vld [vmem:[#allocation2 + $0x2c] sm:$0x1] }
 0x28f   : > { %v4682_v26 = vshrl.u32 %v4612_v56, 16  ;;  %v4517_v39 = vadd.f32 %v11594_v50, %v4481_v29  ;;  %v10206_v35 = vor.u32 %v10205_v62, %v10204_v19  ;;  %v4685_v3 = vshll.u32 %v4612_v56, 16  ;;  %v11712_v43 = vpop.f32.mrf.mxu0 }
 0x290   : > { %v3927_v0 = vpop.f32.mrf.mxu2  ;;  %v11707_v24 = vpack.c.b16 %v5232_v42, %v5232_v42  ;;  %v4242_v16 = vrot.slane %v11672_v22, 5 }
 0x291   : > { %v4684_v15 = vrot.slane %v4682_v26, 7  ;;  %v4549_v12 = vmax.f32 %v4517_v39, 0.0  ;;  %v4017_v13 = vadd.f32 %v4016_v49, %v3927_v0  ;;  %v5704_v29 = vrot.slane %v10206_v35, 1 }
 0x292   : > { %v5705_v14 = vrot.slane %v11707_v24, 1  ;;  %v875_v26 = vunpack.c.l.bf16 %v10355_v27  ;;  %4454 = vmatmul.bf16.gmra.mxu0 %v4318_v44  ;;  %v5279_v39 = vrot.slane %v5277_v30, 1  ;;  %v5282_v0 = vshll.u32 %v11659_v37, 16 }
 0x293   : > { %v4687_v61 = vor.u32 %v4685_v3, %v4684_v15  ;;  %v4689_v19 = vrot.slane %v4684_v15, 4  ;;  %v4581_v42 = vadd.f32 %v4549_v12, %v874_v40  ;;  %v4086_v62 = vadd.f32 %v4017_v13, %v11423_v8  ;;  %v340_v8 = vld [vmem:[#allocation2 + $0xcc] sm:$0x1]  ;;  %v396_v40 = vld [vmem:[#allocation2 + $0xd4] sm:$0x1]  ;;  %4058 = vmatmul.bf16.gmra.mxu3 %v3720_v36 }
 0x294   : > { %v5706_v56 = vsel %vm1525_vm9, %v5704_v29, %v5705_v14  ;;  %v3722_v27 = vshrl.u32 %v11692_v7, 16  ;;  %v3726_v44 = vrot.slane %v3724_v55, 1  ;;  %v3731_v30 = vrot.slane %v3729_v33, 1 }
 0x295   : > { %v4688_v47 = vsel %vm10783_vm8, %v4680_v25, %v4687_v61  ;;  %v4977_v35 = vsel %vm10752_vm3, %v4689_v19, %v4976_v46  ;;  %v4613_v22 = vpack.c.bf16 %v4581_v42, %v4581_v42  ;;  %v4482_v49 = vadd.f32 %v11684_v53, %v4086_v62  ;;  %3969 = vmatmul.bf16.gmra.mxu2 %v11642_v57  ;;  %v11736_v25 = vld [vmem:[#allocation2 + $0xc8] sm:$0x1] }
 0x296   : > { %4975 = vst [vmem:[#allocation2 + $0x28] sm:$0xf] %v4688_v47  ;;  %v5275_v37 = vshrl.u32 %v11697_v2, 16  ;;  %v13142_v12 = vrot.slane %v11686_v11, 5  ;;  %v4243_v53 = vsel %vm11479_vm13, %v4241_v59, %v4242_v16  ;;  %v4019_v13 = vpop.f32.mrf.mxu3  ;;  %v341_v55 = vsel %vm10752_vm3, 0, %v340_v8 }
 0x297   : > { %4978 = vst [vmem:[#allocation2 + $0x2c] sm:$0x1] %v4977_v35  ;;  %v4691_v15 = vshrl.u32 %v4613_v22, 16  ;;  %v4518_v3 = vadd.f32 %v11594_v50, %v4482_v49  ;;  %5952 = vmatmul.bf16.gmra.mxu1 %v5706_v56  ;;  %v397_v33 = vsel %vm10757_vm4, 0, %v396_v40  ;;  %v5284_v29 = vrot.slane %v5282_v0, 1  ;;  %v11744_v19 = vpop.f32.mrf.mxu0 }
 0x298   : > { %v4240_v57 = vsel %vm11479_vm13, %v9305_v51, %v13142_v12  ;;  %v3930_v36 = vpop.f32.mrf.mxu2  ;;  %v5280_v46 = vor.u32 %v5279_v39, %v5275_v37  ;;  %v4694_v11 = vshll.u32 %v4613_v22, 16  ;;  %342 = vst [vmem:[#allocation2 + $0xcc] sm:$0x1] %v341_v55  ;;  %v4979_v59 = vld [vmem:[#allocation2 + $0x30] sm:$0xf]  ;;  %v3727_v16 = vor.u32 %v3726_v44, %v3722_v27  ;;  %v11753_v22 = vld [vmem:[#allocation2 + $0xc0] sm:$0xff] }
 0x299   : > { %v11742_v14 = vrot.slane %v4691_v15, 7  ;;  %v4550_v61 = vmax.f32 %v4518_v3, 0.0  ;;  %v4020_v51 = vadd.f32 %v4019_v13, %v3930_v36  ;;  %v4300_v42 = vunpack.c.l.b16 %v4240_v57  ;;  %v11746_v56 = vld [vmem:[#allocation2 + $0xc4] sm:$0xf]  ;;  %398 = vst [vmem:[#allocation2 + $0xd4] sm:$0x1] %v397_v33 }
 0x29a   : > { %v4301_v62 = vunpack.c.l.b16 %v4243_v53  ;;  %v11749_v6 = vsel %vm1092_vm10, %v5280_v46, %v5284_v29  ;;  %v5505_v35 = vld [vmem:[#allocation2 + $0x24] sm:$0xe]  ;;  %v10356_v49 = vld [vmem:[%s10741_s28 + $0x20] sm:$0xf]  ;;  %v3547_v40 = vunpack.c.l.b16 %v11736_v25  ;;  %v4125_v3 = vld [vmem:[#allocation2 + $0xc0] sm:$0xe] }
 0x29b   : > { %v4696_v39 = vor.u32 %v4694_v11, %v11742_v14  ;;  %v4582_v0 = vadd.f32 %v4550_v61, %v875_v26  ;;  %v4087_v47 = vadd.f32 %v4020_v51, %v11438_v52  ;;  %v876_v8 = vunpack.c.l.bf16 %v10356_v49  ;;  %v9943_v13 = vld [vmem:[#allocation8 + $0xe8] sm:$0xff] }
 0x29c   : > { %v4246_v26 = vrot.slane %v11746_v56, 5  ;;  %v3732_v52 = vsel %vm1092_vm10, %v3727_v16, %v3731_v30  ;;  %v4319_v12 = vpack.c.b16 %v4301_v62, %v4300_v42  ;;  %v5569_v36 = vunpack.c.l.b16 %v5505_v35  ;;  %v9903_v55 = vld [vmem:[#allocation8 + $0x28] sm:$0xff]  ;;  %6025 = vmatpush.bf16.msrb.mxu2 %v9943_v13  ;;  %v4983_v56 = vld [vmem:[#allocation2 + $0x38] sm:$0x1] }
 0x29d   : > { %v4980_v27 = vsel %vm10775_vm7, %v4696_v39, %v4979_v59  ;;  %v4614_v44 = vpack.c.bf16 %v4582_v0, %v4582_v0  ;;  %v4483_v37 = vadd.f32 %v11712_v43, %v4087_v47  ;;  %v11760_v15 = vld [vmem:[#allocation2 + $0x28] sm:$0xf]  ;;  %v9911_v43 = vld [vmem:[#allocation8 + $0x68] sm:$0xff]  ;;  %v3736_v11 = vshll.u32 %v11753_v22, 16  ;;  %6210 = vmatpush.bf16.msrb.mxu3 %v9903_v55 }
 0x29e   : > { %4981 = vst [vmem:[#allocation2 + $0x30] sm:$0xf] %v4980_v27  ;;  %v5105_v57 = vld [vmem:[#allocation2 + $0x2c] sm:$0x1]  ;;  %v5157_v53 = vunpack.c.l.b16 %v11760_v15  ;;  %v4021_v59 = vpop.f32.mrf.mxu3  ;;  %v11769_v16 = vpack.c.b16 %v3547_v40, %v3547_v40  ;;  %v9306_v42 = vrot.slane %v4125_v3, 9  ;;  %6299 = vmatpush.bf16.msrb.mxu0 %v9911_v43  ;;  %v4697_v49 = vrot.slane %v11742_v14, 4 }
 0x29f   : > { %v4699_v33 = vshrl.u32 %v4614_v44, 16  ;;  %v4519_v46 = vadd.f32 %v11594_v50, %v4483_v37  ;;  %v5233_v29 = vunpack.c.l.b16 %v5105_v57  ;;  %v4702_v61 = vshll.u32 %v4614_v44, 16  ;;  %v11771_v47 = vpop.f32.mrf.mxu0  ;;  %v9942_v57 = vld [vmem:[#allocation8 + $0xe0] sm:$0xff]  ;;  %v5076_v14 = vld [vmem:[#allocation2 + $0x24] sm:$0xf]  ;;  %v9900_v15 = vld [vmem:[#allocation8 + $0x10] sm:$0xff] }
 0x2a0   : > { %v3932_v51 = vpop.f32.mrf.mxu2  ;;  %v5585_v30 = vpack.c.b16 %v5157_v53, %v5569_v36  ;;  %v4248_v44 = vrot.slane %v4246_v26, 4  ;;  %v4249_v37 = vrot.slane %v11736_v25, 5  ;;  %v9910_v40 = vld [vmem:[#allocation8 + $0x60] sm:$0xff]  ;;  %v3734_v43 = vshrl.u32 %v11753_v22, 16  ;;  %6026 = vmatpush.bf16.msrb.mxu2 %v9942_v57 }
 0x2a1   : > { %v4701_v62 = vrot.slane %v4699_v33, 7  ;;  %v4551_v39 = vmax.f32 %v4519_v46, 0.0  ;;  %v4022_v0 = vadd.f32 %v4021_v59, %v3932_v51  ;;  %v11773_v35 = vpack.c.b16 %v5233_v29, %v5233_v29  ;;  %v9902_v33 = vld [vmem:[#allocation8 + $0x20] sm:$0xff] }
 0x2a2   : > { %v5709_v27 = vrot.slane %v5585_v30, 1  ;;  %v10357_v46 = vld [vmem:[%s10741_s28 + $0x24] sm:$0xf]  ;;  %4459 = vmatmul.bf16.gmra.mxu0 %v4319_v12  ;;  %v3738_v12 = vrot.slane %v3736_v11, 1  ;;  %v3741_v30 = vshll.u32 %v11769_v16, 16  ;;  %6211 = vmatpush.bf16.msrb.mxu3 %v9902_v33  ;;  %v5156_v11 = vunpack.c.l.b16 %v5076_v14 }
 0x2a3   : > { %v4704_v36 = vor.u32 %v4702_v61, %v4701_v62  ;;  %v4706_v3 = vrot.slane %v4701_v62, 4  ;;  %v4583_v13 = vadd.f32 %v4551_v39, %v876_v8  ;;  %v4088_v55 = vadd.f32 %v4022_v0, %v11448_v18  ;;  %4063 = vmatmul.bf16.gmra.mxu3 %v3732_v52  ;;  %6300 = vmatpush.bf16.msrb.mxu0 %v9910_v40  ;;  %v9941_v39 = vld [vmem:[#allocation8 + $0xd8] sm:$0xff]  ;;  %v4986_v16 = vld [vmem:[#allocation2 + $0x3c] sm:$0xf] }
 0x2a4   : > { %v877_v51 = vunpack.c.l.bf16 %v10357_v46  ;;  %v5710_v29 = vrot.slane %v11773_v35, 1  ;;  %v4247_v62 = vsel %vm11479_vm13, %v9306_v42, %v4246_v26  ;;  %v9901_v52 = vld [vmem:[#allocation8 + $0x18] sm:$0xff]  ;;  %6027 = vmatpush.bf16.msrb.mxu2 %v9941_v39  ;;  %v3739_v33 = vor.u32 %v3738_v12, %v3734_v43  ;;  %v9906_v43 = vld [vmem:[#allocation8 + $0x40] sm:$0xff] }
 0x2a5   : > { %v4705_v25 = vsel %vm10783_vm8, %v4697_v49, %v4704_v36  ;;  %v4984_v61 = vsel %vm10752_vm3, %v4706_v3, %v4983_v56  ;;  %v4615_v59 = vpack.c.bf16 %v4583_v13, %v4583_v13  ;;  %v4484_v8 = vadd.f32 %v11744_v19, %v4088_v55  ;;  %3974 = vmatmul.bf16.gmra.mxu2 %v11692_v7  ;;  %v9951_v19 = vld [vmem:[#allocation8 + $0x128] sm:$0xff]  ;;  %v9909_v49 = vld [vmem:[#allocation8 + $0x58] sm:$0xff] }
 0x2a6   : > { %4985 = vst [vmem:[#allocation2 + $0x38] sm:$0x1] %v4984_v61  ;;  %v5711_v18 = vsel %vm1525_vm9, %v5709_v27, %v5710_v29  ;;  %v4250_v7 = vsel %vm11479_vm13, %v4248_v44, %v4249_v37  ;;  %v4024_v36 = vpop.f32.mrf.mxu3  ;;  %v11794_v26 = vld [vmem:[#allocation2 + $0xd4] sm:$0x1]  ;;  %7332 = vmatpush.bf16.msrb.mxu1 %v9951_v19  ;;  %v11800_v44 = vld [vmem:[#allocation2 + $0xd0] sm:$0xf]  ;;  %v11806_v55 = vpack.c.b16 %v5157_v53, %v5156_v11  ;;  %v4302_v29 = vunpack.c.l.b16 %v4247_v62 }
 0x2a7   : > { %4982 = vst [vmem:[#allocation2 + $0x34] sm:$0xf] %v4705_v25  ;;  %v4708_v0 = vshrl.u32 %v4615_v59, 16  ;;  %v4520_v56 = vadd.f32 %v11594_v50, %v4484_v8  ;;  %5957 = vmatmul.bf16.gmra.mxu1 %v5711_v18  ;;  %v4711_v27 = vshll.u32 %v4615_v59, 16  ;;  %v11798_v13 = vpop.f32.mrf.mxu0  ;;  %v11802_v37 = vld [vmem:[#allocation2 + $0xcc] sm:$0xe]  ;;  %v4303_v14 = vunpack.c.l.b16 %v4250_v7  ;;  %6301 = vmatpush.bf16.msrb.mxu0 %v9909_v49 }
 0x2a8   : > { %v3935_v57 = vpop.f32.mrf.mxu2  ;;  %v3743_v46 = vrot.slane %v3741_v30, 1  ;;  %v11808_v25 = vld [vmem:[#allocation2 + $0xcc] sm:$0xff]  ;;  %6212 = vmatpush.bf16.msrb.mxu3 %v9901_v52  ;;  %v10358_v53 = vld [vmem:[%s10741_s28 + $0x28] sm:$0xf]  ;;  %v5301_v12 = vshll.u32 %v11806_v55, 16 }
 0x2a9   : > { %v11796_v42 = vrot.slane %v4708_v0, 7  ;;  %v4552_v40 = vmax.f32 %v4520_v56, 0.0  ;;  %v4025_v3 = vadd.f32 %v4024_v36, %v3935_v57  ;;  %v9940_v61 = vld [vmem:[#allocation8 + $0xd0] sm:$0xff]  ;;  %v3548_v0 = vunpack.c.l.b16 %v11794_v26  ;;  %v10208_v19 = vld [vmem:[#allocation2 + $0x30] sm:$0xe]  ;;  %v9939_v36 = vld [vmem:[#allocation8 + $0xc8] sm:$0xff] }
 0x2aa   : > { %v9908_v59 = vld [vmem:[#allocation8 + $0x50] sm:$0xff]  ;;  %v878_v56 = vunpack.c.l.bf16 %v10358_v53  ;;  %6028 = vmatpush.bf16.msrb.mxu2 %v9940_v61  ;;  %v3744_v52 = vsel %vm1092_vm10, %v3739_v33, %v3743_v46  ;;  %v4320_v49 = vpack.c.b16 %v4303_v14, %v4302_v29  ;;  %v3748_v57 = vshll.u32 %v11808_v25, 16 }
 0x2ab   : > { %v4713_v8 = vor.u32 %v4711_v27, %v11796_v42  ;;  %v4584_v18 = vadd.f32 %v4552_v40, %v877_v51  ;;  %v4089_v39 = vadd.f32 %v4025_v3, %v11456_v20  ;;  %6302 = vmatpush.bf16.msrb.mxu0 %v9908_v59  ;;  %v11823_v61 = vpack.c.b16 %v3548_v0, %v3548_v0 }
 0x2ac   : > { %6213 = vmatpush.bf16.msrb.mxu3 %v9900_v15  ;;  %v5299_v33 = vshrl.u32 %v11806_v55, 16  ;;  %v5303_v46 = vrot.slane %v5301_v12, 1  ;;  %v5306_v29 = vshll.u32 %v11773_v35, 16  ;;  %v4714_v15 = vrot.slane %v11796_v42, 4 }
 0x2ad   : > { %v4987_v30 = vsel %vm10775_vm7, %v4713_v8, %v4986_v16  ;;  %v4616_v62 = vpack.c.bf16 %v4584_v18, %v4584_v18  ;;  %v4485_v7 = vadd.f32 %v11771_v47, %v4089_v39  ;;  %v5106_v51 = vld [vmem:[#allocation2 + $0x38] sm:$0x1]  ;;  %v9899_v47 = vld [vmem:[#allocation8 + $0x8] sm:$0xff]  ;;  %v13143_v42 = vrot.slane %v11800_v44, 5 }
 0x2ae   : > { %4988 = vst [vmem:[#allocation2 + $0x3c] sm:$0xf] %v4987_v30  ;;  %v10207_v11 = vld [vmem:[#allocation2 + $0x30] sm:$0xf0]  ;;  %v5234_v27 = vunpack.c.l.b16 %v5106_v51  ;;  %v9907_v8 = vld [vmem:[#allocation8 + $0x48] sm:$0xff]  ;;  %v4026_v39 = vpop.f32.mrf.mxu3  ;;  %6029 = vmatpush.bf16.msrb.mxu2 %v9939_v36  ;;  %v5304_v36 = vor.u32 %v5303_v46, %v5299_v33 }
 0x2af   : > { %v4716_v40 = vshrl.u32 %v4616_v62, 16  ;;  %v4521_v16 = vadd.f32 %v11594_v50, %v4485_v7  ;;  %v10209_v3 = vor.u32 %v10208_v19, %v10207_v11  ;;  %v4719_v59 = vshll.u32 %v4616_v62, 16  ;;  %v4990_v30 = vld [vmem:[#allocation2 + $0x44] sm:$0x1]  ;;  %v4425_v0 = vpop.f32.mrf.mxu0  ;;  %6303 = vmatpush.bf16.msrb.mxu0 %v9907_v8  ;;  %v9898_v62 = vld [vmem:[#allocation8] sm:$0xff] }
 0x2b0   : > { %v3937_v18 = vpop.f32.mrf.mxu2  ;;  %v11825_v53 = vpack.c.b16 %v5234_v27, %v5234_v27  ;;  %v9938_v27 = vld [vmem:[#allocation8 + $0xc0] sm:$0xff]  ;;  %6214 = vmatpush.bf16.msrb.mxu3 %v9899_v47  ;;  %v5308_v8 = vrot.slane %v5306_v29, 1 }
 0x2b1   : > { %v4718_v14 = vrot.slane %v4716_v40, 7  ;;  %v4553_v7 = vmax.f32 %v4521_v16, 0.0  ;;  %v4027_v51 = vadd.f32 %v4026_v39, %v3937_v18  ;;  %v5714_v19 = vrot.slane %v10209_v3, 1 }
 0x2b2   : > { %v5715_v11 = vrot.slane %v11825_v53, 1  ;;  %4464 = vmatmul.bf16.gmra.mxu0 %v4320_v49  ;;  %v4256_v16 = vrot.slane %v11794_v26, 5  ;;  %v4255_v3 = vrot.slane %v13143_v42, 4  ;;  %6030 = vmatpush.bf16.msrb.mxu2 %v9938_v27  ;;  %v3746_v26 = vshrl.u32 %v11808_v25, 16 }
 0x2b3   : > { %v4721_v20 = vor.u32 %v4719_v59, %v4718_v14  ;;  %v4723_v17 = vrot.slane %v4718_v14, 4  ;;  %v4585_v12 = vadd.f32 %v4553_v7, %v878_v56  ;;  %v4090_v35 = vadd.f32 %v4027_v51, %v11464_v1  ;;  %4068 = vmatmul.bf16.gmra.mxu3 %v3744_v52  ;;  %6304 = vmatpush.bf16.msrb.mxu0 %v9906_v43 }
 0x2b4   : > { %v5716_v40 = vsel %vm1525_vm9, %v5714_v19, %v5715_v11  ;;  %v3750_v49 = vrot.slane %v3748_v57, 1  ;;  %v11844_v39 = vsel %vm1092_vm10, %v5304_v36, %v5308_v8  ;;  %6215 = vmatpush.bf16.msrb.mxu3 %v9898_v62  ;;  %v13144_v52 = vmov %v13143_v42 }
 0x2b5   : > { %v4722_v18 = vsel %vm10783_vm8, %v4714_v15, %v4721_v20  ;;  %v4991_v56 = vsel %vm10752_vm3, %v4723_v17, %v4990_v30  ;;  %v4617_v1 = vpack.c.bf16 %v4585_v12, %v4585_v12  ;;  %v4486_v47 = vadd.f32 %v11798_v13, %v4090_v35  ;;  %3979 = vmatmul.bf16.gmra.mxu2 %v11753_v22  ;;  %v10359_v20 = vld [vmem:[%s10741_s28 + $0x2c] sm:$0xf]  ;;  %v5080_v36 = vld [vmem:[#allocation2 + $0x3c] sm:$0xf] }
 0x2b6   : > { %4989 = vst [vmem:[#allocation2 + $0x40] sm:$0xf] %v4722_v18  ;;  %v879_v46 = vunpack.c.l.bf16 %v10359_v20  ;;  %v3753_v13 = vshll.u32 %v11823_v61, 16  ;;  %v4029_v29 = vpop.f32.mrf.mxu3  ;;  %v13145_v57 = vrot.slane %v11802_v37, 9  ;;  %v4257_v14 = vsel %vm11479_vm13, %v4255_v3, %v4256_v16  ;;  %v4993_v61 = vld [vmem:[#allocation2 + $0x48] sm:$0xf] }
 0x2b7   : > { %4992 = vst [vmem:[#allocation2 + $0x44] sm:$0x1] %v4991_v56  ;;  %v4725_v33 = vshrl.u32 %v4617_v1, 16  ;;  %v4522_v17 = vadd.f32 %v11594_v50, %v4486_v47  ;;  %5962 = vmatmul.bf16.gmra.mxu1 %v5716_v40  ;;  %v4728_v30 = vshll.u32 %v4617_v1, 16  ;;  %v4427_v51 = vpop.f32.mrf.mxu0  ;;  %v3751_v15 = vor.u32 %v3750_v49, %v3746_v26  ;;  %v5507_v37 = vld [vmem:[#allocation2 + $0x3c] sm:$0xe] }
 0x2b8   : > { %v3940_v22 = vpop.f32.mrf.mxu2  ;;  %v4254_v43 = vsel %vm11479_vm13, %v13145_v57, %v13144_v52  ;;  %v3755_v27 = vrot.slane %v3753_v13, 1  ;;  %v4305_v35 = vunpack.c.l.b16 %v4257_v14  ;;  %v10360_v3 = vld [vmem:[%s10741_s28 + $0x30] sm:$0xf]  ;;  %v5571_v1 = vunpack.c.l.b16 %v5507_v37 }
 0x2b9   : > { %v4727_v59 = vrot.slane %v4725_v33, 7  ;;  %v4554_v7 = vmax.f32 %v4522_v17, 0.0  ;;  %v4030_v50 = vadd.f32 %v4029_v29, %v3940_v22  ;;  %v4304_v12 = vunpack.c.l.b16 %v4254_v43 }
 0x2ba   : > { %v880_v8 = vunpack.c.l.bf16 %v10360_v3  ;;  %v5160_v47 = vunpack.c.l.b16 %v5080_v36  ;;  %v3756_v33 = vsel %vm1092_vm10, %v3751_v15, %v3755_v27 }
 0x2bb   : > { %v4730_v19 = vor.u32 %v4728_v30, %v4727_v59  ;;  %v4586_v11 = vadd.f32 %v4554_v7, %v879_v46  ;;  %v4091_v44 = vadd.f32 %v4030_v50, %v11471_v32  ;;  %v11864_v32 = vld [vmem:[%s13060_s2] ss:$0 sm:$0xff]  ;;  %v4321_v22 = vpack.c.b16 %v4305_v35, %v4304_v12 }
 0x2bc   : > { %v4731_v50 = vrot.slane %v4727_v59, 4 }
 0x2bd   : > { %v4994_v62 = vsel %vm10775_vm7, %v4730_v19, %v4993_v61  ;;  %v4618_v40 = vpack.c.bf16 %v4586_v11, %v4586_v11  ;;  %v4487_v16 = vadd.f32 %v4425_v0, %v4091_v44  ;;  %v5081_v42 = vld [vmem:[#allocation2 + $0x40] sm:$0xf]  ;;  %v4997_v61 = vld [vmem:[#allocation2 + $0x50] sm:$0x1] }
 0x2be   : > { %4995 = vst [vmem:[#allocation2 + $0x48] sm:$0xf] %v4994_v62  ;;  %v5107_v18 = vld [vmem:[#allocation2 + $0x44] sm:$0x1]  ;;  %v5161_v56 = vunpack.c.l.b16 %v5081_v42  ;;  %v4031_v13 = vpop.f32.mrf.mxu3 }
 0x2bf   : > { %v4733_v26 = vshrl.u32 %v4618_v40, 16  ;;  %v4523_v49 = vadd.f32 %v11864_v32, %v4487_v16  ;;  %v5235_v20 = vunpack.c.l.b16 %v5107_v18  ;;  %v11868_v0 = vld [vmem:[#allocation2] sm:$0xff]   ;;  %v4736_v46 = vshll.u32 %v4618_v40, 16  ;;  %v4430_v30 = vpop.f32.mrf.mxu0 }
 0x2c0   : > { %v3942_v17 = vpop.f32.mrf.mxu2  ;;  %v5587_v29 = vpack.c.b16 %v5161_v56, %v5571_v1  ;;  %v11870_v52 = vpack.c.b16 %v5161_v56, %v5160_v47  ;;  %v5265_v15 = vshll.u32 %v11868_v0, 16  ;;  %v10362_v1 = vld [vmem:[%s10741_s28 + $0x34] sm:$0xf] }
 0x2c1   : > { %v4735_v57 = vrot.slane %v4733_v26, 7  ;;  %v4555_v43 = vmax.f32 %v4523_v49, 0.0  ;;  %v4032_v14 = vadd.f32 %v4031_v13, %v3942_v17  ;;  %v5251_v7 = vpack.c.b16 %v5235_v20, %v5235_v20  ;;  %v9950_v49 = vld [vmem:[#allocation8 + $0x120] sm:$0xff] }
 0x2c2   : > { %v5719_v19 = vrot.slane %v5587_v29, 1  ;;  %v5325_v11 = vshll.u32 %v11870_v52, 16  ;;  %4469 = vmatmul.bf16.gmra.mxu0 %v4321_v22  ;;  %v5323_v35 = vshrl.u32 %v11870_v52, 16  ;;  %v881_v47 = vunpack.c.l.bf16 %v10362_v1  ;;  %7333 = vmatpush.bf16.msrb.mxu1 %v9950_v49 }
 0x2c3   : > { %v4738_v44 = vor.u32 %v4736_v46, %v4735_v57  ;;  %v4740_v27 = vrot.slane %v4735_v57, 4  ;;  %v4587_v37 = vadd.f32 %v4555_v43, %v880_v8  ;;  %v4092_v36 = vadd.f32 %v4032_v14, %v11477_v41  ;;  %4073 = vmatmul.bf16.gmra.mxu3 %v3756_v33  ;;  %v5000_v14 = vld [vmem:[#allocation2 + $0x54] sm:$0xf] }
 0x2c4   : > { %v5720_v12 = vrot.slane %v5251_v7, 1  ;;  %v5327_v62 = vrot.slane %v5325_v11, 1  ;;  %v5330_v40 = vshll.u32 %v5251_v7, 16  ;;  %v5267_v17 = vrot.slane %v5265_v15, 1 }
 0x2c5   : > { %v4739_v59 = vsel %vm10783_vm8, %v4731_v50, %v4738_v44  ;;  %v4998_v16 = vsel %vm10752_vm3, %v4740_v27, %v4997_v61  ;;  %v4619_v42 = vpack.c.bf16 %v4587_v37, %v4587_v37  ;;  %v4488_v3 = vadd.f32 %v4427_v51, %v4092_v36  ;;  %3984 = vmatmul.bf16.gmra.mxu2 %v11808_v25 }
 0x2c6   : > { %4999 = vst [vmem:[#allocation2 + $0x50] sm:$0x1] %v4998_v16  ;;  %v5721_v41 = vsel %vm1525_vm9, %v5719_v19, %v5720_v12  ;;  %v5328_v8 = vor.u32 %v5327_v62, %v5323_v35  ;;  %v5332_v18 = vrot.slane %v5330_v40, 1  ;;  %v4034_v46 = vpop.f32.mrf.mxu3  ;;  %v5263_v51 = vshrl.u32 %v11868_v0, 16  ;;  %v10211_v12 = vld [vmem:[#allocation2 + $0x48] sm:$0xe] }
 0x2c7   : > { %4996 = vst [vmem:[#allocation2 + $0x4c] sm:$0xf] %v4739_v59  ;;  %v4742_v56 = vshrl.u32 %v4619_v42, 16  ;;  %v4524_v26 = vadd.f32 %v11864_v32, %v4488_v3  ;;  %5967 = vmatmul.bf16.gmra.mxu1 %v5721_v41  ;;  %v5270_v25 = vshll.u32 %v11576_v63, 16  ;;  %v4745_v22 = vshll.u32 %v4619_v42, 16  ;;  %v4432_v43 = vpop.f32.mrf.mxu0 }
 0x2c8   : > { %v3945_v20 = vpop.f32.mrf.mxu2  ;;  %v11887_v33 = vsel %vm1092_vm10, %v5328_v8, %v5332_v18  ;;  %v5268_v19 = vor.u32 %v5267_v17, %v5263_v51  ;;  %v10363_v62 = vld [vmem:[%s10741_s28 + $0x38] sm:$0xf] }
 0x2c9   : > { %v4744_v13 = vrot.slane %v4742_v56, 7  ;;  %v4556_v29 = vmax.f32 %v4524_v26, 0.0  ;;  %v4035_v57 = vadd.f32 %v4034_v46, %v3945_v20  ;;  %v5272_v11 = vrot.slane %v5270_v25, 1  ;;  %v5004_v26 = vld [vmem:[#allocation2 + $0x5c] sm:$0x1] }
 0x2ca   : > { %v882_v40 = vunpack.c.l.bf16 %v10363_v62 }
 0x2cb   : > { %v4747_v7 = vor.u32 %v4745_v22, %v4744_v13  ;;  %v4588_v50 = vadd.f32 %v4556_v29, %v881_v47  ;;  %v4093_v61 = vadd.f32 %v4035_v57, %v11488_v34  ;;  %v5273_v41 = vsel %vm1092_vm10, %v5268_v19, %v5272_v11  ;;  %v9914_v22 = vld [vmem:[#allocation2 + $0xc] sm:$0xff] }
 0x2cc   : > { %v4748_v47 = vrot.slane %v4744_v13, 4 }
 0x2cd   : > { %v5001_v63 = vsel %vm10775_vm7, %v4747_v7, %v5000_v14  ;;  %v4620_v15 = vpack.c.bf16 %v4588_v50, %v4588_v50  ;;  %v4489_v44 = vadd.f32 %v4430_v30, %v4093_v61  ;;  %v5108_v27 = vld [vmem:[#allocation2 + $0x50] sm:$0x1]  ;;  %v10364_v61 = vld [vmem:[%s10741_s28 + $0x3c] sm:$0xf] }
 0x2ce   : > { %5002 = vst [vmem:[#allocation2 + $0x54] sm:$0xf] %v5001_v63  ;;  %v10210_v37 = vld [vmem:[#allocation2 + $0x48] sm:$0xf0]  ;;  %v5236_v36 = vunpack.c.l.b16 %v5108_v27  ;;  %v4036_v34 = vpop.f32.mrf.mxu3 }
 0x2cf   : > { %v4750_v35 = vshrl.u32 %v4620_v15, 16  ;;  %v4525_v59 = vadd.f32 %v11864_v32, %v4489_v44  ;;  %v10212_v16 = vor.u32 %v10211_v12, %v10210_v37  ;;  %v4753_v18 = vshll.u32 %v4620_v15, 16  ;;  %v4435_v1 = vpop.f32.mrf.mxu0  ;;  %v5007_v12 = vld [vmem:[#allocation2 + $0x60] sm:$0xf] }
 0x2d0   : > { %v3947_v42 = vpop.f32.mrf.mxu2  ;;  %v11894_v3 = vpack.c.b16 %v5236_v36, %v5236_v36 }
 0x2d1   : > { %v4752_v8 = vrot.slane %v4750_v35, 7  ;;  %v4557_v30 = vmax.f32 %v4525_v59, 0.0  ;;  %v4037_v56 = vadd.f32 %v4036_v34, %v3947_v42  ;;  %v5724_v49 = vrot.slane %v10212_v16, 1  ;;  %v11908_v16 = vld [vmem:[#allocation2 + $0xc] sm:$0xff]  }
 0x2d2   : > { %v5725_v20 = vrot.slane %v11894_v3, 1  ;;  %6305 = vmatmul.bf16.vlgmr.msrb.gmra.mxu0 %v5273_v41 }
 0x2d3   : > { %v4755_v46 = vor.u32 %v4753_v18, %v4752_v8  ;;  %v4757_v51 = vrot.slane %v4752_v8, 4  ;;  %v4589_v17 = vadd.f32 %v4557_v30, %v882_v40  ;;  %v4094_v25 = vadd.f32 %v4037_v56, %v11492_v28  ;;  %6216 = vmatmul.bf16.vlgmr.msrb.gmra.mxu3 %v11868_v0  ;;  %v11912_v18 = vld [vmem:[#allocation2 + $0x14] sm:$0x1] }
 0x2d4   : > { %v5726_v29 = vsel %vm1525_vm9, %v5724_v49, %v5725_v20  ;;  %v883_v28 = vunpack.c.l.bf16 %v10364_v61 }
 0x2d5   : > { %v4756_v57 = vsel %vm10783_vm8, %v4748_v47, %v4755_v46  ;;  %v5005_v13 = vsel %vm10752_vm3, %v4757_v51, %v5004_v26  ;;  %v4621_v14 = vpack.c.bf16 %v4589_v17, %v4589_v17  ;;  %v4490_v7 = vadd.f32 %v4432_v43, %v4094_v25  ;;  %6031 = vmatmul.bf16.vlgmr.msrb.gmra.mxu2 %v9914_v22  ;;  %v6434_v43 = vld [vmem:[#allocation2 + $0xc] sm:$0xe]  ;;  %v5509_v40 = vld [vmem:[#allocation2 + $0x54] sm:$0xe]  ;;  %v10365_v46 = vld [vmem:[%s10741_s28 + $0x40] sm:$0xf] }
 0x2d6   : > { %5003 = vst [vmem:[#allocation2 + $0x58] sm:$0xf] %v4756_v57  ;;  %v4039_v63 = vpop.f32.mrf.mxu3  ;;  %v5084_v59 = vld [vmem:[#allocation2 + $0x54] sm:$0xf]  ;;  %v6594_v30 = vunpack.c.l.b16 %v6434_v43  ;;  %v5573_v26 = vunpack.c.l.b16 %v5509_v40  ;;  %v884_v51 = vunpack.c.l.bf16 %v10365_v46  ;;  %v11924_v40 = vld [vmem:[#allocation2 + $0x18] sm:$0xff]  }
 0x2d7   : > { %5006 = vst [vmem:[#allocation2 + $0x5c] sm:$0x1] %v5005_v13  ;;  %v4759_v50 = vshrl.u32 %v4621_v14, 16  ;;  %v4526_v19 = vadd.f32 %v11864_v32, %v4490_v7  ;;  %5972 = vmatmul.bf16.gmra.mxu1 %v5726_v29  ;;  %v4762_v44 = vshll.u32 %v4621_v14, 16  ;;  %v4437_v36 = vpop.f32.mrf.mxu0  ;;  %v5164_v49 = vunpack.c.l.b16 %v5084_v59 }
 0x2d8   : > { %v3950_v11 = vpop.f32.mrf.mxu2  ;;  %v6500_v14 = vunpack.c.l.b16 %v11912_v18 }
 0x2d9   : > { %v4761_v15 = vrot.slane %v4759_v50, 7  ;;  %v4558_v27 = vmax.f32 %v4526_v19, 0.0  ;;  %v4040_v37 = vadd.f32 %v4039_v63, %v3950_v11  ;;  %v5011_v63 = vld [vmem:[#allocation2 + $0x68] sm:$0x1] }
 0x2db   : > { %v4764_v35 = vor.u32 %v4762_v44, %v4761_v15  ;;  %v4590_v62 = vadd.f32 %v4558_v27, %v883_v28  ;;  %v4095_v0 = vadd.f32 %v4040_v37, %v11499_v38  ;;  %v6499_v38 = vunpack.c.h.b16 %v11908_v16 }
 0x2dc   : > { %v4765_v11 = vrot.slane %v4761_v15, 4 }
 0x2dd   : > { %v5008_v42 = vsel %vm10775_vm7, %v4764_v35, %v5007_v12  ;;  %v4622_v34 = vpack.c.bf16 %v4590_v62, %v4590_v62  ;;  %v4491_v41 = vadd.f32 %v4435_v1, %v4095_v0  ;;  %v5085_v8 = vld [vmem:[#allocation2 + $0x58] sm:$0xf]  ;;  %v6610_v37 = vpack.c.b16 %v6499_v38, %v6594_v30 }
 0x2de   : > { %5009 = vst [vmem:[#allocation2 + $0x60] sm:$0xf] %v5008_v42  ;;  %v5109_v56 = vld [vmem:[#allocation2 + $0x5c] sm:$0x1]  ;;  %v5165_v47 = vunpack.c.l.b16 %v5085_v8  ;;  %v4041_v1 = vpop.f32.mrf.mxu3 }
 0x2df   : > { %v4767_v20 = vshrl.u32 %v4622_v34, 16  ;;  %v4527_v17 = vadd.f32 %v11864_v32, %v4491_v41  ;;  %v5237_v25 = vunpack.c.l.b16 %v5109_v56  ;;  %v4770_v22 = vshll.u32 %v4622_v34, 16  ;;  %v4440_v28 = vpop.f32.mrf.mxu0  ;;  %v9915_v0 = vld [vmem:[#allocation2 + $0x18] sm:$0xff] }
 0x2e0   : > { %v3952_v29 = vpop.f32.mrf.mxu2  ;;  %v5589_v57 = vpack.c.b16 %v5165_v47, %v5573_v26  ;;  %v11917_v13 = vpack.c.b16 %v5165_v47, %v5164_v49  ;;  %v10366_v49 = vld [vmem:[%s10741_s28 + $0x44] sm:$0xf] }
 0x2e1   : > { %v4769_v7 = vrot.slane %v4767_v20, 7  ;;  %v4559_v50 = vmax.f32 %v4527_v17, 0.0  ;;  %v4042_v61 = vadd.f32 %v4041_v1, %v3952_v29  ;;  %v5253_v19 = vpack.c.b16 %v5237_v25, %v5237_v25 }
 0x2e2   : > { %v5729_v44 = vrot.slane %v5589_v57, 1  ;;  %v5349_v27 = vshll.u32 %v11917_v13, 16  ;;  %6310 = vmatmul.bf16.gmra.mxu0 %v11749_v6  ;;  %v5347_v15 = vshrl.u32 %v11917_v13, 16  ;;  %v5289_v6 = vshll.u32 %v11924_v40, 16 }
 0x2e3   : > { %v4772_v12 = vor.u32 %v4770_v22, %v4769_v7  ;;  %v4774_v43 = vrot.slane %v4769_v7, 4  ;;  %v4591_v35 = vadd.f32 %v4559_v50, %v884_v51  ;;  %v4096_v62 = vadd.f32 %v4042_v61, %v11503_v45  ;;  %6221 = vmatmul.bf16.gmra.mxu3 %v11697_v2  ;;  %v9949_v51 = vld [vmem:[#allocation8 + $0x118] sm:$0xff] }
 0x2e4   : > { %v5730_v59 = vrot.slane %v5253_v19, 1  ;;  %v5351_v42 = vrot.slane %v5349_v27, 1  ;;  %v5354_v34 = vshll.u32 %v5253_v19, 16  ;;  %v885_v20 = vunpack.c.l.bf16 %v10366_v49  ;;  %7334 = vmatpush.bf16.msrb.mxu1 %v9949_v51  ;;  %v5014_v19 = vld [vmem:[#allocation2 + $0x6c] sm:$0xf] }
 0x2e5   : > { %v4773_v41 = vsel %vm10783_vm8, %v4765_v11, %v4772_v12  ;;  %v5012_v8 = vsel %vm10752_vm3, %v4774_v43, %v5011_v63  ;;  %v4623_v18 = vpack.c.bf16 %v4591_v35, %v4591_v35  ;;  %v4492_v30 = vadd.f32 %v4437_v36, %v4096_v62  ;;  %6036 = vmatmul.bf16.gmra.mxu2 %v9915_v0 }
 0x2e6   : > { %5013 = vst [vmem:[#allocation2 + $0x68] sm:$0x1] %v5012_v8  ;;  %v5731_v45 = vsel %vm1525_vm9, %v5729_v44, %v5730_v59  ;;  %v5352_v56 = vor.u32 %v5351_v42, %v5347_v15  ;;  %v5356_v47 = vrot.slane %v5354_v34, 1  ;;  %v4044_v25 = vpop.f32.mrf.mxu3  ;;  %v5294_v22 = vshll.u32 %v11707_v24, 16 }
 0x2e7   : > { %5010 = vst [vmem:[#allocation2 + $0x64] sm:$0xf] %v4773_v41  ;;  %v4776_v26 = vshrl.u32 %v4623_v18, 16  ;;  %v4528_v46 = vadd.f32 %v11864_v32, %v4492_v30  ;;  %5977 = vmatmul.bf16.gmra.mxu1 %v5731_v45  ;;  %v4779_v17 = vshll.u32 %v4623_v18, 16  ;;  %v11941_v2 = vpack.c.b16 %v6500_v14, %v6500_v14  ;;  %v4442_v50 = vpop.f32.mrf.mxu0  ;;  %v10214_v41 = vld [vmem:[#allocation2 + $0x60] sm:$0xe] }
 0x2e8   : > { %v3955_v36 = vpop.f32.mrf.mxu2  ;;  %v11939_v29 = vsel %vm1092_vm10, %v5352_v56, %v5356_v47  ;;  %v6629_v61 = vshll.u32 %v6610_v37, 16  ;;  %v5291_v11 = vrot.slane %v5289_v6, 1  ;;  %v5287_v12 = vshrl.u32 %v11924_v40, 16  ;;  %v10367_v30 = vld [vmem:[%s10741_s28 + $0x48] sm:$0xf] }
 0x2e9   : > { %v4778_v1 = vrot.slane %v4776_v26, 7  ;;  %v4560_v57 = vmax.f32 %v4528_v46, 0.0  ;;  %v4045_v7 = vadd.f32 %v4044_v25, %v3955_v36  ;;  %v5296_v24 = vrot.slane %v5294_v22, 1  ;;  %v5018_v22 = vld [vmem:[#allocation2 + $0x74] sm:$0x1] }
 0x2ea   : > { %v6634_v43 = vshll.u32 %v11941_v2, 16  ;;  %v6627_v14 = vshrl.u32 %v6610_v37, 16  ;;  %v6631_v35 = vrot.slane %v6629_v61, 1  ;;  %v5292_v8 = vor.u32 %v5291_v11, %v5287_v12  ;;  %v9916_v12 = vld [vmem:[#allocation2 + $0x24] sm:$0xff] }
 0x2eb   : > { %v4781_v63 = vor.u32 %v4779_v17, %v4778_v1  ;;  %v4592_v44 = vadd.f32 %v4560_v57, %v885_v20  ;;  %v4097_v27 = vadd.f32 %v4045_v7, %v11510_v23  ;;  %v886_v45 = vunpack.c.l.bf16 %v10367_v30  ;;  %v11955_v57 = vpop.f32.mrf.mxu1  ;;  %v5021_v30 = vld [vmem:[#allocation2 + $0x78] sm:$0xf] }
 0x2ec   : > { %v6632_v23 = vor.u32 %v6631_v35, %v6627_v14  ;;  %v5297_v49 = vsel %vm1092_vm10, %v5292_v8, %v5296_v24  ;;  %v4782_v25 = vrot.slane %v4778_v1, 4 }
 0x2ed   : > { %v5015_v62 = vsel %vm10775_vm7, %v4781_v63, %v5014_v19  ;;  %v4624_v0 = vpack.c.bf16 %v4592_v44, %v4592_v44  ;;  %v4493_v59 = vadd.f32 %v4440_v28, %v4097_v27  ;;  %v5110_v15 = vld [vmem:[#allocation2 + $0x68] sm:$0x1]  ;;  %v11953_v28 = vrot.slane %v6634_v43, 1 }
 0x2ee   : > { %5016 = vst [vmem:[#allocation2 + $0x6c] sm:$0xf] %v5015_v62  ;;  %v10213_v42 = vld [vmem:[#allocation2 + $0x60] sm:$0xf0]  ;;  %v5238_v34 = vunpack.c.l.b16 %v5110_v15  ;;  %v4046_v47 = vpop.f32.mrf.mxu3  ;;  %v6638_v15 = vshrl.u32 %v11941_v2, 16 }
 0x2ef   : > { %v4784_v18 = vshrl.u32 %v4624_v0, 16  ;;  %v4529_v6 = vadd.f32 %v11864_v32, %v4493_v59  ;;  %v10215_v56 = vor.u32 %v10214_v41, %v10213_v42  ;;  %v4787_v46 = vshll.u32 %v4624_v0, 16  ;;  %v4445_v36 = vpop.f32.mrf.mxu0  ;;  %v10368_v0 = vld [vmem:[%s10741_s28 + $0x4c] sm:$0xf] }
 0x2f0   : > { %v3957_v37 = vpop.f32.mrf.mxu2  ;;  %v11950_v26 = vpack.c.b16 %v5238_v34, %v5238_v34  ;;  %v6637_v19 = vsel %vm1092_vm10, %v6632_v23, %v11953_v28 }
 0x2f1   : > { %v4786_v20 = vrot.slane %v4784_v18, 7  ;;  %v4561_v51 = vmax.f32 %v4529_v6, 0.0  ;;  %v4047_v17 = vadd.f32 %v4046_v47, %v3957_v37  ;;  %v5734_v7 = vrot.slane %v10215_v56, 1 }
 0x2f2   : > { %v5735_v61 = vrot.slane %v11950_v26, 1  ;;  %6315 = vmatmul.bf16.gmra.mxu0 %v5297_v49  ;;  %v6861_v34 = vshll.u32 %v6637_v19, 16  ;;  %v6859_v49 = vshrl.u32 %v6637_v19, 16 }
 0x2f3   : > { %v4789_v11 = vor.u32 %v4787_v46, %v4786_v20  ;;  %v4791_v63 = vrot.slane %v4786_v20, 4  ;;  %v4593_v44 = vadd.f32 %v4561_v51, %v886_v45  ;;  %v4098_v27 = vadd.f32 %v4047_v17, %v11514_v60  ;;  %6226 = vmatmul.bf16.gmra.mxu3 %v11924_v40  ;;  %v11970_v46 = vpop.f32.mrf.mxu1 }
 0x2f4   : > { %v5736_v24 = vsel %vm1525_vm9, %v5734_v7, %v5735_v61  ;;  %v887_v60 = vunpack.c.l.bf16 %v10368_v0  ;;  %v6863_v6 = vrot.slane %v6861_v34, 1  ;;  %v6866_v20 = vshll.u32 %v6638_v15, 16  ;;  %v5025_v34 = vld [vmem:[#allocation2 + $0x80] sm:$0x1] }
 0x2f5   : > { %v4790_v1 = vsel %vm10783_vm8, %v4782_v25, %v4789_v11  ;;  %v5019_v43 = vsel %vm10752_vm3, %v4791_v63, %v5018_v22  ;;  %v4625_v14 = vpack.c.bf16 %v4593_v44, %v4593_v44  ;;  %v4494_v35 = vadd.f32 %v4442_v50, %v4098_v27  ;;  %6041 = vmatmul.bf16.gmra.mxu2 %v9916_v12  ;;  %v5511_v37 = vld [vmem:[#allocation2 + $0x6c] sm:$0xe]  ;;  %v10369_v12 = vld [vmem:[%s10741_s28 + $0x50] sm:$0xf] }
 0x2f6   : > { %5017 = vst [vmem:[#allocation2 + $0x70] sm:$0xf] %v4790_v1  ;;  %v4049_v18 = vpop.f32.mrf.mxu3  ;;  %v5088_v47 = vld [vmem:[#allocation2 + $0x6c] sm:$0xf]  ;;  %v6864_v22 = vor.u32 %v6863_v6, %v6859_v49  ;;  %v5575_v63 = vunpack.c.l.b16 %v5511_v37  ;;  %v888_v19 = vunpack.c.l.bf16 %v10369_v12  ;;  %v6868_v1 = vrot.slane %v6866_v20, 1 }
 0x2f7   : > { %5020 = vst [vmem:[#allocation2 + $0x74] sm:$0x1] %v5019_v43  ;;  %v4793_v62 = vshrl.u32 %v4625_v14, 16  ;;  %v4530_v59 = vadd.f32 %v11864_v32, %v4494_v35  ;;  %5982 = vmatmul.bf16.gmra.mxu1 %v5736_v24  ;;  %v4796_v8 = vshll.u32 %v4625_v14, 16  ;;  %v4447_v50 = vpop.f32.mrf.mxu0  ;;  %v5168_v44 = vunpack.c.l.b16 %v5088_v47 }
 0x2f8   : > { %v3960_v42 = vpop.f32.mrf.mxu2 }
 0x2f9   : > { %v4795_v41 = vrot.slane %v4793_v62, 7  ;;  %v4562_v23 = vmax.f32 %v4530_v59, 0.0  ;;  %v4050_v45 = vadd.f32 %v4049_v18, %v3960_v42  ;;  %v11980_v42 = vsel %vm1092_vm10, %v6864_v22, %v6868_v1 }
 0x2fb   : > { %v4798_v40 = vor.u32 %v4796_v8, %v4795_v41  ;;  %v4594_v56 = vadd.f32 %v4562_v23, %v887_v60  ;;  %v4099_v2 = vadd.f32 %v4050_v45, %v11521_v54  ;;  %v4799_v43 = vrot.slane %v4795_v41, 4 }
 0x2fd   : > { %v5022_v51 = vsel %vm10775_vm7, %v4798_v40, %v5021_v30  ;;  %v4626_v17 = vpack.c.bf16 %v4594_v56, %v4594_v56  ;;  %v5089_v25 = vld [vmem:[#allocation2 + $0x70] sm:$0xf]  ;;  %v4495_v7 = vadd.f32 %v4445_v36, %v4099_v2 }
 0x2fe   : > { %5023 = vst [vmem:[#allocation2 + $0x78] sm:$0xf] %v5022_v51  ;;  %v5111_v61 = vld [vmem:[#allocation2 + $0x74] sm:$0x1]  ;;  %v5169_v11 = vunpack.c.l.b16 %v5089_v25  ;;  %v4051_v59 = vpop.f32.mrf.mxu3  ;;  %v12194_v16 = vld [vmem:[#allocation2 + $0x6c] sm:$0xff]  }
 0x2ff   : > { %v4801_v27 = vshrl.u32 %v4626_v17, 16  ;;  %v5239_v24 = vunpack.c.l.b16 %v5111_v61  ;;  %v4531_v54 = vadd.f32 %v11864_v32, %v4495_v7  ;;  %v4804_v60 = vshll.u32 %v4626_v17, 16  ;;  %v4450_v36 = vpop.f32.mrf.mxu0  ;;  %v9917_v40 = vld [vmem:[#allocation2 + $0x30] sm:$0xff] }
 0x300   : > { %v3962_v14 = vpop.f32.mrf.mxu2  ;;  %v5591_v35 = vpack.c.b16 %v5169_v11, %v5575_v63  ;;  %v11977_v62 = vpack.c.b16 %v5169_v11, %v5168_v44  ;;  %v10370_v63 = vld [vmem:[%s10741_s28 + $0x54] sm:$0xf] }
 0x301   : > { %v4803_v0 = vrot.slane %v4801_v27, 7  ;;  %v5255_v15 = vpack.c.b16 %v5239_v24, %v5239_v24  ;;  %v4563_v8 = vmax.f32 %v4531_v54, 0.0  ;;  %v4052_v23 = vadd.f32 %v4051_v59, %v3962_v14 }
 0x302   : > { %v5739_v18 = vrot.slane %v5591_v35, 1  ;;  %v5373_v41 = vshll.u32 %v11977_v62, 16  ;;  %v5371_v56 = vshrl.u32 %v11977_v62, 16  ;;  %6320 = vmatmul.bf16.gmra.mxu0 %v11844_v39  ;;  %v889_v44 = vunpack.c.l.bf16 %v10370_v63 }
 0x303   : > { %v4806_v30 = vor.u32 %v4804_v60, %v4803_v0  ;;  %v4808_v45 = vrot.slane %v4803_v0, 4  ;;  %v5740_v6 = vrot.slane %v5255_v15, 1  ;;  %v4595_v37 = vadd.f32 %v4563_v8, %v888_v19  ;;  %6231 = vmatmul.bf16.gmra.mxu3 %v11806_v55  ;;  %v9948_v19 = vld [vmem:[#allocation8 + $0x110] sm:$0xff]  ;;  %v5028_v0 = vld [vmem:[#allocation2 + $0x84] sm:$0xf] }
 0x304   : > { %v4100_v47 = vadd.f32 %v4052_v23, %v11525_v10  ;;  %v11985_v49 = vpop.f32.mrf.mxu1  ;;  %v5375_v20 = vrot.slane %v5373_v41, 1  ;;  %v5378_v2 = vshll.u32 %v5255_v15, 16  ;;  %v11994_v10 = vld [vmem:[#allocation2 + $0x30] sm:$0xff]   ;;  %7335 = vmatpush.bf16.msrb.mxu1 %v9948_v19  ;;  %v5318_v60 = vshll.u32 %v11825_v53, 16 }
 0x305   : > { %v4807_v51 = vsel %vm10783_vm8, %v4799_v43, %v4806_v30  ;;  %v5026_v17 = vsel %vm10752_vm3, %v4808_v45, %v5025_v34  ;;  %v5741_v25 = vsel %vm1525_vm9, %v5739_v18, %v5740_v6  ;;  %6046 = vmatmul.bf16.gmra.mxu2 %v9917_v40  ;;  %v4627_v22 = vpack.c.bf16 %v4595_v37, %v4595_v37 }
 0x306   : > { %5027 = vst [vmem:[#allocation2 + $0x80] sm:$0x1] %v5026_v17  ;;  %v4496_v7 = vadd.f32 %v4447_v50, %v4100_v47  ;;  %v5376_v39 = vor.u32 %v5375_v20, %v5371_v56  ;;  %v5380_v61 = vrot.slane %v5378_v2, 1  ;;  %v4054_v24 = vpop.f32.mrf.mxu3  ;;  %v5313_v43 = vshll.u32 %v11994_v10, 16  ;;  %v10217_v56 = vld [vmem:[#allocation2 + $0x78] sm:$0xe] }
 0x307   : > { %5024 = vst [vmem:[#allocation2 + $0x7c] sm:$0xf] %v4807_v51  ;;  %5987 = vmatmul.bf16.gmra.mxu1 %v5741_v25  ;;  %v4810_v11 = vshrl.u32 %v4627_v22, 16  ;;  %v4452_v1 = vpop.f32.mrf.mxu0  ;;  %v4813_v54 = vshll.u32 %v4627_v22, 16  ;;  %v5311_v53 = vshrl.u32 %v11994_v10, 16  ;;  %v5320_v47 = vrot.slane %v5318_v60, 1 }
 0x308   : > { %v4532_v27 = vadd.f32 %v11864_v32, %v4496_v7  ;;  %v3965_v12 = vpop.f32.mrf.mxu2  ;;  %v12000_v50 = vsel %vm1092_vm10, %v5376_v39, %v5380_v61  ;;  %v5315_v18 = vrot.slane %v5313_v43, 1  ;;  %v10371_v2 = vld [vmem:[%s10741_s28 + $0x58] sm:$0xf] }
 0x309   : > { %v4812_v55 = vrot.slane %v4810_v11, 7  ;;  %v4055_v35 = vadd.f32 %v4054_v24, %v3965_v12  ;;  %v5032_v12 = vld [vmem:[#allocation2 + $0x8c] sm:$0x1]  ;;  %v9918_v24 = vld [vmem:[#allocation2 + $0x3c] sm:$0xff] }
 0x30a   : > { %v4564_v14 = vmax.f32 %v4532_v27, 0.0 }
 0x30b   : > { %v4815_v59 = vor.u32 %v4813_v54, %v4812_v55  ;;  %v4101_v34 = vadd.f32 %v4055_v35, %v11532_v48  ;;  %v890_v48 = vunpack.c.l.bf16 %v10371_v2  ;;  %v4816_v27 = vrot.slane %v4812_v55, 4 }
 0x30c   : > { %v4596_v15 = vadd.f32 %v4564_v14, %v889_v44  ;;  %v12004_v8 = vpop.f32.mrf.mxu1 }
 0x30d   : > { %v5112_v23 = vld [vmem:[#allocation2 + $0x80] sm:$0x1]  ;;  %v5029_v41 = vsel %vm10775_vm7, %v4815_v59, %v5028_v0  ;;  %v4497_v45 = vadd.f32 %v4450_v36, %v4101_v34  ;;  %v5316_v36 = vor.u32 %v5315_v18, %v5311_v53  ;;  %v10372_v18 = vld [vmem:[%s10741_s28 + $0x5c] sm:$0xf] }
 0x30e   : > { %v4628_v30 = vpack.c.bf16 %v4596_v15, %v4596_v15  ;;  %v10216_v6 = vld [vmem:[#allocation2 + $0x78] sm:$0xf0]  ;;  %v5240_v40 = vunpack.c.l.b16 %v5112_v23  ;;  %5030 = vst [vmem:[#allocation2 + $0x84] sm:$0xf] %v5029_v41  ;;  %v4056_v7 = vpop.f32.mrf.mxu3  ;;  %v891_v41 = vunpack.c.l.bf16 %v10372_v18 }
 0x30f   : > { %v10218_v37 = vor.u32 %v10217_v56, %v10216_v6  ;;  %v4533_v51 = vadd.f32 %v11864_v32, %v4497_v45  ;;  %v4455_v39 = vpop.f32.mrf.mxu0  ;;  %v5321_v43 = vsel %vm1092_vm10, %v5316_v36, %v5320_v47 }
 0x310   : > { %v4818_v20 = vshrl.u32 %v4628_v30, 16  ;;  %v3967_v17 = vpop.f32.mrf.mxu2  ;;  %v12011_v25 = vpack.c.b16 %v5240_v40, %v5240_v40  ;;  %v4821_v22 = vshll.u32 %v4628_v30, 16 }
 0x311   : > { %v4565_v11 = vmax.f32 %v4533_v51, 0.0  ;;  %v4057_v63 = vadd.f32 %v4056_v7, %v3967_v17  ;;  %v5744_v19 = vrot.slane %v10218_v37, 1 }
 0x312   : > { %v4820_v61 = vrot.slane %v4818_v20, 7  ;;  %v5745_v44 = vrot.slane %v12011_v25, 1  ;;  %6325 = vmatmul.bf16.gmra.mxu0 %v5321_v43  ;;  %v5035_v20 = vld [vmem:[#allocation2 + $0x90] sm:$0xf] }
 0x313   : > { %v4597_v35 = vadd.f32 %v4565_v11, %v890_v48  ;;  %v4102_v0 = vadd.f32 %v4057_v63, %v11536_v31  ;;  %6236 = vmatmul.bf16.gmra.mxu3 %v11994_v10 }
 0x314   : > { %v4823_v54 = vor.u32 %v4821_v22, %v4820_v61  ;;  %v4825_v14 = vrot.slane %v4820_v61, 4  ;;  %v12016_v60 = vpop.f32.mrf.mxu1  ;;  %v5746_v59 = vsel %vm1525_vm9, %v5744_v19, %v5745_v44 }
 0x315   : > { %6051 = vmatmul.bf16.gmra.mxu2 %v9918_v24  ;;  %v4629_v34 = vpack.c.bf16 %v4597_v35, %v4597_v35  ;;  %v4498_v23 = vadd.f32 %v4452_v1, %v4102_v0  ;;  %v5513_v51 = vld [vmem:[#allocation2 + $0x84] sm:$0xe] }
 0x316   : > { %v4824_v55 = vsel %vm10783_vm8, %v4816_v27, %v4823_v54  ;;  %v5033_v15 = vsel %vm10752_vm3, %v4825_v14, %v5032_v12  ;;  %v4059_v6 = vpop.f32.mrf.mxu3  ;;  %v5577_v63 = vunpack.c.l.b16 %v5513_v51  ;;  %v10373_v27 = vld [vmem:[%s10741_s28 + $0x60] sm:$0xf]  ;;  %v10374_v51 = vld [vmem:[%s10741_s28 + $0x64] sm:$0xf] }
 0x317   : > { %5031 = vst [vmem:[#allocation2 + $0x88] sm:$0xf] %v4824_v55  ;;  %5992 = vmatmul.bf16.gmra.mxu1 %v5746_v59  ;;  %v4827_v31 = vshrl.u32 %v4629_v34, 16  ;;  %v4534_v30 = vadd.f32 %v11864_v32, %v4498_v23  ;;  %v4457_v40 = vpop.f32.mrf.mxu0  ;;  %v4830_v37 = vshll.u32 %v4629_v34, 16  ;;  %v892_v12 = vunpack.c.l.bf16 %v10373_v27  ;;  %v5039_v34 = vld [vmem:[#allocation2 + $0x98] sm:$0x1] }
 0x318   : > { %5034 = vst [vmem:[#allocation2 + $0x8c] sm:$0x1] %v5033_v15  ;;  %v3970_v45 = vpop.f32.mrf.mxu2 }
 0x319   : > { %v4829_v56 = vrot.slane %v4827_v31, 7  ;;  %v4566_v53 = vmax.f32 %v4534_v30, 0.0  ;;  %v4060_v47 = vadd.f32 %v4059_v6, %v3970_v45  ;;  %v9919_v31 = vld [vmem:[#allocation2 + $0x48] sm:$0xff] }
 0x31a   : > { %v13146_v45 = vld [vmem:[#allocation15_spill] sm:$0xff] }
 0x31b   : > { %v4832_v1 = vor.u32 %v4830_v37, %v4829_v56  ;;  %v4598_v2 = vadd.f32 %v4566_v53, %v891_v41  ;;  %v4103_v10 = vadd.f32 %v4060_v47, %v11543_v9  ;;  %v4833_v15 = vrot.slane %v4829_v56, 4 }
 0x31c   : > { %v12027_v48 = vpop.f32.mrf.mxu1 }
 0x31d   : > { %v5036_v17 = vsel %vm10775_vm7, %v4832_v1, %v5035_v20  ;;  %v4630_v22 = vpack.c.bf16 %v4598_v2, %v4598_v2  ;;  %v4499_v7 = vadd.f32 %v4455_v39, %v4103_v10  ;;  %v12050_v2 = vld [vmem:[#allocation2 + $0x48] sm:$0xff]  }
 0x31e   : > { %v12031_v36 = vld [vmem:[#allocation2 + $0x88] sm:$0xf]  ;;  %5037 = vst [vmem:[#allocation2 + $0x90] sm:$0xf] %v5036_v17  ;;  %v4061_v54 = vpop.f32.mrf.mxu3  ;;  %v893_v17 = vunpack.c.l.bf16 %v10374_v51 }
 0x31f   : > { %v5113_v61 = vld [vmem:[#allocation2 + $0x8c] sm:$0x1]  ;;  %v5173_v11 = vunpack.c.l.b16 %v12031_v36  ;;  %v4835_v44 = vshrl.u32 %v4630_v22, 16  ;;  %v4535_v9 = vadd.f32 %v11864_v32, %v4499_v7  ;;  %v4838_v43 = vshll.u32 %v4630_v22, 16  ;;  %v4460_v14 = vpop.f32.mrf.mxu0 }
 0x320   : > { %v3972_v19 = vpop.f32.mrf.mxu2  ;;  %v5241_v24 = vunpack.c.l.b16 %v5113_v61  ;;  %v9947_v61 = vld [vmem:[#allocation8 + $0x108] sm:$0xff] }
 0x321   : > { %v5593_v39 = vpack.c.b16 %v5173_v11, %v5577_v63  ;;  %v4837_v35 = vrot.slane %v4835_v44, 7  ;;  %v4567_v0 = vmax.f32 %v4535_v9, 0.0  ;;  %v4062_v59 = vadd.f32 %v4061_v54, %v3972_v19  ;;  %7336 = vmatpush.bf16.msrb.mxu1 %v9947_v61 }
 0x322   : > { %v12038_v55 = vpack.c.b16 %v5241_v24, %v5241_v24  ;;  %6330 = vmatmul.bf16.gmra.mxu0 %v11887_v33  ;;  %v5042_v24 = vld [vmem:[#allocation2 + $0x9c] sm:$0xf] }
 0x323   : > { %v5749_v23 = vrot.slane %v5593_v39, 1  ;;  %v4840_v18 = vor.u32 %v4838_v43, %v4837_v35  ;;  %v4842_v41 = vrot.slane %v4837_v35, 4  ;;  %v4599_v30 = vadd.f32 %v4567_v0, %v892_v12  ;;  %6241 = vmatmul.bf16.gmra.mxu3 %v11870_v52  ;;  %v13147_v39 = vld [vmem:[#allocation16_spill] sm:$0xff] }
 0x324   : > { %v4104_v6 = vadd.f32 %v4062_v59, %v13146_v45  ;;  %v12041_v37 = vpop.f32.mrf.mxu1  ;;  %v5750_v53 = vrot.slane %v12038_v55, 1  ;;  %v5342_v52 = vshll.u32 %v11894_v3, 16  ;;  %v5335_v59 = vshrl.u32 %v12050_v2, 16 }
 0x325   : > { %6056 = vmatmul.bf16.gmra.mxu2 %v9919_v31  ;;  %v4841_v47 = vsel %vm10783_vm8, %v4833_v15, %v4840_v18  ;;  %v5040_v56 = vsel %vm10752_vm3, %v4842_v41, %v5039_v34  ;;  %v4631_v20 = vpack.c.bf16 %v4599_v30, %v4599_v30  ;;  %v10220_v45 = vld [vmem:[#allocation2 + $0x90] sm:$0xe] }
 0x326   : > { %v4500_v1 = vadd.f32 %v4457_v40, %v4104_v6  ;;  %5041 = vst [vmem:[#allocation2 + $0x98] sm:$0x1] %v5040_v56  ;;  %v5751_v10 = vsel %vm1525_vm9, %v5749_v23, %v5750_v53  ;;  %v4064_v63 = vpop.f32.mrf.mxu3  ;;  %v5337_v40 = vshll.u32 %v12050_v2, 16  ;;  %v5344_v18 = vrot.slane %v5342_v52, 1  ;;  %v10375_v53 = vld [vmem:[%s10741_s28 + $0x68] sm:$0xf] }
 0x327   : > { %5038 = vst [vmem:[#allocation2 + $0x94] sm:$0xf] %v4841_v47  ;;  %v4844_v33 = vshrl.u32 %v4631_v20, 16  ;;  %5997 = vmatmul.bf16.gmra.mxu1 %v5751_v10  ;;  %v4462_v44 = vpop.f32.mrf.mxu0  ;;  %v4847_v12 = vshll.u32 %v4631_v20, 16  ;;  %v894_v47 = vunpack.c.l.bf16 %v10375_v53 }
 0x328   : > { %v4536_v22 = vadd.f32 %v11864_v32, %v4500_v1  ;;  %v3975_v7 = vpop.f32.mrf.mxu2  ;;  %v5339_v15 = vrot.slane %v5337_v40, 1  ;;  %v5046_v40 = vld [vmem:[#allocation2 + $0xa4] sm:$0x1] }
 0x329   : > { %v4846_v27 = vrot.slane %v4844_v33, 7  ;;  %v4065_v19 = vadd.f32 %v4064_v63, %v3975_v7 }
 0x32a   : > { %v4568_v9 = vmax.f32 %v4536_v22, 0.0 }
 0x32b   : > { %v4849_v43 = vor.u32 %v4847_v12, %v4846_v27  ;;  %v4105_v35 = vadd.f32 %v4065_v19, %v13147_v39  ;;  %v4850_v63 = vrot.slane %v4846_v27, 4 }
 0x32c   : > { %v4600_v54 = vadd.f32 %v4568_v9, %v893_v17  ;;  %v12058_v0 = vpop.f32.mrf.mxu1  ;;  %v5340_v17 = vor.u32 %v5339_v15, %v5335_v59  ;;  %v9920_v9 = vld [vmem:[#allocation2 + $0x54] sm:$0xff]  ;;  %v5092_v59 = vld [vmem:[#allocation2 + $0x84] sm:$0xf] }
 0x32d   : > { %v5043_v34 = vsel %vm10775_vm7, %v4849_v43, %v5042_v24  ;;  %v4501_v23 = vadd.f32 %v4460_v14, %v4105_v35  ;;  %v5114_v31 = vld [vmem:[#allocation2 + $0x98] sm:$0x1] }
 0x32e   : > { %v4632_v3 = vpack.c.bf16 %v4600_v54, %v4600_v54  ;;  %5044 = vst [vmem:[#allocation2 + $0x9c] sm:$0xf] %v5043_v34  ;;  %v10219_v41 = vld [vmem:[#allocation2 + $0x90] sm:$0xf0]  ;;  %v5242_v30 = vunpack.c.l.b16 %v5114_v31  ;;  %v4066_v10 = vpop.f32.mrf.mxu3  ;;  %v5345_v19 = vsel %vm1092_vm10, %v5340_v17, %v5344_v18  ;;  %v13148_v54 = vld [vmem:[#allocation17_spill] sm:$0xff]  ;;  %v5172_v31 = vunpack.c.l.b16 %v5092_v59 }
 0x32f   : > { %v4537_v56 = vadd.f32 %v11864_v32, %v4501_v23  ;;  %v10221_v1 = vor.u32 %v10220_v45, %v10219_v41  ;;  %v4465_v33 = vpop.f32.mrf.mxu0  ;;  %v10376_v41 = vld [vmem:[%s10741_s28 + $0x6c] sm:$0xf]  ;;  %v12082_v45 = vld [vmem:[%s13060_s2] ss:$0 sm:$0xff]  ;;  %v5049_v17 = vld [vmem:[#allocation2 + $0xa8] sm:$0xf] }
 0x330   : > { %v4852_v6 = vshrl.u32 %v4632_v3, 16  ;;  %v3977_v20 = vpop.f32.mrf.mxu2  ;;  %v12065_v51 = vpack.c.b16 %v5242_v30, %v5242_v30  ;;  %v4855_v14 = vshll.u32 %v4632_v3, 16  ;;  %v895_v30 = vunpack.c.l.bf16 %v10376_v41 }
 0x331   : > { %v4569_v7 = vmax.f32 %v4537_v56, 0.0  ;;  %v4067_v61 = vadd.f32 %v4066_v10, %v3977_v20  ;;  %v5754_v52 = vrot.slane %v10221_v1, 1 }
 0x332   : > { %v4854_v22 = vrot.slane %v4852_v6, 7  ;;  %v5755_v12 = vrot.slane %v12065_v51, 1  ;;  %6335 = vmatmul.bf16.gmra.mxu0 %v5345_v19 }
 0x333   : > { %v4601_v43 = vadd.f32 %v4569_v7, %v894_v47  ;;  %v4106_v39 = vadd.f32 %v4067_v61, %v13148_v54  ;;  %6246 = vmatmul.bf16.gmra.mxu3 %v12050_v2  ;;  %v12087_v2 = vpack.c.b16 %v5173_v11, %v5172_v31 }
 0x334   : > { %v4857_v32 = vor.u32 %v4855_v14, %v4854_v22  ;;  %v4859_v24 = vrot.slane %v4854_v22, 4  ;;  %v12070_v35 = vpop.f32.mrf.mxu1  ;;  %v5756_v15 = vsel %vm1525_vm9, %v5754_v52, %v5755_v12  ;;  %v5402_v14 = vshll.u32 %v12038_v55, 16 }
 0x335   : > { %6061 = vmatmul.bf16.gmra.mxu2 %v9920_v9  ;;  %v4633_v3 = vpack.c.bf16 %v4601_v43, %v4601_v43  ;;  %v4502_v23 = vadd.f32 %v4462_v44, %v4106_v39  ;;  %v5397_v22 = vshll.u32 %v12087_v2, 16  ;;  %v5515_v12 = vld [vmem:[#allocation2 + $0x9c] sm:$0xe]  ;;  %v5395_v36 = vshrl.u32 %v12087_v2, 16 }
 0x336   : > { %v4858_v27 = vsel %vm10783_vm8, %v4850_v63, %v4857_v32  ;;  %v5047_v34 = vsel %vm10752_vm3, %v4859_v24, %v5046_v40  ;;  %v4069_v47 = vpop.f32.mrf.mxu3  ;;  %v13149_v63 = vld [vmem:[#allocation18_spill] sm:$0xff]  ;;  %v5579_v54 = vunpack.c.l.b16 %v5515_v12  ;;  %v5404_v59 = vrot.slane %v5402_v14, 1 }
 0x337   : > { %5045 = vst [vmem:[#allocation2 + $0xa0] sm:$0xf] %v4858_v27  ;;  %v4861_v18 = vshrl.u32 %v4633_v3, 16  ;;  %v4538_v6 = vadd.f32 %v12082_v45, %v4502_v23  ;;  %6002 = vmatmul.bf16.gmra.mxu1 %v5756_v15  ;;  %v4467_v56 = vpop.f32.mrf.mxu0  ;;  %v4864_v20 = vshll.u32 %v4633_v3, 16  ;;  %v5399_v11 = vrot.slane %v5397_v22, 1  ;;  %v9921_v14 = vld [vmem:[#allocation2 + $0x60] sm:$0xff] }
 0x338   : > { %5048 = vst [vmem:[#allocation2 + $0xa4] sm:$0x1] %v5047_v34  ;;  %v3980_v53 = vpop.f32.mrf.mxu2  ;;  %v10378_v27 = vld [vmem:[%s10741_s28 + $0x70] sm:$0xf] }
 0x339   : > { %v4863_v44 = vrot.slane %v4861_v18, 7  ;;  %v4570_v1 = vmax.f32 %v4538_v6, 0.0  ;;  %v4070_v10 = vadd.f32 %v4069_v47, %v3980_v53  ;;  %v5400_v39 = vor.u32 %v5399_v11, %v5395_v36 }
 0x33a   : > { %v896_v34 = vunpack.c.l.bf16 %v10378_v27 }
 0x33b   : > { %v4866_v7 = vor.u32 %v4864_v20, %v4863_v44  ;;  %v4602_v61 = vadd.f32 %v4570_v1, %v895_v30  ;;  %v4107_v40 = vadd.f32 %v4070_v10, %v13149_v63  ;;  %v12105_v6 = vsel %vm1092_vm10, %v5400_v39, %v5404_v59  ;;  %v10379_v39 = vld [vmem:[%s10741_s28 + $0x74] sm:$0xf] }
 0x33c   : > { %v12092_v52 = vpop.f32.mrf.mxu1  ;;  %v4867_v10 = vrot.slane %v4863_v44, 4  ;;  %v897_v59 = vunpack.c.l.bf16 %v10379_v39 }
 0x33d   : > { %v5050_v9 = vsel %vm10775_vm7, %v4866_v7, %v5049_v17  ;;  %v4634_v19 = vpack.c.bf16 %v4602_v61, %v4602_v61  ;;  %v4503_v32 = vadd.f32 %v4465_v33, %v4107_v40  ;;  %v5053_v17 = vld [vmem:[#allocation2 + $0xb0] sm:$0x1]  ;;  %v13150_v40 = vld [vmem:[#allocation19_spill] sm:$0xff] }
 0x33e   : > { %v12097_v24 = vld [vmem:[#allocation2 + $0xa0] sm:$0xf]  ;;  %5051 = vst [vmem:[#allocation2 + $0xa8] sm:$0xf] %v5050_v9  ;;  %v4071_v41 = vpop.f32.mrf.mxu3 }
 0x33f   : > { %v5115_v55 = vld [vmem:[#allocation2 + $0xa4] sm:$0x1]  ;;  %v5177_v43 = vunpack.c.l.b16 %v12097_v24  ;;  %v4869_v15 = vshrl.u32 %v4634_v19, 16  ;;  %v4539_v3 = vadd.f32 %v12082_v45, %v4503_v32  ;;  %v4872_v18 = vshll.u32 %v4634_v19, 16  ;;  %v4470_v30 = vpop.f32.mrf.mxu0 }
 0x340   : > { %v3982_v23 = vpop.f32.mrf.mxu2  ;;  %v5243_v31 = vunpack.c.l.b16 %v5115_v55  ;;  %v12119_v55 = vld [vmem:[#allocation2 + $0x60] sm:$0xff]  }
 0x341   : > { %v5595_v33 = vpack.c.b16 %v5177_v43, %v5579_v54  ;;  %v4871_v53 = vrot.slane %v4869_v15, 7  ;;  %v4571_v47 = vmax.f32 %v4539_v3, 0.0  ;;  %v4072_v20 = vadd.f32 %v4071_v41, %v3982_v23 }
 0x342   : > { %v12107_v1 = vpack.c.b16 %v5243_v31, %v5243_v31  ;;  %6340 = vmatmul.bf16.gmra.mxu0 %v11939_v29 }
 0x343   : > { %v5759_v22 = vrot.slane %v5595_v33, 1  ;;  %v4874_v7 = vor.u32 %v4872_v18, %v4871_v53  ;;  %v4876_v61 = vrot.slane %v4871_v53, 4  ;;  %v4603_v63 = vadd.f32 %v4571_v47, %v896_v34  ;;  %6251 = vmatmul.bf16.gmra.mxu3 %v11917_v13  ;;  %v9946_v34 = vld [vmem:[#allocation8 + $0x100] sm:$0xff]  ;;  %v5056_v53 = vld [vmem:[#allocation2 + $0xb4] sm:$0xf] }
 0x344   : > { %v4108_v12 = vadd.f32 %v4072_v20, %v13150_v40  ;;  %v12110_v36 = vpop.f32.mrf.mxu1  ;;  %v5760_v11 = vrot.slane %v12107_v1, 1  ;;  %v5366_v13 = vshll.u32 %v11950_v26, 16  ;;  %7337 = vmatpush.bf16.msrb.mxu1 %v9946_v34 }
 0x345   : > { %6066 = vmatmul.bf16.gmra.mxu2 %v9921_v14  ;;  %v4875_v9 = vsel %vm10783_vm8, %v4867_v10, %v4874_v7  ;;  %v5054_v44 = vsel %vm10752_vm3, %v4876_v61, %v5053_v17  ;;  %v4635_v19 = vpack.c.bf16 %v4603_v63, %v4603_v63  ;;  %v13151_v10 = vld [vmem:[#allocation20_spill] sm:$0xff]  ;;  %v5359_v14 = vshrl.u32 %v12119_v55, 16 }
 0x346   : > { %v4504_v32 = vadd.f32 %v4467_v56, %v4108_v12  ;;  %5055 = vst [vmem:[#allocation2 + $0xb0] sm:$0x1] %v5054_v44  ;;  %v5761_v54 = vsel %vm1525_vm9, %v5759_v22, %v5760_v11  ;;  %v4074_v3 = vpop.f32.mrf.mxu3  ;;  %v5361_v56 = vshll.u32 %v12119_v55, 16  ;;  %v9961_v61 = vld [vmem:[#allocation8 + $0x178] sm:$0xff] }
 0x347   : > { %5052 = vst [vmem:[#allocation2 + $0xac] sm:$0xf] %v4875_v9  ;;  %v4878_v29 = vshrl.u32 %v4635_v19, 16  ;;  %6007 = vmatmul.bf16.gmra.mxu1 %v5761_v54  ;;  %v4472_v23 = vpop.f32.mrf.mxu0  ;;  %v4881_v18 = vshll.u32 %v4635_v19, 16  ;;  %v9985_v63 = vld [vmem:[#allocation8 + $0x1b8] sm:$0xff]  ;;  %v5368_v9 = vrot.slane %v5366_v13, 1  ;;  %7419 = vmatpush.bf16.msra.mxu2 %v9961_v61 }
 0x348   : > { %v4540_v15 = vadd.f32 %v12082_v45, %v4504_v32  ;;  %v3985_v27 = vpop.f32.mrf.mxu2  ;;  %v5363_v7 = vrot.slane %v5361_v56, 1  ;;  %v10223_v32 = vld [vmem:[#allocation2 + $0xa8] sm:$0xe]  ;;  %8068 = vmatpush.bf16.msra.mxu3 %v9985_v63  ;;  %v9922_v61 = vld [vmem:[#allocation2 + $0x6c] sm:$0xff] }
 0x349   : > { %v4880_v31 = vrot.slane %v4878_v29, 7  ;;  %v4075_v33 = vadd.f32 %v4074_v3, %v3985_v27  ;;  %v10380_v29 = vld [vmem:[%s10741_s28 + $0x78] sm:$0xf] }
 0x34a   : > { %v4572_v41 = vmax.f32 %v4540_v15, 0.0  ;;  %v898_v39 = vunpack.c.l.bf16 %v10380_v29 }
 0x34b   : > { %v4883_v47 = vor.u32 %v4881_v18, %v4880_v31  ;;  %v4109_v17 = vadd.f32 %v4075_v33, %v13151_v10 }
 0x34c   : > { %v4604_v20 = vadd.f32 %v4572_v41, %v897_v59  ;;  %v12127_v22 = vpop.f32.mrf.mxu1 }
 0x34d   : > { %v5057_v26 = vsel %vm10775_vm7, %v4883_v47, %v5056_v53  ;;  %v4505_v12 = vadd.f32 %v4470_v30, %v4109_v17  ;;  %v5116_v11 = vld [vmem:[#allocation2 + $0xb0] sm:$0x1]  ;;  %v5364_v30 = vor.u32 %v5363_v7, %v5359_v14  ;;  %v5096_v53 = vld [vmem:[#allocation2 + $0x9c] sm:$0xf]  ;;  %v4884_v47 = vrot.slane %v4880_v31, 4 }
 0x34e   : > { %v4636_v40 = vpack.c.bf16 %v4604_v20, %v4604_v20  ;;  %5058 = vst [vmem:[#allocation2 + $0xb4] sm:$0xf] %v5057_v26  ;;  %v10222_v44 = vld [vmem:[#allocation2 + $0xa8] sm:$0xf0]  ;;  %v5244_v19 = vunpack.c.l.b16 %v5116_v11  ;;  %v4076_v34 = vpop.f32.mrf.mxu3  ;;  %v5060_v20 = vld [vmem:[#allocation2 + $0xbc] sm:$0x1] }
 0x34f   : > { %v4541_v59 = vadd.f32 %v12082_v45, %v4505_v12  ;;  %v10224_v27 = vor.u32 %v10223_v32, %v10222_v44  ;;  %v6306_v3 = vpop.f32.mrf.mxu0  ;;  %v5369_v63 = vsel %vm1092_vm10, %v5364_v30, %v5368_v9  ;;  %v13152_v44 = vld [vmem:[#allocation21_spill] sm:$0xff]  ;;  %v9993_v31 = vld [vmem:[#allocation8 + $0x1f8] sm:$0xff] }
 0x350   : > { %v4886_v54 = vshrl.u32 %v4636_v40, 16  ;;  %v3987_v15 = vpop.f32.mrf.mxu2  ;;  %v12134_v56 = vpack.c.b16 %v5244_v19, %v5244_v19  ;;  %v4889_v13 = vshll.u32 %v4636_v40, 16  ;;  %v5176_v40 = vunpack.c.l.b16 %v5096_v53  ;;  %8157 = vmatpush.bf16.msra.mxu0 %v9993_v31  ;;  %v10001_v30 = vld [vmem:[#allocation8 + $0x238] sm:$0xff] }
 0x351   : > { %v4573_v41 = vmax.f32 %v4541_v59, 0.0  ;;  %v4077_v33 = vadd.f32 %v4076_v34, %v3987_v15  ;;  %v5764_v10 = vrot.slane %v10224_v27, 1  ;;  %v10381_v59 = vld [vmem:[%s10741_s28 + $0x7c] sm:$0xf]  ;;  %8550 = vmatpush.bf16.msra.mxu1 %v10001_v30  ;;  %v10382_v30 = vld [vmem:[#allocation2 + $0xc] sm:$0xff]   ;;  %s8784_s28 = sshll.u32 %s12791_s6, 4  ;;  %s8785_s28 = int_to_ptr.vmem [resolvable:$true] %s8784_s28 }
 0x352   : > { %v4888_v18 = vrot.slane %v4886_v54, 7  ;;  %v5765_v17 = vrot.slane %v12134_v56, 1  ;;  %6345 = vmatmul.bf16.gmra.mxu0 %v5369_v63  ;;  %v899_v15 = vunpack.c.l.bf16 %v10381_v59 }
 0x353   : > { %v4605_v11 = vadd.f32 %v4573_v41, %v898_v39  ;;  %v4110_v19 = vadd.f32 %v4077_v33, %v13152_v44  ;;  %6256 = vmatmul.bf16.gmra.mxu3 %v12119_v55 }
 0x354   : > { %v4891_v26 = vor.u32 %v4889_v13, %v4888_v18  ;;  %v4893_v12 = vrot.slane %v4888_v18, 4  ;;  %v12139_v14 = vpop.f32.mrf.mxu1  ;;  %v5766_v7 = vsel %vm1525_vm9, %v5764_v10, %v5765_v17  ;;  %v12151_v18 = vpack.c.b16 %v5177_v43, %v5176_v40 }
 0x355   : > { %6071 = vmatmul.bf16.gmra.mxu2 %v9922_v61  ;;  %v4637_v54 = vpack.c.bf16 %v4605_v11, %v4605_v11  ;;  %v4506_v29 = vadd.f32 %v4472_v23, %v4110_v19  ;;  %v5517_v24 = vld [vmem:[#allocation2 + $0xb4] sm:$0xe] }
 0x356   : > { %v4892_v32 = vsel %vm10783_vm8, %v4884_v47, %v4891_v26  ;;  %v5061_v9 = vsel %vm10752_vm3, %v4893_v12, %v5060_v20  ;;  %v6217_v23 = vpop.f32.mrf.mxu3  ;;  %v5421_v47 = vshll.u32 %v12151_v18, 16  ;;  %v5063_v20 = vld [vmem:[#allocation2 + $0xc0] sm:$0xf]  ;;  %v5419_v43 = vshrl.u32 %v12151_v18, 16 }
 0x357   : > { %5059 = vst [vmem:[#allocation2 + $0xb8] sm:$0xf] %v4892_v32  ;;  %v4895_v39 = vshrl.u32 %v4637_v54, 16  ;;  %v4542_v27 = vadd.f32 %v12082_v45, %v4506_v29  ;;  %6012 = vmatmul.bf16.gmra.mxu1 %v5766_v7  ;;  %v6308_v41 = vpop.f32.mrf.mxu0  ;;  %v4898_v33 = vshll.u32 %v4637_v54, 16  ;;  %v5426_v45 = vshll.u32 %v12107_v1, 16 }
 0x358   : > { %5062 = vst [vmem:[#allocation2 + $0xbc] sm:$0x1] %v5061_v9  ;;  %v6032_v34 = vpop.f32.mrf.mxu2  ;;  %v5581_v40 = vunpack.c.l.b16 %v5517_v24  ;;  %v6409_v24 = vld [vmem:[#allocation2 + $0x68] sm:$0x1] }
 0x359   : > { %v6033_v13 = vadd.f32 %v6032_v34, %v11955_v57  ;;  %v4897_v55 = vrot.slane %v4895_v39, 7  ;;  %v4574_v53 = vmax.f32 %v4542_v27, 0.0  ;;  %v5423_v57 = vrot.slane %v5421_v47, 1  ;;  %v9923_v47 = vld [vmem:[#allocation2 + $0x78] sm:$0xff] }
 0x35a   : > { %v5428_v7 = vrot.slane %v5426_v45, 1 }
 0x35b   : > { %v6218_v10 = vadd.f32 %v6217_v23, %v6033_v13  ;;  %v4900_v17 = vor.u32 %v4898_v33, %v4897_v55  ;;  %v4606_v61 = vadd.f32 %v4574_v53, %v899_v15  ;;  %v5424_v19 = vor.u32 %v5423_v57, %v5419_v43  ;;  %v5067_v23 = vld [vmem:[#allocation2 + $0xc8] sm:$0x1] }
 0x35c   : > { %v12156_v63 = vpop.f32.mrf.mxu1  ;;  %v6498_v13 = vunpack.c.l.b16 %v10382_v30  ;;  %v10574_v30 = vld [vmem:[#allocation2 + $0x6c] sm:$0xe] }
 0x35d   : > { %v12159_v26 = vadd.f32 %v6306_v3, %v6218_v10  ;;  %v5064_v12 = vsel %vm10775_vm7, %v4900_v17, %v5063_v20  ;;  %v4638_v11 = vpack.c.bf16 %v4606_v61, %v4606_v61  ;;  %v12167_v29 = vsel %vm1092_vm10, %v5424_v19, %v5428_v7 }
 0x35e   : > { %v12163_v44 = vld [vmem:[#allocation2 + $0xb8] sm:$0xf]  ;;  %5065 = vst [vmem:[#allocation2 + $0xc0] sm:$0xf] %v5064_v12  ;;  %v6219_v58 = vpop.f32.mrf.mxu3  ;;  %v4901_v20 = vrot.slane %v4897_v55, 4 }
 0x35f   : > { %v5117_v1 = vld [vmem:[#allocation2 + $0xbc] sm:$0x1]  ;;  %v5181_v31 = vunpack.c.l.b16 %v12163_v44  ;;  %v4903_v32 = vshrl.u32 %v4638_v11, 16  ;;  %v6311_v39 = vpop.f32.mrf.mxu0  ;;  %v4906_v27 = vshll.u32 %v4638_v11, 16  ;;  %v6546_v11 = vpack.c.b16 %v6499_v38, %v6498_v13  ;;  %v10573_v38 = vld [vmem:[#allocation2 + $0x6c] sm:$0xf0] }
 0x360   : > { %v6034_v9 = vpop.f32.mrf.mxu2  ;;  %v5245_v54 = vunpack.c.l.b16 %v5117_v1  ;;  %v10198_v12 = vld [vmem:[#allocation2 + $0x78] sm:$0xff]  }
 0x361   : > { %v6035_v3 = vadd.f32 %v6034_v9, %v11970_v46  ;;  %v5597_v59 = vpack.c.b16 %v5181_v31, %v5581_v40  ;;  %v4905_v15 = vrot.slane %v4903_v32, 7  ;;  %v5385_v1 = vshll.u32 %v10198_v12, 16 }
 0x362   : > { %v12172_v34 = vpack.c.b16 %v5245_v54, %v5245_v54  ;;  %6350 = vmatmul.bf16.gmra.mxu0 %v12000_v50  ;;  %v6853_v5 = vshll.u32 %v6546_v11, 16  ;;  %v5390_v32 = vshll.u32 %v12011_v25, 16  ;;  %v5383_v13 = vshrl.u32 %v10198_v12, 16  ;;  %v10243_v25 = vld [vmem:[#allocation2 + $0x60] sm:$0xe] }
 0x363   : > { %v6220_v33 = vadd.f32 %v6219_v58, %v6035_v3  ;;  %v5769_v53 = vrot.slane %v5597_v59, 1  ;;  %v4908_v10 = vor.u32 %v4906_v27, %v4905_v15  ;;  %v4910_v45 = vrot.slane %v4905_v15, 4  ;;  %6261 = vmatmul.bf16.gmra.mxu3 %v11977_v62  ;;  %v9960_v58 = vld [vmem:[#allocation8 + $0x170] sm:$0xff]  ;;  %v6412_v27 = vld [vmem:[#allocation2 + $0x74] sm:$0x1] }
 0x364   : > { %v12174_v17 = vpop.f32.mrf.mxu1  ;;  %v5770_v46 = vrot.slane %v12172_v34, 1  ;;  %v5387_v3 = vrot.slane %v5385_v1, 1  ;;  %v9984_v59 = vld [vmem:[#allocation8 + $0x1b0] sm:$0xff]  ;;  %v6855_v15 = vrot.slane %v6853_v5, 1  ;;  %7420 = vmatpush.bf16.msra.mxu2 %v9960_v58  ;;  %v10575_v1 = vor.u32 %v10574_v30, %v10573_v38 }
 0x365   : > { %v12178_v61 = vadd.f32 %v6308_v41, %v6220_v33  ;;  %6076 = vmatmul.bf16.gmra.mxu2 %v9923_v47  ;;  %v4909_v43 = vsel %vm10783_vm8, %v4901_v20, %v4908_v10  ;;  %v5068_v57 = vsel %vm10752_vm3, %v4910_v45, %v5067_v23  ;;  %v6521_v41 = vunpack.c.l.b16 %v6409_v24  ;;  %v6391_v33 = vld [vmem:[#allocation2 + $0x20] sm:$0x1]  ;;  %8069 = vmatpush.bf16.msra.mxu3 %v9984_v59 }
 0x366   : > { %v5771_v55 = vsel %vm1525_vm9, %v5769_v53, %v5770_v46  ;;  %5066 = vst [vmem:[#allocation2 + $0xc4] sm:$0xf] %v4909_v43  ;;  %v6222_v4 = vpop.f32.mrf.mxu3  ;;  %v5392_v23 = vrot.slane %v5390_v32, 1  ;;  %v6851_v47 = vshrl.u32 %v6546_v11, 16  ;;  %v5388_v24 = vor.u32 %v5387_v3, %v5383_v13 }
 0x367   : > { %13153 = vst [vmem:[#allocation22_spill] sm:$0xff] %v12178_v61  ;;  %6017 = vmatmul.bf16.gmra.mxu1 %v5771_v55  ;;  %v6313_v7 = vpop.f32.mrf.mxu0  ;;  %v12192_v62 = vpack.c.b16 %v6521_v41, %v6521_v41  ;;  %v6524_v43 = vunpack.c.l.b16 %v6412_v27  ;;  %v6503_v55 = vunpack.c.l.b16 %v6391_v33  ;;  %v9924_v41 = vld [vmem:[#allocation2 + $0x84] sm:$0xff]  ;;  %v6741_v13 = vshll.u32 %v10575_v1, 16 }
 0x368   : > { %5069 = vst [vmem:[#allocation2 + $0xc8] sm:$0x1] %v5068_v57  ;;  %v6037_v50 = vpop.f32.mrf.mxu2  ;;  %v6856_v57 = vor.u32 %v6855_v15, %v6851_v47  ;;  %v10000_v33 = vld [vmem:[#allocation8 + $0x230] sm:$0xff] }
 0x369   : > { %v6038_v19 = vadd.f32 %v6037_v50, %v11985_v49  ;;  %v10242_v49 = vld [vmem:[#allocation2 + $0x60] sm:$0xf0]  ;;  %v6732_v20 = vshll.u32 %v12192_v62, 16  ;;  %v12207_v3 = vpack.c.b16 %v6524_v43, %v6524_v43  ;;  %v6736_v30 = vshrl.u32 %v12192_v62, 16  ;;  %8551 = vmatpush.bf16.msra.mxu1 %v10000_v33 }
 0x36a   : > { %v10244_v10 = vor.u32 %v10243_v25, %v10242_v49  ;;  %v12209_v49 = vpack.c.b16 %v6503_v55, %v6503_v55  ;;  %v6857_v38 = vsel %vm1092_vm10, %v6856_v57, %v11953_v28  ;;  %v6743_v44 = vrot.slane %v6741_v13, 1 }
 0x36b   : > { %v6223_v40 = vadd.f32 %v6222_v4, %v6038_v19  ;;  %v5393_v19 = vsel %vm1092_vm10, %v5388_v24, %v5392_v23  ;;  %v5100_v4 = vld [vmem:[#allocation2 + $0xb4] sm:$0xf]  ;;  %v12203_v11 = vrot.slane %v6732_v20, 1  ;;  %v12214_v23 = vld [vmem:[#allocation2 + $0x18] sm:$0xff]   ;;  %v6746_v28 = vshll.u32 %v12207_v3, 16 }
 0x36c   : > { %v12190_v9 = vpop.f32.mrf.mxu1  ;;  %v6727_v5 = vshll.u32 %v10244_v10, 16  ;;  %v6725_v58 = vshrl.u32 %v10244_v10, 16  ;;  %v5180_v15 = vunpack.c.l.b16 %v5100_v4  ;;  %v6648_v10 = vshll.u32 %v12209_v49, 16 }
 0x36d   : > { %v12196_v54 = vadd.f32 %v6311_v39, %v6223_v40  ;;  %v6873_v24 = vshll.u32 %v12214_v23, 16 }
 0x36e   : > { %v6224_v45 = vpop.f32.mrf.mxu3  ;;  %v6729_v59 = vrot.slane %v6727_v5, 1  ;;  %v12218_v25 = vpack.c.b16 %v5181_v31, %v5180_v15  ;;  %v12233_v5 = vrot.slane %v6746_v28, 1 }
 0x36f   : > { %13154 = vst [vmem:[#allocation23_spill] sm:$0xff] %v12196_v54  ;;  %v6316_v46 = vpop.f32.mrf.mxu0 }
 0x370   : > { %v6039_v53 = vpop.f32.mrf.mxu2  ;;  %v6730_v27 = vor.u32 %v6729_v59, %v6725_v58  ;;  %v5443_v55 = vshrl.u32 %v12218_v25, 16 }
 0x371   : > { %v6040_v39 = vadd.f32 %v6039_v53, %v12004_v8  ;;  %v9992_v8 = vld [vmem:[#allocation8 + $0x1f0] sm:$0xff] }
 0x372   : > { %6355 = vmatmul.bf16.gmra.mxu0 %v5393_v19  ;;  %v6735_v62 = vsel %vm1092_vm10, %v6730_v27, %v12203_v11  ;;  %v6739_v19 = vshrl.u32 %v10575_v1, 16  ;;  %v12236_v27 = vld [vmem:[#allocation2 + $0x24] sm:$0xff]  }
 0x373   : > { %v6225_v50 = vadd.f32 %v6224_v45, %v6040_v39  ;;  %6266 = vmatmul.bf16.gmra.mxu3 %v10198_v12  ;;  %8158 = vmatpush.bf16.msra.mxu0 %v9992_v8  ;;  %v6415_v12 = vld [vmem:[#allocation2 + $0x80] sm:$0x1]  ;;  %v5445_v39 = vshll.u32 %v12218_v25, 16  ;;  %v5450_v45 = vshll.u32 %v12172_v34, 16  ;;  %v6999_v8 = vshrl.u32 %v6735_v62, 16 }
 0x374   : > { %v12201_v40 = vpop.f32.mrf.mxu1  ;;  %v6527_v43 = vunpack.c.l.b16 %v6415_v12  ;;  %v6750_v34 = vshrl.u32 %v12207_v3, 16  ;;  %v10245_v3 = vld [vmem:[#allocation2 + $0x78] sm:$0xf0] }
 0x375   : > { %v12205_v32 = vadd.f32 %v6313_v7, %v6225_v50  ;;  %6081 = vmatmul.bf16.gmra.mxu2 %v9924_v41  ;;  %v5447_v50 = vrot.slane %v5445_v39, 1  ;;  %v7001_v41 = vshll.u32 %v6735_v62, 16  ;;  %v5452_v59 = vrot.slane %v5450_v45, 1 }
 0x376   : > { %v6227_v47 = vpop.f32.mrf.mxu3  ;;  %v12240_v13 = vpack.c.b16 %v6527_v43, %v6527_v43  ;;  %v12248_v62 = vrot.slane %v6648_v10, 1  ;;  %v6871_v39 = vshrl.u32 %v12214_v23, 16  ;;  %v6875_v45 = vrot.slane %v6873_v24, 1  ;;  %v10576_v43 = vld [vmem:[#allocation2 + $0x84] sm:$0xf0]  ;;  %v12260_v23 = vld [vmem:[#allocation2 + $0x90] sm:$0xff]  }
 0x377   : > { %13155 = vst [vmem:[#allocation24_spill] sm:$0xff] %v12205_v32  ;;  %7338 = vmatmul.bf16.vlgmr.msrb.gmra.mxu1 %v6857_v38  ;;  %v6318_v20 = vpop.f32.mrf.mxu0  ;;  %v5448_v58 = vor.u32 %v5447_v50, %v5443_v55  ;;  %v7003_v15 = vrot.slane %v7001_v41, 1  ;;  %v6744_v38 = vor.u32 %v6743_v44, %v6739_v19  ;;  %v6394_v44 = vld [vmem:[#allocation2 + $0x2c] sm:$0x1]  ;;  %v7026_v50 = vshll.u32 %v6750_v34, 16 }
 0x378   : > { %v6042_v7 = vpop.f32.mrf.mxu2  ;;  %v10246_v41 = vld [vmem:[#allocation2 + $0x78] sm:$0xe]  ;;  %v6506_v34 = vunpack.c.l.b16 %v6394_v44 }
 0x379   : > { %v6043_v53 = vadd.f32 %v6042_v7, %v12016_v60  ;;  %v7006_v60 = vshll.u32 %v6736_v30, 16  ;;  %v12238_v30 = vld [vmem:[#allocation2 + $0x24] sm:$0xf0]  ;;  %v12243_v1 = vsel %vm1092_vm10, %v5448_v58, %v5452_v59  ;;  %v6749_v12 = vsel %vm1092_vm10, %v6744_v38, %v12233_v5  ;;  %v6418_v58 = vld [vmem:[#allocation2 + $0x8c] sm:$0x1] }
 0x37a   : > { %v10247_v10 = vor.u32 %v10246_v41, %v10245_v3  ;;  %v7019_v24 = vshrl.u32 %v6749_v12, 16 }
 0x37b   : > { %v6228_v31 = vadd.f32 %v6227_v47, %v6043_v53  ;;  %v7008_v33 = vrot.slane %v7006_v60, 1  ;;  %v7021_v60 = vshll.u32 %v6749_v12, 16 }
 0x37c   : > { %v12228_v57 = vpop.f32.mrf.mxu1  ;;  %v6755_v3 = vshll.u32 %v10247_v10, 16 }
 0x37d   : > { %v12231_v4 = vadd.f32 %v6316_v46, %v6228_v31  ;;  %v7004_v46 = vor.u32 %v7003_v15, %v6999_v8  ;;  %v12251_v31 = vld [vmem:[#allocation2 + $0x84] sm:$0xff]   ;;  %v9925_v8 = vld [vmem:[#allocation2 + $0x90] sm:$0xff]  ;;  %v7023_v15 = vrot.slane %v7021_v60, 1 }
 0x37e   : > { %v6229_v47 = vpop.f32.mrf.mxu3 }
 0x37f   : > { %13156 = vst [vmem:[#allocation25_spill] sm:$0xff] %v12231_v4  ;;  %v6321_v28 = vpop.f32.mrf.mxu0  ;;  %v12254_v55 = vsel %vm1092_vm10, %v7004_v46, %v7008_v33  ;;  %v10577_v46 = vld [vmem:[#allocation2 + $0x84] sm:$0xe]  ;;  %v6530_v33 = vunpack.c.l.b16 %v6418_v58 }
 0x380   : > { %v6044_v7 = vpop.f32.mrf.mxu2  ;;  %v10578_v58 = vor.u32 %v10577_v46, %v10576_v43  ;;  %v5407_v43 = vshrl.u32 %v12260_v23, 16 }
 0x381   : > { %v6045_v53 = vadd.f32 %v6044_v7, %v12027_v48  ;;  %v6760_v48 = vshll.u32 %v12240_v13, 16  ;;  %v6876_v7 = vor.u32 %v6875_v45, %v6871_v39  ;;  %v6753_v39 = vshrl.u32 %v10247_v10, 16 }
 0x382   : > { %6360 = vmatmul.bf16.gmra.mxu0 %v12105_v6  ;;  %v5409_v6 = vshll.u32 %v12260_v23, 16  ;;  %v6757_v45 = vrot.slane %v6755_v3, 1  ;;  %v9959_v3 = vld [vmem:[#allocation8 + $0x168] sm:$0xff] }
 0x383   : > { %v6230_v19 = vadd.f32 %v6229_v47, %v6045_v53  ;;  %6271 = vmatmul.bf16.gmra.mxu3 %v12087_v2  ;;  %v7024_v53 = vor.u32 %v7023_v15, %v7019_v24  ;;  %v7028_v47 = vrot.slane %v7026_v50, 1  ;;  %v6877_v41 = vsel %vm1092_vm10, %v6876_v7, %v12248_v62  ;;  %7421 = vmatpush.bf16.msra.mxu2 %v9959_v3  ;;  %v9926_v3 = vld [vmem:[#allocation2 + $0x9c] sm:$0xff] }
 0x384   : > { %v12257_v59 = vpop.f32.mrf.mxu1  ;;  %v12268_v4 = vrot.slane %v6760_v48, 1  ;;  %v6764_v50 = vshrl.u32 %v12240_v13, 16  ;;  %v6758_v24 = vor.u32 %v6757_v45, %v6753_v39  ;;  %v5414_v15 = vshll.u32 %v12065_v51, 16  ;;  %v9983_v13 = vld [vmem:[#allocation8 + $0x1a8] sm:$0xff] }
 0x385   : > { %v12262_v38 = vadd.f32 %v6318_v20, %v6230_v19  ;;  %6086 = vmatmul.bf16.gmra.mxu2 %v9925_v8  ;;  %v12271_v12 = vsel %vm1092_vm10, %v7024_v53, %v7028_v47  ;;  %v12275_v19 = vpack.c.b16 %v6506_v34, %v6506_v34  ;;  %v6567_v8 = vpack.c.b16 %v6530_v33, %v6530_v33 }
 0x386   : > { %v6232_v44 = vpop.f32.mrf.mxu3  ;;  %v6893_v7 = vshll.u32 %v12236_v27, 16  ;;  %v5411_v10 = vrot.slane %v5409_v6, 1  ;;  %v6769_v51 = vshll.u32 %v10578_v58, 16  ;;  %8070 = vmatpush.bf16.msra.mxu3 %v9983_v13 }
 0x387   : > { %13157 = vst [vmem:[#allocation26_spill] sm:$0xff] %v12262_v38  ;;  %7343 = vmatmul.bf16.gmra.mxu1 %v6877_v41  ;;  %v6323_v60 = vpop.f32.mrf.mxu0  ;;  %v7046_v41 = vshll.u32 %v6764_v50, 16  ;;  %v6662_v46 = vshll.u32 %v12275_v19, 16  ;;  %v6774_v33 = vshll.u32 %v6567_v8, 16  ;;  %v6778_v54 = vshrl.u32 %v6567_v8, 16 }
 0x388   : > { %v6047_v20 = vpop.f32.mrf.mxu2  ;;  %v6895_v39 = vrot.slane %v6893_v7, 1 }
 0x389   : > { %v6048_v2 = vadd.f32 %v6047_v20, %v12041_v37  ;;  %v6763_v37 = vsel %vm1092_vm10, %v6758_v24, %v12268_v4  ;;  %v5416_v20 = vrot.slane %v5414_v15, 1  ;;  %v6767_v24 = vshrl.u32 %v10578_v58, 16 }
 0x38a   : > { %v7041_v34 = vshll.u32 %v6763_v37, 16  ;;  %v7039_v6 = vshrl.u32 %v6763_v37, 16  ;;  %v7048_v21 = vrot.slane %v7046_v41, 1  ;;  %v12289_v61 = vrot.slane %v6774_v33, 1 }
 0x38b   : > { %v6233_v48 = vadd.f32 %v6232_v44, %v6048_v2  ;;  %v5412_v44 = vor.u32 %v5411_v10, %v5407_v43  ;;  %v12301_v8 = vrot.slane %v6662_v46, 1  ;;  %v7066_v43 = vshll.u32 %v6778_v54, 16 }
 0x38c   : > { %v12279_v53 = vpop.f32.mrf.mxu1  ;;  %v7043_v45 = vrot.slane %v7041_v34, 1 }
 0x38d   : > { %v12283_v47 = vadd.f32 %v6321_v28, %v6233_v48  ;;  %v6891_v28 = vshrl.u32 %v12236_v27, 16  ;;  %v6771_v48 = vrot.slane %v6769_v51, 1  ;;  %v5417_v37 = vsel %vm1092_vm10, %v5412_v44, %v5416_v20  ;;  %v10226_v44 = vld [vmem:[#allocation2 + $0x30] sm:$0xff]  }
 0x38e   : > { %v7044_v32 = vor.u32 %v7043_v45, %v7039_v6 }
 0x38f   : > { %13158 = vst [vmem:[#allocation27_spill] sm:$0xff] %v12283_v47  ;;  %v6234_v47 = vpop.f32.mrf.mxu3  ;;  %v6326_v38 = vpop.f32.mrf.mxu0  ;;  %v6772_v15 = vor.u32 %v6771_v48, %v6767_v24  ;;  %v6896_v13 = vor.u32 %v6895_v39, %v6891_v28  ;;  %v9999_v39 = vld [vmem:[#allocation8 + $0x228] sm:$0xff] }
 0x390   : > { %v6049_v2 = vpop.f32.mrf.mxu2  ;;  %v12293_v10 = vsel %vm1092_vm10, %v7044_v32, %v7048_v21  ;;  %8552 = vmatpush.bf16.msra.mxu1 %v9999_v39  ;;  %v9990_v39 = vld [vmem:[#allocation8 + $0x1e0] sm:$0xff] }
 0x391   : > { %v6050_v50 = vadd.f32 %v6049_v2, %v12058_v0  ;;  %13159 = vst [vmem:[#allocation28_spill] sm:$0xff] %v12293_v10  ;;  %v6397_v0 = vld [vmem:[#allocation2 + $0x38] sm:$0x1]  ;;  %v6777_v58 = vsel %vm1092_vm10, %v6772_v15, %v12289_v61  ;;  %v6897_v21 = vsel %vm1092_vm10, %v6896_v13, %v12301_v8  ;;  %v7068_v2 = vrot.slane %v7066_v43, 1  ;;  %v9927_v43 = vld [vmem:[#allocation2 + $0xa8] sm:$0xff] }
 0x392   : > { %6365 = vmatmul.bf16.gmra.mxu0 %v5417_v37  ;;  %v7061_v41 = vshll.u32 %v6777_v58, 16  ;;  %v6509_v32 = vunpack.c.l.b16 %v6397_v0  ;;  %v7059_v33 = vshrl.u32 %v6777_v58, 16 }
 0x393   : > { %v6235_v7 = vadd.f32 %v6234_v47, %v6050_v50  ;;  %v9991_v47 = vld [vmem:[#allocation8 + $0x1e8] sm:$0xff]  ;;  %6276 = vmatmul.bf16.gmra.mxu3 %v12260_v23  ;;  %v6913_v50 = vshll.u32 %v10226_v44, 16 }
 0x394   : > { %v12295_v27 = vpop.f32.mrf.mxu1  ;;  %8159 = vmatpush.bf16.msra.mxu0 %v9991_v47  ;;  %v7063_v51 = vrot.slane %v7061_v41, 1  ;;  %v12307_v23 = vpack.c.b16 %v6509_v32, %v6509_v32  ;;  %v6911_v47 = vshrl.u32 %v10226_v44, 16 }
 0x395   : > { %v12299_v34 = vadd.f32 %v6323_v60, %v6235_v7  ;;  %6091 = vmatmul.bf16.gmra.mxu2 %v9926_v3  ;;  %v12317_v7 = vld [vmem:[#allocation2 + $0x3c] sm:$0xff]   ;;  %v6915_v58 = vrot.slane %v6913_v50, 1 }
 0x396   : > { %v7064_v45 = vor.u32 %v7063_v51, %v7059_v33  ;;  %v6676_v15 = vshll.u32 %v12307_v23, 16  ;;  %v12319_v3 = vld [vmem:[#allocation2 + $0x3c] sm:$0xf0]  ;;  %v9958_v51 = vld [vmem:[#allocation8 + $0x160] sm:$0xff] }
 0x397   : > { %13160 = vst [vmem:[#allocation29_spill] sm:$0xff] %v12299_v34  ;;  %7348 = vmatmul.bf16.gmra.mxu1 %v6897_v21  ;;  %v6237_v6 = vpop.f32.mrf.mxu3  ;;  %v6328_v46 = vpop.f32.mrf.mxu0  ;;  %v6916_v33 = vor.u32 %v6915_v58, %v6911_v47  ;;  %7422 = vmatpush.bf16.msra.mxu2 %v9958_v51  ;;  %v9988_v51 = vld [vmem:[#allocation8 + $0x1d0] sm:$0xff]  ;;  %v10392_v34 = vld [vmem:[#allocation2 + $0x24] sm:$0xe] }
 0x398   : > { %v6052_v20 = vpop.f32.mrf.mxu2  ;;  %v12310_v28 = vsel %vm1092_vm10, %v7064_v45, %v7068_v2  ;;  %v12322_v21 = vrot.slane %v6676_v15, 1  ;;  %8160 = vmatpush.bf16.msra.mxu0 %v9990_v39  ;;  %v9981_v45 = vld [vmem:[#allocation8 + $0x198] sm:$0xff] }
 0x399   : > { %v6053_v60 = vadd.f32 %v6052_v20, %v12070_v35  ;;  %13161 = vst [vmem:[#allocation13_spill] sm:$0xff] %v12310_v28  ;;  %v9982_v20 = vld [vmem:[#allocation8 + $0x1a0] sm:$0xff]  ;;  %v9989_v2 = vld [vmem:[#allocation8 + $0x1d8] sm:$0xff] }
 0x39a   : > { %8071 = vmatpush.bf16.msra.mxu3 %v9982_v20 }
 0x39b   : > { %v6238_v54 = vadd.f32 %v6237_v6, %v6053_v60  ;;  %v6400_v60 = vld [vmem:[#allocation2 + $0x44] sm:$0x1]  ;;  %v6917_v6 = vsel %vm1092_vm10, %v6916_v33, %v12322_v21  ;;  %v9980_v33 = vld [vmem:[#allocation8 + $0x190] sm:$0xff] }
 0x39c   : > { %v12312_v24 = vpop.f32.mrf.mxu1  ;;  %8161 = vmatpush.bf16.msra.mxu0 %v9989_v2 }
 0x39d   : > { %v12314_v48 = vadd.f32 %v6326_v38, %v6238_v54 }
 0x39e   : > { %8072 = vmatpush.bf16.msra.mxu3 %v9981_v45 }
 0x39f   : > { %13162 = vst [vmem:[#allocation14_spill] sm:$0xff] %v12314_v48  ;;  %v6239_v13 = vpop.f32.mrf.mxu3  ;;  %v6331_v0 = vpop.f32.mrf.mxu0 }
 0x3a0   : > { %v6054_v35 = vpop.f32.mrf.mxu2  ;;  %8162 = vmatpush.bf16.msra.mxu0 %v9988_v51  ;;  %v9954_v51 = vld [vmem:[#allocation8 + $0x140] sm:$0xff] }
 0x3a1   : > { %v6055_v37 = vadd.f32 %v6054_v35, %v12092_v52  ;;  %v10200_v52 = vld [vmem:[#allocation2 + $0xa8] sm:$0xff]   ;;  %v6512_v35 = vunpack.c.l.b16 %v6400_v60 }
 0x3a2   : > { %6370 = vmatmul.bf16.gmra.mxu0 %v12167_v29  ;;  %v5433_v15 = vshll.u32 %v10200_v52, 16  ;;  %v5431_v20 = vshrl.u32 %v10200_v52, 16  ;;  %8073 = vmatpush.bf16.msra.mxu3 %v9980_v33 }
 0x3a3   : > { %v6240_v41 = vadd.f32 %v6239_v13, %v6055_v37  ;;  %6281 = vmatmul.bf16.gmra.mxu3 %v12151_v18  ;;  %v5438_v37 = vshll.u32 %v12134_v56, 16  ;;  %v6933_v13 = vshll.u32 %v12317_v7, 16  ;;  %v9955_v56 = vld [vmem:[#allocation8 + $0x148] sm:$0xff] }
 0x3a4   : > { %v12327_v32 = vpop.f32.mrf.mxu1 }
 0x3a5   : > { %v12325_v38 = vadd.f32 %v6328_v46, %v6240_v41  ;;  %6096 = vmatmul.bf16.gmra.mxu2 %v9927_v43  ;;  %v9957_v46 = vld [vmem:[#allocation8 + $0x158] sm:$0xff]  ;;  %v5435_v41 = vrot.slane %v5433_v15, 1  ;;  %v12339_v43 = vpack.c.b16 %v6512_v35, %v6512_v35  ;;  %v5440_v39 = vrot.slane %v5438_v37, 1  ;;  %v9987_v15 = vld [vmem:[#allocation8 + $0x1c8] sm:$0xff] }
 0x3a6   : > { %7423 = vmatpush.bf16.msra.mxu2 %v9957_v46  ;;  %v6935_v60 = vrot.slane %v6933_v13, 1  ;;  %8163 = vmatpush.bf16.msra.mxu0 %v9987_v15 }
 0x3a7   : > { %13163 = vst [vmem:[#allocation15_spill] sm:$0xff] %v12325_v38  ;;  %7353 = vmatmul.bf16.gmra.mxu1 %v6917_v6  ;;  %v6242_v54 = vpop.f32.mrf.mxu3  ;;  %v6333_v50 = vpop.f32.mrf.mxu0  ;;  %v9979_v6 = vld [vmem:[#allocation8 + $0x188] sm:$0xff]  ;;  %v5436_v2 = vor.u32 %v5435_v41, %v5431_v20  ;;  %v9986_v20 = vld [vmem:[#allocation8 + $0x1c0] sm:$0xff] }
 0x3a8   : > { %v6057_v29 = vpop.f32.mrf.mxu2  ;;  %8074 = vmatpush.bf16.msra.mxu3 %v9979_v6 }
 0x3a9   : > { %v6058_v44 = vadd.f32 %v6057_v29, %v12110_v36  ;;  %v9956_v36 = vld [vmem:[#allocation8 + $0x150] sm:$0xff]  ;;  %v5441_v37 = vsel %vm1092_vm10, %v5436_v2, %v5440_v39 }
 0x3aa   : > { %7424 = vmatpush.bf16.msra.mxu2 %v9956_v36  ;;  %v6403_v36 = vld [vmem:[#allocation2 + $0x50] sm:$0x1]  ;;  %8164 = vmatpush.bf16.msra.mxu0 %v9986_v20 }
 0x3ab   : > { %v6243_v18 = vadd.f32 %v6242_v54, %v6058_v44  ;;  %v6690_v44 = vshll.u32 %v12339_v43, 16  ;;  %v6931_v54 = vshrl.u32 %v12317_v7, 16  ;;  %v9978_v7 = vld [vmem:[#allocation8 + $0x180] sm:$0xff] }
 0x3ac   : > { %v12337_v47 = vpop.f32.mrf.mxu1  ;;  %8075 = vmatpush.bf16.msra.mxu3 %v9978_v7 }
 0x3ad   : > { %v12335_v58 = vadd.f32 %v6331_v0, %v6243_v18  ;;  %v9928_v18 = vld [vmem:[#allocation2 + $0xb4] sm:$0xff]  ;;  %v6936_v13 = vor.u32 %v6935_v60, %v6931_v54  ;;  %v12349_v41 = vrot.slane %v6690_v44, 1  ;;  %v6515_v60 = vunpack.c.l.b16 %v6403_v36  ;;  %v10383_v54 = vld [vmem:[#allocation2 + $0x48] sm:$0xff]  }
 0x3ae   : > { %7425 = vmatpush.bf16.msra.mxu2 %v9955_v56  ;;  %v6953_v15 = vshll.u32 %v10383_v54, 16  ;;  %v12361_v36 = vld [vmem:[#allocation2 + $0x54] sm:$0xf0] }
 0x3af   : > { %13164 = vst [vmem:[#allocation16_spill] sm:$0xff] %v12335_v58  ;;  %v6244_v46 = vpop.f32.mrf.mxu3  ;;  %v6336_v45 = vpop.f32.mrf.mxu0  ;;  %v6937_v39 = vsel %vm1092_vm10, %v6936_v13, %v12349_v41  ;;  %v12354_v2 = vpack.c.b16 %v6515_v60, %v6515_v60  ;;  %v6404_v13 = vld [vmem:[#allocation2 + $0x54] sm:$0xff]  }
 0x3b0   : > { %v6059_v29 = vpop.f32.mrf.mxu2  ;;  %v6955_v20 = vrot.slane %v6953_v15, 1 }
 0x3b1   : > { %v6060_v0 = vadd.f32 %v6059_v29, %v12127_v22 }
 0x3b2   : > { %6375 = vmatmul.bf16.gmra.mxu0 %v5441_v37  ;;  %7426 = vmatpush.bf16.msra.mxu2 %v9954_v51 }
 0x3b3   : > { %v6245_v35 = vadd.f32 %v6244_v46, %v6060_v0  ;;  %6286 = vmatmul.bf16.gmra.mxu3 %v10200_v52 }
 0x3b4   : > { %v12347_v22 = vpop.f32.mrf.mxu1 }
 0x3b5   : > { %v12345_v33 = vadd.f32 %v6333_v50, %v6245_v35  ;;  %6101 = vmatmul.bf16.gmra.mxu2 %v9928_v18  ;;  %v9998_v50 = vld [vmem:[#allocation8 + $0x220] sm:$0xff]  ;;  %v6704_v35 = vshll.u32 %v12354_v2, 16  ;;  %v7572_v18 = vld [vmem:[#allocation2 + $0x20] sm:$0x1] }
 0x3b6   : > { %8553 = vmatpush.bf16.msra.mxu1 %v9998_v50  ;;  %v7700_v60 = vunpack.c.l.b16 %v7572_v18  ;;  %v9929_v50 = vld [vmem:[#allocation2 + $0xc0] sm:$0xff] }
 0x3b7   : > { %13165 = vst [vmem:[#allocation17_spill] sm:$0xff] %v12345_v33  ;;  %7358 = vmatmul.bf16.gmra.mxu1 %v6937_v39  ;;  %v6247_v29 = vpop.f32.mrf.mxu3  ;;  %v6338_v0 = vpop.f32.mrf.mxu0  ;;  %v6951_v39 = vshrl.u32 %v10383_v54, 16  ;;  %v6406_v54 = vld [vmem:[#allocation2 + $0x5c] sm:$0x1] }
 0x3b8   : > { %v6062_v56 = vpop.f32.mrf.mxu2  ;;  %v7716_v18 = vpack.c.b16 %v7700_v60, %v7700_v60 }
 0x3b9   : > { %v6063_v6 = vadd.f32 %v6062_v56, %v12139_v14 }
 0x3bb   : > { %v6248_v46 = vadd.f32 %v6247_v29, %v6063_v6  ;;  %v12364_v6 = vrot.slane %v6704_v35, 1  ;;  %v9962_v29 = vld [vmem:[#allocation2 + $0x18] sm:$0xff] }
 0x3bc   : > { %v12358_v52 = vpop.f32.mrf.mxu1  ;;  %v7735_v35 = vshll.u32 %v9962_v29, 16  ;;  %v7733_v60 = vshrl.u32 %v9962_v29, 16 }
 0x3bd   : > { %v12356_v44 = vadd.f32 %v6336_v45, %v6248_v46  ;;  %v10233_v45 = vld [vmem:[#allocation2 + $0x18] sm:$0xf0]  ;;  %v10234_v46 = vld [vmem:[#allocation2 + $0x18] sm:$0xe] }
 0x3bf   : > { %13166 = vst [vmem:[#allocation18_spill] sm:$0xff] %v12356_v44  ;;  %v6249_v51 = vpop.f32.mrf.mxu3  ;;  %v6341_v7 = vpop.f32.mrf.mxu0 }
 0x3c0   : > { %v6064_v37 = vpop.f32.mrf.mxu2 }
 0x3c1   : > { %v6065_v14 = vadd.f32 %v6064_v37, %v12156_v63  ;;  %v6956_v63 = vor.u32 %v6955_v20, %v6951_v39  ;;  %v10235_v37 = vor.u32 %v10234_v46, %v10233_v45  ;;  %v7737_v20 = vrot.slane %v7735_v35, 1 }
 0x3c2   : > { %6380 = vmatmul.bf16.gmra.mxu0 %v12243_v1  ;;  %v7740_v39 = vshll.u32 %v7716_v18, 16 }
 0x3c3   : > { %v6250_v56 = vadd.f32 %v6249_v51, %v6065_v14  ;;  %6291 = vmatmul.bf16.gmra.mxu3 %v12218_v25  ;;  %v6957_v15 = vsel %vm1092_vm10, %v6956_v63, %v12364_v6  ;;  %v7738_v38 = vor.u32 %v7737_v20, %v7733_v60 }
 0x3c4   : > { %v12369_v33 = vpop.f32.mrf.mxu1  ;;  %v7742_v48 = vrot.slane %v7740_v39, 1 }
 0x3c5   : > { %v12367_v44 = vadd.f32 %v6338_v0, %v6250_v56  ;;  %6106 = vmatmul.bf16.gmra.mxu2 %v9929_v50  ;;  %v6518_v56 = vunpack.c.l.b16 %v6406_v54  ;;  %v6973_v50 = vshll.u32 %v6404_v13, 16 }
 0x3c7   : > { %13167 = vst [vmem:[#allocation19_spill] sm:$0xff] %v12367_v44  ;;  %7363 = vmatmul.bf16.gmra.mxu1 %v6957_v15  ;;  %v6252_v51 = vpop.f32.mrf.mxu3  ;;  %v6343_v0 = vpop.f32.mrf.mxu0  ;;  %v6643_v44 = vshll.u32 %v10235_v37, 16  ;;  %v12379_v46 = vpack.c.b16 %v6518_v56, %v6518_v56  ;;  %v6975_v15 = vrot.slane %v6973_v50, 1  ;;  %v7743_v50 = vsel %vm1092_vm10, %v7738_v38, %v7742_v48 }
 0x3c8   : > { %v6067_v14 = vpop.f32.mrf.mxu2 }
 0x3c9   : > { %v6068_v1 = vadd.f32 %v6067_v14, %v12174_v17  ;;  %v6645_v63 = vrot.slane %v6643_v44, 1  ;;  %v6641_v17 = vshrl.u32 %v10235_v37, 16  ;;  %v7573_v14 = vld [vmem:[#allocation2 + $0x2c] sm:$0x1]  ;;  %v10393_v37 = vor.u32 %v10392_v34, %v12238_v30 }
 0x3ca   : > { %v7701_v56 = vunpack.c.l.b16 %v7573_v14 }
 0x3cb   : > { %v6253_v58 = vadd.f32 %v6252_v51, %v6068_v1  ;;  %v6646_v18 = vor.u32 %v6645_v63, %v6641_v17  ;;  %v6657_v17 = vshll.u32 %v10393_v37, 16 }
 0x3cc   : > { %v12377_v25 = vpop.f32.mrf.mxu1  ;;  %v7717_v63 = vpack.c.b16 %v7701_v56, %v7701_v56 }
 0x3cd   : > { %v12375_v45 = vadd.f32 %v6341_v7, %v6253_v58  ;;  %v6718_v58 = vshll.u32 %v12379_v46, 16  ;;  %v6971_v7 = vshrl.u32 %v6404_v13, 16  ;;  %v6651_v13 = vsel %vm1092_vm10, %v6646_v18, %v12248_v62 }
 0x3ce   : > { %v6881_v34 = vshll.u32 %v6651_v13, 16  ;;  %v7752_v62 = vshll.u32 %v7717_v63, 16  ;;  %v6659_v56 = vrot.slane %v6657_v17, 1  ;;  %v7574_v63 = vld [vmem:[#allocation2 + $0x38] sm:$0x1] }
 0x3cf   : > { %13168 = vst [vmem:[#allocation20_spill] sm:$0xff] %v12375_v45  ;;  %v6254_v51 = vpop.f32.mrf.mxu3  ;;  %v6346_v35 = vpop.f32.mrf.mxu0  ;;  %v12383_v45 = vld [vmem:[#allocation2 + $0x24] sm:$0xff]  ;;  %v6976_v44 = vor.u32 %v6975_v15, %v6971_v7 }
 0x3d0   : > { %v6069_v54 = vpop.f32.mrf.mxu2  ;;  %v7747_v60 = vshll.u32 %v12383_v45, 16  ;;  %v10384_v7 = vld [vmem:[#allocation2 + $0x60] sm:$0xff]  }
 0x3d1   : > { %v6070_v1 = vadd.f32 %v6069_v54, %v12190_v9  ;;  %v12391_v9 = vrot.slane %v6718_v58, 1  ;;  %v6883_v54 = vrot.slane %v6881_v34, 1  ;;  %v6993_v18 = vshll.u32 %v10384_v7, 16 }
 0x3d2   : > { %8165 = vmatmul.bf16.vlgmr.msra.gmra.mxu0 %v7743_v50  ;;  %v7749_v14 = vrot.slane %v7747_v60, 1  ;;  %v6991_v17 = vshrl.u32 %v10384_v7, 16 }
 0x3d3   : > { %v6255_v28 = vadd.f32 %v6254_v51, %v6070_v1  ;;  %8076 = vmatmul.bf16.vlgmr.msra.gmra.mxu3 %v9962_v29  ;;  %v6977_v48 = vsel %vm1092_vm10, %v6976_v44, %v12391_v9  ;;  %v7745_v1 = vshrl.u32 %v12383_v45, 16 }
 0x3d4   : > { %v12389_v39 = vpop.f32.mrf.mxu1 }
 0x3d5   : > { %v12387_v20 = vadd.f32 %v6343_v0, %v6255_v28  ;;  %7427 = vmatmul.bf16.vlgmr.msra.gmra.mxu2 %v11980_v42  ;;  %v9997_v28 = vld [vmem:[#allocation8 + $0x218] sm:$0xff]  ;;  %v6652_v42 = vshrl.u32 %v12209_v49, 16  ;;  %v7750_v50 = vor.u32 %v7749_v14, %v7745_v1 }
 0x3d6   : > { %8554 = vmatpush.bf16.msra.mxu1 %v9997_v28 }
 0x3d7   : > { %13169 = vst [vmem:[#allocation21_spill] sm:$0xff] %v12387_v20  ;;  %7368 = vmatmul.bf16.gmra.mxu1 %v6977_v48  ;;  %v6257_v0 = vpop.f32.mrf.mxu3  ;;  %v6348_v15 = vpop.f32.mrf.mxu0  ;;  %v6886_v44 = vshll.u32 %v6652_v42, 16  ;;  %v7754_v48 = vrot.slane %v7752_v62, 1  ;;  %v10236_v20 = vld [vmem:[#allocation2 + $0x30] sm:$0xf0]  ;;  %v7702_v42 = vunpack.c.l.b16 %v7574_v63 }
 0x3d8   : > { %v6072_v30 = vpop.f32.mrf.mxu2 }
 0x3d9   : > { %v6073_v38 = vadd.f32 %v6072_v30, %v12201_v40  ;;  %v6879_v40 = vshrl.u32 %v6651_v13, 16  ;;  %v6655_v30 = vshrl.u32 %v10393_v37, 16  ;;  %v9964_v13 = vld [vmem:[#allocation2 + $0x30] sm:$0xff] }
 0x3da   : > { %v10237_v37 = vld [vmem:[#allocation2 + $0x30] sm:$0xe] }
 0x3db   : > { %v6258_v29 = vadd.f32 %v6257_v0, %v6073_v38  ;;  %v6884_v60 = vor.u32 %v6883_v54, %v6879_v40  ;;  %v6995_v0 = vrot.slane %v6993_v18, 1  ;;  %v10238_v18 = vor.u32 %v10237_v37, %v10236_v20 }
 0x3dc   : > { %v12404_v58 = vpop.f32.mrf.mxu1  ;;  %v7718_v40 = vpack.c.b16 %v7702_v42, %v7702_v42 }
 0x3dd   : > { %v12402_v51 = vadd.f32 %v6346_v35, %v6258_v29  ;;  %v6660_v35 = vor.u32 %v6659_v56, %v6655_v30  ;;  %v6888_v29 = vrot.slane %v6886_v44, 1  ;;  %v7759_v56 = vshll.u32 %v9964_v13, 16 }
 0x3de   : > { %v6666_v30 = vshrl.u32 %v12275_v19, 16  ;;  %v6669_v42 = vshrl.u32 %v10238_v18, 16  ;;  %v10395_v19 = vld [vmem:[#allocation2 + $0x3c] sm:$0xe] }
 0x3df   : > { %13170 = vst [vmem:[#allocation31_spill] sm:$0xff] %v12402_v51  ;;  %v6259_v34 = vpop.f32.mrf.mxu3  ;;  %v6351_v38 = vpop.f32.mrf.mxu0  ;;  %v7755_v51 = vsel %vm1092_vm10, %v7750_v50, %v7754_v48  ;;  %v6889_v14 = vsel %vm1092_vm10, %v6884_v60, %v6888_v29  ;;  %v6665_v1 = vsel %vm1092_vm10, %v6660_v35, %v12301_v8  ;;  %v6671_v48 = vshll.u32 %v10238_v18, 16 }
 0x3e0   : > { %v6074_v49 = vpop.f32.mrf.mxu2  ;;  %v6901_v44 = vshll.u32 %v6665_v1, 16  ;;  %v7013_v8 = vshll.u32 %v12194_v16, 16  ;;  %v7761_v20 = vrot.slane %v7759_v56, 1  ;;  %v6906_v35 = vshll.u32 %v6666_v30, 16 }
 0x3e1   : > { %v6075_v28 = vadd.f32 %v6074_v49, %v12228_v57  ;;  %v6996_v57 = vor.u32 %v6995_v0, %v6991_v17  ;;  %v6899_v0 = vshrl.u32 %v6665_v1, 16 }
 0x3e2   : > { %8170 = vmatmul.bf16.gmra.mxu0 %v7755_v51  ;;  %v6903_v60 = vrot.slane %v6901_v44, 1  ;;  %v6908_v44 = vrot.slane %v6906_v35, 1 }
 0x3e3   : > { %v6260_v10 = vadd.f32 %v6259_v34, %v6075_v28  ;;  %8081 = vmatmul.bf16.gmra.mxu3 %v12383_v45  ;;  %v6997_v7 = vsel %vm1092_vm10, %v6996_v57, %v12203_v11  ;;  %v7764_v45 = vshll.u32 %v7718_v40, 16  ;;  %v7757_v28 = vshrl.u32 %v9964_v13, 16 }
 0x3e4   : > { %v12411_v54 = vpop.f32.mrf.mxu1  ;;  %v6673_v34 = vrot.slane %v6671_v48, 1  ;;  %v6904_v57 = vor.u32 %v6903_v60, %v6899_v0  ;;  %v9996_v0 = vld [vmem:[#allocation8 + $0x210] sm:$0xff] }
 0x3e5   : > { %v12409_v62 = vadd.f32 %v6348_v15, %v6260_v10  ;;  %7432 = vmatmul.bf16.gmra.mxu2 %v6889_v14  ;;  %v7762_v29 = vor.u32 %v7761_v20, %v7757_v28  ;;  %v7766_v17 = vrot.slane %v7764_v45, 1  ;;  %v7575_v14 = vld [vmem:[#allocation2 + $0x44] sm:$0x1]  ;;  %8555 = vmatpush.bf16.msra.mxu1 %v9996_v0 }
 0x3e6   : > { %v7703_v1 = vunpack.c.l.b16 %v7575_v14  ;;  %v6909_v18 = vsel %vm1092_vm10, %v6904_v57, %v6908_v44 }
 0x3e7   : > { %13171 = vst [vmem:[#allocation32_spill] sm:$0xff] %v12409_v62  ;;  %7373 = vmatmul.bf16.gmra.mxu1 %v6997_v7  ;;  %v6262_v15 = vpop.f32.mrf.mxu3  ;;  %v6353_v50 = vpop.f32.mrf.mxu0  ;;  %v7767_v30 = vsel %vm1092_vm10, %v7762_v29, %v7766_v17  ;;  %v10229_v29 = vld [vmem:[#allocation2 + $0x78] sm:$0xff]   ;;  %v6680_v17 = vshrl.u32 %v12307_v23, 16 }
 0x3e8   : > { %v6077_v51 = vpop.f32.mrf.mxu2  ;;  %v7719_v45 = vpack.c.b16 %v7703_v1, %v7703_v1  ;;  %v7033_v57 = vshll.u32 %v10229_v29, 16  ;;  %v7031_v0 = vshrl.u32 %v10229_v29, 16 }
 0x3e9   : > { %v6078_v10 = vadd.f32 %v6077_v51, %v12257_v59  ;;  %v7015_v59 = vrot.slane %v7013_v8, 1  ;;  %v6674_v51 = vor.u32 %v6673_v34, %v6669_v42 }
 0x3eb   : > { %v6263_v49 = vadd.f32 %v6262_v15, %v6078_v10  ;;  %v12427_v10 = vld [vmem:[#allocation2 + $0x3c] sm:$0xff] }
 0x3ec   : > { %v12423_v11 = vpop.f32.mrf.mxu1  ;;  %v7771_v20 = vshll.u32 %v12427_v10, 16 }
 0x3ed   : > { %v12421_v63 = vadd.f32 %v6351_v38, %v6263_v49  ;;  %v7011_v38 = vshrl.u32 %v12194_v16, 16  ;;  %v10396_v49 = vor.u32 %v10395_v19, %v12319_v3  ;;  %v6679_v16 = vsel %vm1092_vm10, %v6674_v51, %v12322_v21 }
 0x3ee   : > { %v6921_v34 = vshll.u32 %v6679_v16, 16  ;;  %v7773_v21 = vrot.slane %v7771_v20, 1  ;;  %v7769_v19 = vshrl.u32 %v12427_v10, 16  ;;  %v7035_v20 = vrot.slane %v7033_v57, 1 }
 0x3ef   : > { %13172 = vst [vmem:[#allocation33_spill] sm:$0xff] %v12421_v63  ;;  %v6264_v56 = vpop.f32.mrf.mxu3  ;;  %v6356_v40 = vpop.f32.mrf.mxu0  ;;  %v7016_v48 = vor.u32 %v7015_v59, %v7011_v38  ;;  %v6685_v59 = vshll.u32 %v10396_v49, 16  ;;  %v6683_v44 = vshrl.u32 %v10396_v49, 16  ;;  %v10240_v49 = vld [vmem:[#allocation2 + $0x48] sm:$0xe] }
 0x3f0   : > { %v6079_v37 = vpop.f32.mrf.mxu2  ;;  %v6923_v14 = vrot.slane %v6921_v34, 1  ;;  %v7774_v38 = vor.u32 %v7773_v21, %v7769_v19 }
 0x3f1   : > { %v6080_v7 = vadd.f32 %v6079_v37, %v12279_v53  ;;  %v7017_v60 = vsel %vm1092_vm10, %v7016_v48, %v12233_v5 }
 0x3f2   : > { %8175 = vmatmul.bf16.gmra.mxu0 %v7767_v30 }
 0x3f3   : > { %v6265_v15 = vadd.f32 %v6264_v56, %v6080_v7  ;;  %8086 = vmatmul.bf16.gmra.mxu3 %v9964_v13  ;;  %v7776_v13 = vshll.u32 %v7719_v45, 16  ;;  %v6687_v7 = vrot.slane %v6685_v59, 1  ;;  %v6926_v56 = vshll.u32 %v6680_v17, 16 }
 0x3f4   : > { %v12434_v53 = vpop.f32.mrf.mxu1 }
 0x3f5   : > { %v12432_v8 = vadd.f32 %v6353_v50, %v6265_v15  ;;  %7437 = vmatmul.bf16.gmra.mxu2 %v6909_v18  ;;  %v7778_v51 = vrot.slane %v7776_v13, 1  ;;  %v7576_v15 = vld [vmem:[#allocation2 + $0x50] sm:$0x1]  ;;  %v6688_v45 = vor.u32 %v6687_v7, %v6683_v44 }
 0x3f7   : > { %13173 = vst [vmem:[#allocation34_spill] sm:$0xff] %v12432_v8  ;;  %7378 = vmatmul.bf16.gmra.mxu1 %v7017_v60  ;;  %v6267_v50 = vpop.f32.mrf.mxu3  ;;  %v6358_v35 = vpop.f32.mrf.mxu0  ;;  %v7779_v60 = vsel %vm1092_vm10, %v7774_v38, %v7778_v51  ;;  %v6693_v21 = vsel %vm1092_vm10, %v6688_v45, %v12349_v41  ;;  %v6694_v38 = vshrl.u32 %v12339_v43, 16  ;;  %v7053_v41 = vshll.u32 %v12251_v31, 16  ;;  %v10398_v43 = vld [vmem:[#allocation2 + $0x54] sm:$0xe] }
 0x3f8   : > { %v6082_v28 = vpop.f32.mrf.mxu2  ;;  %v6941_v57 = vshll.u32 %v6693_v21, 16 }
 0x3f9   : > { %v6083_v3 = vadd.f32 %v6082_v28, %v12295_v27  ;;  %v6919_v27 = vshrl.u32 %v6679_v16, 16  ;;  %v10239_v28 = vld [vmem:[#allocation2 + $0x48] sm:$0xf0] }
 0x3fa   : > { %v9966_v16 = vld [vmem:[#allocation2 + $0x48] sm:$0xff]  ;;  %v10241_v13 = vor.u32 %v10240_v49, %v10239_v28  ;;  %v7577_v28 = vld [vmem:[#allocation2 + $0x5c] sm:$0x1] }
 0x3fb   : > { %v6268_v42 = vadd.f32 %v6267_v50, %v6083_v3  ;;  %v6924_v23 = vor.u32 %v6923_v14, %v6919_v27  ;;  %v7704_v3 = vunpack.c.l.b16 %v7576_v15  ;;  %v7781_v15 = vshrl.u32 %v9966_v16, 16 }
 0x3fc   : > { %v12446_v37 = vpop.f32.mrf.mxu1 }
 0x3fd   : > { %v12444_v5 = vadd.f32 %v6356_v40, %v6268_v42  ;;  %v6928_v40 = vrot.slane %v6926_v56, 1  ;;  %v7783_v42 = vshll.u32 %v9966_v16, 16  ;;  %v7720_v14 = vpack.c.b16 %v7704_v3, %v7704_v3 }
 0x3fe   : > { %v6699_v56 = vshll.u32 %v10241_v13, 16 }
 0x3ff   : > { %13174 = vst [vmem:[#allocation35_spill] sm:$0xff] %v12444_v5  ;;  %v6269_v30 = vpop.f32.mrf.mxu3  ;;  %v6361_v18 = vpop.f32.mrf.mxu0  ;;  %v6929_v50 = vsel %vm1092_vm10, %v6924_v23, %v6928_v40  ;;  %v7785_v44 = vrot.slane %v7783_v42, 1  ;;  %v12469_v42 = vld [vmem:[#allocation2 + $0x54] sm:$0xff] }
 0x400   : > { %v6084_v1 = vpop.f32.mrf.mxu2 }
 0x401   : > { %v6085_v48 = vadd.f32 %v6084_v1, %v12312_v24  ;;  %v7036_v24 = vor.u32 %v7035_v20, %v7031_v0  ;;  %v6943_v1 = vrot.slane %v6941_v57, 1  ;;  %v6946_v20 = vshll.u32 %v6694_v38, 16 }
 0x402   : > { %8180 = vmatmul.bf16.gmra.mxu0 %v7779_v60  ;;  %v7786_v45 = vor.u32 %v7785_v44, %v7781_v15  ;;  %v6697_v60 = vshrl.u32 %v10241_v13, 16  ;;  %v7795_v38 = vshll.u32 %v12469_v42, 16 }
 0x403   : > { %v6270_v34 = vadd.f32 %v6269_v30, %v6085_v48  ;;  %8091 = vmatmul.bf16.gmra.mxu3 %v12427_v10  ;;  %v7037_v29 = vsel %vm1092_vm10, %v7036_v24, %v12268_v4  ;;  %v7788_v10 = vshll.u32 %v7720_v14, 16  ;;  %v6701_v48 = vrot.slane %v6699_v56, 1 }
 0x404   : > { %v12453_v17 = vpop.f32.mrf.mxu1  ;;  %v6939_v30 = vshrl.u32 %v6693_v21, 16  ;;  %v7705_v21 = vunpack.c.l.b16 %v7577_v28 }
 0x405   : > { %v12451_v59 = vadd.f32 %v6358_v35, %v6270_v34  ;;  %7442 = vmatmul.bf16.gmra.mxu2 %v6929_v50  ;;  %v7790_v40 = vrot.slane %v7788_v10, 1  ;;  %v6702_v24 = vor.u32 %v6701_v48, %v6697_v60  ;;  %v7793_v60 = vshrl.u32 %v12469_v42, 16 }
 0x406   : > { %v6944_v0 = vor.u32 %v6943_v1, %v6939_v30 }
 0x407   : > { %13175 = vst [vmem:[#allocation36_spill] sm:$0xff] %v12451_v59  ;;  %7383 = vmatmul.bf16.gmra.mxu1 %v7037_v29  ;;  %v6272_v7 = vpop.f32.mrf.mxu3  ;;  %v6363_v27 = vpop.f32.mrf.mxu0  ;;  %v6948_v29 = vrot.slane %v6946_v20, 1  ;;  %v7791_v57 = vsel %vm1092_vm10, %v7786_v45, %v7790_v40  ;;  %v10230_v20 = vld [vmem:[#allocation2 + $0x90] sm:$0xff]   ;;  %v10401_v59 = vld [vmem:[#allocation2 + $0x9c] sm:$0xe] }
 0x408   : > { %v6087_v19 = vpop.f32.mrf.mxu2 }
 0x409   : > { %v6088_v35 = vadd.f32 %v6087_v19, %v12327_v32  ;;  %v7055_v32 = vrot.slane %v7053_v41, 1  ;;  %v6949_v13 = vsel %vm1092_vm10, %v6944_v0, %v6948_v29  ;;  %v12493_v29 = vld [vmem:[#allocation2 + $0x68] sm:$0x1] }
 0x40b   : > { %v6273_v51 = vadd.f32 %v6272_v7, %v6088_v35  ;;  %v6421_v35 = vld [vmem:[#allocation2 + $0x98] sm:$0x1]  ;;  %v10399_v7 = vor.u32 %v10398_v43, %v12361_v36  ;;  %v9995_v36 = vld [vmem:[#allocation8 + $0x208] sm:$0xff] }
 0x40c   : > { %v12465_v4 = vpop.f32.mrf.mxu1  ;;  %v6533_v44 = vunpack.c.l.b16 %v6421_v35  ;;  %8556 = vmatpush.bf16.msra.mxu1 %v9995_v36  ;;  %v9968_v36 = vld [vmem:[#allocation2 + $0x60] sm:$0xff] }
 0x40d   : > { %v12463_v23 = vadd.f32 %v6361_v18, %v6273_v51  ;;  %v7051_v18 = vshrl.u32 %v12251_v31, 16  ;;  %v6707_v31 = vsel %vm1092_vm10, %v6702_v24, %v12364_v6  ;;  %v7721_v51 = vpack.c.b16 %v7705_v21, %v7705_v21 }
 0x40e   : > { %v6961_v1 = vshll.u32 %v6707_v31, 16  ;;  %v6713_v30 = vshll.u32 %v10399_v7, 16  ;;  %v6708_v6 = vshrl.u32 %v12354_v2, 16  ;;  %v12485_v40 = vpack.c.b16 %v6533_v44, %v6533_v44 }
 0x40f   : > { %13176 = vst [vmem:[#allocation37_spill] sm:$0xff] %v12463_v23  ;;  %v6274_v50 = vpop.f32.mrf.mxu3  ;;  %v6366_v49 = vpop.f32.mrf.mxu0  ;;  %v7056_v19 = vor.u32 %v7055_v32, %v7051_v18  ;;  %v7800_v32 = vshll.u32 %v7721_v51, 16  ;;  %v6959_v0 = vshrl.u32 %v6707_v31, 16  ;;  %v6711_v24 = vshrl.u32 %v10399_v7, 16 }
 0x410   : > { %v6089_v34 = vpop.f32.mrf.mxu2  ;;  %v6788_v2 = vshll.u32 %v12485_v40, 16  ;;  %v7071_v31 = vshrl.u32 %v10230_v20, 16 }
 0x411   : > { %v6090_v3 = vadd.f32 %v6089_v34, %v12337_v47  ;;  %v7057_v41 = vsel %vm1092_vm10, %v7056_v19, %v12289_v61  ;;  %v6963_v61 = vrot.slane %v6961_v1, 1  ;;  %v6715_v34 = vrot.slane %v6713_v30, 1  ;;  %v6422_v19 = vld [vmem:[#allocation2 + $0x9c] sm:$0xff]  }
 0x412   : > { %8185 = vmatmul.bf16.gmra.mxu0 %v7791_v57  ;;  %v7802_v18 = vrot.slane %v7800_v32, 1  ;;  %v12495_v57 = vld [vmem:[#allocation2 + $0x9c] sm:$0xf0]  ;;  %v12500_v1 = vrot.slane %v6788_v2, 1  ;;  %v7807_v32 = vshll.u32 %v9968_v36, 16 }
 0x413   : > { %v6275_v14 = vadd.f32 %v6274_v50, %v6090_v3  ;;  %8096 = vmatmul.bf16.gmra.mxu3 %v9966_v16  ;;  %v7797_v16 = vrot.slane %v7795_v38, 1  ;;  %v6966_v3 = vshll.u32 %v6708_v6, 16  ;;  %v6716_v51 = vor.u32 %v6715_v34, %v6711_v24  ;;  %v6424_v6 = vld [vmem:[#allocation2 + $0xa4] sm:$0x1] }
 0x414   : > { %v12476_v56 = vpop.f32.mrf.mxu1 }
 0x415   : > { %v12474_v47 = vadd.f32 %v6363_v27, %v6275_v14  ;;  %7447 = vmatmul.bf16.gmra.mxu2 %v6949_v13  ;;  %v7798_v50 = vor.u32 %v7797_v16, %v7793_v60  ;;  %v6964_v14 = vor.u32 %v6963_v61, %v6959_v0  ;;  %v6536_v0 = vunpack.c.l.b16 %v6424_v6 }
 0x417   : > { %13177 = vst [vmem:[#allocation38_spill] sm:$0xff] %v12474_v47  ;;  %7388 = vmatmul.bf16.gmra.mxu1 %v7057_v41  ;;  %v6277_v15 = vpop.f32.mrf.mxu3  ;;  %v6368_v48 = vpop.f32.mrf.mxu0  ;;  %v6968_v41 = vrot.slane %v6966_v3, 1  ;;  %v7803_v44 = vsel %vm1092_vm10, %v7798_v50, %v7802_v18  ;;  %v6722_v3 = vshrl.u32 %v12379_v46, 16  ;;  %v7809_v18 = vrot.slane %v7807_v32, 1 }
 0x418   : > { %v6092_v10 = vpop.f32.mrf.mxu2 }
 0x419   : > { %v6093_v27 = vadd.f32 %v6092_v10, %v12347_v22  ;;  %v7073_v22 = vshll.u32 %v10230_v20, 16  ;;  %v7706_v10 = vunpack.c.l.b16 %v12493_v29  ;;  %v6721_v20 = vsel %vm1092_vm10, %v6716_v51, %v12391_v9 }
 0x41a   : > { %v6981_v60 = vshll.u32 %v6721_v20, 16  ;;  %v7093_v9 = vshll.u32 %v6422_v19, 16 }
 0x41b   : > { %v6278_v45 = vadd.f32 %v6277_v15, %v6093_v27  ;;  %v7075_v38 = vrot.slane %v7073_v22, 1  ;;  %v6969_v27 = vsel %vm1092_vm10, %v6964_v14, %v6968_v41  ;;  %v12518_v14 = vpack.c.b16 %v6536_v0, %v6536_v0  ;;  %v12520_v41 = vld [vmem:[#allocation2 + $0x74] sm:$0x1] }
 0x41c   : > { %v12490_v43 = vpop.f32.mrf.mxu1  ;;  %v6983_v2 = vrot.slane %v6981_v60, 1  ;;  %v7707_v32 = vunpack.c.l.b16 %v12520_v41 }
 0x41d   : > { %v12488_v28 = vadd.f32 %v6366_v49, %v6278_v45  ;;  %v7076_v30 = vor.u32 %v7075_v38, %v7071_v31  ;;  %v7722_v45 = vpack.c.b16 %v7706_v10, %v7706_v10  ;;  %v6986_v38 = vshll.u32 %v6722_v3, 16 }
 0x41e   : > { %v7723_v3 = vpack.c.b16 %v7707_v32, %v7707_v32  ;;  %v6428_v32 = vld [vmem:[#allocation2 + $0xb4] sm:$0xff]  }
 0x41f   : > { %13178 = vst [vmem:[#allocation39_spill] sm:$0xff] %v12488_v28  ;;  %v6279_v13 = vpop.f32.mrf.mxu3  ;;  %v6371_v35 = vpop.f32.mrf.mxu0  ;;  %v7077_v16 = vsel %vm1092_vm10, %v7076_v30, %v12500_v1  ;;  %v7091_v30 = vshrl.u32 %v6422_v19, 16  ;;  %v6988_v6 = vrot.slane %v6986_v38, 1 }
 0x420   : > { %v6094_v21 = vpop.f32.mrf.mxu2 }
 0x421   : > { %v6095_v49 = vadd.f32 %v6094_v21, %v12358_v52 }
 0x422   : > { %8190 = vmatmul.bf16.gmra.mxu0 %v7803_v44 }
 0x423   : > { %v6280_v7 = vadd.f32 %v6279_v13, %v6095_v49  ;;  %8101 = vmatmul.bf16.gmra.mxu3 %v12469_v42  ;;  %v7812_v42 = vshll.u32 %v7722_v45, 16  ;;  %v7805_v49 = vshrl.u32 %v9968_v36, 16  ;;  %v6979_v13 = vshrl.u32 %v6721_v20, 16 }
 0x424   : > { %v12505_v52 = vpop.f32.mrf.mxu1 }
 0x425   : > { %v12503_v15 = vadd.f32 %v6368_v48, %v6280_v7  ;;  %7452 = vmatmul.bf16.gmra.mxu2 %v6969_v27  ;;  %v7810_v51 = vor.u32 %v7809_v18, %v7805_v49  ;;  %v7814_v31 = vrot.slane %v7812_v42, 1  ;;  %v6984_v44 = vor.u32 %v6983_v2, %v6979_v13  ;;  %v9994_v42 = vld [vmem:[#allocation8 + $0x200] sm:$0xff]  ;;  %v10231_v13 = vld [vmem:[#allocation2 + $0xa8] sm:$0xff]  }
 0x426   : > { %8557 = vmatpush.bf16.msra.mxu1 %v9994_v42 }
 0x427   : > { %13179 = vst [vmem:[#allocation40_spill] sm:$0xff] %v12503_v15  ;;  %7393 = vmatmul.bf16.gmra.mxu1 %v7077_v16  ;;  %v6282_v22 = vpop.f32.mrf.mxu3  ;;  %v6373_v34 = vpop.f32.mrf.mxu0  ;;  %v9969_v16 = vld [vmem:[#allocation2 + $0x6c] sm:$0xff]  ;;  %v6989_v60 = vsel %vm1092_vm10, %v6984_v44, %v6988_v6 }
 0x428   : > { %v6097_v61 = vpop.f32.mrf.mxu2  ;;  %v7819_v19 = vshll.u32 %v9969_v16, 16 }
 0x429   : > { %v6098_v48 = vadd.f32 %v6097_v61, %v12369_v33  ;;  %v7095_v33 = vrot.slane %v7093_v9, 1  ;;  %v7815_v61 = vsel %vm1092_vm10, %v7810_v51, %v7814_v31 }
 0x42a   : > { %v7821_v38 = vrot.slane %v7819_v19, 1 }
 0x42b   : > { %v6283_v50 = vadd.f32 %v6282_v22, %v6098_v48  ;;  %v7096_v45 = vor.u32 %v7095_v33, %v7091_v30  ;;  %v6427_v48 = vld [vmem:[#allocation2 + $0xb0] sm:$0x1]  ;;  %v7824_v33 = vshll.u32 %v7723_v3, 16 }
 0x42c   : > { %v12516_v21 = vpop.f32.mrf.mxu1  ;;  %v6539_v9 = vunpack.c.l.b16 %v6427_v48 }
 0x42d   : > { %v12514_v24 = vadd.f32 %v6371_v35, %v6283_v50  ;;  %v6802_v35 = vshll.u32 %v12518_v14, 16 }
 0x42e   : > { %v12536_v31 = vpack.c.b16 %v6539_v9, %v6539_v9 }
 0x42f   : > { %13180 = vst [vmem:[#allocation41_spill] sm:$0xff] %v12514_v24  ;;  %v6284_v7 = vpop.f32.mrf.mxu3  ;;  %v6376_v27 = vpop.f32.mrf.mxu0  ;;  %v12531_v0 = vrot.slane %v6802_v35, 1  ;;  %v7826_v35 = vrot.slane %v7824_v33, 1 }
 0x430   : > { %v6099_v46 = vpop.f32.mrf.mxu2  ;;  %v6816_v30 = vshll.u32 %v12536_v31, 16 }
 0x431   : > { %v6100_v10 = vadd.f32 %v6099_v46, %v12377_v25  ;;  %v7097_v50 = vsel %vm1092_vm10, %v7096_v45, %v12531_v0 }
 0x432   : > { %8195 = vmatmul.bf16.gmra.mxu0 %v7815_v61  ;;  %v12550_v9 = vrot.slane %v6816_v30, 1  ;;  %v7133_v30 = vshll.u32 %v6428_v32, 16 }
 0x433   : > { %v6285_v20 = vadd.f32 %v6284_v7, %v6100_v10  ;;  %8106 = vmatmul.bf16.gmra.mxu3 %v9968_v36  ;;  %v7817_v36 = vshrl.u32 %v9969_v16, 16  ;;  %v7113_v10 = vshll.u32 %v10231_v13, 16 }
 0x434   : > { %v12529_v25 = vpop.f32.mrf.mxu1 }
 0x435   : > { %v12527_v22 = vadd.f32 %v6373_v34, %v6285_v20  ;;  %7457 = vmatmul.bf16.gmra.mxu2 %v6989_v60  ;;  %v7822_v7 = vor.u32 %v7821_v38, %v7817_v36  ;;  %v12545_v20 = vld [vmem:[#allocation2 + $0xb4] sm:$0xf0]  ;;  %v7115_v48 = vrot.slane %v7113_v10, 1 }
 0x437   : > { %13181 = vst [vmem:[#allocation42_spill] sm:$0xff] %v12527_v22  ;;  %7398 = vmatmul.bf16.gmra.mxu1 %v7097_v50  ;;  %v6287_v49 = vpop.f32.mrf.mxu3  ;;  %v6378_v34 = vpop.f32.mrf.mxu0  ;;  %v7827_v19 = vsel %vm1092_vm10, %v7822_v7, %v7826_v35 }
 0x438   : > { %v6102_v18 = vpop.f32.mrf.mxu2 }
 0x439   : > { %v6103_v2 = vadd.f32 %v6102_v18, %v12389_v39  ;;  %v12543_v39 = vld [vmem:[#allocation2 + $0x80] sm:$0x1]  ;;  %v9970_v18 = vld [vmem:[#allocation2 + $0x78] sm:$0xff] }
 0x43a   : > { %v7708_v3 = vunpack.c.l.b16 %v12543_v39  ;;  %v7831_v38 = vshll.u32 %v9970_v18, 16 }
 0x43b   : > { %v6288_v51 = vadd.f32 %v6287_v49, %v6103_v2 }
 0x43c   : > { %v12540_v44 = vpop.f32.mrf.mxu1  ;;  %v7724_v33 = vpack.c.b16 %v7708_v3, %v7708_v3 }
 0x43d   : > { %v12538_v46 = vadd.f32 %v6376_v27, %v6288_v51  ;;  %v7111_v27 = vshrl.u32 %v10231_v13, 16 }
 0x43f   : > { %13182 = vst [vmem:[#allocation43_spill] sm:$0xff] %v12538_v46  ;;  %v6289_v61 = vpop.f32.mrf.mxu3  ;;  %v6381_v60 = vpop.f32.mrf.mxu0  ;;  %v7116_v49 = vor.u32 %v7115_v48, %v7111_v27  ;;  %v7829_v48 = vshrl.u32 %v9970_v18, 16  ;;  %v7135_v27 = vrot.slane %v7133_v30, 1  ;;  %v7541_v46 = vld [vmem:[#allocation2 + $0x1c] sm:$0xf] }
 0x440   : > { %v6104_v6 = vpop.f32.mrf.mxu2 }
 0x441   : > { %v6105_v45 = vadd.f32 %v6104_v6, %v12404_v58  ;;  %v6430_v58 = vld [vmem:[#allocation2 + $0xbc] sm:$0x1]  ;;  %v7117_v13 = vsel %vm1092_vm10, %v7116_v49, %v12550_v9  ;;  %v7833_v6 = vrot.slane %v7831_v38, 1 }
 0x442   : > { %8200 = vmatmul.bf16.gmra.mxu0 %v7827_v19 }
 0x443   : > { %v6290_v50 = vadd.f32 %v6289_v61, %v6105_v45  ;;  %8111 = vmatmul.bf16.gmra.mxu3 %v9969_v16  ;;  %v7836_v45 = vshll.u32 %v7724_v33, 16  ;;  %v7834_v19 = vor.u32 %v7833_v6, %v7829_v48  ;;  %v7131_v33 = vshrl.u32 %v6428_v32, 16 }
 0x444   : > { %v12554_v2 = vpop.f32.mrf.mxu1 }
 0x445   : > { %v12552_v42 = vadd.f32 %v6378_v34, %v6290_v50  ;;  %7462 = vmatmul.bf16.gmra.mxu2 %v12254_v55  ;;  %v6542_v34 = vunpack.c.l.b16 %v6430_v58  ;;  %v7838_v3 = vrot.slane %v7836_v45, 1  ;;  %v12566_v50 = vld [vmem:[#allocation2 + $0x8c] sm:$0x1] }
 0x447   : > { %13183 = vst [vmem:[#allocation44_spill] sm:$0xff] %v12552_v42  ;;  %7403 = vmatmul.bf16.gmra.mxu1 %v7117_v13  ;;  %v6292_v10 = vpop.f32.mrf.mxu3  ;;  %v6383_v7 = vpop.f32.mrf.mxu0  ;;  %v12564_v16 = vpack.c.b16 %v6542_v34, %v6542_v34  ;;  %v7839_v34 = vsel %vm1092_vm10, %v7834_v19, %v7838_v3 }
 0x448   : > { %v6107_v51 = vpop.f32.mrf.mxu2 }
 0x449   : > { %v6108_v36 = vadd.f32 %v6107_v51, %v12411_v54  ;;  %v6830_v38 = vshll.u32 %v12564_v16, 16  ;;  %v7709_v51 = vunpack.c.l.b16 %v12566_v50 }
 0x44b   : > { %v6293_v35 = vadd.f32 %v6292_v10, %v6108_v36  ;;  %v7136_v10 = vor.u32 %v7135_v27, %v7131_v33  ;;  %v12576_v45 = vrot.slane %v6830_v38, 1  ;;  %v7725_v32 = vpack.c.b16 %v7709_v51, %v7709_v51 }
 0x44c   : > { %v12562_v55 = vpop.f32.mrf.mxu1 }
 0x44d   : > { %v12560_v61 = vadd.f32 %v6381_v60, %v6293_v35  ;;  %v9971_v60 = vld [vmem:[#allocation2 + $0x84] sm:$0xff]  ;;  %v7137_v48 = vsel %vm1092_vm10, %v7136_v10, %v12576_v45  ;;  %v7848_v33 = vshll.u32 %v7725_v32, 16 }
 0x44e   : > { %v6433_v35 = vld [vmem:[#allocation2 + $0xc8] sm:$0x1]  ;;  %v7841_v51 = vshrl.u32 %v9971_v60, 16 }
 0x44f   : > { %13184 = vst [vmem:[#allocation45_spill] sm:$0xff] %v12560_v61  ;;  %v6294_v58 = vpop.f32.mrf.mxu3  ;;  %v8166_v13 = vpop.f32.mrf.mxu0 }
 0x450   : > { %v6109_v54 = vpop.f32.mrf.mxu2 }
 0x451   : > { %v6110_v49 = vadd.f32 %v6109_v54, %v12423_v11  ;;  %v7843_v11 = vshll.u32 %v9971_v60, 16  ;;  %v6545_v54 = vunpack.c.l.b16 %v6433_v35  ;;  %v7850_v35 = vrot.slane %v7848_v33, 1 }
 0x452   : > { %8205 = vmatmul.bf16.gmra.mxu0 %v7839_v34 }
 0x453   : > { %v6295_v36 = vadd.f32 %v6294_v58, %v6110_v49  ;;  %8116 = vmatmul.bf16.gmra.mxu3 %v9970_v18  ;;  %v10232_v58 = vld [vmem:[#allocation2 + $0xc0] sm:$0xff]   ;;  %v7845_v38 = vrot.slane %v7843_v11, 1  ;;  %v12587_v18 = vpack.c.b16 %v6545_v54, %v6545_v54 }
 0x454   : > { %v12574_v6 = vpop.f32.mrf.mxu1  ;;  %v7153_v10 = vshll.u32 %v10232_v58, 16  ;;  %v7151_v33 = vshrl.u32 %v10232_v58, 16 }
 0x455   : > { %v12572_v30 = vadd.f32 %v6383_v7, %v6295_v36  ;;  %7467 = vmatmul.bf16.gmra.mxu2 %v12271_v12  ;;  %v7846_v34 = vor.u32 %v7845_v38, %v7841_v51  ;;  %v9972_v51 = vld [vmem:[#allocation2 + $0x90] sm:$0xff] }
 0x457   : > { %13185 = vst [vmem:[#allocation46_spill] sm:$0xff] %v12572_v30  ;;  %7408 = vmatmul.bf16.gmra.mxu1 %v7137_v48  ;;  %v8077_v3 = vpop.f32.mrf.mxu3  ;;  %v8168_v7 = vpop.f32.mrf.mxu0  ;;  %v7851_v54 = vsel %vm1092_vm10, %v7846_v34, %v7850_v35  ;;  %v13186_v30 = vld [vmem:[#allocation22_spill] sm:$0xff]  ;;  %v7855_v34 = vshll.u32 %v9972_v51, 16 }
 0x458   : > { %v7428_v27 = vpop.f32.mrf.mxu2  ;;  %v12582_v49 = vadd.f32 %v8166_v13, %v8077_v3  ;;  %v7155_v3 = vrot.slane %v7153_v10, 1 }
 0x459   : > { %v7429_v19 = vadd.f32 %v7428_v27, %v12434_v53  ;;  %v6844_v53 = vshll.u32 %v12587_v18, 16  ;;  %v12592_v27 = vld [vmem:[#allocation2 + $0x98] sm:$0x1] }
 0x45a   : > { %v7710_v42 = vunpack.c.l.b16 %v12592_v27  ;;  %v7156_v10 = vor.u32 %v7155_v3, %v7151_v33  ;;  %v13189_v3 = vld [vmem:[#allocation23_spill] sm:$0xff] }
 0x45b   : > { %v12585_v12 = vadd.f32 %v7429_v19, %v12159_v26  ;;  %v10248_v19 = vld [vmem:[#allocation2 + $0x90] sm:$0xf0]  ;;  %v12601_v38 = vrot.slane %v6844_v53, 1  ;;  %v8312_v53 = vrot.slane %v7541_v46, 5  ;;  %v7853_v46 = vshrl.u32 %v9972_v51, 16 }
 0x45c   : > { %v12589_v36 = vpop.f32.mrf.mxu1  ;;  %v7726_v35 = vpack.c.b16 %v7710_v42, %v7710_v42 }
 0x45f   : > { %v8079_v11 = vpop.f32.mrf.mxu3  ;;  %v8171_v32 = vpop.f32.mrf.mxu0 }
 0x460   : > { %v7430_v48 = vpop.f32.mrf.mxu2  ;;  %v12595_v26 = vadd.f32 %v8168_v7, %v8079_v11  ;;  %v13188_v7 = vld [vmem:[#allocation28_spill] sm:$0xff] }
 0x461   : > { %v7431_v13 = vadd.f32 %v7430_v48, %v12446_v37  ;;  %v10249_v37 = vld [vmem:[#allocation2 + $0x90] sm:$0xe] }
 0x462   : > { %8210 = vmatmul.bf16.gmra.mxu0 %v7851_v54  ;;  %v10250_v11 = vor.u32 %v10249_v37, %v10248_v19  ;;  %v7857_v19 = vrot.slane %v7855_v34, 1  ;;  %v8278_v37 = vld [vmem:[#allocation2 + $0x18] sm:$0xe] }
 0x463   : > { %v12599_v61 = vadd.f32 %v7431_v13, %v13186_v30  ;;  %8121 = vmatmul.bf16.gmra.mxu3 %v9971_v60  ;;  %v7157_v30 = vsel %vm1092_vm10, %v7156_v10, %v12601_v38  ;;  %v7860_v60 = vshll.u32 %v7726_v35, 16  ;;  %v10385_v10 = vld [vmem:[#allocation2 + $0x20] sm:$0x1]  ;;  %v9740_v47 = vrot.slane %v8278_v37, 9 }
 0x464   : > { %v12604_v48 = vpop.f32.mrf.mxu1  ;;  %v6783_v24 = vshll.u32 %v10250_v11, 16  ;;  %v8315_v28 = vrot.slane %v10385_v10, 5 }
 0x465   : > { %13187 = vst [vmem:[#allocation22_spill] sm:$0xff] %v12604_v48  ;;  %7472 = vmatmul.bf16.gmra.mxu2 %v13188_v7  ;;  %v8314_v7 = vrot.slane %v8312_v53, 4  ;;  %v8313_v10 = vsel %vm11479_vm13, %v9740_v47, %v8312_v53 }
 0x467   : > { %7413 = vmatmul.bf16.gmra.mxu1 %v7157_v30  ;;  %v8082_v54 = vpop.f32.mrf.mxu3  ;;  %v8173_v22 = vpop.f32.mrf.mxu0  ;;  %v6785_v30 = vrot.slane %v6783_v24, 1 }
 0x468   : > { %v7433_v58 = vpop.f32.mrf.mxu2  ;;  %v12610_v15 = vadd.f32 %v8171_v32, %v8082_v54  ;;  %v8316_v32 = vsel %vm11479_vm13, %v8314_v7, %v8315_v28  ;;  %v6781_v54 = vshrl.u32 %v10250_v11, 16  ;;  %v12630_v11 = vld [vmem:[#allocation2 + $0x9c] sm:$0xff] }
 0x469   : > { %v7434_v13 = vadd.f32 %v7433_v58, %v12453_v17  ;;  %v7858_v17 = vor.u32 %v7857_v19, %v7853_v46  ;;  %v7862_v58 = vrot.slane %v7860_v60, 1  ;;  %v8439_v24 = vunpack.c.l.b16 %v8316_v32  ;;  %v13192_v19 = vld [vmem:[#allocation24_spill] sm:$0xff]  ;;  %v7543_v46 = vld [vmem:[#allocation2 + $0x28] sm:$0xf] }
 0x46a   : > { %v6786_v5 = vor.u32 %v6785_v30, %v6781_v54  ;;  %v8319_v32 = vrot.slane %v7543_v46, 5 }
 0x46b   : > { %v12613_v33 = vadd.f32 %v7434_v13, %v13189_v3  ;;  %v12619_v3 = vld [vmem:[#allocation2 + $0xa4] sm:$0x1]  ;;  %v7863_v28 = vsel %vm1092_vm10, %v7858_v17, %v7862_v58  ;;  %v7867_v17 = vshll.u32 %v12630_v11, 16 }
 0x46c   : > { %v12615_v42 = vpop.f32.mrf.mxu1  ;;  %v7711_v7 = vunpack.c.l.b16 %v12619_v3  ;;  %v6791_v53 = vsel %vm1092_vm10, %v6786_v5, %v12500_v1 }
 0x46d   : > { %13190 = vst [vmem:[#allocation28_spill] sm:$0xff] %v12615_v42  ;;  %v7869_v5 = vrot.slane %v7867_v17, 1 }
 0x46e   : > { %v7727_v58 = vpack.c.b16 %v7711_v7, %v7711_v7 }
 0x46f   : > { %v8084_v35 = vpop.f32.mrf.mxu3  ;;  %v8176_v37 = vpop.f32.mrf.mxu0 }
 0x470   : > { %v7435_v13 = vpop.f32.mrf.mxu2  ;;  %v12624_v8 = vadd.f32 %v8173_v22, %v8084_v35  ;;  %v13194_v22 = vld [vmem:[#allocation13_spill] sm:$0xff]  ;;  %v7872_v1 = vshll.u32 %v7727_v58, 16 }
 0x471   : > { %v7436_v34 = vadd.f32 %v7435_v13, %v12465_v4  ;;  %v8438_v4 = vunpack.c.l.b16 %v8313_v10  ;;  %v10402_v13 = vor.u32 %v10401_v59, %v12495_v57 }
 0x472   : > { %8215 = vmatmul.bf16.gmra.mxu0 %v7863_v28  ;;  %v13195_v28 = vld [vmem:[#allocation25_spill] sm:$0xff] }
 0x473   : > { %v12627_v60 = vadd.f32 %v7436_v34, %v13192_v19  ;;  %8126 = vmatmul.bf16.gmra.mxu3 %v9972_v51  ;;  %v8470_v30 = vpack.c.b16 %v8439_v24, %v8438_v4  ;;  %v7081_v34 = vshll.u32 %v6791_v53, 16  ;;  %v6797_v59 = vshll.u32 %v10402_v13, 16  ;;  %v8279_v51 = vld [vmem:[#allocation2 + $0x24] sm:$0xe]  ;;  %v10386_v4 = vld [vmem:[#allocation2 + $0x2c] sm:$0x1] }
 0x474   : > { %v12634_v47 = vpop.f32.mrf.mxu1  ;;  %v6792_v19 = vshrl.u32 %v12485_v40, 16  ;;  %v8321_v24 = vrot.slane %v8319_v32, 4  ;;  %v8322_v46 = vrot.slane %v10386_v4, 5  ;;  %v9741_v62 = vrot.slane %v8279_v51, 9  ;;  %v13197_v51 = vld [vmem:[#allocation26_spill] sm:$0xff] }
 0x475   : > { %13193 = vst [vmem:[#allocation23_spill] sm:$0xff] %v12634_v47  ;;  %7477 = vmatmul.bf16.gmra.mxu2 %v13194_v22  ;;  %v7083_v7 = vrot.slane %v7081_v34, 1  ;;  %v7874_v47 = vrot.slane %v7872_v1, 1  ;;  %v6795_v58 = vshrl.u32 %v10402_v13, 16  ;;  %v12652_v34 = vld [vmem:[#allocation2 + $0xb0] sm:$0x1] }
 0x476   : > { %v8323_v17 = vsel %vm11479_vm13, %v8321_v24, %v8322_v46  ;;  %v8320_v42 = vsel %vm11479_vm13, %v9741_v62, %v8319_v32  ;;  %v10251_v1 = vld [vmem:[#allocation2 + $0xa8] sm:$0xf0]  ;;  %v7545_v62 = vld [vmem:[#allocation2 + $0x34] sm:$0xf]  ;;  %v10252_v32 = vld [vmem:[#allocation2 + $0xa8] sm:$0xe] }
 0x477   : > { %8558 = vmatmul.bf16.vlgmr.msra.gmra.mxu1 %v8470_v30  ;;  %v8087_v10 = vpop.f32.mrf.mxu3  ;;  %v8178_v63 = vpop.f32.mrf.mxu0  ;;  %v12663_v24 = vld [vmem:[#allocation2 + $0xa8] sm:$0xff]  ;;  %v8440_v46 = vunpack.c.l.b16 %v8320_v42 }
 0x478   : > { %v7438_v54 = vpop.f32.mrf.mxu2  ;;  %v12641_v57 = vadd.f32 %v8176_v37, %v8087_v10  ;;  %v7079_v37 = vshrl.u32 %v6791_v53, 16  ;;  %v7086_v10 = vshll.u32 %v6792_v19, 16 }
 0x479   : > { %v7439_v35 = vadd.f32 %v7438_v54, %v12476_v56  ;;  %v7865_v56 = vshrl.u32 %v12630_v11, 16  ;;  %v6799_v54 = vrot.slane %v6797_v59, 1 }
 0x47a   : > { %v7088_v19 = vrot.slane %v7086_v10, 1  ;;  %v7879_v10 = vshll.u32 %v12663_v24, 16 }
 0x47b   : > { %v12645_v22 = vadd.f32 %v7439_v35, %v13195_v28  ;;  %v7870_v40 = vor.u32 %v7869_v5, %v7865_v56  ;;  %v7084_v28 = vor.u32 %v7083_v7, %v7079_v37  ;;  %v6800_v59 = vor.u32 %v6799_v54, %v6795_v58 }
 0x47c   : > { %v12647_v30 = vpop.f32.mrf.mxu1  ;;  %v8441_v5 = vunpack.c.l.b16 %v8323_v17  ;;  %v7712_v7 = vunpack.c.l.b16 %v12652_v34  ;;  %v10253_v54 = vor.u32 %v10252_v32, %v10251_v1  ;;  %v8326_v17 = vrot.slane %v7545_v62, 5 }
 0x47d   : > { %13196 = vst [vmem:[#allocation30_spill] sm:$0xff] %v12647_v30  ;;  %v7875_v13 = vsel %vm1092_vm10, %v7870_v40, %v7874_v47 }
 0x47e   : > { %v8471_v47 = vpack.c.b16 %v8441_v5, %v8440_v46  ;;  %v7728_v40 = vpack.c.b16 %v7712_v7, %v7712_v7 }
 0x47f   : > { %v8089_v30 = vpop.f32.mrf.mxu3  ;;  %v8181_v37 = vpop.f32.mrf.mxu0 }
 0x480   : > { %v7440_v35 = vpop.f32.mrf.mxu2  ;;  %v12657_v53 = vadd.f32 %v8178_v63, %v8089_v30  ;;  %v6805_v30 = vsel %vm1092_vm10, %v6800_v59, %v12531_v0  ;;  %v6806_v0 = vshrl.u32 %v12518_v14, 16  ;;  %v13199_v59 = vld [vmem:[#allocation27_spill] sm:$0xff]  ;;  %v7884_v5 = vshll.u32 %v7728_v40, 16  ;;  %v10404_v40 = vld [vmem:[#allocation2 + $0xb4] sm:$0xe] }
 0x481   : > { %v7441_v4 = vadd.f32 %v7440_v35, %v12490_v43  ;;  %v7089_v43 = vsel %vm1092_vm10, %v7084_v28, %v7088_v19  ;;  %v7101_v42 = vshll.u32 %v6805_v30, 16 }
 0x482   : > { %8220 = vmatmul.bf16.gmra.mxu0 %v7875_v13  ;;  %v8328_v13 = vrot.slane %v8326_v17, 4  ;;  %v7886_v14 = vrot.slane %v7884_v5, 1 }
 0x483   : > { %v12660_v56 = vadd.f32 %v7441_v4, %v13197_v51  ;;  %8131 = vmatmul.bf16.gmra.mxu3 %v12630_v11  ;;  %v6811_v4 = vshll.u32 %v10253_v54, 16  ;;  %v7881_v11 = vrot.slane %v7879_v10, 1  ;;  %v8280_v51 = vld [vmem:[#allocation2 + $0x30] sm:$0xe]  ;;  %v7103_v7 = vrot.slane %v7101_v42, 1 }
 0x484   : > { %v12667_v63 = vpop.f32.mrf.mxu1  ;;  %v6809_v10 = vshrl.u32 %v10253_v54, 16  ;;  %v12685_v42 = vld [vmem:[#allocation2 + $0xbc] sm:$0x1] }
 0x485   : > { %13198 = vst [vmem:[#allocation24_spill] sm:$0xff] %v12667_v63  ;;  %7482 = vmatmul.bf16.gmra.mxu2 %v7089_v43  ;;  %v10387_v43 = vld [vmem:[#allocation2 + $0x38] sm:$0x1]  ;;  %v6813_v32 = vrot.slane %v6811_v4, 1 }
 0x486   : > { %v8329_v46 = vrot.slane %v10387_v43, 5 }
 0x487   : > { %8563 = vmatmul.bf16.gmra.mxu1 %v8471_v47  ;;  %v8092_v28 = vpop.f32.mrf.mxu3  ;;  %v7099_v47 = vshrl.u32 %v6805_v30, 16  ;;  %v8183_v43 = vpop.f32.mrf.mxu0  ;;  %v6814_v4 = vor.u32 %v6813_v32, %v6809_v10 }
 0x488   : > { %v7443_v58 = vpop.f32.mrf.mxu2  ;;  %v12674_v19 = vadd.f32 %v8181_v37, %v8092_v28  ;;  %v7106_v37 = vshll.u32 %v6806_v0, 16 }
 0x489   : > { %v7444_v35 = vadd.f32 %v7443_v58, %v12505_v52  ;;  %v7877_v52 = vshrl.u32 %v12663_v24, 16  ;;  %v9742_v58 = vrot.slane %v8280_v51, 9  ;;  %v7104_v63 = vor.u32 %v7103_v7, %v7099_v47  ;;  %v13201_v51 = vld [vmem:[#allocation29_spill] sm:$0xff]  ;;  %v7547_v47 = vld [vmem:[#allocation2 + $0x40] sm:$0xf] }
 0x48a   : > { %v9975_v7 = vld [vmem:[#allocation2 + $0xb4] sm:$0xff] }
 0x48b   : > { %v12678_v1 = vadd.f32 %v7444_v35, %v13199_v59  ;;  %v7882_v28 = vor.u32 %v7881_v11, %v7877_v52  ;;  %v8330_v35 = vsel %vm11479_vm13, %v8328_v13, %v8329_v46  ;;  %v8327_v30 = vsel %vm11479_vm13, %v9742_v58, %v8326_v17 }
 0x48c   : > { %v12680_v62 = vpop.f32.mrf.mxu1  ;;  %v7108_v11 = vrot.slane %v7106_v37, 1  ;;  %v8443_v5 = vunpack.c.l.b16 %v8330_v35  ;;  %v7713_v46 = vunpack.c.l.b16 %v12685_v42  ;;  %v10405_v17 = vor.u32 %v10404_v40, %v12545_v20  ;;  %v8281_v20 = vld [vmem:[#allocation2 + $0x3c] sm:$0xe] }
 0x48d   : > { %13200 = vst [vmem:[#allocation13_spill] sm:$0xff] %v12680_v62  ;;  %v7887_v54 = vsel %vm1092_vm10, %v7882_v28, %v7886_v14  ;;  %v7891_v37 = vshll.u32 %v9975_v7, 16  ;;  %v8333_v28 = vrot.slane %v7547_v47, 5  ;;  %v6820_v35 = vshrl.u32 %v12536_v31, 16 }
 0x48e   : > { %v7109_v52 = vsel %vm1092_vm10, %v7104_v63, %v7108_v11  ;;  %v7729_v58 = vpack.c.b16 %v7713_v46, %v7713_v46  ;;  %v6825_v63 = vshll.u32 %v10405_v17, 16  ;;  %v6823_v31 = vshrl.u32 %v10405_v17, 16  ;;  %v7549_v17 = vld [vmem:[#allocation2 + $0x4c] sm:$0xf] }
 0x48f   : > { %v8094_v48 = vpop.f32.mrf.mxu3  ;;  %v7893_v10 = vrot.slane %v7891_v37, 1  ;;  %v8335_v40 = vrot.slane %v8333_v28, 4 }
 0x490   : > { %v7445_v59 = vpop.f32.mrf.mxu2  ;;  %v12690_v0 = vadd.f32 %v8183_v43, %v8094_v48  ;;  %v6819_v48 = vsel %vm1092_vm10, %v6814_v4, %v12550_v9  ;;  %v7889_v9 = vshrl.u32 %v9975_v7, 16 }
 0x491   : > { %v7446_v62 = vadd.f32 %v7445_v59, %v12516_v21  ;;  %v8442_v21 = vunpack.c.l.b16 %v8327_v30  ;;  %v7121_v14 = vshll.u32 %v6819_v48, 16  ;;  %v7896_v59 = vshll.u32 %v7729_v58, 16  ;;  %v10388_v30 = vld [vmem:[#allocation2 + $0x44] sm:$0x1] }
 0x492   : > { %8225 = vmatmul.bf16.gmra.mxu0 %v7887_v54  ;;  %v8336_v11 = vrot.slane %v10388_v30, 5  ;;  %v7119_v4 = vshrl.u32 %v6819_v48, 16  ;;  %v9743_v54 = vrot.slane %v8281_v20, 9  ;;  %v7894_v46 = vor.u32 %v7893_v10, %v7889_v9  ;;  %v10255_v20 = vld [vmem:[#allocation2 + $0xc0] sm:$0xe] }
 0x493   : > { %v12693_v13 = vadd.f32 %v7446_v62, %v13201_v51  ;;  %8136 = vmatmul.bf16.gmra.mxu3 %v12663_v24  ;;  %v8472_v62 = vpack.c.b16 %v8443_v5, %v8442_v21  ;;  %v7123_v43 = vrot.slane %v7121_v14, 1  ;;  %v6827_v24 = vrot.slane %v6825_v63, 1  ;;  %v9976_v63 = vld [vmem:[#allocation2 + $0xc0] sm:$0xff] }
 0x494   : > { %v12699_v32 = vpop.f32.mrf.mxu1  ;;  %v7126_v5 = vshll.u32 %v6820_v35, 16  ;;  %v8337_v21 = vsel %vm11479_vm13, %v8335_v40, %v8336_v11  ;;  %v8334_v37 = vsel %vm11479_vm13, %v9743_v54, %v8333_v28  ;;  %v7903_v9 = vshll.u32 %v9976_v63, 16 }
 0x495   : > { %7487 = vmatmul.bf16.gmra.mxu2 %v7109_v52  ;;  %v7898_v52 = vrot.slane %v7896_v59, 1  ;;  %v7124_v47 = vor.u32 %v7123_v43, %v7119_v4  ;;  %v6828_v58 = vor.u32 %v6827_v24, %v6823_v31  ;;  %v8445_v30 = vunpack.c.l.b16 %v8337_v21  ;;  %v8282_v31 = vld [vmem:[#allocation2 + $0x48] sm:$0xe] }
 0x496   : > { %v7128_v14 = vrot.slane %v7126_v5, 1  ;;  %v8444_v59 = vunpack.c.l.b16 %v8334_v37  ;;  %v8340_v4 = vrot.slane %v7549_v17, 5 }
 0x497   : > { %8568 = vmatmul.bf16.gmra.mxu1 %v8472_v62  ;;  %v12709_v62 = vld [vmem:[#allocation2 + $0xc8] sm:$0x1]  ;;  %v7899_v48 = vsel %vm1092_vm10, %v7894_v46, %v7898_v52  ;;  %v6833_v28 = vsel %vm1092_vm10, %v6828_v58, %v12576_v45  ;;  %v6834_v46 = vshrl.u32 %v12564_v16, 16  ;;  %v7905_v52 = vrot.slane %v7903_v9, 1 }
 0x498   : > { %v7714_v35 = vunpack.c.l.b16 %v12709_v62  ;;  %v7129_v10 = vsel %vm1092_vm10, %v7124_v47, %v7128_v14  ;;  %v8473_v11 = vpack.c.b16 %v8445_v30, %v8444_v59  ;;  %v7141_v5 = vshll.u32 %v6833_v28, 16  ;;  %v10389_v14 = vld [vmem:[#allocation2 + $0x50] sm:$0x1] }
 0x499   : > { %v8342_v47 = vrot.slane %v8340_v4, 4  ;;  %v7901_v45 = vshrl.u32 %v9976_v63, 16  ;;  %v7146_v58 = vshll.u32 %v6834_v46, 16  ;;  %v9744_v30 = vrot.slane %v8282_v31, 9 }
 0x49a   : > { %v7730_v24 = vpack.c.b16 %v7714_v35, %v7714_v35  ;;  %v7143_v37 = vrot.slane %v7141_v5, 1  ;;  %v12723_v35 = vld [vmem:[#allocation2 + $0xd4] sm:$0x1]  ;;  %v9977_v5 = vld [vmem:[#allocation2 + $0xcc] sm:$0xff] }
 0x49b   : > { %v7906_v59 = vor.u32 %v7905_v52, %v7901_v45  ;;  %v8341_v9 = vsel %vm11479_vm13, %v9744_v30, %v8340_v4  ;;  %v7915_v4 = vshll.u32 %v9977_v5, 16 }
 0x49c   : > { %v12705_v51 = vpop.f32.mrf.mxu1  ;;  %v7908_v21 = vshll.u32 %v7730_v24, 16  ;;  %v8446_v52 = vunpack.c.l.b16 %v8341_v9 }
 0x49d   : > { %13202 = vst [vmem:[#allocation25_spill] sm:$0xff] %v12705_v51  ;;  %v10254_v51 = vld [vmem:[#allocation2 + $0xc0] sm:$0xf0] }
 0x49e   : > { %v10256_v43 = vor.u32 %v10255_v20, %v10254_v51  ;;  %v7139_v51 = vshrl.u32 %v6833_v28, 16  ;;  %v7910_v17 = vrot.slane %v7908_v21, 1  ;;  %v7551_v21 = vld [vmem:[#allocation2 + $0x58] sm:$0xf] }
 0x4a0   : > { %v6839_v54 = vshll.u32 %v10256_v43, 16  ;;  %v6837_v20 = vshrl.u32 %v10256_v43, 16  ;;  %v7911_v46 = vsel %vm1092_vm10, %v7906_v59, %v7910_v17  ;;  %v6848_v59 = vshrl.u32 %v12587_v18, 16 }
 0x4a2   : > { %8230 = vmatmul.bf16.gmra.mxu0 %v7899_v48  ;;  %v8343_v48 = vrot.slane %v10389_v14, 5  ;;  %v7715_v14 = vunpack.c.l.b16 %v12723_v35 }
 0x4a3   : > { %8141 = vmatmul.bf16.gmra.mxu3 %v9975_v7  ;;  %v6841_v7 = vrot.slane %v6839_v54, 1  ;;  %v7148_v54 = vrot.slane %v7146_v58, 1  ;;  %v7917_v58 = vrot.slane %v7915_v4, 1 }
 0x4a4   : > { %v12716_v40 = vpop.f32.mrf.mxu1  ;;  %v8344_v16 = vsel %vm11479_vm13, %v8342_v47, %v8343_v48  ;;  %v7731_v47 = vpack.c.b16 %v7715_v14, %v7715_v14  ;;  %v8347_v48 = vrot.slane %v7551_v21, 5 }
 0x4a5   : > { %7492 = vmatmul.bf16.gmra.mxu2 %v7129_v10  ;;  %v6842_v24 = vor.u32 %v6841_v7, %v6837_v20  ;;  %v8447_v28 = vunpack.c.l.b16 %v8344_v16  ;;  %v8283_v20 = vld [vmem:[#allocation2 + $0x54] sm:$0xe] }
 0x4a6   : > { %v7920_v30 = vshll.u32 %v7731_v47, 16  ;;  %v8349_v17 = vrot.slane %v8347_v48, 4 }
 0x4a7   : > { %8573 = vmatmul.bf16.gmra.mxu1 %v8473_v11  ;;  %v7144_v11 = vor.u32 %v7143_v37, %v7139_v51  ;;  %v6847_v43 = vsel %vm1092_vm10, %v6842_v24, %v12601_v38  ;;  %v8474_v37 = vpack.c.b16 %v8447_v28, %v8446_v52  ;;  %v7913_v51 = vshrl.u32 %v9977_v5, 16 }
 0x4a8   : > { %v7161_v7 = vshll.u32 %v6847_v43, 16  ;;  %v7922_v24 = vrot.slane %v7920_v30, 1  ;;  %v7159_v14 = vshrl.u32 %v6847_v43, 16  ;;  %v9745_v28 = vrot.slane %v8283_v20, 9 }
 0x4a9   : > { %v7149_v31 = vsel %vm1092_vm10, %v7144_v11, %v7148_v54  ;;  %v10390_v11 = vld [vmem:[#allocation2 + $0x5c] sm:$0x1]  ;;  %v7918_v38 = vor.u32 %v7917_v58, %v7913_v51 }
 0x4aa   : > { %v7163_v16 = vrot.slane %v7161_v7, 1  ;;  %v8350_v9 = vrot.slane %v10390_v11, 5  ;;  %v8348_v52 = vsel %vm11479_vm13, %v9745_v28, %v8347_v48  ;;  %v7553_v7 = vld [vmem:[#allocation2 + $0x64] sm:$0xf]  ;;  %v8357_v48 = vrot.slane %v12493_v29, 5 }
 0x4ab   : > { %v7923_v18 = vsel %vm1092_vm10, %v7918_v38, %v7922_v24  ;;  %v8354_v58 = vrot.slane %v7553_v7, 5  ;;  %v8246_v38 = vadd.f32 %v12582_v49, %v12585_v12  ;;  %v7555_v24 = vld [vmem:[#allocation2 + $0x70] sm:$0xf]  ;;  %v8248_v7 = vadd.f32 %v12610_v15, %v12613_v33 }
 0x4ac   : > { %v12721_v10 = vpop.f32.mrf.mxu1  ;;  %v8361_v28 = vrot.slane %v7555_v24, 5 }
 0x4ad   : > { %v8356_v30 = vrot.slane %v8354_v58, 4 }
 0x4ae   : > { %v8363_v29 = vrot.slane %v8361_v28, 4 }
 0x4af   : > { %v8358_v20 = vsel %vm11479_vm13, %v8356_v30, %v8357_v48  ;;  %v8249_v30 = vadd.f32 %v12624_v8, %v12627_v60  ;;  %v8250_v8 = vadd.f32 %v12641_v57, %v12645_v22  ;;  %v8251_v57 = vadd.f32 %v12657_v53, %v12660_v56  ;;  %v7561_v53 = vld [vmem:[#allocation2 + $0x94] sm:$0xf] }
 0x4b0   : > { %v8378_v22 = vrot.slane %v12566_v50, 5  ;;  %v8252_v56 = vadd.f32 %v12674_v19, %v12678_v1  ;;  %v8253_v19 = vadd.f32 %v12690_v0, %v12693_v13  ;;  %v8385_v1 = vrot.slane %v12592_v27, 5  ;;  %v7563_v0 = vld [vmem:[#allocation2 + $0xa0] sm:$0xf] }
 0x4b2   : > { %8235 = vmatmul.bf16.gmra.mxu0 %v7911_v46  ;;  %v8351_v46 = vsel %vm11479_vm13, %v8349_v17, %v8350_v9  ;;  %v8451_v9 = vunpack.c.l.b16 %v8358_v20 }
 0x4b3   : > { %8146 = vmatmul.bf16.gmra.mxu3 %v9976_v63  ;;  %v7166_v63 = vshll.u32 %v6848_v59, 16  ;;  %v8449_v4 = vunpack.c.l.b16 %v8351_v46  ;;  %v8284_v59 = vld [vmem:[#allocation2 + $0x60] sm:$0xe]  ;;  %v8285_v46 = vld [vmem:[#allocation2 + $0x6c] sm:$0xe] }
 0x4b4   : > { %v12732_v45 = vpop.f32.mrf.mxu1 }
 0x4b5   : > { %7497 = vmatmul.bf16.gmra.mxu2 %v7149_v31  ;;  %v7164_v31 = vor.u32 %v7163_v16, %v7159_v14  ;;  %v7168_v21 = vrot.slane %v7166_v63, 1  ;;  %v9746_v16 = vrot.slane %v8284_v59, 9  ;;  %v8371_v59 = vrot.slane %v12543_v39, 5 }
 0x4b7   : > { %8578 = vmatmul.bf16.gmra.mxu1 %v8474_v37  ;;  %v7169_v47 = vsel %vm1092_vm10, %v7164_v31, %v7168_v21  ;;  %v8448_v37 = vunpack.c.l.b16 %v8348_v52  ;;  %v8355_v11 = vsel %vm11479_vm13, %v9746_v16, %v8354_v58  ;;  %v8247_v31 = vadd.f32 %v12595_v26, %v12599_v61  ;;  %v8286_v58 = vld [vmem:[#allocation2 + $0x78] sm:$0xe] }
 0x4b8   : > { %v8364_v52 = vrot.slane %v12520_v41, 5  ;;  %v9747_v21 = vrot.slane %v8285_v46, 9  ;;  %v9748_v16 = vrot.slane %v8286_v58, 9  ;;  %v12789_v46 = vpop.f32.mrf.mxu2 }
 0x4b9   : > { %v8475_v43 = vpack.c.b16 %v8449_v4, %v8448_v37  ;;  %v7557_v37 = vld [vmem:[#allocation2 + $0x7c] sm:$0xf] }
 0x4ba   : > { %v8365_v49 = vsel %vm11479_vm13, %v8363_v29, %v8364_v52  ;;  %v8362_v12 = vsel %vm11479_vm13, %v9747_v21, %v8361_v28  ;;  %v8368_v26 = vrot.slane %v7557_v37, 5  ;;  %v8287_v21 = vld [vmem:[#allocation2 + $0x84] sm:$0xe] }
 0x4bb   : > { %v8453_v4 = vunpack.c.l.b16 %v8365_v49 }
 0x4bc   : > { %v12737_v54 = vpop.f32.mrf.mxu1  ;;  %v8370_v41 = vrot.slane %v8368_v26, 4  ;;  %v8369_v15 = vsel %vm11479_vm13, %v9748_v16, %v8368_v26 }
 0x4be   : > { %v8372_v20 = vsel %vm11479_vm13, %v8370_v41, %v8371_v59 }
 0x4bf   : > { %v8455_v33 = vunpack.c.l.b16 %v8372_v20 }
 0x4c2   : > { %8240 = vmatmul.bf16.gmra.mxu0 %v7923_v18 }
 0x4c3   : > { %8151 = vmatmul.bf16.gmra.mxu3 %v9977_v5  ;;  %v8450_v5 = vunpack.c.l.b16 %v8355_v11  ;;  %v12783_v11 = vld [vmem:[%s13062_s4] ss:$0 sm:$0xff] }
 0x4c4   : > { %v12745_v51 = vpop.f32.mrf.mxu1 }
 0x4c5   : > { %7502 = vmatmul.bf16.gmra.mxu2 %v7169_v47  ;;  %v8476_v63 = vpack.c.b16 %v8451_v9, %v8450_v5  ;;  %v8452_v47 = vunpack.c.l.b16 %v8362_v12  ;;  %v8454_v9 = vunpack.c.l.b16 %v8369_v15  ;;  %v7559_v5 = vld [vmem:[#allocation2 + $0x88] sm:$0xf]  ;;  %v9749_v12 = vrot.slane %v8287_v21, 9 }
 0x4c6   : > { %v8382_v15 = vrot.slane %v7561_v53, 5 }
 0x4c7   : > { %8583 = vmatmul.bf16.gmra.mxu1 %v8475_v43  ;;  %v8477_v61 = vpack.c.b16 %v8453_v4, %v8452_v47  ;;  %v8478_v24 = vpack.c.b16 %v8455_v33, %v8454_v9  ;;  %v12799_v47 = vpop.f32.mrf.mxu0 }
 0x4cc   : > { %v12748_v17 = vpop.f32.mrf.mxu1 }
 0x4cf   : > { %v12812_v9 = vpop.f32.mrf.mxu0 }
 0x4d4   : > { %v12756_v14 = vpop.f32.mrf.mxu1 }
 0x4d7   : > { %8588 = vmatmul.bf16.gmra.mxu1 %v8476_v63  ;;  %v8375_v63 = vrot.slane %v7559_v5, 5 }
 0x4d9   : > { %v8377_v52 = vrot.slane %v8375_v63, 4  ;;  %v8376_v26 = vsel %vm11479_vm13, %v9749_v12, %v8375_v63  ;;  %v12827_v12 = vpop.f32.mrf.mxu0 }
 0x4da   : > { %v8456_v50 = vunpack.c.l.b16 %v8376_v26  ;;  %v8389_v26 = vrot.slane %v7563_v0, 5 }
 0x4db   : > { %v8379_v4 = vsel %vm11479_vm13, %v8377_v52, %v8378_v22 }
 0x4dc   : > { %v12761_v18 = vpop.f32.mrf.mxu1  ;;  %v8457_v58 = vunpack.c.l.b16 %v8379_v4  ;;  %v8391_v53 = vrot.slane %v8389_v26, 4 }
 0x4de   : > { %v8479_v20 = vpack.c.b16 %v8457_v58, %v8456_v50 }
 0x4e4   : > { %v12769_v43 = vpop.f32.mrf.mxu1 }
 0x4e7   : > { %8593 = vmatmul.bf16.gmra.mxu1 %v8477_v61  ;;  %v12802_v61 = vpop.f32.mrf.mxu3 }
 0x4ec   : > { %v12774_v48 = vpop.f32.mrf.mxu1 }
 0x4f4   : > { %v8559_v39 = vpop.f32.mrf.mxu1 }
 0x4f5   : > { %v8639_v60 = vadd.f32 %v8559_v39, %v8246_v38  ;;  %v12814_v39 = vpop.f32.mrf.mxu3 }
 0x4f7   : > { %v8675_v28 = vadd.f32 %v12783_v11, %v8639_v60  ;;  %8598 = vmatmul.bf16.gmra.mxu1 %v8478_v24  ;;  %v8384_v60 = vrot.slane %v8382_v15, 4  ;;  %v8288_v24 = vld [vmem:[#allocation2 + $0x90] sm:$0xe] }
 0x4f9   : > { %v8707_v29 = vmax.f32 %v8675_v28, 0.0  ;;  %v8386_v52 = vsel %vm11479_vm13, %v8384_v60, %v8385_v1 }
 0x4fb   : > { %8739 = vst [vmem:[%s12791_s6] sm:$0xff] %v8707_v29  ;;  %v9750_v29 = vrot.slane %v8288_v24, 9 }
 0x4fc   : > { %v8561_v38 = vpop.f32.mrf.mxu1 }
 0x4fd   : > { %v8640_v49 = vadd.f32 %v8561_v38, %v8247_v31  ;;  %v12809_v31 = vpop.f32.mrf.mxu2  ;;  %v8383_v22 = vsel %vm11479_vm13, %v9750_v29, %v8382_v15  ;;  %v12830_v13 = vpop.f32.mrf.mxu3 }
 0x4fe   : > { %v8458_v27 = vunpack.c.l.b16 %v8383_v22  ;;  %v12837_v15 = vpop.f32.mrf.mxu0 }
 0x4ff   : > { %v8676_v37 = vadd.f32 %v12783_v11, %v8640_v49  ;;  %v8459_v49 = vunpack.c.l.b16 %v8386_v52  ;;  %v7565_v52 = vld [vmem:[#allocation2 + $0xac] sm:$0xf] }
 0x501   : > { %v8708_v41 = vmax.f32 %v8676_v37, 0.0  ;;  %v8480_v37 = vpack.c.b16 %v8459_v49, %v8458_v27 }
 0x503   : > { %8740 = vst [vmem:[%s12791_s6 + $0x8] sm:$0xff] %v8708_v41 }
 0x504   : > { %v8564_v59 = vpop.f32.mrf.mxu1 }
 0x505   : > { %v8641_v16 = vadd.f32 %v8564_v59, %v8248_v7  ;;  %v12820_v28 = vpop.f32.mrf.mxu2  ;;  %v8289_v59 = vld [vmem:[#allocation2 + $0x9c] sm:$0xe] }
 0x506   : > { %v12849_v49 = vpop.f32.mrf.mxu0 }
 0x507   : > { %v8677_v33 = vadd.f32 %v12783_v11, %v8641_v16  ;;  %8603 = vmatmul.bf16.gmra.mxu1 %v8479_v20  ;;  %v8392_v16 = vrot.slane %v12619_v3, 5 }
 0x509   : > { %v8709_v5 = vmax.f32 %v8677_v33, 0.0  ;;  %v8393_v60 = vsel %vm11479_vm13, %v8391_v53, %v8392_v16 }
 0x50b   : > { %8741 = vst [vmem:[%s12791_s6 + $0x10] sm:$0xff] %v8709_v5  ;;  %v12839_v5 = vpop.f32.mrf.mxu3 }
 0x50c   : > { %v8566_v7 = vpop.f32.mrf.mxu1 }
 0x50d   : > { %v8642_v63 = vadd.f32 %v8566_v7, %v8249_v30  ;;  %v12833_v58 = vpop.f32.mrf.mxu2 }
 0x50f   : > { %v8678_v21 = vadd.f32 %v12783_v11, %v8642_v63  ;;  %v8461_v63 = vunpack.c.l.b16 %v8393_v60  ;;  %v12868_v60 = vpop.f32.mrf.mxu0 }
 0x511   : > { %v8710_v38 = vmax.f32 %v8678_v21, 0.0 }
 0x513   : > { %8742 = vst [vmem:[%s12791_s6 + $0x18] sm:$0xff] %v8710_v38  ;;  %v8396_v38 = vrot.slane %v7565_v52, 5  ;;  %v12852_v0 = vpop.f32.mrf.mxu3 }
 0x514   : > { %v8569_v30 = vpop.f32.mrf.mxu1 }
 0x515   : > { %v8643_v4 = vadd.f32 %v8569_v30, %v8250_v8  ;;  %v9751_v8 = vrot.slane %v8289_v59, 9  ;;  %v12846_v29 = vpop.f32.mrf.mxu2 }
 0x517   : > { %v8679_v41 = vadd.f32 %v12783_v11, %v8643_v4  ;;  %8608 = vmatmul.bf16.gmra.mxu1 %v8480_v37  ;;  %v8390_v1 = vsel %vm11479_vm13, %v9751_v8, %v8389_v26  ;;  %v8398_v4 = vrot.slane %v8396_v38, 4  ;;  %v7449_v37 = vadd.f32 %v12789_v46, %v12529_v25  ;;  %v8290_v26 = vld [vmem:[#allocation2 + $0xa8] sm:$0xe] }
 0x518   : > { %v8460_v3 = vunpack.c.l.b16 %v8390_v1  ;;  %v9752_v59 = vrot.slane %v8290_v26, 9  ;;  %v8187_v46 = vadd.f32 %v12799_v47, %v12802_v61  ;;  %v13204_v61 = vld [vmem:[#allocation15_spill] sm:$0xff] }
 0x519   : > { %v8711_v50 = vmax.f32 %v8679_v41, 0.0  ;;  %v8399_v41 = vrot.slane %v12652_v34, 5 }
 0x51a   : > { %v8481_v22 = vpack.c.b16 %v8461_v63, %v8460_v3  ;;  %v8397_v25 = vsel %vm11479_vm13, %v9752_v59, %v8396_v38  ;;  %v7567_v3 = vld [vmem:[#allocation2 + $0xb8] sm:$0xf] }
 0x51b   : > { %8743 = vst [vmem:[%s12791_s6 + $0x20] sm:$0xff] %v8711_v50  ;;  %v8400_v16 = vsel %vm11479_vm13, %v8398_v4, %v8399_v41  ;;  %v12870_v1 = vpop.f32.mrf.mxu3  ;;  %v8462_v63 = vunpack.c.l.b16 %v8397_v25  ;;  %v8403_v47 = vrot.slane %v7567_v3, 5  ;;  %v7454_v4 = vadd.f32 %v12820_v28, %v12554_v2  ;;  %v8291_v41 = vld [vmem:[#allocation2 + $0xb4] sm:$0xe] }
 0x51c   : > { %v8571_v20 = vpop.f32.mrf.mxu1 }
 0x51d   : > { %v8644_v33 = vadd.f32 %v8571_v20, %v8251_v57  ;;  %v13203_v20 = vld [vmem:[#allocation14_spill] sm:$0xff] }
 0x51f   : > { %v8680_v24 = vadd.f32 %v12783_v11, %v8644_v33  ;;  %v7516_v33 = vadd.f32 %v7449_v37, %v13203_v20  ;;  %v12883_v37 = vpop.f32.mrf.mxu0  ;;  %v9753_v20 = vrot.slane %v8291_v41, 9 }
 0x521   : > { %v8712_v7 = vmax.f32 %v8680_v24, 0.0  ;;  %v8463_v24 = vunpack.c.l.b16 %v8400_v16 }
 0x523   : > { %8744 = vst [vmem:[%s12791_s6 + $0x28] sm:$0xff] %v8712_v7  ;;  %v8254_v7 = vadd.f32 %v8187_v46, %v7516_v33 }
 0x524   : > { %v8574_v57 = vpop.f32.mrf.mxu1 }
 0x525   : > { %v8645_v21 = vadd.f32 %v8574_v57, %v8252_v56  ;;  %v12858_v56 = vpop.f32.mrf.mxu2 }
 0x527   : > { %v8681_v27 = vadd.f32 %v12783_v11, %v8645_v21  ;;  %8613 = vmatmul.bf16.gmra.mxu1 %v8481_v22  ;;  %v8482_v21 = vpack.c.b16 %v8463_v24, %v8462_v63  ;;  %v12902_v3 = vpop.f32.mrf.mxu0 }
 0x529   : > { %v8713_v30 = vmax.f32 %v8681_v27, 0.0 }
 0x52b   : > { %8745 = vst [vmem:[%s12791_s6 + $0x30] sm:$0xff] %v8713_v30  ;;  %v8189_v30 = vadd.f32 %v12812_v9, %v12814_v39  ;;  %v13205_v39 = vld [vmem:[#allocation16_spill] sm:$0xff] }
 0x52c   : > { %v8576_v50 = vpop.f32.mrf.mxu1  ;;  %v7518_v33 = vadd.f32 %v7454_v4, %v13205_v39  ;;  %v8413_v4 = vrot.slane %v12709_v62, 5  ;;  %v8197_v62 = vadd.f32 %v12849_v49, %v12852_v0  ;;  %v8420_v0 = vrot.slane %v12723_v35, 5 }
 0x52d   : > { %v8646_v53 = vadd.f32 %v8576_v50, %v8253_v19  ;;  %v7451_v19 = vadd.f32 %v12809_v31, %v12540_v44  ;;  %v12875_v22 = vpop.f32.mrf.mxu2  ;;  %v8405_v31 = vrot.slane %v8403_v47, 4  ;;  %v8406_v50 = vrot.slane %v12685_v42, 5 }
 0x52e   : > { %v8192_v42 = vadd.f32 %v12827_v12, %v12830_v13 }
 0x52f   : > { %v8682_v8 = vadd.f32 %v12783_v11, %v8646_v53  ;;  %v7517_v38 = vadd.f32 %v7451_v19, %v13204_v61  ;;  %v12887_v53 = vpop.f32.mrf.mxu3  ;;  %v8407_v9 = vsel %vm11479_vm13, %v8405_v31, %v8406_v50  ;;  %v13206_v61 = vld [vmem:[#allocation17_spill] sm:$0xff]  ;;  %v8292_v31 = vld [vmem:[#allocation2 + $0xc0] sm:$0xe] }
 0x530   : > { %v8465_v46 = vunpack.c.l.b16 %v8407_v9  ;;  %v8256_v24 = vadd.f32 %v8192_v42, %v7518_v33  ;;  %v9754_v50 = vrot.slane %v8292_v31, 9  ;;  %v7571_v33 = vld [vmem:[#allocation2 + $0xd0] sm:$0xf] }
 0x531   : > { %v8714_v34 = vmax.f32 %v8682_v8, 0.0  ;;  %v8255_v26 = vadd.f32 %v8189_v30, %v7517_v38  ;;  %v8404_v8 = vsel %vm11479_vm13, %v9753_v20, %v8403_v47  ;;  %v7459_v30 = vadd.f32 %v12846_v29, %v12574_v6 }
 0x532   : > { %v8464_v19 = vunpack.c.l.b16 %v8404_v8 }
 0x533   : > { %8746 = vst [vmem:[%s12791_s6 + $0x38] sm:$0xff] %v8714_v34  ;;  %v7456_v34 = vadd.f32 %v12833_v58, %v12562_v55  ;;  %v8194_v55 = vadd.f32 %v12837_v15, %v12839_v5  ;;  %v13207_v15 = vld [vmem:[#allocation18_spill] sm:$0xff] }
 0x534   : > { %v8579_v52 = vpop.f32.mrf.mxu1  ;;  %v7520_v5 = vadd.f32 %v7459_v30, %v13207_v15 }
 0x535   : > { %v8647_v57 = vadd.f32 %v8579_v52, %v8254_v7  ;;  %v12893_v28 = vpop.f32.mrf.mxu2  ;;  %v7569_v7 = vld [vmem:[#allocation2 + $0xc4] sm:$0xf]  ;;  %v7519_v12 = vadd.f32 %v7456_v34, %v13206_v61  ;;  %v8417_v34 = vrot.slane %v7571_v33, 5 }
 0x536   : > { %v8410_v47 = vrot.slane %v7569_v7, 5  ;;  %v8258_v8 = vadd.f32 %v8197_v62, %v7520_v5  ;;  %v8293_v7 = vld [vmem:[#allocation2 + $0xcc] sm:$0xe] }
 0x537   : > { %v8683_v27 = vadd.f32 %v12783_v11, %v8647_v57  ;;  %8618 = vmatmul.bf16.gmra.mxu1 %v8482_v21  ;;  %v8483_v57 = vpack.c.b16 %v8465_v46, %v8464_v19  ;;  %v12904_v21 = vpop.f32.mrf.mxu3 }
 0x538   : > { %v8411_v6 = vsel %vm11479_vm13, %v9754_v50, %v8410_v47 }
 0x539   : > { %v8715_v44 = vmax.f32 %v8683_v27, 0.0  ;;  %v8412_v27 = vrot.slane %v8410_v47, 4  ;;  %v8466_v42 = vunpack.c.l.b16 %v8411_v6  ;;  %v8419_v47 = vrot.slane %v8417_v34, 4 }
 0x53b   : > { %8747 = vst [vmem:[%s12791_s6 + $0x40] sm:$0xff] %v8715_v44  ;;  %v8257_v44 = vadd.f32 %v8194_v55, %v7519_v12  ;;  %v8421_v35 = vsel %vm11479_vm13, %v8419_v47, %v8420_v0 }
 0x53c   : > { %v8581_v59 = vpop.f32.mrf.mxu1 }
 0x53d   : > { %v8648_v16 = vadd.f32 %v8581_v59, %v8255_v26  ;;  %v12910_v38 = vpop.f32.mrf.mxu2  ;;  %v8414_v59 = vsel %vm11479_vm13, %v8412_v27, %v8413_v4  ;;  %v13210_v4 = vld [vmem:[#allocation20_spill] sm:$0xff] }
 0x53e   : > { %v8467_v39 = vunpack.c.l.b16 %v8414_v59  ;;  %v13211_v59 = vld [vmem:[#allocation28_spill] sm:$0xff] }
 0x53f   : > { %v8684_v2 = vadd.f32 %v12783_v11, %v8648_v16  ;;  %v12919_v16 = vpop.f32.mrf.mxu0  ;;  %v12922_v9 = vpop.f32.mrf.mxu3  ;;  %v7466_v15 = vadd.f32 %v12893_v28, %v13211_v59 }
 0x540   : > { %v8484_v19 = vpack.c.b16 %v8467_v39, %v8466_v42  ;;  %v13212_v39 = vld [vmem:[#allocation21_spill] sm:$0xff]  ;;  %v13213_v42 = vld [vmem:[#allocation23_spill] sm:$0xff]  ;;  %v8207_v0 = vadd.f32 %v12919_v16, %v12922_v9 }
 0x541   : > { %v8716_v25 = vmax.f32 %v8684_v2, 0.0  ;;  %v7461_v2 = vadd.f32 %v12858_v56, %v12589_v36  ;;  %v8199_v36 = vadd.f32 %v12868_v60, %v12870_v1  ;;  %v7523_v33 = vadd.f32 %v7466_v15, %v13212_v39  ;;  %v13220_v39 = vld [vmem:[#allocation34_spill] sm:$0xff] }
 0x542   : > { %v7469_v28 = vadd.f32 %v12910_v38, %v13213_v42 }
 0x543   : > { %8748 = vst [vmem:[%s12791_s6 + $0x48] sm:$0xff] %v8716_v25 }
 0x544   : > { %v8584_v63 = vpop.f32.mrf.mxu1 }
 0x545   : > { %v8649_v52 = vadd.f32 %v8584_v63, %v8256_v24  ;;  %v7470_v25 = vpop.f32.mrf.mxu2  ;;  %v13208_v63 = vld [vmem:[#allocation19_spill] sm:$0xff] }
 0x547   : > { %v8685_v13 = vadd.f32 %v12783_v11, %v8649_v52  ;;  %8623 = vmatmul.bf16.gmra.mxu1 %v8483_v57  ;;  %v7521_v52 = vadd.f32 %v7461_v2, %v13208_v63  ;;  %v9755_v57 = vrot.slane %v8293_v7, 9  ;;  %v8208_v56 = vpop.f32.mrf.mxu0  ;;  %v8119_v12 = vpop.f32.mrf.mxu3  ;;  %v13214_v63 = vld [vmem:[#allocation31_spill] sm:$0xff] }
 0x549   : > { %v8717_v58 = vmax.f32 %v8685_v13, 0.0  ;;  %v13209_v13 = vld [vmem:[#allocation22_spill] sm:$0xff]  ;;  %v8418_v30 = vsel %vm11479_vm13, %v9755_v57, %v8417_v34 }
 0x54a   : > { %v7464_v55 = vadd.f32 %v12875_v22, %v13209_v13  ;;  %v8202_v22 = vadd.f32 %v12883_v37, %v12887_v53  ;;  %v8204_v37 = vadd.f32 %v12902_v3, %v12904_v21  ;;  %v13215_v21 = vld [vmem:[#allocation30_spill] sm:$0xff]  ;;  %v13216_v13 = vld [vmem:[#allocation32_spill] sm:$0xff] }
 0x54b   : > { %8749 = vst [vmem:[%s12791_s6 + $0x50] sm:$0xff] %v8717_v58  ;;  %v8259_v58 = vadd.f32 %v8199_v36, %v7521_v52  ;;  %v7524_v52 = vadd.f32 %v7469_v28, %v13214_v63  ;;  %v7471_v47 = vadd.f32 %v7470_v25, %v13215_v21 }
 0x54c   : > { %v8586_v26 = vpop.f32.mrf.mxu1  ;;  %v7522_v60 = vadd.f32 %v7464_v55, %v13210_v4  ;;  %v13217_v4 = vld [vmem:[#allocation24_spill] sm:$0xff] }
 0x54d   : > { %v8650_v41 = vadd.f32 %v8586_v26, %v8257_v44  ;;  %v7473_v31 = vpop.f32.mrf.mxu2  ;;  %v8468_v26 = vunpack.c.l.b16 %v8418_v30  ;;  %v8262_v38 = vadd.f32 %v8207_v0, %v7524_v52  ;;  %v7525_v55 = vadd.f32 %v7471_v47, %v13216_v13 }
 0x54e   : > { %v8260_v23 = vadd.f32 %v8202_v22, %v7522_v60  ;;  %v7474_v60 = vadd.f32 %v7473_v31, %v13217_v4  ;;  %v13224_v4 = vld [vmem:[#allocation37_spill] sm:$0xff] }
 0x54f   : > { %v8686_v20 = vadd.f32 %v12783_v11, %v8650_v41  ;;  %v8469_v41 = vunpack.c.l.b16 %v8421_v35  ;;  %v8211_v5 = vpop.f32.mrf.mxu0  ;;  %v8122_v6 = vpop.f32.mrf.mxu3  ;;  %v8209_v35 = vadd.f32 %v8208_v56, %v8119_v12 }
 0x551   : > { %v8718_v29 = vmax.f32 %v8686_v20, 0.0  ;;  %v8485_v20 = vpack.c.b16 %v8469_v41, %v8468_v26  ;;  %v8263_v16 = vadd.f32 %v8209_v35, %v7525_v55  ;;  %v13218_v26 = vld [vmem:[#allocation33_spill] sm:$0xff] }
 0x552   : > { %v7526_v41 = vadd.f32 %v7474_v60, %v13218_v26 }
 0x553   : > { %8750 = vst [vmem:[%s12791_s6 + $0x58] sm:$0xff] %v8718_v29 }
 0x554   : > { %v8589_v46 = vpop.f32.mrf.mxu1 }
 0x555   : > { %v8651_v24 = vadd.f32 %v8589_v46, %v8258_v8  ;;  %v7475_v8 = vpop.f32.mrf.mxu2  ;;  %v8261_v46 = vadd.f32 %v8204_v37, %v7523_v33 }
 0x557   : > { %v8687_v49 = vadd.f32 %v12783_v11, %v8651_v24  ;;  %8628 = vmatmul.bf16.gmra.mxu1 %v8484_v19  ;;  %v8213_v24 = vpop.f32.mrf.mxu0  ;;  %v8124_v7 = vpop.f32.mrf.mxu3 }
 0x558   : > { %v8214_v37 = vadd.f32 %v8213_v24, %v8124_v7 }
 0x559   : > { %v8719_v61 = vmax.f32 %v8687_v49, 0.0 }
 0x55b   : > { %8751 = vst [vmem:[%s12791_s6 + $0x60] sm:$0xff] %v8719_v61 }
 0x55c   : > { %v8591_v27 = vpop.f32.mrf.mxu1 }
 0x55d   : > { %v8652_v44 = vadd.f32 %v8591_v27, %v8259_v58  ;;  %v7478_v3 = vpop.f32.mrf.mxu2 }
 0x55f   : > { %v8688_v1 = vadd.f32 %v12783_v11, %v8652_v44  ;;  %v8216_v58 = vpop.f32.mrf.mxu0  ;;  %v8127_v30 = vpop.f32.mrf.mxu3 }
 0x561   : > { %v8720_v50 = vmax.f32 %v8688_v1, 0.0 }
 0x563   : > { %8752 = vst [vmem:[%s12791_s6 + $0x68] sm:$0xff] %v8720_v50  ;;  %v8212_v50 = vadd.f32 %v8211_v5, %v8122_v6  ;;  %v7479_v5 = vadd.f32 %v7478_v3, %v12699_v32 }
 0x564   : > { %v8594_v62 = vpop.f32.mrf.mxu1 }
 0x565   : > { %v8653_v29 = vadd.f32 %v8594_v62, %v8260_v23  ;;  %v7480_v9 = vpop.f32.mrf.mxu2  ;;  %v8264_v56 = vadd.f32 %v8212_v50, %v7526_v41 }
 0x567   : > { %v8689_v2 = vadd.f32 %v12783_v11, %v8653_v29  ;;  %8633 = vmatmul.bf16.gmra.mxu1 %v8485_v20  ;;  %v8218_v59 = vpop.f32.mrf.mxu0  ;;  %v8129_v23 = vpop.f32.mrf.mxu3  ;;  %v13219_v20 = vld [vmem:[#allocation13_spill] sm:$0xff] }
 0x568   : > { %v7476_v62 = vadd.f32 %v7475_v8, %v13219_v20  ;;  %v8219_v13 = vadd.f32 %v8218_v59, %v8129_v23 }
 0x569   : > { %v8721_v53 = vmax.f32 %v8689_v2, 0.0 }
 0x56a   : > { %v7527_v33 = vadd.f32 %v7476_v62, %v13220_v39 }
 0x56b   : > { %8753 = vst [vmem:[%s12791_s6 + $0x70] sm:$0xff] %v8721_v53 }
 0x56c   : > { %v8596_v34 = vpop.f32.mrf.mxu1  ;;  %v8265_v42 = vadd.f32 %v8214_v37, %v7527_v33  ;;  %v13226_v37 = vld [vmem:[#allocation39_spill] sm:$0xff] }
 0x56d   : > { %v8654_v19 = vadd.f32 %v8596_v34, %v8261_v46  ;;  %v7483_v29 = vpop.f32.mrf.mxu2  ;;  %v13221_v34 = vld [vmem:[#allocation35_spill] sm:$0xff] }
 0x56e   : > { %v7484_v35 = vadd.f32 %v7483_v29, %v12716_v40 }
 0x56f   : > { %v8690_v49 = vadd.f32 %v12783_v11, %v8654_v19  ;;  %v8221_v6 = vpop.f32.mrf.mxu0  ;;  %v8132_v28 = vpop.f32.mrf.mxu3  ;;  %v7528_v19 = vadd.f32 %v7479_v5, %v13221_v34 }
 0x570   : > { %v7530_v60 = vadd.f32 %v7484_v35, %v13224_v4 }
 0x571   : > { %v8722_v57 = vmax.f32 %v8690_v49, 0.0  ;;  %v8217_v49 = vadd.f32 %v8216_v58, %v8127_v30 }
 0x573   : > { %8754 = vst [vmem:[%s12791_s6 + $0x78] sm:$0xff] %v8722_v57  ;;  %v13222_v57 = vld [vmem:[#allocation25_spill] sm:$0xff]  ;;  %v8266_v24 = vadd.f32 %v8217_v49, %v7528_v19 }
 0x574   : > { %v8599_v36 = vpop.f32.mrf.mxu1  ;;  %v7481_v21 = vadd.f32 %v7480_v9, %v13222_v57 }
 0x575   : > { %v8655_v61 = vadd.f32 %v8599_v36, %v8262_v38  ;;  %v7485_v52 = vpop.f32.mrf.mxu2  ;;  %v13223_v38 = vld [vmem:[#allocation36_spill] sm:$0xff] }
 0x576   : > { %v7529_v36 = vadd.f32 %v7481_v21, %v13223_v38  ;;  %v7486_v41 = vadd.f32 %v7485_v52, %v12721_v10  ;;  %v13228_v38 = vld [vmem:[#allocation41_spill] sm:$0xff] }
 0x577   : > { %v8691_v27 = vadd.f32 %v12783_v11, %v8655_v61  ;;  %v8223_v32 = vpop.f32.mrf.mxu0  ;;  %v8134_v47 = vpop.f32.mrf.mxu3 }
 0x578   : > { %v8267_v58 = vadd.f32 %v8219_v13, %v7529_v36  ;;  %v8224_v62 = vadd.f32 %v8223_v32, %v8134_v47 }
 0x579   : > { %v8723_v44 = vmax.f32 %v8691_v27, 0.0 }
 0x57b   : > { %8755 = vst [vmem:[%s12791_s6 + $0x80] sm:$0xff] %v8723_v44 }
 0x57c   : > { %v8601_v1 = vpop.f32.mrf.mxu1 }
 0x57d   : > { %v8656_v25 = vadd.f32 %v8601_v1, %v8263_v16  ;;  %v7488_v27 = vpop.f32.mrf.mxu2 }
 0x57e   : > { %v7489_v29 = vadd.f32 %v7488_v27, %v12732_v45 }
 0x57f   : > { %v8692_v22 = vadd.f32 %v12783_v11, %v8656_v25  ;;  %v8226_v16 = vpop.f32.mrf.mxu0  ;;  %v8137_v1 = vpop.f32.mrf.mxu3  ;;  %v8222_v25 = vadd.f32 %v8221_v6, %v8132_v28 }
 0x580   : > { %v8227_v6 = vadd.f32 %v8226_v16, %v8137_v1 }
 0x581   : > { %v8724_v15 = vmax.f32 %v8692_v22, 0.0  ;;  %v8268_v22 = vadd.f32 %v8222_v25, %v7530_v60 }
 0x583   : > { %8756 = vst [vmem:[%s12791_s6 + $0x88] sm:$0xff] %v8724_v15  ;;  %v13225_v15 = vld [vmem:[#allocation38_spill] sm:$0xff] }
 0x584   : > { %v8604_v12 = vpop.f32.mrf.mxu1  ;;  %v7531_v23 = vadd.f32 %v7486_v41, %v13225_v15 }
 0x585   : > { %v8657_v31 = vadd.f32 %v8604_v12, %v8264_v56  ;;  %v7490_v50 = vpop.f32.mrf.mxu2 }
 0x586   : > { %v8269_v39 = vadd.f32 %v8224_v62, %v7531_v23  ;;  %v7491_v28 = vadd.f32 %v7490_v50, %v12737_v54 }
 0x587   : > { %v8693_v2 = vadd.f32 %v12783_v11, %v8657_v31  ;;  %v8228_v56 = vpop.f32.mrf.mxu0  ;;  %v8139_v31 = vpop.f32.mrf.mxu3 }
 0x588   : > { %v8229_v57 = vadd.f32 %v8228_v56, %v8139_v31 }
 0x589   : > { %v8725_v53 = vmax.f32 %v8693_v2, 0.0 }
 0x58b   : > { %8757 = vst [vmem:[%s12791_s6 + $0x90] sm:$0xff] %v8725_v53  ;;  %v7532_v53 = vadd.f32 %v7489_v29, %v13226_v37 }
 0x58c   : > { %v8606_v46 = vpop.f32.mrf.mxu1 }
 0x58d   : > { %v8658_v8 = vadd.f32 %v8606_v46, %v8265_v42  ;;  %v7493_v2 = vpop.f32.mrf.mxu2 }
 0x58f   : > { %v8694_v63 = vadd.f32 %v12783_v11, %v8658_v8  ;;  %v8231_v46 = vpop.f32.mrf.mxu0  ;;  %v8270_v8 = vadd.f32 %v8227_v6, %v7532_v53  ;;  %v8142_v34 = vpop.f32.mrf.mxu3 }
 0x590   : > { %v8232_v13 = vadd.f32 %v8231_v46, %v8142_v34 }
 0x591   : > { %v8726_v0 = vmax.f32 %v8694_v63, 0.0  ;;  %v13227_v63 = vld [vmem:[#allocation40_spill] sm:$0xff] }
 0x592   : > { %v7533_v52 = vadd.f32 %v7491_v28, %v13227_v63 }
 0x593   : > { %8758 = vst [vmem:[%s12791_s6 + $0x98] sm:$0xff] %v8726_v0 }
 0x594   : > { %v8609_v7 = vpop.f32.mrf.mxu1 }
 0x595   : > { %v8659_v3 = vadd.f32 %v8609_v7, %v8266_v24  ;;  %v7495_v0 = vpop.f32.mrf.mxu2  ;;  %v7494_v24 = vadd.f32 %v7493_v2, %v12745_v51  ;;  %v8271_v7 = vadd.f32 %v8229_v57, %v7533_v52 }
 0x596   : > { %v7496_v35 = vadd.f32 %v7495_v0, %v12748_v17 }
 0x597   : > { %v8695_v61 = vadd.f32 %v12783_v11, %v8659_v3  ;;  %v8233_v54 = vpop.f32.mrf.mxu0  ;;  %v8144_v47 = vpop.f32.mrf.mxu3  ;;  %v7534_v36 = vadd.f32 %v7494_v24, %v13228_v38 }
 0x598   : > { %v8234_v1 = vadd.f32 %v8233_v54, %v8144_v47 }
 0x599   : > { %v8727_v55 = vmax.f32 %v8695_v61, 0.0 }
 0x59b   : > { %8759 = vst [vmem:[%s12791_s6 + $0xa0] sm:$0xff] %v8727_v55 }
 0x59c   : > { %v8611_v30 = vpop.f32.mrf.mxu1 }
 0x59d   : > { %v8660_v44 = vadd.f32 %v8611_v30, %v8267_v58  ;;  %v7498_v27 = vpop.f32.mrf.mxu2  ;;  %v8272_v58 = vadd.f32 %v8232_v13, %v7534_v36 }
 0x59f   : > { %v8696_v9 = vadd.f32 %v12783_v11, %v8660_v44  ;;  %v13229_v44 = vld [vmem:[#allocation42_spill] sm:$0xff]  ;;  %v8236_v60 = vpop.f32.mrf.mxu0 }
 0x5a0   : > { %v7535_v4 = vadd.f32 %v7496_v35, %v13229_v44 }
 0x5a1   : > { %v8728_v26 = vmax.f32 %v8696_v9, 0.0  ;;  %v8147_v9 = vpop.f32.mrf.mxu3 }
 0x5a2   : > { %v8273_v41 = vadd.f32 %v8234_v1, %v7535_v4  ;;  %v8237_v23 = vadd.f32 %v8236_v60, %v8147_v9 }
 0x5a3   : > { %8760 = vst [vmem:[%s12791_s6 + $0xa8] sm:$0xff] %v8728_v26  ;;  %v7499_v26 = vadd.f32 %v7498_v27, %v12756_v14 }
 0x5a4   : > { %v8614_v59 = vpop.f32.mrf.mxu1 }
 0x5a5   : > { %v8661_v40 = vadd.f32 %v8614_v59, %v8268_v22  ;;  %v7500_v22 = vpop.f32.mrf.mxu2  ;;  %v13230_v59 = vld [vmem:[#allocation43_spill] sm:$0xff] }
 0x5a7   : > { %v8697_v20 = vadd.f32 %v12783_v11, %v8661_v40  ;;  %v7536_v40 = vadd.f32 %v7499_v26, %v13230_v59 }
 0x5a9   : > { %v8729_v12 = vmax.f32 %v8697_v20, 0.0  ;;  %v8238_v20 = vpop.f32.mrf.mxu0  ;;  %v8149_v56 = vpop.f32.mrf.mxu3  ;;  %v8274_v31 = vadd.f32 %v8237_v23, %v7536_v40 }
 0x5aa   : > { %v8239_v37 = vadd.f32 %v8238_v20, %v8149_v56 }
 0x5ab   : > { %8761 = vst [vmem:[%s12791_s6 + $0xb0] sm:$0xff] %v8729_v12  ;;  %v7501_v12 = vadd.f32 %v7500_v22, %v12761_v18 }
 0x5ac   : > { %v8616_v33 = vpop.f32.mrf.mxu1 }
 0x5ad   : > { %v8662_v10 = vadd.f32 %v8616_v33, %v8269_v39  ;;  %v7503_v39 = vpop.f32.mrf.mxu2  ;;  %v13231_v33 = vld [vmem:[#allocation44_spill] sm:$0xff] }
 0x5af   : > { %v8698_v5 = vadd.f32 %v12783_v11, %v8662_v10  ;;  %v7537_v10 = vadd.f32 %v7501_v12, %v13231_v33 }
 0x5b1   : > { %v8730_v42 = vmax.f32 %v8698_v5, 0.0  ;;  %v8241_v53 = vpop.f32.mrf.mxu0  ;;  %v8152_v6 = vpop.f32.mrf.mxu3  ;;  %v8275_v28 = vadd.f32 %v8239_v37, %v7537_v10 }
 0x5b3   : > { %8762 = vst [vmem:[%s12791_s6 + $0xb8] sm:$0xff] %v8730_v42  ;;  %v7504_v42 = vadd.f32 %v7503_v39, %v12769_v43 }
 0x5b4   : > { %v8619_v19 = vpop.f32.mrf.mxu1 }
 0x5b5   : > { %v8663_v45 = vadd.f32 %v8619_v19, %v8270_v8  ;;  %v13232_v8 = vld [vmem:[#allocation45_spill] sm:$0xff]  ;;  %v8242_v19 = vadd.f32 %v8241_v53, %v8152_v6  ;;  %v7505_v63 = vpop.f32.mrf.mxu2 }
 0x5b6   : > { %v7538_v34 = vadd.f32 %v7504_v42, %v13232_v8 }
 0x5b7   : > { %v8699_v49 = vadd.f32 %v12783_v11, %v8663_v45 }
 0x5b8   : > { %v8276_v57 = vadd.f32 %v8242_v19, %v7538_v34 }
 0x5b9   : > { %v8731_v21 = vmax.f32 %v8699_v49, 0.0  ;;  %v7506_v49 = vadd.f32 %v7505_v63, %v12774_v48  ;;  %v8243_v0 = vpop.f32.mrf.mxu0  ;;  %v8154_v43 = vpop.f32.mrf.mxu3 }
 0x5ba   : > { %v8244_v54 = vadd.f32 %v8243_v0, %v8154_v43 }
 0x5bb   : > { %8763 = vst [vmem:[%s12791_s6 + $0xc0] sm:$0xff] %v8731_v21 }
 0x5bc   : > { %v8621_v32 = vpop.f32.mrf.mxu1 }
 0x5bd   : > { %v8664_v3 = vadd.f32 %v8621_v32, %v8271_v7  ;;  %v13233_v7 = vld [vmem:[#allocation46_spill] sm:$0xff] }
 0x5be   : > { %v7539_v32 = vadd.f32 %v7506_v49, %v13233_v7 }
 0x5bf   : > { %v8700_v61 = vadd.f32 %v12783_v11, %v8664_v3 }
 0x5c0   : > { %v8277_v48 = vadd.f32 %v8244_v54, %v7539_v32 }
 0x5c1   : > { %v8732_v55 = vmax.f32 %v8700_v61, 0.0 }
 0x5c3   : > { %8764 = vst [vmem:[%s12791_s6 + $0xc8] sm:$0xff] %v8732_v55 }
 0x5c4   : > { %v8624_v30 = vpop.f32.mrf.mxu1 }
 0x5c5   : > { %v8665_v51 = vadd.f32 %v8624_v30, %v8272_v58 }
 0x5c7   : > { %v8701_v16 = vadd.f32 %v12783_v11, %v8665_v51 }
 0x5c9   : > { %v8733_v25 = vmax.f32 %v8701_v16, 0.0 }
 0x5cb   : > { %8765 = vst [vmem:[%s12791_s6 + $0xd0] sm:$0xff] %v8733_v25 }
 0x5cc   : > { %v8626_v50 = vpop.f32.mrf.mxu1 }
 0x5cd   : > { %v8666_v17 = vadd.f32 %v8626_v50, %v8273_v41 }
 0x5cf   : > { %v8702_v15 = vadd.f32 %v12783_v11, %v8666_v17 }
 0x5d1   : > { %v8734_v62 = vmax.f32 %v8702_v15, 0.0 }
 0x5d3   : > { %8766 = vst [vmem:[%s12791_s6 + $0xd8] sm:$0xff] %v8734_v62 }
 0x5d4   : > { %v8629_v29 = vpop.f32.mrf.mxu1 }
 0x5d5   : > { %v8667_v14 = vadd.f32 %v8629_v29, %v8274_v31 }
 0x5d7   : > { %v8703_v2 = vadd.f32 %v12783_v11, %v8667_v14 }
 0x5d9   : > { %v8735_v5 = vmax.f32 %v8703_v2, 0.0 }
 0x5db   : > { %8767 = vst [vmem:[%s12791_s6 + $0xe0] sm:$0xff] %v8735_v5 }
 0x5dc   : > { %v8631_v46 = vpop.f32.mrf.mxu1 }
 0x5dd   : > { %v8668_v18 = vadd.f32 %v8631_v46, %v8275_v28 }
 0x5df   : > { %v8704_v45 = vadd.f32 %v12783_v11, %v8668_v18 }
 0x5e1   : > { %v8736_v52 = vmax.f32 %v8704_v45, 0.0 }
 0x5e3   : > { %8768 = vst [vmem:[%s12791_s6 + $0xe8] sm:$0xff] %v8736_v52 }
 0x5e4   : > { %v8634_v21 = vpop.f32.mrf.mxu1 }
 0x5e5   : > { %v8669_v24 = vadd.f32 %v8634_v21, %v8276_v57 }
 0x5e7   : > { %v8705_v3 = vadd.f32 %v12783_v11, %v8669_v24 }
 0x5e9   : > { %v8737_v47 = vmax.f32 %v8705_v3, 0.0 }
 0x5eb   : > { %8769 = vst [vmem:[%s12791_s6 + $0xf0] sm:$0xff] %v8737_v47 }
 0x5ec   : > { %v8636_v38 = vpop.f32.mrf.mxu1 }
 0x5ed   : > { %v8670_v36 = vadd.f32 %v8636_v38, %v8277_v48 }
 0x5ef   : > { %v8706_v61 = vadd.f32 %v12783_v11, %v8670_v36 }
 0x5f1   : > { %v8738_v13 = vmax.f32 %v8706_v61, 0.0 }
 0x5f3   : > { %8770 = vst [vmem:[%s12791_s6 + $0xf8] sm:$0xff] %v8738_v13 }
 0x5f4   : > { %10523 = shalt.err (!%p10520_p10)
}
 0x5f5   : > { %s10600_s8 = smov 128   ;;  %s10601_s30 = smov 8  }
 0x5f6   : > { %10283 = dma.vmem_to_hbm [thread:$0]  (%p10704_p3), %s8785_s28, 4096, %s8787_s24, %s8772_s29, %s10600_s8, %s10600_s8, %s10601_s30  }
 0x5f7 PF: > { %s8801_s6 = sand.u32 1, %s10581_s18   ;;  %p13234_p12 = scmp.ge.s32.totalorder %s10593_s21, 2 }
 0x5f8   : > { %s8802_s7 = scalar_lea.sflag [#allocation5], %s8801_s6 }
 0x5f9   : > { %p10297_p13 = pnand %p13234_p12, %p10667_p6 }
 0x5fb   : > { %p10298_p0 = pneg %p10297_p13 }
 0x5fd   : > { %10549 = dma.done.wait (%p10298_p0), %s8802_s7, 4096  }
 0x5fe   : > { %10551 = vsyncadd (%p10298_p0), %s8802_s7, 4294963200  ;;  %p19_p5 = scmp.ge.s32.totalorder %s10694_s14, 4   ;;  %s13235_s18 = smov %s10585_s19 }
 0x5ff   : > { %s13236_s19 = smov %s10589_s20  ;;  %s13237_s20 = smov %s10710_s23 }
 0x600   : > { %s13238_s21 = smov %s10694_s14  ;;  %21 = sbr.rel (!%p19_p5) target bundleno = 6 (0x6), region = 96 }
 0x605   :  { %8808 = vsyncpa [#allocation4], 1 }
 0x606   :  { %8810 = vsyncpa [#allocation4 + $0x1], 1 }
 0x607   :  { %8811 = vsyncpa [#allocation7], 1 }
 0x608   :  { %8812 = vsyncpa [#allocation5], 1 }
 0x609   :  { %8814 = vsyncpa [#allocation5 + $0x1], 1 }

</bundles_post_ra>
